<compile_context>
chip_gen: v7x
topology: tpu7x:2x2x1
jax: 0.10.0
libtpu: 0.0.40
codegen_flags: <defaults>
</compile_context>

<pallas_src>
import functools

import numpy as np
import jax
import jax.numpy as jnp
from jax import lax
from jax.experimental import pallas as pl
from jax.experimental.pallas import tpu as pltpu


# ---------------------------------------------------------------------------
# Pallas kernel: one dual-path leg
#   BiLSTM (fused fwd/bwd) -> Linear(2H->N) -> LayerNorm(N) -> + residual(input)
#
# Refs (per grid step over batch tiles of size TB):
#   x_ref    [T, TB, N]    f32 input block (also the residual)
#   wih_ref  [N, 8H]       bf16, columns = [fwd (i,f,o,g) | bwd (i,f,o,g)]
#   b_ref    [1, 8H]       f32 combined biases (b_ih + b_hh), same column order
#   whh_ref  [2H, 8H]      bf16 block-diagonal: rows[:H]->fwd cols, rows[H:]->bwd cols
#   wlin_ref [2H, N]       bf16 output projection (rows [:H] fwd, [H:] bwd)
#   blin_ref / gamma_ref / beta_ref  [1, N] f32
#   out_ref  [T, TB, N]    f32
# Scratch:
#   xg_sc    [T, TB, 8H]   f32 precomputed input-gate pre-activations
#   h_sc     [T, TB, 2H]   f32 per-step hidden states (fwd | bwd), time-aligned
# ---------------------------------------------------------------------------
def bilstm_path_kernel(x_ref, wih_ref, b_ref, whh_ref, wlin_ref,
                       blin_ref, gamma_ref, beta_ref,
                       out_ref,
                       xg_sc, h_sc, *, unroll):
    T, TB, N = x_ref.shape
    H2 = whh_ref.shape[0]            # 2H
    H = H2 // 2
    G = 4 * H                        # per-direction gate width
    TT = T * TB
    f32 = jnp.float32
    bf16 = jnp.bfloat16

    # ---- Stage 1: hoisted input->gate projection (one MXU-shaped matmul) ----
    x2 = x_ref[...].reshape(TT, N)
    xg = jnp.dot(x2.astype(bf16), wih_ref[...],
                 preferred_element_type=f32) + b_ref[...]
    xg_sc[...] = xg.reshape(T, TB, 2 * G)        # single wide lane-dense store

    # ---- Stage 2: fused fwd/bwd recurrence -----------------------------------
    whh = whh_ref[...]                           # loop-invariant, bf16

    def step(t, carry):
        h_cat, c_f, c_b = carry
        tb = T - 1 - t
        xf = xg_sc[t, :, 0:G]                    # fwd gate pre-acts, time t
        xb = xg_sc[tb, :, G:2 * G]               # bwd gate pre-acts, time T-1-t
        # One MXU push per step: [TB, 2H] @ [2H, 8H] (block-diagonal weights).
        g_all = jnp.dot(h_cat.astype(bf16), whh, preferred_element_type=f32)
        gate_f = g_all[:, 0:G] + xf
        gate_b = g_all[:, G:2 * G] + xb
        # Per direction: sigmoid over contiguous (i,f,o), tanh on trailing g.
        s_f = jax.nn.sigmoid(gate_f[:, 0:3 * H])
        s_b = jax.nn.sigmoid(gate_b[:, 0:3 * H])
        gg_f = jnp.tanh(gate_f[:, 3 * H:G])
        gg_b = jnp.tanh(gate_b[:, 3 * H:G])
        c_f = s_f[:, H:2 * H] * c_f + s_f[:, 0:H] * gg_f
        c_b = s_b[:, H:2 * H] * c_b + s_b[:, 0:H] * gg_b
        h_f = s_f[:, 2 * H:3 * H] * jnp.tanh(c_f)
        h_b = s_b[:, 2 * H:3 * H] * jnp.tanh(c_b)
        h_sc[t, :, 0:H] = h_f                    # fwd output aligned at t
        h_sc[tb, :, H:2 * H] = h_b               # bwd output aligned at T-1-t
        return (jnp.concatenate([h_f, h_b], axis=-1), c_f, c_b)

    zH = jnp.zeros((TB, H), f32)
    lax.fori_loop(0, T, step, (jnp.zeros((TB, 2 * H), f32), zH, zH),
                  unroll=unroll)

    # ---- Stage 3: batched Linear + LayerNorm + residual epilogue -------------
    h_all = h_sc[...].reshape(TT, 2 * H).astype(bf16)
    y = jnp.dot(h_all, wlin_ref[...], preferred_element_type=f32) + blin_ref[...]
    # One-pass LayerNorm statistics: the two cross-lane reductions are
    # independent (overlap on the XLUs); eps = 1e-5, biased variance (torch).
    mu = jnp.mean(y, axis=-1, keepdims=True)
    ms = jnp.mean(y * y, axis=-1, keepdims=True)
    var = jnp.maximum(ms - mu * mu, 0.0)
    yn = (y - mu) * lax.rsqrt(var + 1e-5)
    yn = yn * gamma_ref[...] + beta_ref[...]
    resid = x_ref[...].reshape(TT, N)
    out_ref[...] = (yn + resid).reshape(T, TB, N)   # lane-dense block store


# ---------------------------------------------------------------------------
# Generation-aware tiling / VMEM budgeting.
# ---------------------------------------------------------------------------
def _vmem_capacity_bytes():
    try:
        return int(pltpu.get_tpu_info().vmem_capacity_bytes)
    except Exception:
        pass
    try:
        kind = jax.local_devices()[0].device_kind.lower()
    except Exception:
        kind = ""
    if "v7" in kind or "7x" in kind:
        return 64 << 20
    if any(v in kind for v in ("v4", "v5", "v6")):
        return 128 << 20
    return 64 << 20      # unknown: be conservative


def _select_tile_and_vmem(T, BATCH, N, H):
    cap = _vmem_capacity_bytes()
    # ~52-56 MiB usable on v7x (64 MiB physical/TC), ~100 MiB on v4/v5e/v6e.
    vmem_limit = (54 << 20) if cap <= (64 << 20) else (100 << 20)

    def tile_bytes(tb):
        io = 2 * 2 * T * tb * N * 4                       # double-buffered in/out
        xg = T * tb * 8 * H * 4                           # f32 gate scratch
        hs = T * tb * 2 * H * 4                           # f32 hidden scratch
        w = 2 * ((N * 8 * H + 2 * H * 8 * H + 2 * H * N) * 2   # bf16 weights (x2 buf)
                 + (8 * H + 4 * N) * 4)                   # f32 biases / LN params
        return io + xg + hs + w + (2 << 20)               # compiler headroom

    # Candidates: multiples of 8 (f32 sublane) dividing BATCH, capped at 256
    # (MXU M-dim saturation on v6e/v7x; >=128 preferred when BATCH allows).
    cands = [tb for tb in range(8, min(BATCH, 256) + 1, 8) if BATCH % tb == 0]
    if not cands:
        cands = [BATCH]
    fitting = [tb for tb in cands if tile_bytes(tb) <= vmem_limit]
    tb = max(fitting) if fitting else min(cands)
    # Keep >= 2 grid steps when possible so the "parallel" batch axis can shard
    # across TensorCores (v7x); shrink TB rather than collapsing the grid to 1.
    if BATCH // tb < 2:
        smaller = [c for c in (fitting or cands) if BATCH // c >= 2]
        if smaller:
            tb = max(smaller)
    vmem_limit = int(min(max(vmem_limit, tile_bytes(tb) + (2 << 20)),
                         cap - (4 << 20)))
    return tb, vmem_limit


def run_path(x, p, *, batch_tile=None):
    """Run one dual-path leg on x: [T, BATCH, N] -> [T, BATCH, N]."""
    T, BATCH, N = x.shape
    H = p["whh"].shape[0] // 2
    tb_auto, vmem_limit = _select_tile_and_vmem(T, BATCH, N, H)
    TB = batch_tile if batch_tile is not None else tb_auto
    assert BATCH % TB == 0, (BATCH, TB)
    grid = (BATCH // TB,)

    # Bounded unroll at large tiles: full unroll with TB>=128 blows the 64-vreg
    # file (gates alone are [TB, 8H]); keep live ranges register-resident.
    unroll = True if (T <= 32 and TB <= 64) else min(8, T)

    def x_map(b):
        return (0, b, 0)

    def w_map(b):
        return (0, 0)

    weight_names = ("wih", "b", "whh", "wlin", "blin", "gamma", "beta")
    weights = [p[k] for k in weight_names]

    in_specs = [pl.BlockSpec((T, TB, N), x_map)]
    in_specs += [pl.BlockSpec(w.shape, w_map) for w in weights]
    out_spec = pl.BlockSpec((T, TB, N), x_map)

    scratch = [
        pltpu.VMEM((T, TB, 8 * H), jnp.float32),   # xg: fused input-gate pre-acts
        pltpu.VMEM((T, TB, 2 * H), jnp.float32),   # h:  fwd|bwd hidden states
    ]

    flops = 2 * T * BATCH * (N * 8 * H + 2 * H * 8 * H + 2 * H * N) \
        + 8 * T * BATCH * N
    transcend = T * BATCH * (10 * H + 1)
    bytes_accessed = (2 * T * BATCH * N * 4
                      + 2 * (N * 8 * H + 16 * H * H + 2 * H * N)
                      + 4 * (8 * H + 4 * N))

    kernel = functools.partial(bilstm_path_kernel, unroll=unroll)
    return pl.pallas_call(
        kernel,
        out_shape=jax.ShapeDtypeStruct((T, BATCH, N), jnp.float32),
        grid=grid,
        in_specs=in_specs,
        out_specs=out_spec,
        scratch_shapes=scratch,
        compiler_params=pltpu.CompilerParams(
            dimension_semantics=("parallel",),      # megacore sharding over batch
            vmem_limit_bytes=vmem_limit,
        ),
        cost_estimate=pl.CostEstimate(
            flops=flops, transcendentals=transcend,
            bytes_accessed=bytes_accessed),
    )(x, *weights)


# ---------------------------------------------------------------------------
# Full DPRNNBlock forward (mirrors the PyTorch permute/view choreography).
# mix: [B, N, K, S] -> out: [B, N, K, S]
# ---------------------------------------------------------------------------
def dprnn_block(mix, params, *, batch_tile=None):
    B, N, K, S = mix.shape
    # intra-chunk path: sequences of length K, batch = B*S
    x_intra = jnp.transpose(mix, (2, 0, 3, 1)).reshape(K, B * S, N)
    intra = run_path(x_intra, params["intra"], batch_tile=batch_tile)
    intra_bnks = jnp.transpose(intra.reshape(K, B, S, N), (1, 3, 0, 2))  # [B,N,K,S]
    # inter-chunk path: sequences of length S, batch = B*K
    x_inter = jnp.transpose(intra_bnks, (3, 0, 2, 1)).reshape(S, B * K, N)
    inter = run_path(x_inter, params["inter"], batch_tile=batch_tile)
    return jnp.transpose(inter.reshape(S, B, K, N), (1, 3, 2, 0))        # [B,N,K,S]


# ---------------------------------------------------------------------------
# Parameter init (torch-style per-direction weights, gate order i|f|g|o) and
# packing into the fused kernel layout (gate order i|f|o|g per direction,
# directions concatenated, block-diagonal W_hh, bf16 matmul weights).
# ---------------------------------------------------------------------------
def init_path_params_raw(key, N, H):
    ks = jax.random.split(key, 10)
    s_lstm = 1.0 / np.sqrt(H)
    s_lin = 1.0 / np.sqrt(2 * H)

    def u(k, shape, s):
        v = jax.random.uniform(k, shape, jnp.float32, -s, s)
        # Round to bf16-representable values so the bf16 kernel and the f32
        # reference consume numerically identical parameters.
        return v.astype(jnp.bfloat16).astype(jnp.float32)

    return dict(
        wih_f=u(ks[0], (N, 4 * H), s_lstm),
        whh_f=u(ks[1], (H, 4 * H), s_lstm),
        b_f=u(ks[2], (1, 4 * H), s_lstm) + u(ks[3], (1, 4 * H), s_lstm),
        wih_b=u(ks[4], (N, 4 * H), s_lstm),
        whh_b=u(ks[5], (H, 4 * H), s_lstm),
        b_b=u(ks[6], (1, 4 * H), s_lstm) + u(ks[7], (1, 4 * H), s_lstm),
        wlin=u(ks[8], (2 * H, N), s_lin),
        blin=u(ks[9], (1, N), s_lin),
        gamma=jnp.ones((1, N), jnp.float32),
        beta=jnp.zeros((1, N), jnp.float32),
    )


def pack_path_params(raw, dtype=jnp.bfloat16):
    """torch-style per-direction weights -> fused kernel weights.

    Gate columns are permuted from torch order (i,f,g,o) to kernel order
    (i,f,o,g) — PyTorch checkpoints imported here MUST go through this packing.
    """
    H = raw["whh_f"].shape[0]

    def reorder(w):  # (i,f,g,o) -> (i,f,o,g) along the last (4H) axis
        return jnp.concatenate([w[..., :2 * H], w[..., 3 * H:4 * H],
                                w[..., 2 * H:3 * H]], axis=-1)

    wih = jnp.concatenate([reorder(raw["wih_f"]), reorder(raw["wih_b"])], axis=1)
    b = jnp.concatenate([reorder(raw["b_f"]), reorder(raw["b_b"])], axis=1)
    whh = jnp.zeros((2 * H, 8 * H), jnp.float32)
    whh = whh.at[:H, :4 * H].set(reorder(raw["whh_f"]))
    whh = whh.at[H:, 4 * H:].set(reorder(raw["whh_b"]))
    return dict(
        wih=wih.astype(dtype),                    # [N, 8H]   bf16
        b=b.astype(jnp.float32),                  # [1, 8H]   f32
        whh=whh.astype(dtype),                    # [2H, 8H]  bf16 block-diagonal
        wlin=raw["wlin"].astype(dtype),           # [2H, N]   bf16
        blin=raw["blin"].astype(jnp.float32),
        gamma=raw["gamma"].astype(jnp.float32),
        beta=raw["beta"].astype(jnp.float32),
    )


# ---------------------------------------------------------------------------
# Pure-JAX reference (correctness check), f32 HIGHEST-precision matmuls,
# torch-style per-direction weights.
# ---------------------------------------------------------------------------
def _lstm_scan_ref(x, wih, whh, b, reverse):
    H = whh.shape[0]
    BATCH = x.shape[1]
    hp = lax.Precision.HIGHEST

    def step(carry, x_t):
        h, c = carry
        gates = (jnp.dot(x_t, wih, precision=hp)
                 + jnp.dot(h, whh, precision=hp) + b)
        i = jax.nn.sigmoid(gates[:, 0:H])
        f = jax.nn.sigmoid(gates[:, H:2 * H])
        g = jnp.tanh(gates[:, 2 * H:3 * H])
        o = jax.nn.sigmoid(gates[:, 3 * H:4 * H])
        c = f * c + i * g
        h = o * jnp.tanh(c)
        return (h, c), h

    init = (jnp.zeros((BATCH, H), jnp.float32),
            jnp.zeros((BATCH, H), jnp.float32))
    _, hs = lax.scan(step, init, x, reverse=reverse)
    return hs


def _run_path_ref(x, raw):
    hf = _lstm_scan_ref(x, raw["wih_f"], raw["whh_f"], raw["b_f"], reverse=False)
    hb = _lstm_scan_ref(x, raw["wih_b"], raw["whh_b"], raw["b_b"], reverse=True)
    y = jnp.dot(jnp.concatenate([hf, hb], axis=-1), raw["wlin"],
                precision=lax.Precision.HIGHEST) + raw["blin"]
    mu = jnp.mean(y, axis=-1, keepdims=True)
    var = jnp.mean((y - mu) ** 2, axis=-1, keepdims=True)
    yn = (y - mu) / jnp.sqrt(var + 1e-5)
    return yn * raw["gamma"] + raw["beta"] + x


def dprnn_block_ref(mix, raw_params):
    B, N, K, S = mix.shape
    x_intra = jnp.transpose(mix, (2, 0, 3, 1)).reshape(K, B * S, N)
    intra = _run_path_ref(x_intra, raw_params["intra"])
    intra_bnks = jnp.transpose(intra.reshape(K, B, S, N), (1, 3, 0, 2))
    x_inter = jnp.transpose(intra_bnks, (3, 0, 2, 1)).reshape(S, B * K, N)
    inter = _run_path_ref(x_inter, raw_params["inter"])
    return jnp.transpose(inter.reshape(S, B, K, N), (1, 3, 2, 0))


if __name__ == "__main__":
    # mix: [B, feature_dim, K, S]; hidden_channels H (bidirectional -> 2H).
    # N=128 and H=32 keep gate blocks and output stores lane-dense; K=S=16 gives
    # BATCH=32 per leg so the auto tile picker chooses TB=16 with a grid of 2.
    B, N, K, S = 2, 128, 16, 16
    H = 32

    key = jax.random.PRNGKey(0)
    k_mix, k_intra, k_inter = jax.random.split(key, 3)
    mix = jax.random.normal(k_mix, (B, N, K, S), jnp.float32)

    raw_params = {
        "intra": init_path_params_raw(k_intra, N, H),
        "inter": init_path_params_raw(k_inter, N, H),
    }
    params = {
        "intra": pack_path_params(raw_params["intra"]),
        "inter": pack_path_params(raw_params["inter"]),
    }

    fn = jax.jit(dprnn_block)
    out = jax.block_until_ready(fn(mix, params))
    assert out.shape == (B, N, K, S)

    # Tolerance reflects bf16 MXU matmuls in the kernel vs the f32 HIGHEST
    # reference (weights are shared bf16-representable values).
    ref = dprnn_block_ref(mix, raw_params)
    np.testing.assert_allclose(np.asarray(out), np.asarray(ref),
                               rtol=5e-2, atol=5e-2)
    print("KERNEL_OK")
</pallas_src>

<mosaic_0001>
module attributes {stable_mosaic.version = 11 : i64} {
  func.func @bilstm_path_kernel(%arg0: i32, %arg1: memref<16x16x128xf32, #tpu.memory_space<vmem>>, %arg2: memref<128x256xbf16, #tpu.memory_space<vmem>>, %arg3: memref<1x256xf32, #tpu.memory_space<vmem>>, %arg4: memref<64x256xbf16, #tpu.memory_space<vmem>>, %arg5: memref<64x128xbf16, #tpu.memory_space<vmem>>, %arg6: memref<1x128xf32, #tpu.memory_space<vmem>>, %arg7: memref<1x128xf32, #tpu.memory_space<vmem>>, %arg8: memref<1x128xf32, #tpu.memory_space<vmem>>, %arg9: memref<16x16x128xf32, #tpu.memory_space<vmem>>, %arg10: memref<16x16x256xf32, #tpu.memory_space<vmem>>, %arg11: memref<16x16x64xf32, #tpu.memory_space<vmem>>) attributes {dimension_semantics = [#tpu.dimension_semantics<parallel>], iteration_bounds = array<i64: 2>, scalar_prefetch = 0 : i64, scratch_operands = 2 : i64, tpu.core_type = #tpu.core_type<tc>, window_params = [{transform_indices = @transform_0, window_bounds = array<i64: 16, 16, 128>}, {pipeline_mode = #tpu.pipeline_mode<synchronous>, transform_indices = @transform_1, window_bounds = array<i64: 128, 256>}, {pipeline_mode = #tpu.pipeline_mode<synchronous>, transform_indices = @transform_2, window_bounds = array<i64: 1, 256>}, {pipeline_mode = #tpu.pipeline_mode<synchronous>, transform_indices = @transform_3, window_bounds = array<i64: 64, 256>}, {pipeline_mode = #tpu.pipeline_mode<synchronous>, transform_indices = @transform_4, window_bounds = array<i64: 64, 128>}, {pipeline_mode = #tpu.pipeline_mode<synchronous>, transform_indices = @transform_5, window_bounds = array<i64: 1, 128>}, {pipeline_mode = #tpu.pipeline_mode<synchronous>, transform_indices = @transform_6, window_bounds = array<i64: 1, 128>}, {pipeline_mode = #tpu.pipeline_mode<synchronous>, transform_indices = @transform_7, window_bounds = array<i64: 1, 128>}, {transform_indices = @transform_8, window_bounds = array<i64: 16, 16, 128>}]} {
    %c0 = arith.constant 0 : index
    %c0_0 = arith.constant 0 : index
    %c0_1 = arith.constant 0 : index
    %0 = vector.load %arg1[%c0, %c0_0, %c0_1] : memref<16x16x128xf32, #tpu.memory_space<vmem>>, vector<16x16x128xf32>
    %1 = vector.shape_cast %0 : vector<16x16x128xf32> to vector<256x128xf32>
    %2 = arith.truncf %1 : vector<256x128xf32> to vector<256x128xbf16>
    %c0_2 = arith.constant 0 : index
    %c0_3 = arith.constant 0 : index
    %3 = vector.load %arg2[%c0_2, %c0_3] : memref<128x256xbf16, #tpu.memory_space<vmem>>, vector<128x256xbf16>
    %cst = arith.constant dense<0.000000e+00> : vector<256x256xf32>
    %4 = tpu.matmul %2, %3, %cst {dimension_numbers = #tpu.dot_dimension_numbers<[1], [0], [0], [1], [0, 0, 1, 1], [], []>} : vector<256x128xbf16>, vector<128x256xbf16>, vector<256x256xf32> -> vector<256x256xf32>
    %c0_4 = arith.constant 0 : index
    %c0_5 = arith.constant 0 : index
    %5 = vector.load %arg3[%c0_4, %c0_5] : memref<1x256xf32, #tpu.memory_space<vmem>>, vector<1x256xf32>
    %6 = vector.broadcast %5 : vector<1x256xf32> to vector<256x256xf32>
    %7 = arith.addf %4, %6 : vector<256x256xf32>
    %8 = vector.shape_cast %7 : vector<256x256xf32> to vector<16x16x256xf32>
    %c0_6 = arith.constant 0 : index
    %c0_7 = arith.constant 0 : index
    %c0_8 = arith.constant 0 : index
    %9 = vector.load %arg10[%c0_6, %c0_7, %c0_8] : memref<16x16x256xf32, #tpu.memory_space<vmem>>, vector<16x16x256xf32>
    tpu.vector_store %arg10[%c0_6, %c0_7, %c0_8], %8 {strides = array<i32>} : memref<16x16x256xf32, #tpu.memory_space<vmem>>, vector<16x16x256xf32>,
    %c0_9 = arith.constant 0 : index
    %c0_10 = arith.constant 0 : index
    %10 = vector.load %arg4[%c0_9, %c0_10] : memref<64x256xbf16, #tpu.memory_space<vmem>>, vector<64x256xbf16>
    %cst_11 = arith.constant 0.000000e+00 : f32
    %11 = vector.broadcast %cst_11 : f32 to vector<16x32xf32>
    %cst_12 = arith.constant 0.000000e+00 : f32
    %12 = vector.broadcast %cst_12 : f32 to vector<16x64xf32>
    %c0_i32 = arith.constant 0 : i32
    %c15_i32 = arith.constant 15 : i32
    %13 = arith.subi %c15_i32, %c0_i32 : i32
    %14 = arith.index_cast %c0_i32 : i32 to index
    %c0_13 = arith.constant 0 : index
    %c0_14 = arith.constant 0 : index
    %15 = vector.load %arg10[%14, %c0_13, %c0_14] : memref<16x16x256xf32, #tpu.memory_space<vmem>>, vector<1x16x128xf32>
    %16 = vector.shape_cast %15 : vector<1x16x128xf32> to vector<16x128xf32>
    %17 = arith.index_cast %13 : i32 to index
    %c0_15 = arith.constant 0 : index
    %c128 = arith.constant 128 : index
    %18 = vector.load %arg10[%17, %c0_15, %c128] : memref<16x16x256xf32, #tpu.memory_space<vmem>>, vector<1x16x128xf32>
    %19 = vector.shape_cast %18 : vector<1x16x128xf32> to vector<16x128xf32>
    %20 = arith.truncf %12 : vector<16x64xf32> to vector<16x64xbf16>
    %cst_16 = arith.constant dense<0.000000e+00> : vector<16x256xf32>
    %21 = tpu.matmul %20, %10, %cst_16 {dimension_numbers = #tpu.dot_dimension_numbers<[1], [0], [0], [1], [0, 0, 1, 1], [], []>} : vector<16x64xbf16>, vector<64x256xbf16>, vector<16x256xf32> -> vector<16x256xf32>
    %22 = vector.extract_strided_slice %21 {offsets = [0, 0], sizes = [16, 128], strides = [1, 1]} : vector<16x256xf32> to vector<16x128xf32>
    %23 = arith.addf %22, %16 : vector<16x128xf32>
    %24 = vector.extract_strided_slice %21 {offsets = [0, 128], sizes = [16, 128], strides = [1, 1]} : vector<16x256xf32> to vector<16x128xf32>
    %25 = arith.addf %24, %19 : vector<16x128xf32>
    %26 = vector.extract_strided_slice %23 {offsets = [0, 0], sizes = [16, 96], strides = [1, 1]} : vector<16x128xf32> to vector<16x96xf32>
    %27 = arith.negf %26 : vector<16x96xf32>
    %28 = math.exp %27 : vector<16x96xf32>
    %cst_17 = arith.constant 1.000000e+00 : f32
    %29 = vector.broadcast %cst_17 : f32 to vector<16x96xf32>
    %30 = arith.addf %29, %28 : vector<16x96xf32>
    %31 = arith.divf %29, %30 : vector<16x96xf32>
    %32 = vector.extract_strided_slice %25 {offsets = [0, 0], sizes = [16, 96], strides = [1, 1]} : vector<16x128xf32> to vector<16x96xf32>
    %33 = arith.negf %32 : vector<16x96xf32>
    %34 = math.exp %33 : vector<16x96xf32>
    %cst_18 = arith.constant 1.000000e+00 : f32
    %35 = vector.broadcast %cst_18 : f32 to vector<16x96xf32>
    %36 = arith.addf %35, %34 : vector<16x96xf32>
    %37 = arith.divf %35, %36 : vector<16x96xf32>
    %38 = vector.extract_strided_slice %23 {offsets = [0, 96], sizes = [16, 32], strides = [1, 1]} : vector<16x128xf32> to vector<16x32xf32>
    %39 = math.tanh %38 : vector<16x32xf32>
    %40 = vector.extract_strided_slice %25 {offsets = [0, 96], sizes = [16, 32], strides = [1, 1]} : vector<16x128xf32> to vector<16x32xf32>
    %41 = math.tanh %40 : vector<16x32xf32>
    %42 = vector.extract_strided_slice %31 {offsets = [0, 32], sizes = [16, 32], strides = [1, 1]} : vector<16x96xf32> to vector<16x32xf32>
    %43 = arith.mulf %42, %11 : vector<16x32xf32>
    %44 = vector.extract_strided_slice %31 {offsets = [0, 0], sizes = [16, 32], strides = [1, 1]} : vector<16x96xf32> to vector<16x32xf32>
    %45 = arith.mulf %44, %39 : vector<16x32xf32>
    %46 = arith.addf %43, %45 : vector<16x32xf32>
    %47 = vector.extract_strided_slice %37 {offsets = [0, 32], sizes = [16, 32], strides = [1, 1]} : vector<16x96xf32> to vector<16x32xf32>
    %48 = arith.mulf %47, %11 : vector<16x32xf32>
    %49 = vector.extract_strided_slice %37 {offsets = [0, 0], sizes = [16, 32], strides = [1, 1]} : vector<16x96xf32> to vector<16x32xf32>
    %50 = arith.mulf %49, %41 : vector<16x32xf32>
    %51 = arith.addf %48, %50 : vector<16x32xf32>
    %52 = vector.extract_strided_slice %31 {offsets = [0, 64], sizes = [16, 32], strides = [1, 1]} : vector<16x96xf32> to vector<16x32xf32>
    %53 = math.tanh %46 : vector<16x32xf32>
    %54 = arith.mulf %52, %53 : vector<16x32xf32>
    %55 = vector.extract_strided_slice %37 {offsets = [0, 64], sizes = [16, 32], strides = [1, 1]} : vector<16x96xf32> to vector<16x32xf32>
    %56 = math.tanh %51 : vector<16x32xf32>
    %57 = arith.mulf %55, %56 : vector<16x32xf32>
    %58 = arith.index_cast %c0_i32 : i32 to index
    %c0_19 = arith.constant 0 : index
    %c0_20 = arith.constant 0 : index
    %59 = vector.load %arg11[%58, %c0_19, %c0_20] : memref<16x16x64xf32, #tpu.memory_space<vmem>>, vector<1x16x32xf32>
    %60 = vector.shape_cast %59 : vector<1x16x32xf32> to vector<16x32xf32>
    %61 = vector.shape_cast %54 : vector<16x32xf32> to vector<1x16x32xf32>
    tpu.vector_store %arg11[%58, %c0_19, %c0_20], %61 {strides = array<i32>} : memref<16x16x64xf32, #tpu.memory_space<vmem>>, vector<1x16x32xf32>,
    %62 = arith.index_cast %13 : i32 to index
    %c0_21 = arith.constant 0 : index
    %c32 = arith.constant 32 : index
    %63 = vector.load %arg11[%62, %c0_21, %c32] : memref<16x16x64xf32, #tpu.memory_space<vmem>>, vector<1x16x32xf32>
    %64 = vector.shape_cast %63 : vector<1x16x32xf32> to vector<16x32xf32>
    %65 = vector.shape_cast %57 : vector<16x32xf32> to vector<1x16x32xf32>
    tpu.vector_store %arg11[%62, %c0_21, %c32], %65 {strides = array<i32>} : memref<16x16x64xf32, #tpu.memory_space<vmem>>, vector<1x16x32xf32>,
    %66 = tpu.concatenate %54, %57 in 1 : vector<16x32xf32>, vector<16x32xf32> -> vector<16x64xf32>
    %c1_i32 = arith.constant 1 : i32
    %c15_i32_22 = arith.constant 15 : i32
    %67 = arith.subi %c15_i32_22, %c1_i32 : i32
    %68 = arith.index_cast %c1_i32 : i32 to index
    %c0_23 = arith.constant 0 : index
    %c0_24 = arith.constant 0 : index
    %69 = vector.load %arg10[%68, %c0_23, %c0_24] : memref<16x16x256xf32, #tpu.memory_space<vmem>>, vector<1x16x128xf32>
    %70 = vector.shape_cast %69 : vector<1x16x128xf32> to vector<16x128xf32>
    %71 = arith.index_cast %67 : i32 to index
    %c0_25 = arith.constant 0 : index
    %c128_26 = arith.constant 128 : index
    %72 = vector.load %arg10[%71, %c0_25, %c128_26] : memref<16x16x256xf32, #tpu.memory_space<vmem>>, vector<1x16x128xf32>
    %73 = vector.shape_cast %72 : vector<1x16x128xf32> to vector<16x128xf32>
    %74 = arith.truncf %66 : vector<16x64xf32> to vector<16x64xbf16>
    %cst_27 = arith.constant dense<0.000000e+00> : vector<16x256xf32>
    %75 = tpu.matmul %74, %10, %cst_27 {dimension_numbers = #tpu.dot_dimension_numbers<[1], [0], [0], [1], [0, 0, 1, 1], [], []>} : vector<16x64xbf16>, vector<64x256xbf16>, vector<16x256xf32> -> vector<16x256xf32>
    %76 = vector.extract_strided_slice %75 {offsets = [0, 0], sizes = [16, 128], strides = [1, 1]} : vector<16x256xf32> to vector<16x128xf32>
    %77 = arith.addf %76, %70 : vector<16x128xf32>
    %78 = vector.extract_strided_slice %75 {offsets = [0, 128], sizes = [16, 128], strides = [1, 1]} : vector<16x256xf32> to vector<16x128xf32>
    %79 = arith.addf %78, %73 : vector<16x128xf32>
    %80 = vector.extract_strided_slice %77 {offsets = [0, 0], sizes = [16, 96], strides = [1, 1]} : vector<16x128xf32> to vector<16x96xf32>
    %81 = arith.negf %80 : vector<16x96xf32>
    %82 = math.exp %81 : vector<16x96xf32>
    %cst_28 = arith.constant 1.000000e+00 : f32
    %83 = vector.broadcast %cst_28 : f32 to vector<16x96xf32>
    %84 = arith.addf %83, %82 : vector<16x96xf32>
    %85 = arith.divf %83, %84 : vector<16x96xf32>
    %86 = vector.extract_strided_slice %79 {offsets = [0, 0], sizes = [16, 96], strides = [1, 1]} : vector<16x128xf32> to vector<16x96xf32>
    %87 = arith.negf %86 : vector<16x96xf32>
    %88 = math.exp %87 : vector<16x96xf32>
    %cst_29 = arith.constant 1.000000e+00 : f32
    %89 = vector.broadcast %cst_29 : f32 to vector<16x96xf32>
    %90 = arith.addf %89, %88 : vector<16x96xf32>
    %91 = arith.divf %89, %90 : vector<16x96xf32>
    %92 = vector.extract_strided_slice %77 {offsets = [0, 96], sizes = [16, 32], strides = [1, 1]} : vector<16x128xf32> to vector<16x32xf32>
    %93 = math.tanh %92 : vector<16x32xf32>
    %94 = vector.extract_strided_slice %79 {offsets = [0, 96], sizes = [16, 32], strides = [1, 1]} : vector<16x128xf32> to vector<16x32xf32>
    %95 = math.tanh %94 : vector<16x32xf32>
    %96 = vector.extract_strided_slice %85 {offsets = [0, 32], sizes = [16, 32], strides = [1, 1]} : vector<16x96xf32> to vector<16x32xf32>
    %97 = arith.mulf %96, %46 : vector<16x32xf32>
    %98 = vector.extract_strided_slice %85 {offsets = [0, 0], sizes = [16, 32], strides = [1, 1]} : vector<16x96xf32> to vector<16x32xf32>
    %99 = arith.mulf %98, %93 : vector<16x32xf32>
    %100 = arith.addf %97, %99 : vector<16x32xf32>
    %101 = vector.extract_strided_slice %91 {offsets = [0, 32], sizes = [16, 32], strides = [1, 1]} : vector<16x96xf32> to vector<16x32xf32>
    %102 = arith.mulf %101, %51 : vector<16x32xf32>
    %103 = vector.extract_strided_slice %91 {offsets = [0, 0], sizes = [16, 32], strides = [1, 1]} : vector<16x96xf32> to vector<16x32xf32>
    %104 = arith.mulf %103, %95 : vector<16x32xf32>
    %105 = arith.addf %102, %104 : vector<16x32xf32>
    %106 = vector.extract_strided_slice %85 {offsets = [0, 64], sizes = [16, 32], strides = [1, 1]} : vector<16x96xf32> to vector<16x32xf32>
    %107 = math.tanh %100 : vector<16x32xf32>
    %108 = arith.mulf %106, %107 : vector<16x32xf32>
    %109 = vector.extract_strided_slice %91 {offsets = [0, 64], sizes = [16, 32], strides = [1, 1]} : vector<16x96xf32> to vector<16x32xf32>
    %110 = math.tanh %105 : vector<16x32xf32>
    %111 = arith.mulf %109, %110 : vector<16x32xf32>
    %112 = arith.index_cast %c1_i32 : i32 to index
    %c0_30 = arith.constant 0 : index
    %c0_31 = arith.constant 0 : index
    %113 = vector.load %arg11[%112, %c0_30, %c0_31] : memref<16x16x64xf32, #tpu.memory_space<vmem>>, vector<1x16x32xf32>
    %114 = vector.shape_cast %113 : vector<1x16x32xf32> to vector<16x32xf32>
    %115 = vector.shape_cast %108 : vector<16x32xf32> to vector<1x16x32xf32>
    tpu.vector_store %arg11[%112, %c0_30, %c0_31], %115 {strides = array<i32>} : memref<16x16x64xf32, #tpu.memory_space<vmem>>, vector<1x16x32xf32>,
    %116 = arith.index_cast %67 : i32 to index
    %c0_32 = arith.constant 0 : index
    %c32_33 = arith.constant 32 : index
    %117 = vector.load %arg11[%116, %c0_32, %c32_33] : memref<16x16x64xf32, #tpu.memory_space<vmem>>, vector<1x16x32xf32>
    %118 = vector.shape_cast %117 : vector<1x16x32xf32> to vector<16x32xf32>
    %119 = vector.shape_cast %111 : vector<16x32xf32> to vector<1x16x32xf32>
    tpu.vector_store %arg11[%116, %c0_32, %c32_33], %119 {strides = array<i32>} : memref<16x16x64xf32, #tpu.memory_space<vmem>>, vector<1x16x32xf32>,
    %120 = tpu.concatenate %108, %111 in 1 : vector<16x32xf32>, vector<16x32xf32> -> vector<16x64xf32>
    %c2_i32 = arith.constant 2 : i32
    %c15_i32_34 = arith.constant 15 : i32
    %121 = arith.subi %c15_i32_34, %c2_i32 : i32
    %122 = arith.index_cast %c2_i32 : i32 to index
    %c0_35 = arith.constant 0 : index
    %c0_36 = arith.constant 0 : index
    %123 = vector.load %arg10[%122, %c0_35, %c0_36] : memref<16x16x256xf32, #tpu.memory_space<vmem>>, vector<1x16x128xf32>
    %124 = vector.shape_cast %123 : vector<1x16x128xf32> to vector<16x128xf32>
    %125 = arith.index_cast %121 : i32 to index
    %c0_37 = arith.constant 0 : index
    %c128_38 = arith.constant 128 : index
    %126 = vector.load %arg10[%125, %c0_37, %c128_38] : memref<16x16x256xf32, #tpu.memory_space<vmem>>, vector<1x16x128xf32>
    %127 = vector.shape_cast %126 : vector<1x16x128xf32> to vector<16x128xf32>
    %128 = arith.truncf %120 : vector<16x64xf32> to vector<16x64xbf16>
    %cst_39 = arith.constant dense<0.000000e+00> : vector<16x256xf32>
    %129 = tpu.matmul %128, %10, %cst_39 {dimension_numbers = #tpu.dot_dimension_numbers<[1], [0], [0], [1], [0, 0, 1, 1], [], []>} : vector<16x64xbf16>, vector<64x256xbf16>, vector<16x256xf32> -> vector<16x256xf32>
    %130 = vector.extract_strided_slice %129 {offsets = [0, 0], sizes = [16, 128], strides = [1, 1]} : vector<16x256xf32> to vector<16x128xf32>
    %131 = arith.addf %130, %124 : vector<16x128xf32>
    %132 = vector.extract_strided_slice %129 {offsets = [0, 128], sizes = [16, 128], strides = [1, 1]} : vector<16x256xf32> to vector<16x128xf32>
    %133 = arith.addf %132, %127 : vector<16x128xf32>
    %134 = vector.extract_strided_slice %131 {offsets = [0, 0], sizes = [16, 96], strides = [1, 1]} : vector<16x128xf32> to vector<16x96xf32>
    %135 = arith.negf %134 : vector<16x96xf32>
    %136 = math.exp %135 : vector<16x96xf32>
    %cst_40 = arith.constant 1.000000e+00 : f32
    %137 = vector.broadcast %cst_40 : f32 to vector<16x96xf32>
    %138 = arith.addf %137, %136 : vector<16x96xf32>
    %139 = arith.divf %137, %138 : vector<16x96xf32>
    %140 = vector.extract_strided_slice %133 {offsets = [0, 0], sizes = [16, 96], strides = [1, 1]} : vector<16x128xf32> to vector<16x96xf32>
    %141 = arith.negf %140 : vector<16x96xf32>
    %142 = math.exp %141 : vector<16x96xf32>
    %cst_41 = arith.constant 1.000000e+00 : f32
    %143 = vector.broadcast %cst_41 : f32 to vector<16x96xf32>
    %144 = arith.addf %143, %142 : vector<16x96xf32>
    %145 = arith.divf %143, %144 : vector<16x96xf32>
    %146 = vector.extract_strided_slice %131 {offsets = [0, 96], sizes = [16, 32], strides = [1, 1]} : vector<16x128xf32> to vector<16x32xf32>
    %147 = math.tanh %146 : vector<16x32xf32>
    %148 = vector.extract_strided_slice %133 {offsets = [0, 96], sizes = [16, 32], strides = [1, 1]} : vector<16x128xf32> to vector<16x32xf32>
    %149 = math.tanh %148 : vector<16x32xf32>
    %150 = vector.extract_strided_slice %139 {offsets = [0, 32], sizes = [16, 32], strides = [1, 1]} : vector<16x96xf32> to vector<16x32xf32>
    %151 = arith.mulf %150, %100 : vector<16x32xf32>
    %152 = vector.extract_strided_slice %139 {offsets = [0, 0], sizes = [16, 32], strides = [1, 1]} : vector<16x96xf32> to vector<16x32xf32>
    %153 = arith.mulf %152, %147 : vector<16x32xf32>
    %154 = arith.addf %151, %153 : vector<16x32xf32>
    %155 = vector.extract_strided_slice %145 {offsets = [0, 32], sizes = [16, 32], strides = [1, 1]} : vector<16x96xf32> to vector<16x32xf32>
    %156 = arith.mulf %155, %105 : vector<16x32xf32>
    %157 = vector.extract_strided_slice %145 {offsets = [0, 0], sizes = [16, 32], strides = [1, 1]} : vector<16x96xf32> to vector<16x32xf32>
    %158 = arith.mulf %157, %149 : vector<16x32xf32>
    %159 = arith.addf %156, %158 : vector<16x32xf32>
    %160 = vector.extract_strided_slice %139 {offsets = [0, 64], sizes = [16, 32], strides = [1, 1]} : vector<16x96xf32> to vector<16x32xf32>
    %161 = math.tanh %154 : vector<16x32xf32>
    %162 = arith.mulf %160, %161 : vector<16x32xf32>
    %163 = vector.extract_strided_slice %145 {offsets = [0, 64], sizes = [16, 32], strides = [1, 1]} : vector<16x96xf32> to vector<16x32xf32>
    %164 = math.tanh %159 : vector<16x32xf32>
    %165 = arith.mulf %163, %164 : vector<16x32xf32>
    %166 = arith.index_cast %c2_i32 : i32 to index
    %c0_42 = arith.constant 0 : index
    %c0_43 = arith.constant 0 : index
    %167 = vector.load %arg11[%166, %c0_42, %c0_43] : memref<16x16x64xf32, #tpu.memory_space<vmem>>, vector<1x16x32xf32>
    %168 = vector.shape_cast %167 : vector<1x16x32xf32> to vector<16x32xf32>
    %169 = vector.shape_cast %162 : vector<16x32xf32> to vector<1x16x32xf32>
    tpu.vector_store %arg11[%166, %c0_42, %c0_43], %169 {strides = array<i32>} : memref<16x16x64xf32, #tpu.memory_space<vmem>>, vector<1x16x32xf32>,
    %170 = arith.index_cast %121 : i32 to index
    %c0_44 = arith.constant 0 : index
    %c32_45 = arith.constant 32 : index
    %171 = vector.load %arg11[%170, %c0_44, %c32_45] : memref<16x16x64xf32, #tpu.memory_space<vmem>>, vector<1x16x32xf32>
    %172 = vector.shape_cast %171 : vector<1x16x32xf32> to vector<16x32xf32>
    %173 = vector.shape_cast %165 : vector<16x32xf32> to vector<1x16x32xf32>
    tpu.vector_store %arg11[%170, %c0_44, %c32_45], %173 {strides = array<i32>} : memref<16x16x64xf32, #tpu.memory_space<vmem>>, vector<1x16x32xf32>,
    %174 = tpu.concatenate %162, %165 in 1 : vector<16x32xf32>, vector<16x32xf32> -> vector<16x64xf32>
    %c3_i32 = arith.constant 3 : i32
    %c15_i32_46 = arith.constant 15 : i32
    %175 = arith.subi %c15_i32_46, %c3_i32 : i32
    %176 = arith.index_cast %c3_i32 : i32 to index
    %c0_47 = arith.constant 0 : index
    %c0_48 = arith.constant 0 : index
    %177 = vector.load %arg10[%176, %c0_47, %c0_48] : memref<16x16x256xf32, #tpu.memory_space<vmem>>, vector<1x16x128xf32>
    %178 = vector.shape_cast %177 : vector<1x16x128xf32> to vector<16x128xf32>
    %179 = arith.index_cast %175 : i32 to index
    %c0_49 = arith.constant 0 : index
    %c128_50 = arith.constant 128 : index
    %180 = vector.load %arg10[%179, %c0_49, %c128_50] : memref<16x16x256xf32, #tpu.memory_space<vmem>>, vector<1x16x128xf32>
    %181 = vector.shape_cast %180 : vector<1x16x128xf32> to vector<16x128xf32>
    %182 = arith.truncf %174 : vector<16x64xf32> to vector<16x64xbf16>
    %cst_51 = arith.constant dense<0.000000e+00> : vector<16x256xf32>
    %183 = tpu.matmul %182, %10, %cst_51 {dimension_numbers = #tpu.dot_dimension_numbers<[1], [0], [0], [1], [0, 0, 1, 1], [], []>} : vector<16x64xbf16>, vector<64x256xbf16>, vector<16x256xf32> -> vector<16x256xf32>
    %184 = vector.extract_strided_slice %183 {offsets = [0, 0], sizes = [16, 128], strides = [1, 1]} : vector<16x256xf32> to vector<16x128xf32>
    %185 = arith.addf %184, %178 : vector<16x128xf32>
    %186 = vector.extract_strided_slice %183 {offsets = [0, 128], sizes = [16, 128], strides = [1, 1]} : vector<16x256xf32> to vector<16x128xf32>
    %187 = arith.addf %186, %181 : vector<16x128xf32>
    %188 = vector.extract_strided_slice %185 {offsets = [0, 0], sizes = [16, 96], strides = [1, 1]} : vector<16x128xf32> to vector<16x96xf32>
    %189 = arith.negf %188 : vector<16x96xf32>
    %190 = math.exp %189 : vector<16x96xf32>
    %cst_52 = arith.constant 1.000000e+00 : f32
    %191 = vector.broadcast %cst_52 : f32 to vector<16x96xf32>
    %192 = arith.addf %191, %190 : vector<16x96xf32>
    %193 = arith.divf %191, %192 : vector<16x96xf32>
    %194 = vector.extract_strided_slice %187 {offsets = [0, 0], sizes = [16, 96], strides = [1, 1]} : vector<16x128xf32> to vector<16x96xf32>
    %195 = arith.negf %194 : vector<16x96xf32>
    %196 = math.exp %195 : vector<16x96xf32>
    %cst_53 = arith.constant 1.000000e+00 : f32
    %197 = vector.broadcast %cst_53 : f32 to vector<16x96xf32>
    %198 = arith.addf %197, %196 : vector<16x96xf32>
    %199 = arith.divf %197, %198 : vector<16x96xf32>
    %200 = vector.extract_strided_slice %185 {offsets = [0, 96], sizes = [16, 32], strides = [1, 1]} : vector<16x128xf32> to vector<16x32xf32>
    %201 = math.tanh %200 : vector<16x32xf32>
    %202 = vector.extract_strided_slice %187 {offsets = [0, 96], sizes = [16, 32], strides = [1, 1]} : vector<16x128xf32> to vector<16x32xf32>
    %203 = math.tanh %202 : vector<16x32xf32>
    %204 = vector.extract_strided_slice %193 {offsets = [0, 32], sizes = [16, 32], strides = [1, 1]} : vector<16x96xf32> to vector<16x32xf32>
    %205 = arith.mulf %204, %154 : vector<16x32xf32>
    %206 = vector.extract_strided_slice %193 {offsets = [0, 0], sizes = [16, 32], strides = [1, 1]} : vector<16x96xf32> to vector<16x32xf32>
    %207 = arith.mulf %206, %201 : vector<16x32xf32>
    %208 = arith.addf %205, %207 : vector<16x32xf32>
    %209 = vector.extract_strided_slice %199 {offsets = [0, 32], sizes = [16, 32], strides = [1, 1]} : vector<16x96xf32> to vector<16x32xf32>
    %210 = arith.mulf %209, %159 : vector<16x32xf32>
    %211 = vector.extract_strided_slice %199 {offsets = [0, 0], sizes = [16, 32], strides = [1, 1]} : vector<16x96xf32> to vector<16x32xf32>
    %212 = arith.mulf %211, %203 : vector<16x32xf32>
    %213 = arith.addf %210, %212 : vector<16x32xf32>
    %214 = vector.extract_strided_slice %193 {offsets = [0, 64], sizes = [16, 32], strides = [1, 1]} : vector<16x96xf32> to vector<16x32xf32>
    %215 = math.tanh %208 : vector<16x32xf32>
    %216 = arith.mulf %214, %215 : vector<16x32xf32>
    %217 = vector.extract_strided_slice %199 {offsets = [0, 64], sizes = [16, 32], strides = [1, 1]} : vector<16x96xf32> to vector<16x32xf32>
    %218 = math.tanh %213 : vector<16x32xf32>
    %219 = arith.mulf %217, %218 : vector<16x32xf32>
    %220 = arith.index_cast %c3_i32 : i32 to index
    %c0_54 = arith.constant 0 : index
    %c0_55 = arith.constant 0 : index
    %221 = vector.load %arg11[%220, %c0_54, %c0_55] : memref<16x16x64xf32, #tpu.memory_space<vmem>>, vector<1x16x32xf32>
    %222 = vector.shape_cast %221 : vector<1x16x32xf32> to vector<16x32xf32>
    %223 = vector.shape_cast %216 : vector<16x32xf32> to vector<1x16x32xf32>
    tpu.vector_store %arg11[%220, %c0_54, %c0_55], %223 {strides = array<i32>} : memref<16x16x64xf32, #tpu.memory_space<vmem>>, vector<1x16x32xf32>,
    %224 = arith.index_cast %175 : i32 to index
    %c0_56 = arith.constant 0 : index
    %c32_57 = arith.constant 32 : index
    %225 = vector.load %arg11[%224, %c0_56, %c32_57] : memref<16x16x64xf32, #tpu.memory_space<vmem>>, vector<1x16x32xf32>
    %226 = vector.shape_cast %225 : vector<1x16x32xf32> to vector<16x32xf32>
    %227 = vector.shape_cast %219 : vector<16x32xf32> to vector<1x16x32xf32>
    tpu.vector_store %arg11[%224, %c0_56, %c32_57], %227 {strides = array<i32>} : memref<16x16x64xf32, #tpu.memory_space<vmem>>, vector<1x16x32xf32>,
    %228 = tpu.concatenate %216, %219 in 1 : vector<16x32xf32>, vector<16x32xf32> -> vector<16x64xf32>
    %c4_i32 = arith.constant 4 : i32
    %c15_i32_58 = arith.constant 15 : i32
    %229 = arith.subi %c15_i32_58, %c4_i32 : i32
    %230 = arith.index_cast %c4_i32 : i32 to index
    %c0_59 = arith.constant 0 : index
    %c0_60 = arith.constant 0 : index
    %231 = vector.load %arg10[%230, %c0_59, %c0_60] : memref<16x16x256xf32, #tpu.memory_space<vmem>>, vector<1x16x128xf32>
    %232 = vector.shape_cast %231 : vector<1x16x128xf32> to vector<16x128xf32>
    %233 = arith.index_cast %229 : i32 to index
    %c0_61 = arith.constant 0 : index
    %c128_62 = arith.constant 128 : index
    %234 = vector.load %arg10[%233, %c0_61, %c128_62] : memref<16x16x256xf32, #tpu.memory_space<vmem>>, vector<1x16x128xf32>
    %235 = vector.shape_cast %234 : vector<1x16x128xf32> to vector<16x128xf32>
    %236 = arith.truncf %228 : vector<16x64xf32> to vector<16x64xbf16>
    %cst_63 = arith.constant dense<0.000000e+00> : vector<16x256xf32>
    %237 = tpu.matmul %236, %10, %cst_63 {dimension_numbers = #tpu.dot_dimension_numbers<[1], [0], [0], [1], [0, 0, 1, 1], [], []>} : vector<16x64xbf16>, vector<64x256xbf16>, vector<16x256xf32> -> vector<16x256xf32>
    %238 = vector.extract_strided_slice %237 {offsets = [0, 0], sizes = [16, 128], strides = [1, 1]} : vector<16x256xf32> to vector<16x128xf32>
    %239 = arith.addf %238, %232 : vector<16x128xf32>
    %240 = vector.extract_strided_slice %237 {offsets = [0, 128], sizes = [16, 128], strides = [1, 1]} : vector<16x256xf32> to vector<16x128xf32>
    %241 = arith.addf %240, %235 : vector<16x128xf32>
    %242 = vector.extract_strided_slice %239 {offsets = [0, 0], sizes = [16, 96], strides = [1, 1]} : vector<16x128xf32> to vector<16x96xf32>
    %243 = arith.negf %242 : vector<16x96xf32>
    %244 = math.exp %243 : vector<16x96xf32>
    %cst_64 = arith.constant 1.000000e+00 : f32
    %245 = vector.broadcast %cst_64 : f32 to vector<16x96xf32>
    %246 = arith.addf %245, %244 : vector<16x96xf32>
    %247 = arith.divf %245, %246 : vector<16x96xf32>
    %248 = vector.extract_strided_slice %241 {offsets = [0, 0], sizes = [16, 96], strides = [1, 1]} : vector<16x128xf32> to vector<16x96xf32>
    %249 = arith.negf %248 : vector<16x96xf32>
    %250 = math.exp %249 : vector<16x96xf32>
    %cst_65 = arith.constant 1.000000e+00 : f32
    %251 = vector.broadcast %cst_65 : f32 to vector<16x96xf32>
    %252 = arith.addf %251, %250 : vector<16x96xf32>
    %253 = arith.divf %251, %252 : vector<16x96xf32>
    %254 = vector.extract_strided_slice %239 {offsets = [0, 96], sizes = [16, 32], strides = [1, 1]} : vector<16x128xf32> to vector<16x32xf32>
    %255 = math.tanh %254 : vector<16x32xf32>
    %256 = vector.extract_strided_slice %241 {offsets = [0, 96], sizes = [16, 32], strides = [1, 1]} : vector<16x128xf32> to vector<16x32xf32>
    %257 = math.tanh %256 : vector<16x32xf32>
    %258 = vector.extract_strided_slice %247 {offsets = [0, 32], sizes = [16, 32], strides = [1, 1]} : vector<16x96xf32> to vector<16x32xf32>
    %259 = arith.mulf %258, %208 : vector<16x32xf32>
    %260 = vector.extract_strided_slice %247 {offsets = [0, 0], sizes = [16, 32], strides = [1, 1]} : vector<16x96xf32> to vector<16x32xf32>
    %261 = arith.mulf %260, %255 : vector<16x32xf32>
    %262 = arith.addf %259, %261 : vector<16x32xf32>
    %263 = vector.extract_strided_slice %253 {offsets = [0, 32], sizes = [16, 32], strides = [1, 1]} : vector<16x96xf32> to vector<16x32xf32>
    %264 = arith.mulf %263, %213 : vector<16x32xf32>
    %265 = vector.extract_strided_slice %253 {offsets = [0, 0], sizes = [16, 32], strides = [1, 1]} : vector<16x96xf32> to vector<16x32xf32>
    %266 = arith.mulf %265, %257 : vector<16x32xf32>
    %267 = arith.addf %264, %266 : vector<16x32xf32>
    %268 = vector.extract_strided_slice %247 {offsets = [0, 64], sizes = [16, 32], strides = [1, 1]} : vector<16x96xf32> to vector<16x32xf32>
    %269 = math.tanh %262 : vector<16x32xf32>
    %270 = arith.mulf %268, %269 : vector<16x32xf32>
    %271 = vector.extract_strided_slice %253 {offsets = [0, 64], sizes = [16, 32], strides = [1, 1]} : vector<16x96xf32> to vector<16x32xf32>
    %272 = math.tanh %267 : vector<16x32xf32>
    %273 = arith.mulf %271, %272 : vector<16x32xf32>
    %274 = arith.index_cast %c4_i32 : i32 to index
    %c0_66 = arith.constant 0 : index
    %c0_67 = arith.constant 0 : index
    %275 = vector.load %arg11[%274, %c0_66, %c0_67] : memref<16x16x64xf32, #tpu.memory_space<vmem>>, vector<1x16x32xf32>
    %276 = vector.shape_cast %275 : vector<1x16x32xf32> to vector<16x32xf32>
    %277 = vector.shape_cast %270 : vector<16x32xf32> to vector<1x16x32xf32>
    tpu.vector_store %arg11[%274, %c0_66, %c0_67], %277 {strides = array<i32>} : memref<16x16x64xf32, #tpu.memory_space<vmem>>, vector<1x16x32xf32>,
    %278 = arith.index_cast %229 : i32 to index
    %c0_68 = arith.constant 0 : index
    %c32_69 = arith.constant 32 : index
    %279 = vector.load %arg11[%278, %c0_68, %c32_69] : memref<16x16x64xf32, #tpu.memory_space<vmem>>, vector<1x16x32xf32>
    %280 = vector.shape_cast %279 : vector<1x16x32xf32> to vector<16x32xf32>
    %281 = vector.shape_cast %273 : vector<16x32xf32> to vector<1x16x32xf32>
    tpu.vector_store %arg11[%278, %c0_68, %c32_69], %281 {strides = array<i32>} : memref<16x16x64xf32, #tpu.memory_space<vmem>>, vector<1x16x32xf32>,
    %282 = tpu.concatenate %270, %273 in 1 : vector<16x32xf32>, vector<16x32xf32> -> vector<16x64xf32>
    %c5_i32 = arith.constant 5 : i32
    %c15_i32_70 = arith.constant 15 : i32
    %283 = arith.subi %c15_i32_70, %c5_i32 : i32
    %284 = arith.index_cast %c5_i32 : i32 to index
    %c0_71 = arith.constant 0 : index
    %c0_72 = arith.constant 0 : index
    %285 = vector.load %arg10[%284, %c0_71, %c0_72] : memref<16x16x256xf32, #tpu.memory_space<vmem>>, vector<1x16x128xf32>
    %286 = vector.shape_cast %285 : vector<1x16x128xf32> to vector<16x128xf32>
    %287 = arith.index_cast %283 : i32 to index
    %c0_73 = arith.constant 0 : index
    %c128_74 = arith.constant 128 : index
    %288 = vector.load %arg10[%287, %c0_73, %c128_74] : memref<16x16x256xf32, #tpu.memory_space<vmem>>, vector<1x16x128xf32>
    %289 = vector.shape_cast %288 : vector<1x16x128xf32> to vector<16x128xf32>
    %290 = arith.truncf %282 : vector<16x64xf32> to vector<16x64xbf16>
    %cst_75 = arith.constant dense<0.000000e+00> : vector<16x256xf32>
    %291 = tpu.matmul %290, %10, %cst_75 {dimension_numbers = #tpu.dot_dimension_numbers<[1], [0], [0], [1], [0, 0, 1, 1], [], []>} : vector<16x64xbf16>, vector<64x256xbf16>, vector<16x256xf32> -> vector<16x256xf32>
    %292 = vector.extract_strided_slice %291 {offsets = [0, 0], sizes = [16, 128], strides = [1, 1]} : vector<16x256xf32> to vector<16x128xf32>
    %293 = arith.addf %292, %286 : vector<16x128xf32>
    %294 = vector.extract_strided_slice %291 {offsets = [0, 128], sizes = [16, 128], strides = [1, 1]} : vector<16x256xf32> to vector<16x128xf32>
    %295 = arith.addf %294, %289 : vector<16x128xf32>
    %296 = vector.extract_strided_slice %293 {offsets = [0, 0], sizes = [16, 96], strides = [1, 1]} : vector<16x128xf32> to vector<16x96xf32>
    %297 = arith.negf %296 : vector<16x96xf32>
    %298 = math.exp %297 : vector<16x96xf32>
    %cst_76 = arith.constant 1.000000e+00 : f32
    %299 = vector.broadcast %cst_76 : f32 to vector<16x96xf32>
    %300 = arith.addf %299, %298 : vector<16x96xf32>
    %301 = arith.divf %299, %300 : vector<16x96xf32>
    %302 = vector.extract_strided_slice %295 {offsets = [0, 0], sizes = [16, 96], strides = [1, 1]} : vector<16x128xf32> to vector<16x96xf32>
    %303 = arith.negf %302 : vector<16x96xf32>
    %304 = math.exp %303 : vector<16x96xf32>
    %cst_77 = arith.constant 1.000000e+00 : f32
    %305 = vector.broadcast %cst_77 : f32 to vector<16x96xf32>
    %306 = arith.addf %305, %304 : vector<16x96xf32>
    %307 = arith.divf %305, %306 : vector<16x96xf32>
    %308 = vector.extract_strided_slice %293 {offsets = [0, 96], sizes = [16, 32], strides = [1, 1]} : vector<16x128xf32> to vector<16x32xf32>
    %309 = math.tanh %308 : vector<16x32xf32>
    %310 = vector.extract_strided_slice %295 {offsets = [0, 96], sizes = [16, 32], strides = [1, 1]} : vector<16x128xf32> to vector<16x32xf32>
    %311 = math.tanh %310 : vector<16x32xf32>
    %312 = vector.extract_strided_slice %301 {offsets = [0, 32], sizes = [16, 32], strides = [1, 1]} : vector<16x96xf32> to vector<16x32xf32>
    %313 = arith.mulf %312, %262 : vector<16x32xf32>
    %314 = vector.extract_strided_slice %301 {offsets = [0, 0], sizes = [16, 32], strides = [1, 1]} : vector<16x96xf32> to vector<16x32xf32>
    %315 = arith.mulf %314, %309 : vector<16x32xf32>
    %316 = arith.addf %313, %315 : vector<16x32xf32>
    %317 = vector.extract_strided_slice %307 {offsets = [0, 32], sizes = [16, 32], strides = [1, 1]} : vector<16x96xf32> to vector<16x32xf32>
    %318 = arith.mulf %317, %267 : vector<16x32xf32>
    %319 = vector.extract_strided_slice %307 {offsets = [0, 0], sizes = [16, 32], strides = [1, 1]} : vector<16x96xf32> to vector<16x32xf32>
    %320 = arith.mulf %319, %311 : vector<16x32xf32>
    %321 = arith.addf %318, %320 : vector<16x32xf32>
    %322 = vector.extract_strided_slice %301 {offsets = [0, 64], sizes = [16, 32], strides = [1, 1]} : vector<16x96xf32> to vector<16x32xf32>
    %323 = math.tanh %316 : vector<16x32xf32>
    %324 = arith.mulf %322, %323 : vector<16x32xf32>
    %325 = vector.extract_strided_slice %307 {offsets = [0, 64], sizes = [16, 32], strides = [1, 1]} : vector<16x96xf32> to vector<16x32xf32>
    %326 = math.tanh %321 : vector<16x32xf32>
    %327 = arith.mulf %325, %326 : vector<16x32xf32>
    %328 = arith.index_cast %c5_i32 : i32 to index
    %c0_78 = arith.constant 0 : index
    %c0_79 = arith.constant 0 : index
    %329 = vector.load %arg11[%328, %c0_78, %c0_79] : memref<16x16x64xf32, #tpu.memory_space<vmem>>, vector<1x16x32xf32>
    %330 = vector.shape_cast %329 : vector<1x16x32xf32> to vector<16x32xf32>
    %331 = vector.shape_cast %324 : vector<16x32xf32> to vector<1x16x32xf32>
    tpu.vector_store %arg11[%328, %c0_78, %c0_79], %331 {strides = array<i32>} : memref<16x16x64xf32, #tpu.memory_space<vmem>>, vector<1x16x32xf32>,
    %332 = arith.index_cast %283 : i32 to index
    %c0_80 = arith.constant 0 : index
    %c32_81 = arith.constant 32 : index
    %333 = vector.load %arg11[%332, %c0_80, %c32_81] : memref<16x16x64xf32, #tpu.memory_space<vmem>>, vector<1x16x32xf32>
    %334 = vector.shape_cast %333 : vector<1x16x32xf32> to vector<16x32xf32>
    %335 = vector.shape_cast %327 : vector<16x32xf32> to vector<1x16x32xf32>
    tpu.vector_store %arg11[%332, %c0_80, %c32_81], %335 {strides = array<i32>} : memref<16x16x64xf32, #tpu.memory_space<vmem>>, vector<1x16x32xf32>,
    %336 = tpu.concatenate %324, %327 in 1 : vector<16x32xf32>, vector<16x32xf32> -> vector<16x64xf32>
    %c6_i32 = arith.constant 6 : i32
    %c15_i32_82 = arith.constant 15 : i32
    %337 = arith.subi %c15_i32_82, %c6_i32 : i32
    %338 = arith.index_cast %c6_i32 : i32 to index
    %c0_83 = arith.constant 0 : index
    %c0_84 = arith.constant 0 : index
    %339 = vector.load %arg10[%338, %c0_83, %c0_84] : memref<16x16x256xf32, #tpu.memory_space<vmem>>, vector<1x16x128xf32>
    %340 = vector.shape_cast %339 : vector<1x16x128xf32> to vector<16x128xf32>
    %341 = arith.index_cast %337 : i32 to index
    %c0_85 = arith.constant 0 : index
    %c128_86 = arith.constant 128 : index
    %342 = vector.load %arg10[%341, %c0_85, %c128_86] : memref<16x16x256xf32, #tpu.memory_space<vmem>>, vector<1x16x128xf32>
    %343 = vector.shape_cast %342 : vector<1x16x128xf32> to vector<16x128xf32>
    %344 = arith.truncf %336 : vector<16x64xf32> to vector<16x64xbf16>
    %cst_87 = arith.constant dense<0.000000e+00> : vector<16x256xf32>
    %345 = tpu.matmul %344, %10, %cst_87 {dimension_numbers = #tpu.dot_dimension_numbers<[1], [0], [0], [1], [0, 0, 1, 1], [], []>} : vector<16x64xbf16>, vector<64x256xbf16>, vector<16x256xf32> -> vector<16x256xf32>
    %346 = vector.extract_strided_slice %345 {offsets = [0, 0], sizes = [16, 128], strides = [1, 1]} : vector<16x256xf32> to vector<16x128xf32>
    %347 = arith.addf %346, %340 : vector<16x128xf32>
    %348 = vector.extract_strided_slice %345 {offsets = [0, 128], sizes = [16, 128], strides = [1, 1]} : vector<16x256xf32> to vector<16x128xf32>
    %349 = arith.addf %348, %343 : vector<16x128xf32>
    %350 = vector.extract_strided_slice %347 {offsets = [0, 0], sizes = [16, 96], strides = [1, 1]} : vector<16x128xf32> to vector<16x96xf32>
    %351 = arith.negf %350 : vector<16x96xf32>
    %352 = math.exp %351 : vector<16x96xf32>
    %cst_88 = arith.constant 1.000000e+00 : f32
    %353 = vector.broadcast %cst_88 : f32 to vector<16x96xf32>
    %354 = arith.addf %353, %352 : vector<16x96xf32>
    %355 = arith.divf %353, %354 : vector<16x96xf32>
    %356 = vector.extract_strided_slice %349 {offsets = [0, 0], sizes = [16, 96], strides = [1, 1]} : vector<16x128xf32> to vector<16x96xf32>
    %357 = arith.negf %356 : vector<16x96xf32>
    %358 = math.exp %357 : vector<16x96xf32>
    %cst_89 = arith.constant 1.000000e+00 : f32
    %359 = vector.broadcast %cst_89 : f32 to vector<16x96xf32>
    %360 = arith.addf %359, %358 : vector<16x96xf32>
    %361 = arith.divf %359, %360 : vector<16x96xf32>
    %362 = vector.extract_strided_slice %347 {offsets = [0, 96], sizes = [16, 32], strides = [1, 1]} : vector<16x128xf32> to vector<16x32xf32>
    %363 = math.tanh %362 : vector<16x32xf32>
    %364 = vector.extract_strided_slice %349 {offsets = [0, 96], sizes = [16, 32], strides = [1, 1]} : vector<16x128xf32> to vector<16x32xf32>
    %365 = math.tanh %364 : vector<16x32xf32>
    %366 = vector.extract_strided_slice %355 {offsets = [0, 32], sizes = [16, 32], strides = [1, 1]} : vector<16x96xf32> to vector<16x32xf32>
    %367 = arith.mulf %366, %316 : vector<16x32xf32>
    %368 = vector.extract_strided_slice %355 {offsets = [0, 0], sizes = [16, 32], strides = [1, 1]} : vector<16x96xf32> to vector<16x32xf32>
    %369 = arith.mulf %368, %363 : vector<16x32xf32>
    %370 = arith.addf %367, %369 : vector<16x32xf32>
    %371 = vector.extract_strided_slice %361 {offsets = [0, 32], sizes = [16, 32], strides = [1, 1]} : vector<16x96xf32> to vector<16x32xf32>
    %372 = arith.mulf %371, %321 : vector<16x32xf32>
    %373 = vector.extract_strided_slice %361 {offsets = [0, 0], sizes = [16, 32], strides = [1, 1]} : vector<16x96xf32> to vector<16x32xf32>
    %374 = arith.mulf %373, %365 : vector<16x32xf32>
    %375 = arith.addf %372, %374 : vector<16x32xf32>
    %376 = vector.extract_strided_slice %355 {offsets = [0, 64], sizes = [16, 32], strides = [1, 1]} : vector<16x96xf32> to vector<16x32xf32>
    %377 = math.tanh %370 : vector<16x32xf32>
    %378 = arith.mulf %376, %377 : vector<16x32xf32>
    %379 = vector.extract_strided_slice %361 {offsets = [0, 64], sizes = [16, 32], strides = [1, 1]} : vector<16x96xf32> to vector<16x32xf32>
    %380 = math.tanh %375 : vector<16x32xf32>
    %381 = arith.mulf %379, %380 : vector<16x32xf32>
    %382 = arith.index_cast %c6_i32 : i32 to index
    %c0_90 = arith.constant 0 : index
    %c0_91 = arith.constant 0 : index
    %383 = vector.load %arg11[%382, %c0_90, %c0_91] : memref<16x16x64xf32, #tpu.memory_space<vmem>>, vector<1x16x32xf32>
    %384 = vector.shape_cast %383 : vector<1x16x32xf32> to vector<16x32xf32>
    %385 = vector.shape_cast %378 : vector<16x32xf32> to vector<1x16x32xf32>
    tpu.vector_store %arg11[%382, %c0_90, %c0_91], %385 {strides = array<i32>} : memref<16x16x64xf32, #tpu.memory_space<vmem>>, vector<1x16x32xf32>,
    %386 = arith.index_cast %337 : i32 to index
    %c0_92 = arith.constant 0 : index
    %c32_93 = arith.constant 32 : index
    %387 = vector.load %arg11[%386, %c0_92, %c32_93] : memref<16x16x64xf32, #tpu.memory_space<vmem>>, vector<1x16x32xf32>
    %388 = vector.shape_cast %387 : vector<1x16x32xf32> to vector<16x32xf32>
    %389 = vector.shape_cast %381 : vector<16x32xf32> to vector<1x16x32xf32>
    tpu.vector_store %arg11[%386, %c0_92, %c32_93], %389 {strides = array<i32>} : memref<16x16x64xf32, #tpu.memory_space<vmem>>, vector<1x16x32xf32>,
    %390 = tpu.concatenate %378, %381 in 1 : vector<16x32xf32>, vector<16x32xf32> -> vector<16x64xf32>
    %c7_i32 = arith.constant 7 : i32
    %c15_i32_94 = arith.constant 15 : i32
    %391 = arith.subi %c15_i32_94, %c7_i32 : i32
    %392 = arith.index_cast %c7_i32 : i32 to index
    %c0_95 = arith.constant 0 : index
    %c0_96 = arith.constant 0 : index
    %393 = vector.load %arg10[%392, %c0_95, %c0_96] : memref<16x16x256xf32, #tpu.memory_space<vmem>>, vector<1x16x128xf32>
    %394 = vector.shape_cast %393 : vector<1x16x128xf32> to vector<16x128xf32>
    %395 = arith.index_cast %391 : i32 to index
    %c0_97 = arith.constant 0 : index
    %c128_98 = arith.constant 128 : index
    %396 = vector.load %arg10[%395, %c0_97, %c128_98] : memref<16x16x256xf32, #tpu.memory_space<vmem>>, vector<1x16x128xf32>
    %397 = vector.shape_cast %396 : vector<1x16x128xf32> to vector<16x128xf32>
    %398 = arith.truncf %390 : vector<16x64xf32> to vector<16x64xbf16>
    %cst_99 = arith.constant dense<0.000000e+00> : vector<16x256xf32>
    %399 = tpu.matmul %398, %10, %cst_99 {dimension_numbers = #tpu.dot_dimension_numbers<[1], [0], [0], [1], [0, 0, 1, 1], [], []>} : vector<16x64xbf16>, vector<64x256xbf16>, vector<16x256xf32> -> vector<16x256xf32>
    %400 = vector.extract_strided_slice %399 {offsets = [0, 0], sizes = [16, 128], strides = [1, 1]} : vector<16x256xf32> to vector<16x128xf32>
    %401 = arith.addf %400, %394 : vector<16x128xf32>
    %402 = vector.extract_strided_slice %399 {offsets = [0, 128], sizes = [16, 128], strides = [1, 1]} : vector<16x256xf32> to vector<16x128xf32>
    %403 = arith.addf %402, %397 : vector<16x128xf32>
    %404 = vector.extract_strided_slice %401 {offsets = [0, 0], sizes = [16, 96], strides = [1, 1]} : vector<16x128xf32> to vector<16x96xf32>
    %405 = arith.negf %404 : vector<16x96xf32>
    %406 = math.exp %405 : vector<16x96xf32>
    %cst_100 = arith.constant 1.000000e+00 : f32
    %407 = vector.broadcast %cst_100 : f32 to vector<16x96xf32>
    %408 = arith.addf %407, %406 : vector<16x96xf32>
    %409 = arith.divf %407, %408 : vector<16x96xf32>
    %410 = vector.extract_strided_slice %403 {offsets = [0, 0], sizes = [16, 96], strides = [1, 1]} : vector<16x128xf32> to vector<16x96xf32>
    %411 = arith.negf %410 : vector<16x96xf32>
    %412 = math.exp %411 : vector<16x96xf32>
    %cst_101 = arith.constant 1.000000e+00 : f32
    %413 = vector.broadcast %cst_101 : f32 to vector<16x96xf32>
    %414 = arith.addf %413, %412 : vector<16x96xf32>
    %415 = arith.divf %413, %414 : vector<16x96xf32>
    %416 = vector.extract_strided_slice %401 {offsets = [0, 96], sizes = [16, 32], strides = [1, 1]} : vector<16x128xf32> to vector<16x32xf32>
    %417 = math.tanh %416 : vector<16x32xf32>
    %418 = vector.extract_strided_slice %403 {offsets = [0, 96], sizes = [16, 32], strides = [1, 1]} : vector<16x128xf32> to vector<16x32xf32>
    %419 = math.tanh %418 : vector<16x32xf32>
    %420 = vector.extract_strided_slice %409 {offsets = [0, 32], sizes = [16, 32], strides = [1, 1]} : vector<16x96xf32> to vector<16x32xf32>
    %421 = arith.mulf %420, %370 : vector<16x32xf32>
    %422 = vector.extract_strided_slice %409 {offsets = [0, 0], sizes = [16, 32], strides = [1, 1]} : vector<16x96xf32> to vector<16x32xf32>
    %423 = arith.mulf %422, %417 : vector<16x32xf32>
    %424 = arith.addf %421, %423 : vector<16x32xf32>
    %425 = vector.extract_strided_slice %415 {offsets = [0, 32], sizes = [16, 32], strides = [1, 1]} : vector<16x96xf32> to vector<16x32xf32>
    %426 = arith.mulf %425, %375 : vector<16x32xf32>
    %427 = vector.extract_strided_slice %415 {offsets = [0, 0], sizes = [16, 32], strides = [1, 1]} : vector<16x96xf32> to vector<16x32xf32>
    %428 = arith.mulf %427, %419 : vector<16x32xf32>
    %429 = arith.addf %426, %428 : vector<16x32xf32>
    %430 = vector.extract_strided_slice %409 {offsets = [0, 64], sizes = [16, 32], strides = [1, 1]} : vector<16x96xf32> to vector<16x32xf32>
    %431 = math.tanh %424 : vector<16x32xf32>
    %432 = arith.mulf %430, %431 : vector<16x32xf32>
    %433 = vector.extract_strided_slice %415 {offsets = [0, 64], sizes = [16, 32], strides = [1, 1]} : vector<16x96xf32> to vector<16x32xf32>
    %434 = math.tanh %429 : vector<16x32xf32>
    %435 = arith.mulf %433, %434 : vector<16x32xf32>
    %436 = arith.index_cast %c7_i32 : i32 to index
    %c0_102 = arith.constant 0 : index
    %c0_103 = arith.constant 0 : index
    %437 = vector.load %arg11[%436, %c0_102, %c0_103] : memref<16x16x64xf32, #tpu.memory_space<vmem>>, vector<1x16x32xf32>
    %438 = vector.shape_cast %437 : vector<1x16x32xf32> to vector<16x32xf32>
    %439 = vector.shape_cast %432 : vector<16x32xf32> to vector<1x16x32xf32>
    tpu.vector_store %arg11[%436, %c0_102, %c0_103], %439 {strides = array<i32>} : memref<16x16x64xf32, #tpu.memory_space<vmem>>, vector<1x16x32xf32>,
    %440 = arith.index_cast %391 : i32 to index
    %c0_104 = arith.constant 0 : index
    %c32_105 = arith.constant 32 : index
    %441 = vector.load %arg11[%440, %c0_104, %c32_105] : memref<16x16x64xf32, #tpu.memory_space<vmem>>, vector<1x16x32xf32>
    %442 = vector.shape_cast %441 : vector<1x16x32xf32> to vector<16x32xf32>
    %443 = vector.shape_cast %435 : vector<16x32xf32> to vector<1x16x32xf32>
    tpu.vector_store %arg11[%440, %c0_104, %c32_105], %443 {strides = array<i32>} : memref<16x16x64xf32, #tpu.memory_space<vmem>>, vector<1x16x32xf32>,
    %444 = tpu.concatenate %432, %435 in 1 : vector<16x32xf32>, vector<16x32xf32> -> vector<16x64xf32>
    %c8_i32 = arith.constant 8 : i32
    %c15_i32_106 = arith.constant 15 : i32
    %445 = arith.subi %c15_i32_106, %c8_i32 : i32
    %446 = arith.index_cast %c8_i32 : i32 to index
    %c0_107 = arith.constant 0 : index
    %c0_108 = arith.constant 0 : index
    %447 = vector.load %arg10[%446, %c0_107, %c0_108] : memref<16x16x256xf32, #tpu.memory_space<vmem>>, vector<1x16x128xf32>
    %448 = vector.shape_cast %447 : vector<1x16x128xf32> to vector<16x128xf32>
    %449 = arith.index_cast %445 : i32 to index
    %c0_109 = arith.constant 0 : index
    %c128_110 = arith.constant 128 : index
    %450 = vector.load %arg10[%449, %c0_109, %c128_110] : memref<16x16x256xf32, #tpu.memory_space<vmem>>, vector<1x16x128xf32>
    %451 = vector.shape_cast %450 : vector<1x16x128xf32> to vector<16x128xf32>
    %452 = arith.truncf %444 : vector<16x64xf32> to vector<16x64xbf16>
    %cst_111 = arith.constant dense<0.000000e+00> : vector<16x256xf32>
    %453 = tpu.matmul %452, %10, %cst_111 {dimension_numbers = #tpu.dot_dimension_numbers<[1], [0], [0], [1], [0, 0, 1, 1], [], []>} : vector<16x64xbf16>, vector<64x256xbf16>, vector<16x256xf32> -> vector<16x256xf32>
    %454 = vector.extract_strided_slice %453 {offsets = [0, 0], sizes = [16, 128], strides = [1, 1]} : vector<16x256xf32> to vector<16x128xf32>
    %455 = arith.addf %454, %448 : vector<16x128xf32>
    %456 = vector.extract_strided_slice %453 {offsets = [0, 128], sizes = [16, 128], strides = [1, 1]} : vector<16x256xf32> to vector<16x128xf32>
    %457 = arith.addf %456, %451 : vector<16x128xf32>
    %458 = vector.extract_strided_slice %455 {offsets = [0, 0], sizes = [16, 96], strides = [1, 1]} : vector<16x128xf32> to vector<16x96xf32>
    %459 = arith.negf %458 : vector<16x96xf32>
    %460 = math.exp %459 : vector<16x96xf32>
    %cst_112 = arith.constant 1.000000e+00 : f32
    %461 = vector.broadcast %cst_112 : f32 to vector<16x96xf32>
    %462 = arith.addf %461, %460 : vector<16x96xf32>
    %463 = arith.divf %461, %462 : vector<16x96xf32>
    %464 = vector.extract_strided_slice %457 {offsets = [0, 0], sizes = [16, 96], strides = [1, 1]} : vector<16x128xf32> to vector<16x96xf32>
    %465 = arith.negf %464 : vector<16x96xf32>
    %466 = math.exp %465 : vector<16x96xf32>
    %cst_113 = arith.constant 1.000000e+00 : f32
    %467 = vector.broadcast %cst_113 : f32 to vector<16x96xf32>
    %468 = arith.addf %467, %466 : vector<16x96xf32>
    %469 = arith.divf %467, %468 : vector<16x96xf32>
    %470 = vector.extract_strided_slice %455 {offsets = [0, 96], sizes = [16, 32], strides = [1, 1]} : vector<16x128xf32> to vector<16x32xf32>
    %471 = math.tanh %470 : vector<16x32xf32>
    %472 = vector.extract_strided_slice %457 {offsets = [0, 96], sizes = [16, 32], strides = [1, 1]} : vector<16x128xf32> to vector<16x32xf32>
    %473 = math.tanh %472 : vector<16x32xf32>
    %474 = vector.extract_strided_slice %463 {offsets = [0, 32], sizes = [16, 32], strides = [1, 1]} : vector<16x96xf32> to vector<16x32xf32>
    %475 = arith.mulf %474, %424 : vector<16x32xf32>
    %476 = vector.extract_strided_slice %463 {offsets = [0, 0], sizes = [16, 32], strides = [1, 1]} : vector<16x96xf32> to vector<16x32xf32>
    %477 = arith.mulf %476, %471 : vector<16x32xf32>
    %478 = arith.addf %475, %477 : vector<16x32xf32>
    %479 = vector.extract_strided_slice %469 {offsets = [0, 32], sizes = [16, 32], strides = [1, 1]} : vector<16x96xf32> to vector<16x32xf32>
    %480 = arith.mulf %479, %429 : vector<16x32xf32>
    %481 = vector.extract_strided_slice %469 {offsets = [0, 0], sizes = [16, 32], strides = [1, 1]} : vector<16x96xf32> to vector<16x32xf32>
    %482 = arith.mulf %481, %473 : vector<16x32xf32>
    %483 = arith.addf %480, %482 : vector<16x32xf32>
    %484 = vector.extract_strided_slice %463 {offsets = [0, 64], sizes = [16, 32], strides = [1, 1]} : vector<16x96xf32> to vector<16x32xf32>
    %485 = math.tanh %478 : vector<16x32xf32>
    %486 = arith.mulf %484, %485 : vector<16x32xf32>
    %487 = vector.extract_strided_slice %469 {offsets = [0, 64], sizes = [16, 32], strides = [1, 1]} : vector<16x96xf32> to vector<16x32xf32>
    %488 = math.tanh %483 : vector<16x32xf32>
    %489 = arith.mulf %487, %488 : vector<16x32xf32>
    %490 = arith.index_cast %c8_i32 : i32 to index
    %c0_114 = arith.constant 0 : index
    %c0_115 = arith.constant 0 : index
    %491 = vector.load %arg11[%490, %c0_114, %c0_115] : memref<16x16x64xf32, #tpu.memory_space<vmem>>, vector<1x16x32xf32>
    %492 = vector.shape_cast %491 : vector<1x16x32xf32> to vector<16x32xf32>
    %493 = vector.shape_cast %486 : vector<16x32xf32> to vector<1x16x32xf32>
    tpu.vector_store %arg11[%490, %c0_114, %c0_115], %493 {strides = array<i32>} : memref<16x16x64xf32, #tpu.memory_space<vmem>>, vector<1x16x32xf32>,
    %494 = arith.index_cast %445 : i32 to index
    %c0_116 = arith.constant 0 : index
    %c32_117 = arith.constant 32 : index
    %495 = vector.load %arg11[%494, %c0_116, %c32_117] : memref<16x16x64xf32, #tpu.memory_space<vmem>>, vector<1x16x32xf32>
    %496 = vector.shape_cast %495 : vector<1x16x32xf32> to vector<16x32xf32>
    %497 = vector.shape_cast %489 : vector<16x32xf32> to vector<1x16x32xf32>
    tpu.vector_store %arg11[%494, %c0_116, %c32_117], %497 {strides = array<i32>} : memref<16x16x64xf32, #tpu.memory_space<vmem>>, vector<1x16x32xf32>,
    %498 = tpu.concatenate %486, %489 in 1 : vector<16x32xf32>, vector<16x32xf32> -> vector<16x64xf32>
    %c9_i32 = arith.constant 9 : i32
    %c15_i32_118 = arith.constant 15 : i32
    %499 = arith.subi %c15_i32_118, %c9_i32 : i32
    %500 = arith.index_cast %c9_i32 : i32 to index
    %c0_119 = arith.constant 0 : index
    %c0_120 = arith.constant 0 : index
    %501 = vector.load %arg10[%500, %c0_119, %c0_120] : memref<16x16x256xf32, #tpu.memory_space<vmem>>, vector<1x16x128xf32>
    %502 = vector.shape_cast %501 : vector<1x16x128xf32> to vector<16x128xf32>
    %503 = arith.index_cast %499 : i32 to index
    %c0_121 = arith.constant 0 : index
    %c128_122 = arith.constant 128 : index
    %504 = vector.load %arg10[%503, %c0_121, %c128_122] : memref<16x16x256xf32, #tpu.memory_space<vmem>>, vector<1x16x128xf32>
    %505 = vector.shape_cast %504 : vector<1x16x128xf32> to vector<16x128xf32>
    %506 = arith.truncf %498 : vector<16x64xf32> to vector<16x64xbf16>
    %cst_123 = arith.constant dense<0.000000e+00> : vector<16x256xf32>
    %507 = tpu.matmul %506, %10, %cst_123 {dimension_numbers = #tpu.dot_dimension_numbers<[1], [0], [0], [1], [0, 0, 1, 1], [], []>} : vector<16x64xbf16>, vector<64x256xbf16>, vector<16x256xf32> -> vector<16x256xf32>
    %508 = vector.extract_strided_slice %507 {offsets = [0, 0], sizes = [16, 128], strides = [1, 1]} : vector<16x256xf32> to vector<16x128xf32>
    %509 = arith.addf %508, %502 : vector<16x128xf32>
    %510 = vector.extract_strided_slice %507 {offsets = [0, 128], sizes = [16, 128], strides = [1, 1]} : vector<16x256xf32> to vector<16x128xf32>
    %511 = arith.addf %510, %505 : vector<16x128xf32>
    %512 = vector.extract_strided_slice %509 {offsets = [0, 0], sizes = [16, 96], strides = [1, 1]} : vector<16x128xf32> to vector<16x96xf32>
    %513 = arith.negf %512 : vector<16x96xf32>
    %514 = math.exp %513 : vector<16x96xf32>
    %cst_124 = arith.constant 1.000000e+00 : f32
    %515 = vector.broadcast %cst_124 : f32 to vector<16x96xf32>
    %516 = arith.addf %515, %514 : vector<16x96xf32>
    %517 = arith.divf %515, %516 : vector<16x96xf32>
    %518 = vector.extract_strided_slice %511 {offsets = [0, 0], sizes = [16, 96], strides = [1, 1]} : vector<16x128xf32> to vector<16x96xf32>
    %519 = arith.negf %518 : vector<16x96xf32>
    %520 = math.exp %519 : vector<16x96xf32>
    %cst_125 = arith.constant 1.000000e+00 : f32
    %521 = vector.broadcast %cst_125 : f32 to vector<16x96xf32>
    %522 = arith.addf %521, %520 : vector<16x96xf32>
    %523 = arith.divf %521, %522 : vector<16x96xf32>
    %524 = vector.extract_strided_slice %509 {offsets = [0, 96], sizes = [16, 32], strides = [1, 1]} : vector<16x128xf32> to vector<16x32xf32>
    %525 = math.tanh %524 : vector<16x32xf32>
    %526 = vector.extract_strided_slice %511 {offsets = [0, 96], sizes = [16, 32], strides = [1, 1]} : vector<16x128xf32> to vector<16x32xf32>
    %527 = math.tanh %526 : vector<16x32xf32>
    %528 = vector.extract_strided_slice %517 {offsets = [0, 32], sizes = [16, 32], strides = [1, 1]} : vector<16x96xf32> to vector<16x32xf32>
    %529 = arith.mulf %528, %478 : vector<16x32xf32>
    %530 = vector.extract_strided_slice %517 {offsets = [0, 0], sizes = [16, 32], strides = [1, 1]} : vector<16x96xf32> to vector<16x32xf32>
    %531 = arith.mulf %530, %525 : vector<16x32xf32>
    %532 = arith.addf %529, %531 : vector<16x32xf32>
    %533 = vector.extract_strided_slice %523 {offsets = [0, 32], sizes = [16, 32], strides = [1, 1]} : vector<16x96xf32> to vector<16x32xf32>
    %534 = arith.mulf %533, %483 : vector<16x32xf32>
    %535 = vector.extract_strided_slice %523 {offsets = [0, 0], sizes = [16, 32], strides = [1, 1]} : vector<16x96xf32> to vector<16x32xf32>
    %536 = arith.mulf %535, %527 : vector<16x32xf32>
    %537 = arith.addf %534, %536 : vector<16x32xf32>
    %538 = vector.extract_strided_slice %517 {offsets = [0, 64], sizes = [16, 32], strides = [1, 1]} : vector<16x96xf32> to vector<16x32xf32>
    %539 = math.tanh %532 : vector<16x32xf32>
    %540 = arith.mulf %538, %539 : vector<16x32xf32>
    %541 = vector.extract_strided_slice %523 {offsets = [0, 64], sizes = [16, 32], strides = [1, 1]} : vector<16x96xf32> to vector<16x32xf32>
    %542 = math.tanh %537 : vector<16x32xf32>
    %543 = arith.mulf %541, %542 : vector<16x32xf32>
    %544 = arith.index_cast %c9_i32 : i32 to index
    %c0_126 = arith.constant 0 : index
    %c0_127 = arith.constant 0 : index
    %545 = vector.load %arg11[%544, %c0_126, %c0_127] : memref<16x16x64xf32, #tpu.memory_space<vmem>>, vector<1x16x32xf32>
    %546 = vector.shape_cast %545 : vector<1x16x32xf32> to vector<16x32xf32>
    %547 = vector.shape_cast %540 : vector<16x32xf32> to vector<1x16x32xf32>
    tpu.vector_store %arg11[%544, %c0_126, %c0_127], %547 {strides = array<i32>} : memref<16x16x64xf32, #tpu.memory_space<vmem>>, vector<1x16x32xf32>,
    %548 = arith.index_cast %499 : i32 to index
    %c0_128 = arith.constant 0 : index
    %c32_129 = arith.constant 32 : index
    %549 = vector.load %arg11[%548, %c0_128, %c32_129] : memref<16x16x64xf32, #tpu.memory_space<vmem>>, vector<1x16x32xf32>
    %550 = vector.shape_cast %549 : vector<1x16x32xf32> to vector<16x32xf32>
    %551 = vector.shape_cast %543 : vector<16x32xf32> to vector<1x16x32xf32>
    tpu.vector_store %arg11[%548, %c0_128, %c32_129], %551 {strides = array<i32>} : memref<16x16x64xf32, #tpu.memory_space<vmem>>, vector<1x16x32xf32>,
    %552 = tpu.concatenate %540, %543 in 1 : vector<16x32xf32>, vector<16x32xf32> -> vector<16x64xf32>
    %c10_i32 = arith.constant 10 : i32
    %c15_i32_130 = arith.constant 15 : i32
    %553 = arith.subi %c15_i32_130, %c10_i32 : i32
    %554 = arith.index_cast %c10_i32 : i32 to index
    %c0_131 = arith.constant 0 : index
    %c0_132 = arith.constant 0 : index
    %555 = vector.load %arg10[%554, %c0_131, %c0_132] : memref<16x16x256xf32, #tpu.memory_space<vmem>>, vector<1x16x128xf32>
    %556 = vector.shape_cast %555 : vector<1x16x128xf32> to vector<16x128xf32>
    %557 = arith.index_cast %553 : i32 to index
    %c0_133 = arith.constant 0 : index
    %c128_134 = arith.constant 128 : index
    %558 = vector.load %arg10[%557, %c0_133, %c128_134] : memref<16x16x256xf32, #tpu.memory_space<vmem>>, vector<1x16x128xf32>
    %559 = vector.shape_cast %558 : vector<1x16x128xf32> to vector<16x128xf32>
    %560 = arith.truncf %552 : vector<16x64xf32> to vector<16x64xbf16>
    %cst_135 = arith.constant dense<0.000000e+00> : vector<16x256xf32>
    %561 = tpu.matmul %560, %10, %cst_135 {dimension_numbers = #tpu.dot_dimension_numbers<[1], [0], [0], [1], [0, 0, 1, 1], [], []>} : vector<16x64xbf16>, vector<64x256xbf16>, vector<16x256xf32> -> vector<16x256xf32>
    %562 = vector.extract_strided_slice %561 {offsets = [0, 0], sizes = [16, 128], strides = [1, 1]} : vector<16x256xf32> to vector<16x128xf32>
    %563 = arith.addf %562, %556 : vector<16x128xf32>
    %564 = vector.extract_strided_slice %561 {offsets = [0, 128], sizes = [16, 128], strides = [1, 1]} : vector<16x256xf32> to vector<16x128xf32>
    %565 = arith.addf %564, %559 : vector<16x128xf32>
    %566 = vector.extract_strided_slice %563 {offsets = [0, 0], sizes = [16, 96], strides = [1, 1]} : vector<16x128xf32> to vector<16x96xf32>
    %567 = arith.negf %566 : vector<16x96xf32>
    %568 = math.exp %567 : vector<16x96xf32>
    %cst_136 = arith.constant 1.000000e+00 : f32
    %569 = vector.broadcast %cst_136 : f32 to vector<16x96xf32>
    %570 = arith.addf %569, %568 : vector<16x96xf32>
    %571 = arith.divf %569, %570 : vector<16x96xf32>
    %572 = vector.extract_strided_slice %565 {offsets = [0, 0], sizes = [16, 96], strides = [1, 1]} : vector<16x128xf32> to vector<16x96xf32>
    %573 = arith.negf %572 : vector<16x96xf32>
    %574 = math.exp %573 : vector<16x96xf32>
    %cst_137 = arith.constant 1.000000e+00 : f32
    %575 = vector.broadcast %cst_137 : f32 to vector<16x96xf32>
    %576 = arith.addf %575, %574 : vector<16x96xf32>
    %577 = arith.divf %575, %576 : vector<16x96xf32>
    %578 = vector.extract_strided_slice %563 {offsets = [0, 96], sizes = [16, 32], strides = [1, 1]} : vector<16x128xf32> to vector<16x32xf32>
    %579 = math.tanh %578 : vector<16x32xf32>
    %580 = vector.extract_strided_slice %565 {offsets = [0, 96], sizes = [16, 32], strides = [1, 1]} : vector<16x128xf32> to vector<16x32xf32>
    %581 = math.tanh %580 : vector<16x32xf32>
    %582 = vector.extract_strided_slice %571 {offsets = [0, 32], sizes = [16, 32], strides = [1, 1]} : vector<16x96xf32> to vector<16x32xf32>
    %583 = arith.mulf %582, %532 : vector<16x32xf32>
    %584 = vector.extract_strided_slice %571 {offsets = [0, 0], sizes = [16, 32], strides = [1, 1]} : vector<16x96xf32> to vector<16x32xf32>
    %585 = arith.mulf %584, %579 : vector<16x32xf32>
    %586 = arith.addf %583, %585 : vector<16x32xf32>
    %587 = vector.extract_strided_slice %577 {offsets = [0, 32], sizes = [16, 32], strides = [1, 1]} : vector<16x96xf32> to vector<16x32xf32>
    %588 = arith.mulf %587, %537 : vector<16x32xf32>
    %589 = vector.extract_strided_slice %577 {offsets = [0, 0], sizes = [16, 32], strides = [1, 1]} : vector<16x96xf32> to vector<16x32xf32>
    %590 = arith.mulf %589, %581 : vector<16x32xf32>
    %591 = arith.addf %588, %590 : vector<16x32xf32>
    %592 = vector.extract_strided_slice %571 {offsets = [0, 64], sizes = [16, 32], strides = [1, 1]} : vector<16x96xf32> to vector<16x32xf32>
    %593 = math.tanh %586 : vector<16x32xf32>
    %594 = arith.mulf %592, %593 : vector<16x32xf32>
    %595 = vector.extract_strided_slice %577 {offsets = [0, 64], sizes = [16, 32], strides = [1, 1]} : vector<16x96xf32> to vector<16x32xf32>
    %596 = math.tanh %591 : vector<16x32xf32>
    %597 = arith.mulf %595, %596 : vector<16x32xf32>
    %598 = arith.index_cast %c10_i32 : i32 to index
    %c0_138 = arith.constant 0 : index
    %c0_139 = arith.constant 0 : index
    %599 = vector.load %arg11[%598, %c0_138, %c0_139] : memref<16x16x64xf32, #tpu.memory_space<vmem>>, vector<1x16x32xf32>
    %600 = vector.shape_cast %599 : vector<1x16x32xf32> to vector<16x32xf32>
    %601 = vector.shape_cast %594 : vector<16x32xf32> to vector<1x16x32xf32>
    tpu.vector_store %arg11[%598, %c0_138, %c0_139], %601 {strides = array<i32>} : memref<16x16x64xf32, #tpu.memory_space<vmem>>, vector<1x16x32xf32>,
    %602 = arith.index_cast %553 : i32 to index
    %c0_140 = arith.constant 0 : index
    %c32_141 = arith.constant 32 : index
    %603 = vector.load %arg11[%602, %c0_140, %c32_141] : memref<16x16x64xf32, #tpu.memory_space<vmem>>, vector<1x16x32xf32>
    %604 = vector.shape_cast %603 : vector<1x16x32xf32> to vector<16x32xf32>
    %605 = vector.shape_cast %597 : vector<16x32xf32> to vector<1x16x32xf32>
    tpu.vector_store %arg11[%602, %c0_140, %c32_141], %605 {strides = array<i32>} : memref<16x16x64xf32, #tpu.memory_space<vmem>>, vector<1x16x32xf32>,
    %606 = tpu.concatenate %594, %597 in 1 : vector<16x32xf32>, vector<16x32xf32> -> vector<16x64xf32>
    %c11_i32 = arith.constant 11 : i32
    %c15_i32_142 = arith.constant 15 : i32
    %607 = arith.subi %c15_i32_142, %c11_i32 : i32
    %608 = arith.index_cast %c11_i32 : i32 to index
    %c0_143 = arith.constant 0 : index
    %c0_144 = arith.constant 0 : index
    %609 = vector.load %arg10[%608, %c0_143, %c0_144] : memref<16x16x256xf32, #tpu.memory_space<vmem>>, vector<1x16x128xf32>
    %610 = vector.shape_cast %609 : vector<1x16x128xf32> to vector<16x128xf32>
    %611 = arith.index_cast %607 : i32 to index
    %c0_145 = arith.constant 0 : index
    %c128_146 = arith.constant 128 : index
    %612 = vector.load %arg10[%611, %c0_145, %c128_146] : memref<16x16x256xf32, #tpu.memory_space<vmem>>, vector<1x16x128xf32>
    %613 = vector.shape_cast %612 : vector<1x16x128xf32> to vector<16x128xf32>
    %614 = arith.truncf %606 : vector<16x64xf32> to vector<16x64xbf16>
    %cst_147 = arith.constant dense<0.000000e+00> : vector<16x256xf32>
    %615 = tpu.matmul %614, %10, %cst_147 {dimension_numbers = #tpu.dot_dimension_numbers<[1], [0], [0], [1], [0, 0, 1, 1], [], []>} : vector<16x64xbf16>, vector<64x256xbf16>, vector<16x256xf32> -> vector<16x256xf32>
    %616 = vector.extract_strided_slice %615 {offsets = [0, 0], sizes = [16, 128], strides = [1, 1]} : vector<16x256xf32> to vector<16x128xf32>
    %617 = arith.addf %616, %610 : vector<16x128xf32>
    %618 = vector.extract_strided_slice %615 {offsets = [0, 128], sizes = [16, 128], strides = [1, 1]} : vector<16x256xf32> to vector<16x128xf32>
    %619 = arith.addf %618, %613 : vector<16x128xf32>
    %620 = vector.extract_strided_slice %617 {offsets = [0, 0], sizes = [16, 96], strides = [1, 1]} : vector<16x128xf32> to vector<16x96xf32>
    %621 = arith.negf %620 : vector<16x96xf32>
    %622 = math.exp %621 : vector<16x96xf32>
    %cst_148 = arith.constant 1.000000e+00 : f32
    %623 = vector.broadcast %cst_148 : f32 to vector<16x96xf32>
    %624 = arith.addf %623, %622 : vector<16x96xf32>
    %625 = arith.divf %623, %624 : vector<16x96xf32>
    %626 = vector.extract_strided_slice %619 {offsets = [0, 0], sizes = [16, 96], strides = [1, 1]} : vector<16x128xf32> to vector<16x96xf32>
    %627 = arith.negf %626 : vector<16x96xf32>
    %628 = math.exp %627 : vector<16x96xf32>
    %cst_149 = arith.constant 1.000000e+00 : f32
    %629 = vector.broadcast %cst_149 : f32 to vector<16x96xf32>
    %630 = arith.addf %629, %628 : vector<16x96xf32>
    %631 = arith.divf %629, %630 : vector<16x96xf32>
    %632 = vector.extract_strided_slice %617 {offsets = [0, 96], sizes = [16, 32], strides = [1, 1]} : vector<16x128xf32> to vector<16x32xf32>
    %633 = math.tanh %632 : vector<16x32xf32>
    %634 = vector.extract_strided_slice %619 {offsets = [0, 96], sizes = [16, 32], strides = [1, 1]} : vector<16x128xf32> to vector<16x32xf32>
    %635 = math.tanh %634 : vector<16x32xf32>
    %636 = vector.extract_strided_slice %625 {offsets = [0, 32], sizes = [16, 32], strides = [1, 1]} : vector<16x96xf32> to vector<16x32xf32>
    %637 = arith.mulf %636, %586 : vector<16x32xf32>
    %638 = vector.extract_strided_slice %625 {offsets = [0, 0], sizes = [16, 32], strides = [1, 1]} : vector<16x96xf32> to vector<16x32xf32>
    %639 = arith.mulf %638, %633 : vector<16x32xf32>
    %640 = arith.addf %637, %639 : vector<16x32xf32>
    %641 = vector.extract_strided_slice %631 {offsets = [0, 32], sizes = [16, 32], strides = [1, 1]} : vector<16x96xf32> to vector<16x32xf32>
    %642 = arith.mulf %641, %591 : vector<16x32xf32>
    %643 = vector.extract_strided_slice %631 {offsets = [0, 0], sizes = [16, 32], strides = [1, 1]} : vector<16x96xf32> to vector<16x32xf32>
    %644 = arith.mulf %643, %635 : vector<16x32xf32>
    %645 = arith.addf %642, %644 : vector<16x32xf32>
    %646 = vector.extract_strided_slice %625 {offsets = [0, 64], sizes = [16, 32], strides = [1, 1]} : vector<16x96xf32> to vector<16x32xf32>
    %647 = math.tanh %640 : vector<16x32xf32>
    %648 = arith.mulf %646, %647 : vector<16x32xf32>
    %649 = vector.extract_strided_slice %631 {offsets = [0, 64], sizes = [16, 32], strides = [1, 1]} : vector<16x96xf32> to vector<16x32xf32>
    %650 = math.tanh %645 : vector<16x32xf32>
    %651 = arith.mulf %649, %650 : vector<16x32xf32>
    %652 = arith.index_cast %c11_i32 : i32 to index
    %c0_150 = arith.constant 0 : index
    %c0_151 = arith.constant 0 : index
    %653 = vector.load %arg11[%652, %c0_150, %c0_151] : memref<16x16x64xf32, #tpu.memory_space<vmem>>, vector<1x16x32xf32>
    %654 = vector.shape_cast %653 : vector<1x16x32xf32> to vector<16x32xf32>
    %655 = vector.shape_cast %648 : vector<16x32xf32> to vector<1x16x32xf32>
    tpu.vector_store %arg11[%652, %c0_150, %c0_151], %655 {strides = array<i32>} : memref<16x16x64xf32, #tpu.memory_space<vmem>>, vector<1x16x32xf32>,
    %656 = arith.index_cast %607 : i32 to index
    %c0_152 = arith.constant 0 : index
    %c32_153 = arith.constant 32 : index
    %657 = vector.load %arg11[%656, %c0_152, %c32_153] : memref<16x16x64xf32, #tpu.memory_space<vmem>>, vector<1x16x32xf32>
    %658 = vector.shape_cast %657 : vector<1x16x32xf32> to vector<16x32xf32>
    %659 = vector.shape_cast %651 : vector<16x32xf32> to vector<1x16x32xf32>
    tpu.vector_store %arg11[%656, %c0_152, %c32_153], %659 {strides = array<i32>} : memref<16x16x64xf32, #tpu.memory_space<vmem>>, vector<1x16x32xf32>,
    %660 = tpu.concatenate %648, %651 in 1 : vector<16x32xf32>, vector<16x32xf32> -> vector<16x64xf32>
    %c12_i32 = arith.constant 12 : i32
    %c15_i32_154 = arith.constant 15 : i32
    %661 = arith.subi %c15_i32_154, %c12_i32 : i32
    %662 = arith.index_cast %c12_i32 : i32 to index
    %c0_155 = arith.constant 0 : index
    %c0_156 = arith.constant 0 : index
    %663 = vector.load %arg10[%662, %c0_155, %c0_156] : memref<16x16x256xf32, #tpu.memory_space<vmem>>, vector<1x16x128xf32>
    %664 = vector.shape_cast %663 : vector<1x16x128xf32> to vector<16x128xf32>
    %665 = arith.index_cast %661 : i32 to index
    %c0_157 = arith.constant 0 : index
    %c128_158 = arith.constant 128 : index
    %666 = vector.load %arg10[%665, %c0_157, %c128_158] : memref<16x16x256xf32, #tpu.memory_space<vmem>>, vector<1x16x128xf32>
    %667 = vector.shape_cast %666 : vector<1x16x128xf32> to vector<16x128xf32>
    %668 = arith.truncf %660 : vector<16x64xf32> to vector<16x64xbf16>
    %cst_159 = arith.constant dense<0.000000e+00> : vector<16x256xf32>
    %669 = tpu.matmul %668, %10, %cst_159 {dimension_numbers = #tpu.dot_dimension_numbers<[1], [0], [0], [1], [0, 0, 1, 1], [], []>} : vector<16x64xbf16>, vector<64x256xbf16>, vector<16x256xf32> -> vector<16x256xf32>
    %670 = vector.extract_strided_slice %669 {offsets = [0, 0], sizes = [16, 128], strides = [1, 1]} : vector<16x256xf32> to vector<16x128xf32>
    %671 = arith.addf %670, %664 : vector<16x128xf32>
    %672 = vector.extract_strided_slice %669 {offsets = [0, 128], sizes = [16, 128], strides = [1, 1]} : vector<16x256xf32> to vector<16x128xf32>
    %673 = arith.addf %672, %667 : vector<16x128xf32>
    %674 = vector.extract_strided_slice %671 {offsets = [0, 0], sizes = [16, 96], strides = [1, 1]} : vector<16x128xf32> to vector<16x96xf32>
    %675 = arith.negf %674 : vector<16x96xf32>
    %676 = math.exp %675 : vector<16x96xf32>
    %cst_160 = arith.constant 1.000000e+00 : f32
    %677 = vector.broadcast %cst_160 : f32 to vector<16x96xf32>
    %678 = arith.addf %677, %676 : vector<16x96xf32>
    %679 = arith.divf %677, %678 : vector<16x96xf32>
    %680 = vector.extract_strided_slice %673 {offsets = [0, 0], sizes = [16, 96], strides = [1, 1]} : vector<16x128xf32> to vector<16x96xf32>
    %681 = arith.negf %680 : vector<16x96xf32>
    %682 = math.exp %681 : vector<16x96xf32>
    %cst_161 = arith.constant 1.000000e+00 : f32
    %683 = vector.broadcast %cst_161 : f32 to vector<16x96xf32>
    %684 = arith.addf %683, %682 : vector<16x96xf32>
    %685 = arith.divf %683, %684 : vector<16x96xf32>
    %686 = vector.extract_strided_slice %671 {offsets = [0, 96], sizes = [16, 32], strides = [1, 1]} : vector<16x128xf32> to vector<16x32xf32>
    %687 = math.tanh %686 : vector<16x32xf32>
    %688 = vector.extract_strided_slice %673 {offsets = [0, 96], sizes = [16, 32], strides = [1, 1]} : vector<16x128xf32> to vector<16x32xf32>
    %689 = math.tanh %688 : vector<16x32xf32>
    %690 = vector.extract_strided_slice %679 {offsets = [0, 32], sizes = [16, 32], strides = [1, 1]} : vector<16x96xf32> to vector<16x32xf32>
    %691 = arith.mulf %690, %640 : vector<16x32xf32>
    %692 = vector.extract_strided_slice %679 {offsets = [0, 0], sizes = [16, 32], strides = [1, 1]} : vector<16x96xf32> to vector<16x32xf32>
    %693 = arith.mulf %692, %687 : vector<16x32xf32>
    %694 = arith.addf %691, %693 : vector<16x32xf32>
    %695 = vector.extract_strided_slice %685 {offsets = [0, 32], sizes = [16, 32], strides = [1, 1]} : vector<16x96xf32> to vector<16x32xf32>
    %696 = arith.mulf %695, %645 : vector<16x32xf32>
    %697 = vector.extract_strided_slice %685 {offsets = [0, 0], sizes = [16, 32], strides = [1, 1]} : vector<16x96xf32> to vector<16x32xf32>
    %698 = arith.mulf %697, %689 : vector<16x32xf32>
    %699 = arith.addf %696, %698 : vector<16x32xf32>
    %700 = vector.extract_strided_slice %679 {offsets = [0, 64], sizes = [16, 32], strides = [1, 1]} : vector<16x96xf32> to vector<16x32xf32>
    %701 = math.tanh %694 : vector<16x32xf32>
    %702 = arith.mulf %700, %701 : vector<16x32xf32>
    %703 = vector.extract_strided_slice %685 {offsets = [0, 64], sizes = [16, 32], strides = [1, 1]} : vector<16x96xf32> to vector<16x32xf32>
    %704 = math.tanh %699 : vector<16x32xf32>
    %705 = arith.mulf %703, %704 : vector<16x32xf32>
    %706 = arith.index_cast %c12_i32 : i32 to index
    %c0_162 = arith.constant 0 : index
    %c0_163 = arith.constant 0 : index
    %707 = vector.load %arg11[%706, %c0_162, %c0_163] : memref<16x16x64xf32, #tpu.memory_space<vmem>>, vector<1x16x32xf32>
    %708 = vector.shape_cast %707 : vector<1x16x32xf32> to vector<16x32xf32>
    %709 = vector.shape_cast %702 : vector<16x32xf32> to vector<1x16x32xf32>
    tpu.vector_store %arg11[%706, %c0_162, %c0_163], %709 {strides = array<i32>} : memref<16x16x64xf32, #tpu.memory_space<vmem>>, vector<1x16x32xf32>,
    %710 = arith.index_cast %661 : i32 to index
    %c0_164 = arith.constant 0 : index
    %c32_165 = arith.constant 32 : index
    %711 = vector.load %arg11[%710, %c0_164, %c32_165] : memref<16x16x64xf32, #tpu.memory_space<vmem>>, vector<1x16x32xf32>
    %712 = vector.shape_cast %711 : vector<1x16x32xf32> to vector<16x32xf32>
    %713 = vector.shape_cast %705 : vector<16x32xf32> to vector<1x16x32xf32>
    tpu.vector_store %arg11[%710, %c0_164, %c32_165], %713 {strides = array<i32>} : memref<16x16x64xf32, #tpu.memory_space<vmem>>, vector<1x16x32xf32>,
    %714 = tpu.concatenate %702, %705 in 1 : vector<16x32xf32>, vector<16x32xf32> -> vector<16x64xf32>
    %c13_i32 = arith.constant 13 : i32
    %c15_i32_166 = arith.constant 15 : i32
    %715 = arith.subi %c15_i32_166, %c13_i32 : i32
    %716 = arith.index_cast %c13_i32 : i32 to index
    %c0_167 = arith.constant 0 : index
    %c0_168 = arith.constant 0 : index
    %717 = vector.load %arg10[%716, %c0_167, %c0_168] : memref<16x16x256xf32, #tpu.memory_space<vmem>>, vector<1x16x128xf32>
    %718 = vector.shape_cast %717 : vector<1x16x128xf32> to vector<16x128xf32>
    %719 = arith.index_cast %715 : i32 to index
    %c0_169 = arith.constant 0 : index
    %c128_170 = arith.constant 128 : index
    %720 = vector.load %arg10[%719, %c0_169, %c128_170] : memref<16x16x256xf32, #tpu.memory_space<vmem>>, vector<1x16x128xf32>
    %721 = vector.shape_cast %720 : vector<1x16x128xf32> to vector<16x128xf32>
    %722 = arith.truncf %714 : vector<16x64xf32> to vector<16x64xbf16>
    %cst_171 = arith.constant dense<0.000000e+00> : vector<16x256xf32>
    %723 = tpu.matmul %722, %10, %cst_171 {dimension_numbers = #tpu.dot_dimension_numbers<[1], [0], [0], [1], [0, 0, 1, 1], [], []>} : vector<16x64xbf16>, vector<64x256xbf16>, vector<16x256xf32> -> vector<16x256xf32>
    %724 = vector.extract_strided_slice %723 {offsets = [0, 0], sizes = [16, 128], strides = [1, 1]} : vector<16x256xf32> to vector<16x128xf32>
    %725 = arith.addf %724, %718 : vector<16x128xf32>
    %726 = vector.extract_strided_slice %723 {offsets = [0, 128], sizes = [16, 128], strides = [1, 1]} : vector<16x256xf32> to vector<16x128xf32>
    %727 = arith.addf %726, %721 : vector<16x128xf32>
    %728 = vector.extract_strided_slice %725 {offsets = [0, 0], sizes = [16, 96], strides = [1, 1]} : vector<16x128xf32> to vector<16x96xf32>
    %729 = arith.negf %728 : vector<16x96xf32>
    %730 = math.exp %729 : vector<16x96xf32>
    %cst_172 = arith.constant 1.000000e+00 : f32
    %731 = vector.broadcast %cst_172 : f32 to vector<16x96xf32>
    %732 = arith.addf %731, %730 : vector<16x96xf32>
    %733 = arith.divf %731, %732 : vector<16x96xf32>
    %734 = vector.extract_strided_slice %727 {offsets = [0, 0], sizes = [16, 96], strides = [1, 1]} : vector<16x128xf32> to vector<16x96xf32>
    %735 = arith.negf %734 : vector<16x96xf32>
    %736 = math.exp %735 : vector<16x96xf32>
    %cst_173 = arith.constant 1.000000e+00 : f32
    %737 = vector.broadcast %cst_173 : f32 to vector<16x96xf32>
    %738 = arith.addf %737, %736 : vector<16x96xf32>
    %739 = arith.divf %737, %738 : vector<16x96xf32>
    %740 = vector.extract_strided_slice %725 {offsets = [0, 96], sizes = [16, 32], strides = [1, 1]} : vector<16x128xf32> to vector<16x32xf32>
    %741 = math.tanh %740 : vector<16x32xf32>
    %742 = vector.extract_strided_slice %727 {offsets = [0, 96], sizes = [16, 32], strides = [1, 1]} : vector<16x128xf32> to vector<16x32xf32>
    %743 = math.tanh %742 : vector<16x32xf32>
    %744 = vector.extract_strided_slice %733 {offsets = [0, 32], sizes = [16, 32], strides = [1, 1]} : vector<16x96xf32> to vector<16x32xf32>
    %745 = arith.mulf %744, %694 : vector<16x32xf32>
    %746 = vector.extract_strided_slice %733 {offsets = [0, 0], sizes = [16, 32], strides = [1, 1]} : vector<16x96xf32> to vector<16x32xf32>
    %747 = arith.mulf %746, %741 : vector<16x32xf32>
    %748 = arith.addf %745, %747 : vector<16x32xf32>
    %749 = vector.extract_strided_slice %739 {offsets = [0, 32], sizes = [16, 32], strides = [1, 1]} : vector<16x96xf32> to vector<16x32xf32>
    %750 = arith.mulf %749, %699 : vector<16x32xf32>
    %751 = vector.extract_strided_slice %739 {offsets = [0, 0], sizes = [16, 32], strides = [1, 1]} : vector<16x96xf32> to vector<16x32xf32>
    %752 = arith.mulf %751, %743 : vector<16x32xf32>
    %753 = arith.addf %750, %752 : vector<16x32xf32>
    %754 = vector.extract_strided_slice %733 {offsets = [0, 64], sizes = [16, 32], strides = [1, 1]} : vector<16x96xf32> to vector<16x32xf32>
    %755 = math.tanh %748 : vector<16x32xf32>
    %756 = arith.mulf %754, %755 : vector<16x32xf32>
    %757 = vector.extract_strided_slice %739 {offsets = [0, 64], sizes = [16, 32], strides = [1, 1]} : vector<16x96xf32> to vector<16x32xf32>
    %758 = math.tanh %753 : vector<16x32xf32>
    %759 = arith.mulf %757, %758 : vector<16x32xf32>
    %760 = arith.index_cast %c13_i32 : i32 to index
    %c0_174 = arith.constant 0 : index
    %c0_175 = arith.constant 0 : index
    %761 = vector.load %arg11[%760, %c0_174, %c0_175] : memref<16x16x64xf32, #tpu.memory_space<vmem>>, vector<1x16x32xf32>
    %762 = vector.shape_cast %761 : vector<1x16x32xf32> to vector<16x32xf32>
    %763 = vector.shape_cast %756 : vector<16x32xf32> to vector<1x16x32xf32>
    tpu.vector_store %arg11[%760, %c0_174, %c0_175], %763 {strides = array<i32>} : memref<16x16x64xf32, #tpu.memory_space<vmem>>, vector<1x16x32xf32>,
    %764 = arith.index_cast %715 : i32 to index
    %c0_176 = arith.constant 0 : index
    %c32_177 = arith.constant 32 : index
    %765 = vector.load %arg11[%764, %c0_176, %c32_177] : memref<16x16x64xf32, #tpu.memory_space<vmem>>, vector<1x16x32xf32>
    %766 = vector.shape_cast %765 : vector<1x16x32xf32> to vector<16x32xf32>
    %767 = vector.shape_cast %759 : vector<16x32xf32> to vector<1x16x32xf32>
    tpu.vector_store %arg11[%764, %c0_176, %c32_177], %767 {strides = array<i32>} : memref<16x16x64xf32, #tpu.memory_space<vmem>>, vector<1x16x32xf32>,
    %768 = tpu.concatenate %756, %759 in 1 : vector<16x32xf32>, vector<16x32xf32> -> vector<16x64xf32>
    %c14_i32 = arith.constant 14 : i32
    %c15_i32_178 = arith.constant 15 : i32
    %769 = arith.subi %c15_i32_178, %c14_i32 : i32
    %770 = arith.index_cast %c14_i32 : i32 to index
    %c0_179 = arith.constant 0 : index
    %c0_180 = arith.constant 0 : index
    %771 = vector.load %arg10[%770, %c0_179, %c0_180] : memref<16x16x256xf32, #tpu.memory_space<vmem>>, vector<1x16x128xf32>
    %772 = vector.shape_cast %771 : vector<1x16x128xf32> to vector<16x128xf32>
    %773 = arith.index_cast %769 : i32 to index
    %c0_181 = arith.constant 0 : index
    %c128_182 = arith.constant 128 : index
    %774 = vector.load %arg10[%773, %c0_181, %c128_182] : memref<16x16x256xf32, #tpu.memory_space<vmem>>, vector<1x16x128xf32>
    %775 = vector.shape_cast %774 : vector<1x16x128xf32> to vector<16x128xf32>
    %776 = arith.truncf %768 : vector<16x64xf32> to vector<16x64xbf16>
    %cst_183 = arith.constant dense<0.000000e+00> : vector<16x256xf32>
    %777 = tpu.matmul %776, %10, %cst_183 {dimension_numbers = #tpu.dot_dimension_numbers<[1], [0], [0], [1], [0, 0, 1, 1], [], []>} : vector<16x64xbf16>, vector<64x256xbf16>, vector<16x256xf32> -> vector<16x256xf32>
    %778 = vector.extract_strided_slice %777 {offsets = [0, 0], sizes = [16, 128], strides = [1, 1]} : vector<16x256xf32> to vector<16x128xf32>
    %779 = arith.addf %778, %772 : vector<16x128xf32>
    %780 = vector.extract_strided_slice %777 {offsets = [0, 128], sizes = [16, 128], strides = [1, 1]} : vector<16x256xf32> to vector<16x128xf32>
    %781 = arith.addf %780, %775 : vector<16x128xf32>
    %782 = vector.extract_strided_slice %779 {offsets = [0, 0], sizes = [16, 96], strides = [1, 1]} : vector<16x128xf32> to vector<16x96xf32>
    %783 = arith.negf %782 : vector<16x96xf32>
    %784 = math.exp %783 : vector<16x96xf32>
    %cst_184 = arith.constant 1.000000e+00 : f32
    %785 = vector.broadcast %cst_184 : f32 to vector<16x96xf32>
    %786 = arith.addf %785, %784 : vector<16x96xf32>
    %787 = arith.divf %785, %786 : vector<16x96xf32>
    %788 = vector.extract_strided_slice %781 {offsets = [0, 0], sizes = [16, 96], strides = [1, 1]} : vector<16x128xf32> to vector<16x96xf32>
    %789 = arith.negf %788 : vector<16x96xf32>
    %790 = math.exp %789 : vector<16x96xf32>
    %cst_185 = arith.constant 1.000000e+00 : f32
    %791 = vector.broadcast %cst_185 : f32 to vector<16x96xf32>
    %792 = arith.addf %791, %790 : vector<16x96xf32>
    %793 = arith.divf %791, %792 : vector<16x96xf32>
    %794 = vector.extract_strided_slice %779 {offsets = [0, 96], sizes = [16, 32], strides = [1, 1]} : vector<16x128xf32> to vector<16x32xf32>
    %795 = math.tanh %794 : vector<16x32xf32>
    %796 = vector.extract_strided_slice %781 {offsets = [0, 96], sizes = [16, 32], strides = [1, 1]} : vector<16x128xf32> to vector<16x32xf32>
    %797 = math.tanh %796 : vector<16x32xf32>
    %798 = vector.extract_strided_slice %787 {offsets = [0, 32], sizes = [16, 32], strides = [1, 1]} : vector<16x96xf32> to vector<16x32xf32>
    %799 = arith.mulf %798, %748 : vector<16x32xf32>
    %800 = vector.extract_strided_slice %787 {offsets = [0, 0], sizes = [16, 32], strides = [1, 1]} : vector<16x96xf32> to vector<16x32xf32>
    %801 = arith.mulf %800, %795 : vector<16x32xf32>
    %802 = arith.addf %799, %801 : vector<16x32xf32>
    %803 = vector.extract_strided_slice %793 {offsets = [0, 32], sizes = [16, 32], strides = [1, 1]} : vector<16x96xf32> to vector<16x32xf32>
    %804 = arith.mulf %803, %753 : vector<16x32xf32>
    %805 = vector.extract_strided_slice %793 {offsets = [0, 0], sizes = [16, 32], strides = [1, 1]} : vector<16x96xf32> to vector<16x32xf32>
    %806 = arith.mulf %805, %797 : vector<16x32xf32>
    %807 = arith.addf %804, %806 : vector<16x32xf32>
    %808 = vector.extract_strided_slice %787 {offsets = [0, 64], sizes = [16, 32], strides = [1, 1]} : vector<16x96xf32> to vector<16x32xf32>
    %809 = math.tanh %802 : vector<16x32xf32>
    %810 = arith.mulf %808, %809 : vector<16x32xf32>
    %811 = vector.extract_strided_slice %793 {offsets = [0, 64], sizes = [16, 32], strides = [1, 1]} : vector<16x96xf32> to vector<16x32xf32>
    %812 = math.tanh %807 : vector<16x32xf32>
    %813 = arith.mulf %811, %812 : vector<16x32xf32>
    %814 = arith.index_cast %c14_i32 : i32 to index
    %c0_186 = arith.constant 0 : index
    %c0_187 = arith.constant 0 : index
    %815 = vector.load %arg11[%814, %c0_186, %c0_187] : memref<16x16x64xf32, #tpu.memory_space<vmem>>, vector<1x16x32xf32>
    %816 = vector.shape_cast %815 : vector<1x16x32xf32> to vector<16x32xf32>
    %817 = vector.shape_cast %810 : vector<16x32xf32> to vector<1x16x32xf32>
    tpu.vector_store %arg11[%814, %c0_186, %c0_187], %817 {strides = array<i32>} : memref<16x16x64xf32, #tpu.memory_space<vmem>>, vector<1x16x32xf32>,
    %818 = arith.index_cast %769 : i32 to index
    %c0_188 = arith.constant 0 : index
    %c32_189 = arith.constant 32 : index
    %819 = vector.load %arg11[%818, %c0_188, %c32_189] : memref<16x16x64xf32, #tpu.memory_space<vmem>>, vector<1x16x32xf32>
    %820 = vector.shape_cast %819 : vector<1x16x32xf32> to vector<16x32xf32>
    %821 = vector.shape_cast %813 : vector<16x32xf32> to vector<1x16x32xf32>
    tpu.vector_store %arg11[%818, %c0_188, %c32_189], %821 {strides = array<i32>} : memref<16x16x64xf32, #tpu.memory_space<vmem>>, vector<1x16x32xf32>,
    %822 = tpu.concatenate %810, %813 in 1 : vector<16x32xf32>, vector<16x32xf32> -> vector<16x64xf32>
    %c15_i32_190 = arith.constant 15 : i32
    %c15_i32_191 = arith.constant 15 : i32
    %823 = arith.subi %c15_i32_191, %c15_i32_190 : i32
    %824 = arith.index_cast %c15_i32_190 : i32 to index
    %c0_192 = arith.constant 0 : index
    %c0_193 = arith.constant 0 : index
    %825 = vector.load %arg10[%824, %c0_192, %c0_193] : memref<16x16x256xf32, #tpu.memory_space<vmem>>, vector<1x16x128xf32>
    %826 = vector.shape_cast %825 : vector<1x16x128xf32> to vector<16x128xf32>
    %827 = arith.index_cast %823 : i32 to index
    %c0_194 = arith.constant 0 : index
    %c128_195 = arith.constant 128 : index
    %828 = vector.load %arg10[%827, %c0_194, %c128_195] : memref<16x16x256xf32, #tpu.memory_space<vmem>>, vector<1x16x128xf32>
    %829 = vector.shape_cast %828 : vector<1x16x128xf32> to vector<16x128xf32>
    %830 = arith.truncf %822 : vector<16x64xf32> to vector<16x64xbf16>
    %cst_196 = arith.constant dense<0.000000e+00> : vector<16x256xf32>
    %831 = tpu.matmul %830, %10, %cst_196 {dimension_numbers = #tpu.dot_dimension_numbers<[1], [0], [0], [1], [0, 0, 1, 1], [], []>} : vector<16x64xbf16>, vector<64x256xbf16>, vector<16x256xf32> -> vector<16x256xf32>
    %832 = vector.extract_strided_slice %831 {offsets = [0, 0], sizes = [16, 128], strides = [1, 1]} : vector<16x256xf32> to vector<16x128xf32>
    %833 = arith.addf %832, %826 : vector<16x128xf32>
    %834 = vector.extract_strided_slice %831 {offsets = [0, 128], sizes = [16, 128], strides = [1, 1]} : vector<16x256xf32> to vector<16x128xf32>
    %835 = arith.addf %834, %829 : vector<16x128xf32>
    %836 = vector.extract_strided_slice %833 {offsets = [0, 0], sizes = [16, 96], strides = [1, 1]} : vector<16x128xf32> to vector<16x96xf32>
    %837 = arith.negf %836 : vector<16x96xf32>
    %838 = math.exp %837 : vector<16x96xf32>
    %cst_197 = arith.constant 1.000000e+00 : f32
    %839 = vector.broadcast %cst_197 : f32 to vector<16x96xf32>
    %840 = arith.addf %839, %838 : vector<16x96xf32>
    %841 = arith.divf %839, %840 : vector<16x96xf32>
    %842 = vector.extract_strided_slice %835 {offsets = [0, 0], sizes = [16, 96], strides = [1, 1]} : vector<16x128xf32> to vector<16x96xf32>
    %843 = arith.negf %842 : vector<16x96xf32>
    %844 = math.exp %843 : vector<16x96xf32>
    %cst_198 = arith.constant 1.000000e+00 : f32
    %845 = vector.broadcast %cst_198 : f32 to vector<16x96xf32>
    %846 = arith.addf %845, %844 : vector<16x96xf32>
    %847 = arith.divf %845, %846 : vector<16x96xf32>
    %848 = vector.extract_strided_slice %833 {offsets = [0, 96], sizes = [16, 32], strides = [1, 1]} : vector<16x128xf32> to vector<16x32xf32>
    %849 = math.tanh %848 : vector<16x32xf32>
    %850 = vector.extract_strided_slice %835 {offsets = [0, 96], sizes = [16, 32], strides = [1, 1]} : vector<16x128xf32> to vector<16x32xf32>
    %851 = math.tanh %850 : vector<16x32xf32>
    %852 = vector.extract_strided_slice %841 {offsets = [0, 32], sizes = [16, 32], strides = [1, 1]} : vector<16x96xf32> to vector<16x32xf32>
    %853 = arith.mulf %852, %802 : vector<16x32xf32>
    %854 = vector.extract_strided_slice %841 {offsets = [0, 0], sizes = [16, 32], strides = [1, 1]} : vector<16x96xf32> to vector<16x32xf32>
    %855 = arith.mulf %854, %849 : vector<16x32xf32>
    %856 = arith.addf %853, %855 : vector<16x32xf32>
    %857 = vector.extract_strided_slice %847 {offsets = [0, 32], sizes = [16, 32], strides = [1, 1]} : vector<16x96xf32> to vector<16x32xf32>
    %858 = arith.mulf %857, %807 : vector<16x32xf32>
    %859 = vector.extract_strided_slice %847 {offsets = [0, 0], sizes = [16, 32], strides = [1, 1]} : vector<16x96xf32> to vector<16x32xf32>
    %860 = arith.mulf %859, %851 : vector<16x32xf32>
    %861 = arith.addf %858, %860 : vector<16x32xf32>
    %862 = vector.extract_strided_slice %841 {offsets = [0, 64], sizes = [16, 32], strides = [1, 1]} : vector<16x96xf32> to vector<16x32xf32>
    %863 = math.tanh %856 : vector<16x32xf32>
    %864 = arith.mulf %862, %863 : vector<16x32xf32>
    %865 = vector.extract_strided_slice %847 {offsets = [0, 64], sizes = [16, 32], strides = [1, 1]} : vector<16x96xf32> to vector<16x32xf32>
    %866 = math.tanh %861 : vector<16x32xf32>
    %867 = arith.mulf %865, %866 : vector<16x32xf32>
    %868 = arith.index_cast %c15_i32_190 : i32 to index
    %c0_199 = arith.constant 0 : index
    %c0_200 = arith.constant 0 : index
    %869 = vector.load %arg11[%868, %c0_199, %c0_200] : memref<16x16x64xf32, #tpu.memory_space<vmem>>, vector<1x16x32xf32>
    %870 = vector.shape_cast %869 : vector<1x16x32xf32> to vector<16x32xf32>
    %871 = vector.shape_cast %864 : vector<16x32xf32> to vector<1x16x32xf32>
    tpu.vector_store %arg11[%868, %c0_199, %c0_200], %871 {strides = array<i32>} : memref<16x16x64xf32, #tpu.memory_space<vmem>>, vector<1x16x32xf32>,
    %872 = arith.index_cast %823 : i32 to index
    %c0_201 = arith.constant 0 : index
    %c32_202 = arith.constant 32 : index
    %873 = vector.load %arg11[%872, %c0_201, %c32_202] : memref<16x16x64xf32, #tpu.memory_space<vmem>>, vector<1x16x32xf32>
    %874 = vector.shape_cast %873 : vector<1x16x32xf32> to vector<16x32xf32>
    %875 = vector.shape_cast %867 : vector<16x32xf32> to vector<1x16x32xf32>
    tpu.vector_store %arg11[%872, %c0_201, %c32_202], %875 {strides = array<i32>} : memref<16x16x64xf32, #tpu.memory_space<vmem>>, vector<1x16x32xf32>,
    %876 = tpu.concatenate %864, %867 in 1 : vector<16x32xf32>, vector<16x32xf32> -> vector<16x64xf32>
    %c16_i32 = arith.constant 16 : i32
    %c0_203 = arith.constant 0 : index
    %c0_204 = arith.constant 0 : index
    %c0_205 = arith.constant 0 : index
    %877 = vector.load %arg11[%c0_203, %c0_204, %c0_205] : memref<16x16x64xf32, #tpu.memory_space<vmem>>, vector<16x16x64xf32>
    %878 = vector.shape_cast %877 : vector<16x16x64xf32> to vector<256x64xf32>
    %879 = arith.truncf %878 : vector<256x64xf32> to vector<256x64xbf16>
    %c0_206 = arith.constant 0 : index
    %c0_207 = arith.constant 0 : index
    %880 = vector.load %arg5[%c0_206, %c0_207] : memref<64x128xbf16, #tpu.memory_space<vmem>>, vector<64x128xbf16>
    %cst_208 = arith.constant dense<0.000000e+00> : vector<256x128xf32>
    %881 = tpu.matmul %879, %880, %cst_208 {dimension_numbers = #tpu.dot_dimension_numbers<[1], [0], [0], [1], [0, 0, 1, 1], [], []>} : vector<256x64xbf16>, vector<64x128xbf16>, vector<256x128xf32> -> vector<256x128xf32>
    %c0_209 = arith.constant 0 : index
    %c0_210 = arith.constant 0 : index
    %882 = vector.load %arg6[%c0_209, %c0_210] : memref<1x128xf32, #tpu.memory_space<vmem>>, vector<1x128xf32>
    %883 = vector.broadcast %882 : vector<1x128xf32> to vector<256x128xf32>
    %884 = arith.addf %881, %883 : vector<256x128xf32>
    %cst_211 = arith.constant dense<0.000000e+00> : vector<256xf32>
    %885 = vector.multi_reduction <add>, %884, %cst_211 [1] : vector<256x128xf32> to vector<256xf32>
    %886 = vector.shape_cast %885 : vector<256xf32> to vector<256x1xf32>
    %cst_212 = arith.constant 1.280000e+02 : f32
    %887 = vector.broadcast %cst_212 : f32 to vector<256x1xf32>
    %888 = arith.divf %886, %887 : vector<256x1xf32>
    %889 = arith.mulf %884, %884 : vector<256x128xf32>
    %cst_213 = arith.constant dense<0.000000e+00> : vector<256xf32>
    %890 = vector.multi_reduction <add>, %889, %cst_213 [1] : vector<256x128xf32> to vector<256xf32>
    %891 = vector.shape_cast %890 : vector<256xf32> to vector<256x1xf32>
    %cst_214 = arith.constant 1.280000e+02 : f32
    %892 = vector.broadcast %cst_214 : f32 to vector<256x1xf32>
    %893 = arith.divf %891, %892 : vector<256x1xf32>
    %894 = arith.mulf %888, %888 : vector<256x1xf32>
    %895 = arith.subf %893, %894 : vector<256x1xf32>
    %cst_215 = arith.constant 0.000000e+00 : f32
    %896 = vector.broadcast %cst_215 : f32 to vector<256x1xf32>
    %897 = arith.maximumf %895, %896 : vector<256x1xf32>
    %898 = vector.broadcast %888 : vector<256x1xf32> to vector<256x128xf32>
    %899 = arith.subf %884, %898 : vector<256x128xf32>
    %cst_216 = arith.constant 9.99999974E-6 : f32
    %900 = vector.broadcast %cst_216 : f32 to vector<256x1xf32>
    %901 = arith.addf %897, %900 : vector<256x1xf32>
    %902 = math.rsqrt %901 : vector<256x1xf32>
    %903 = vector.broadcast %902 : vector<256x1xf32> to vector<256x128xf32>
    %904 = arith.mulf %899, %903 : vector<256x128xf32>
    %c0_217 = arith.constant 0 : index
    %c0_218 = arith.constant 0 : index
    %905 = vector.load %arg7[%c0_217, %c0_218] : memref<1x128xf32, #tpu.memory_space<vmem>>, vector<1x128xf32>
    %906 = vector.broadcast %905 : vector<1x128xf32> to vector<256x128xf32>
    %907 = arith.mulf %904, %906 : vector<256x128xf32>
    %c0_219 = arith.constant 0 : index
    %c0_220 = arith.constant 0 : index
    %908 = vector.load %arg8[%c0_219, %c0_220] : memref<1x128xf32, #tpu.memory_space<vmem>>, vector<1x128xf32>
    %909 = vector.broadcast %908 : vector<1x128xf32> to vector<256x128xf32>
    %910 = arith.addf %907, %909 : vector<256x128xf32>
    %c0_221 = arith.constant 0 : index
    %c0_222 = arith.constant 0 : index
    %c0_223 = arith.constant 0 : index
    %911 = vector.load %arg1[%c0_221, %c0_222, %c0_223] : memref<16x16x128xf32, #tpu.memory_space<vmem>>, vector<16x16x128xf32>
    %912 = vector.shape_cast %911 : vector<16x16x128xf32> to vector<256x128xf32>
    %913 = arith.addf %910, %912 : vector<256x128xf32>
    %914 = vector.shape_cast %913 : vector<256x128xf32> to vector<16x16x128xf32>
    %c0_224 = arith.constant 0 : index
    %c0_225 = arith.constant 0 : index
    %c0_226 = arith.constant 0 : index
    %915 = vector.load %arg9[%c0_224, %c0_225, %c0_226] : memref<16x16x128xf32, #tpu.memory_space<vmem>>, vector<16x16x128xf32>
    tpu.vector_store %arg9[%c0_224, %c0_225, %c0_226], %914 {strides = array<i32>} : memref<16x16x128xf32, #tpu.memory_space<vmem>>, vector<16x16x128xf32>,
    return
  }
  func.func @transform_0(%arg0: i32) -> (i32, i32, i32) {
    %c0_i32 = arith.constant 0 : i32
    %c0_i32_0 = arith.constant 0 : i32
    %c0_i32_1 = arith.constant 0 : i32
    return %c0_i32, %arg0, %c0_i32_0 : i32, i32, i32
  }
  func.func @transform_1(%arg0: i32) -> (i32, i32) {
    %c0_i32 = arith.constant 0 : i32
    %c0_i32_0 = arith.constant 0 : i32
    %c0_i32_1 = arith.constant 0 : i32
    return %c0_i32, %c0_i32_0 : i32, i32
  }
  func.func @transform_2(%arg0: i32) -> (i32, i32) {
    %c0_i32 = arith.constant 0 : i32
    %c0_i32_0 = arith.constant 0 : i32
    %c0_i32_1 = arith.constant 0 : i32
    return %c0_i32, %c0_i32_0 : i32, i32
  }
  func.func @transform_3(%arg0: i32) -> (i32, i32) {
    %c0_i32 = arith.constant 0 : i32
    %c0_i32_0 = arith.constant 0 : i32
    %c0_i32_1 = arith.constant 0 : i32
    return %c0_i32, %c0_i32_0 : i32, i32
  }
  func.func @transform_4(%arg0: i32) -> (i32, i32) {
    %c0_i32 = arith.constant 0 : i32
    %c0_i32_0 = arith.constant 0 : i32
    %c0_i32_1 = arith.constant 0 : i32
    return %c0_i32, %c0_i32_0 : i32, i32
  }
  func.func @transform_5(%arg0: i32) -> (i32, i32) {
    %c0_i32 = arith.constant 0 : i32
    %c0_i32_0 = arith.constant 0 : i32
    %c0_i32_1 = arith.constant 0 : i32
    return %c0_i32, %c0_i32_0 : i32, i32
  }
  func.func @transform_6(%arg0: i32) -> (i32, i32) {
    %c0_i32 = arith.constant 0 : i32
    %c0_i32_0 = arith.constant 0 : i32
    %c0_i32_1 = arith.constant 0 : i32
    return %c0_i32, %c0_i32_0 : i32, i32
  }
  func.func @transform_7(%arg0: i32) -> (i32, i32) {
    %c0_i32 = arith.constant 0 : i32
    %c0_i32_0 = arith.constant 0 : i32
    %c0_i32_1 = arith.constant 0 : i32
    return %c0_i32, %c0_i32_0 : i32, i32
  }
  func.func @transform_8(%arg0: i32) -> (i32, i32, i32) {
    %c0_i32 = arith.constant 0 : i32
    %c0_i32_0 = arith.constant 0 : i32
    %c0_i32_1 = arith.constant 0 : i32
    return %c0_i32, %arg0, %c0_i32_0 : i32, i32, i32
  }
}

</mosaic_0001>

<bundles_post_ra>
// kernel: dprnn_block.2
= control target key start
LH: loop header
LB: loop body
LE: loop exit
PB: predicated region body
PF: predicated region fallthrough
CT: control target
= control target key end

     0   :  { %s5815_s27 = smov 0   ;;  %s5817_s28 = smov 0   ;;  %s7918_s0 = inlined_call_operand.vmem [shape: f32[16,32,128], index: 0, kind: input, shape index: {}]   ;;  %s7919_s1 = inlined_call_operand.vmem [shape: bf16[128,256], index: 1, kind: input, shape index: {}]   ;;  %s7920_s2 = inlined_call_operand.vmem [shape: f32[1,256], index: 2, kind: input, shape index: {}]   ;;  %s7921_s3 = inlined_call_operand.vmem [shape: bf16[64,256], index: 3, kind: input, shape index: {}]   ;;  %s7922_s4 = inlined_call_operand.vmem [shape: bf16[64,128], index: 4, kind: input, shape index: {}]   ;;  %s7923_s5 = inlined_call_operand.vmem [shape: f32[1,128], index: 5, kind: input, shape index: {}]   ;;  %s7924_s6 = inlined_call_operand.vmem [shape: f32[1,128], index: 6, kind: input, shape index: {}]   ;;  %s7925_s7 = inlined_call_operand.vmem [shape: f32[1,128], index: 7, kind: input, shape index: {}]   ;;  %s7926_s8 = inlined_call_operand.vmem [shape: f32[16,32,128], index: 8, kind: output, shape index: {}]  }
   0x1   :  { %s5819_s29 = smov 0  }
   0x2 LB: > { %s4862_s30 = sadd.s32 4294967295, %s5764_s29   ;;  %s5832_s9 = sadd.s32 1, %s5764_s29   ;;  %s5764_s29 = sphi %s5819_s29, %s7981_s29   ;;  %s5760_s28 = sphi %s5817_s28, %s7980_s28   ;;  %s5756_s27 = sphi %s5815_s27, %s7979_s27  }
   0x3   : > { %s22_s10 = ssub.s32 %s5764_s29, %s5832_s9  ;;  %s25_s11 = sadd.s32 1, %s5760_s28 }
   0x4   : > { %p23_p0 = scmp.eq.s32.totalorder %s22_s10, 0  ;;  %p32_p1 = scmp.ne.s32.totalorder %s5760_s28, %s5756_s27 }
   0x5   : > { %p33_p2 = scmp.eq.s32.totalorder %s5764_s29, 0  ;;  %p209_p3 = scmp.eq.s32.totalorder %s4862_s30, 1 }
   0x6   : > { %s5843_s12 = scalar_select %p23_p0, %s5760_s28, %s25_s11  }
   0x7   : > { %p34_p4 = por %p33_p2, %p32_p1  ;;  %p5845_p5 = por %p209_p3, %p32_p1 }
   0x8   : > { %p4865_p6 = scmp.ge.s32.totalorder %s5764_s29, 2 }
   0xa   : > { %252 = sbr.rel (%p4865_p6) target bundleno = 37 (0x25), region = 44 }
  0x11   : > { %255 = sbr.rel (!%p34_p4) target bundleno = 37 (0x25), region = 48  ;;  %s257_s14 = sand.u32 (%p34_p4), 1, %s5760_s28  }
  0x12   : > { %s5003_s15 = sshll.u32 (%p34_p4), %s5764_s29, 4  ;;  %s4866_s16 = sshll.u32 (%p34_p4), %s257_s14, 8 }
  0x13   : > { %s5855_s19 = scalar_lea.vmem (%p34_p4), %s7918_s0, %s5003_s15  ;;  %s5860_s20 = scalar_lea.vmem (%p34_p4), [#allocation4], %s4866_s16 }
  0x14   : > { %v352_v0 = vld [vmem:[%s5855_s19] sm:$0xff] (%p34_p4)  ;;  %v354_v1 = vld [vmem:[%s5855_s19 + $0x8] sm:$0xff] (%p34_p4) }
  0x15   : > { %v356_v2 = vld [vmem:[%s5855_s19 + $0x20] sm:$0xff] (%p34_p4)  ;;  %353 = vst [vmem:[%s5860_s20] sm:$0xff] (%p34_p4), %v352_v0  ;;  %355 = vst [vmem:[%s5860_s20 + $0x8] sm:$0xff] (%p34_p4), %v354_v1  ;;  %v358_v3 = vld [vmem:[%s5855_s19 + $0x28] sm:$0xff] (%p34_p4) }
  0x16   : > { %357 = vst [vmem:[%s5860_s20 + $0x10] sm:$0xff] (%p34_p4), %v356_v2  ;;  %v360_v4 = vld [vmem:[%s5855_s19 + $0x40] sm:$0xff] (%p34_p4)  ;;  %v362_v5 = vld [vmem:[%s5855_s19 + $0x48] sm:$0xff] (%p34_p4)  ;;  %359 = vst [vmem:[%s5860_s20 + $0x18] sm:$0xff] (%p34_p4), %v358_v3 }
  0x17   : > { %361 = vst [vmem:[%s5860_s20 + $0x20] sm:$0xff] (%p34_p4), %v360_v4  ;;  %363 = vst [vmem:[%s5860_s20 + $0x28] sm:$0xff] (%p34_p4), %v362_v5  ;;  %v364_v6 = vld [vmem:[%s5855_s19 + $0x60] sm:$0xff] (%p34_p4)  ;;  %v366_v7 = vld [vmem:[%s5855_s19 + $0x68] sm:$0xff] (%p34_p4) }
  0x18   : > { %v368_v8 = vld [vmem:[%s5855_s19 + $0x80] sm:$0xff]  ;;  %365 = vst [vmem:[%s5860_s20 + $0x30] sm:$0xff] %v364_v6  ;;  %367 = vst [vmem:[%s5860_s20 + $0x38] sm:$0xff] %v366_v7  ;;  %v370_v9 = vld [vmem:[%s5855_s19 + $0x88] sm:$0xff] }
  0x19   : > { %369 = vst [vmem:[%s5860_s20 + $0x40] sm:$0xff] %v368_v8  ;;  %v372_v10 = vld [vmem:[%s5855_s19 + $0xa0] sm:$0xff]  ;;  %v374_v11 = vld [vmem:[%s5855_s19 + $0xa8] sm:$0xff]  ;;  %371 = vst [vmem:[%s5860_s20 + $0x48] sm:$0xff] %v370_v9 }
  0x1a   : > { %373 = vst [vmem:[%s5860_s20 + $0x50] sm:$0xff] %v372_v10  ;;  %375 = vst [vmem:[%s5860_s20 + $0x58] sm:$0xff] %v374_v11  ;;  %v376_v12 = vld [vmem:[%s5855_s19 + $0xc0] sm:$0xff]  ;;  %v378_v13 = vld [vmem:[%s5855_s19 + $0xc8] sm:$0xff] }
  0x1b   : > { %v380_v14 = vld [vmem:[%s5855_s19 + $0xe0] sm:$0xff]  ;;  %377 = vst [vmem:[%s5860_s20 + $0x60] sm:$0xff] %v376_v12  ;;  %379 = vst [vmem:[%s5860_s20 + $0x68] sm:$0xff] %v378_v13  ;;  %v382_v15 = vld [vmem:[%s5855_s19 + $0xe8] sm:$0xff] }
  0x1c   : > { %381 = vst [vmem:[%s5860_s20 + $0x70] sm:$0xff] %v380_v14  ;;  %v384_v16 = vld [vmem:[%s5855_s19 + $0x100] sm:$0xff]  ;;  %v386_v17 = vld [vmem:[%s5855_s19 + $0x108] sm:$0xff]  ;;  %383 = vst [vmem:[%s5860_s20 + $0x78] sm:$0xff] %v382_v15 }
  0x1d   : > { %385 = vst [vmem:[%s5860_s20 + $0x80] sm:$0xff] %v384_v16  ;;  %387 = vst [vmem:[%s5860_s20 + $0x88] sm:$0xff] %v386_v17  ;;  %v388_v18 = vld [vmem:[%s5855_s19 + $0x120] sm:$0xff]  ;;  %v390_v19 = vld [vmem:[%s5855_s19 + $0x128] sm:$0xff] }
  0x1e   : > { %v392_v20 = vld [vmem:[%s5855_s19 + $0x140] sm:$0xff]  ;;  %389 = vst [vmem:[%s5860_s20 + $0x90] sm:$0xff] %v388_v18  ;;  %391 = vst [vmem:[%s5860_s20 + $0x98] sm:$0xff] %v390_v19  ;;  %v394_v21 = vld [vmem:[%s5855_s19 + $0x148] sm:$0xff] }
  0x1f   : > { %393 = vst [vmem:[%s5860_s20 + $0xa0] sm:$0xff] %v392_v20  ;;  %v396_v22 = vld [vmem:[%s5855_s19 + $0x160] sm:$0xff]  ;;  %v398_v23 = vld [vmem:[%s5855_s19 + $0x168] sm:$0xff]  ;;  %395 = vst [vmem:[%s5860_s20 + $0xa8] sm:$0xff] %v394_v21 }
  0x20   : > { %397 = vst [vmem:[%s5860_s20 + $0xb0] sm:$0xff] %v396_v22  ;;  %399 = vst [vmem:[%s5860_s20 + $0xb8] sm:$0xff] %v398_v23  ;;  %v400_v24 = vld [vmem:[%s5855_s19 + $0x180] sm:$0xff]  ;;  %v402_v25 = vld [vmem:[%s5855_s19 + $0x188] sm:$0xff] }
  0x21   : > { %v404_v26 = vld [vmem:[%s5855_s19 + $0x1a0] sm:$0xff]  ;;  %401 = vst [vmem:[%s5860_s20 + $0xc0] sm:$0xff] %v400_v24  ;;  %403 = vst [vmem:[%s5860_s20 + $0xc8] sm:$0xff] %v402_v25  ;;  %v406_v27 = vld [vmem:[%s5855_s19 + $0x1a8] sm:$0xff] }
  0x22   : > { %405 = vst [vmem:[%s5860_s20 + $0xd0] sm:$0xff] %v404_v26  ;;  %v408_v28 = vld [vmem:[%s5855_s19 + $0x1c0] sm:$0xff]  ;;  %v410_v29 = vld [vmem:[%s5855_s19 + $0x1c8] sm:$0xff]  ;;  %407 = vst [vmem:[%s5860_s20 + $0xd8] sm:$0xff] %v406_v27 }
  0x23   : > { %409 = vst [vmem:[%s5860_s20 + $0xe0] sm:$0xff] %v408_v28  ;;  %411 = vst [vmem:[%s5860_s20 + $0xe8] sm:$0xff] %v410_v29  ;;  %v412_v30 = vld [vmem:[%s5855_s19 + $0x1e0] sm:$0xff]  ;;  %v414_v31 = vld [vmem:[%s5855_s19 + $0x1e8] sm:$0xff] }
  0x24   : > { %413 = vst [vmem:[%s5860_s20 + $0xf0] sm:$0xff] %v412_v30  ;;  %415 = vst [vmem:[%s5860_s20 + $0xf8] sm:$0xff] %v414_v31 }
  0x25 PF: > { %p4869_p7 = scmp.ge.s32.totalorder %s5764_s29, 1  ;;  %p420_p8 = scmp.lt.s32.totalorder %s5764_s29, 3 }
  0x27   : > { %p421_p9 = pnand %p4869_p7, %p420_p8 }
  0x29   : > { %424 = sbr.rel (%p421_p9) target bundleno = 12086 (0x2f36), region = 86 }
  0x30   : > { %v5101_v32 = vld [vmem:[%s7919_s1 + $0x4] ss:$8 sps:$4 sm:$0xff]   ;;  %v5103_v33 = vld [vmem:[%s7919_s1] ss:$8 sps:$4 sm:$0xff]   ;;  %v7927_v34 = vmov 0   ;;  %s427_s10 = sand.u32 1, %s5756_s27  }
  0x31   : > { %650 = vmatprep.mubr.bf16.mxu0 %v7927_v34  ;;  %964 = vmatprep.mubr.bf16.mxu1 %v7927_v34  ;;  %v5104_v35 = vld [vmem:[%s7919_s1 + $0x14] ss:$8 sps:$4 sm:$0xff]   ;;  %v5106_v36 = vld [vmem:[%s7919_s1 + $0x10] ss:$8 sps:$4 sm:$0xff]   ;;  %v5107_v37 = vld [vmem:[%s7919_s1 + $0x24] ss:$8 sps:$4 sm:$0xff]  }
  0x32   : > { %618 = vmatprep.subr.bf16.mxu0 %v5101_v32  ;;  %v5109_v38 = vld [vmem:[%s7919_s1 + $0x20] ss:$8 sps:$4 sm:$0xff]   ;;  %v5948_v39 = vld [vmem:[%s7921_s3 + $0x4] ss:$8 sps:$4 sm:$0xff]   ;;  %v5110_v41 = vld [vmem:[%s7919_s1 + $0x34] ss:$8 sps:$4 sm:$0xff]  }
  0x33   : > { %619 = vmatpush1.bf16.msra.mxu0 %v5103_v33  ;;  %v5953_v40 = vld [vmem:[%s7921_s3] ss:$8 sps:$4 sm:$0xff]   ;;  %932 = vmatprep.subr.bf16.mxu1 %v5948_v39  ;;  %v5963_v42 = vld [vmem:[%s7921_s3 + $0x14] ss:$8 sps:$4 sm:$0xff]   ;;  %v5968_v43 = vld [vmem:[%s7921_s3 + $0x10] ss:$8 sps:$4 sm:$0xff]  }
  0x34   : > { %620 = vmatprep.subr.bf16.mxu0 %v5104_v35  ;;  %933 = vmatpush1.bf16.msra.mxu1 %v5953_v40  ;;  %v5112_v44 = vld [vmem:[%s7919_s1 + $0x30] ss:$8 sps:$4 sm:$0xff]   ;;  %v5113_v45 = vld [vmem:[%s7919_s1 + $0x44] ss:$8 sps:$4 sm:$0xff]   ;;  %v5986_v47 = vld [vmem:[%s7921_s3 + $0x20] ss:$8 sps:$4 sm:$0xff]  }
  0x35   : > { %934 = vmatprep.subr.bf16.mxu1 %v5963_v42  ;;  %v5980_v46 = vld [vmem:[%s7921_s3 + $0x24] ss:$8 sps:$4 sm:$0xff]   ;;  %v5115_v48 = vld [vmem:[%s7919_s1 + $0x40] ss:$8 sps:$4 sm:$0xff]   ;;  %v5995_v49 = vld [vmem:[%s7921_s3 + $0x34] ss:$8 sps:$4 sm:$0xff]  }
  0x36   : > { %v5119_v50 = vld [vmem:[%s7919_s1 + $0x54] ss:$8 sps:$4 sm:$0xff]   ;;  %v6005_v51 = vld [vmem:[%s7921_s3 + $0x30] ss:$8 sps:$4 sm:$0xff]   ;;  %v5125_v53 = vld [vmem:[%s7919_s1 + $0x64] ss:$8 sps:$4 sm:$0xff]  }
  0x37   : > { %621 = vmatpush1.bf16.msra.mxu0 %v5106_v36  ;;  %v5121_v52 = vld [vmem:[%s7919_s1 + $0x50] ss:$8 sps:$4 sm:$0xff]   ;;  %s6014_s27 = sshll.u32 %s427_s10, 8  ;;  %v5127_v54 = vld [vmem:[%s7919_s1 + $0x60] ss:$8 sps:$4 sm:$0xff]   ;;  %s5767_s11 = smov 32  }
  0x38   : > { %622 = vmatprep.subr.bf16.mxu0 %v5107_v37  ;;  %935 = vmatpush1.bf16.msra.mxu1 %v5968_v43  ;;  %v5131_v55 = vld [vmem:[%s7919_s1 + $0x74] ss:$8 sps:$4 sm:$0xff]   ;;  %v5133_v56 = vld [vmem:[%s7919_s1 + $0x70] ss:$8 sps:$4 sm:$0xff]   ;;  %s6029_s25 = scalar_lea.vmem [#allocation4], %s6014_s27  ;;  %s5768_s14 = smov 64  }
  0x39   : > { %936 = vmatprep.subr.bf16.mxu1 %v5980_v46  ;;  %v462_v57 = vld [vmem:[%s6029_s25] sm:$0xff]  ;;  %v463_v58 = vld [vmem:[%s6029_s25 + $0x8] sm:$0xff]  ;;  %v464_v60 = vld [vmem:[%s6029_s25 + $0x10] sm:$0xff]  ;;  %vm1083_vm0 = vcmask 261120   ;;  %s5769_s15 = smov 96   ;;  %vm1095_vm1 = vcmask 523520  }
  0x3a   : > { %v494_v59 = vpack.c.bf16 %v463_v58, %v462_v57  ;;  %v465_v61 = vld [vmem:[%s6029_s25 + $0x18] sm:$0xff]  ;;  %v466_v63 = vld [vmem:[%s6029_s25 + $0x20] sm:$0xff]  ;;  %v467_v0 = vld [vmem:[%s6029_s25 + $0x28] sm:$0xff]  ;;  %vm928_vm2 = vcmask 523264   ;;  %s7484_s18 = scalar_lea.vmem [#allocation5], %s6014_s27  ;;  %s5004_s22 = sshll.u32 (%p5845_p5), %s4862_s30, 4 }
  0x3b   : > { %623 = vmatpush1.bf16.msra.mxu0 %v5109_v38  ;;  %v495_v62 = vpack.c.bf16 %v465_v61, %v464_v60  ;;  %v496_v1 = vpack.c.bf16 %v467_v0, %v466_v63  ;;  %v468_v2 = vld [vmem:[%s6029_s25 + $0x30] sm:$0xff]  ;;  %v469_v3 = vld [vmem:[%s6029_s25 + $0x38] sm:$0xff]  ;;  %v470_v5 = vld [vmem:[%s6029_s25 + $0x40] sm:$0xff]  ;;  %s7845_s13 = scalar_lea.vmem (%p5845_p5), %s7926_s8, %s5004_s22 }
  0x3c   : > { %624 = vmatprep.subr.bf16.mxu0 %v5110_v41  ;;  %937 = vmatpush1.bf16.msra.mxu1 %v5986_v47  ;;  %v497_v4 = vpack.c.bf16 %v469_v3, %v468_v2  ;;  %v471_v6 = vld [vmem:[%s6029_s25 + $0x48] sm:$0xff]  ;;  %v472_v8 = vld [vmem:[%s6029_s25 + $0x50] sm:$0xff]  ;;  %v473_v9 = vld [vmem:[%s6029_s25 + $0x58] sm:$0xff] }
  0x3d   : > { %938 = vmatprep.subr.bf16.mxu1 %v5995_v49  ;;  %v498_v7 = vpack.c.bf16 %v471_v6, %v470_v5  ;;  %v499_v10 = vpack.c.bf16 %v473_v9, %v472_v8  ;;  %v474_v11 = vld [vmem:[%s6029_s25 + $0x60] sm:$0xff]  ;;  %v475_v12 = vld [vmem:[%s6029_s25 + $0x68] sm:$0xff]  ;;  %v476_v14 = vld [vmem:[%s6029_s25 + $0x70] sm:$0xff] }
  0x3e   : > { %v500_v13 = vpack.c.bf16 %v475_v12, %v474_v11  ;;  %v477_v15 = vld [vmem:[%s6029_s25 + $0x78] sm:$0xff]  ;;  %v478_v17 = vld [vmem:[%s6029_s25 + $0x80] sm:$0xff]  ;;  %v479_v18 = vld [vmem:[%s6029_s25 + $0x88] sm:$0xff] }
  0x3f   : > { %625 = vmatpush1.bf16.msra.mxu0 %v5112_v44  ;;  %v501_v16 = vpack.c.bf16 %v477_v15, %v476_v14  ;;  %v502_v19 = vpack.c.bf16 %v479_v18, %v478_v17  ;;  %v480_v20 = vld [vmem:[%s6029_s25 + $0x90] sm:$0xff]  ;;  %v481_v21 = vld [vmem:[%s6029_s25 + $0x98] sm:$0xff]  ;;  %v482_v23 = vld [vmem:[%s6029_s25 + $0xa0] sm:$0xff] }
  0x40   : > { %626 = vmatprep.subr.bf16.mxu0 %v5113_v45  ;;  %939 = vmatpush1.bf16.msra.mxu1 %v6005_v51  ;;  %v503_v22 = vpack.c.bf16 %v481_v21, %v480_v20  ;;  %v483_v24 = vld [vmem:[%s6029_s25 + $0xa8] sm:$0xff]  ;;  %v484_v26 = vld [vmem:[%s6029_s25 + $0xb0] sm:$0xff]  ;;  %v485_v27 = vld [vmem:[%s6029_s25 + $0xb8] sm:$0xff] }
  0x41   : > { %1110 = vmatprep.subr.bf16.mxu1 %v5948_v39  ;;  %v504_v25 = vpack.c.bf16 %v483_v24, %v482_v23  ;;  %v505_v28 = vpack.c.bf16 %v485_v27, %v484_v26  ;;  %v486_v29 = vld [vmem:[%s6029_s25 + $0xc0] sm:$0xff]  ;;  %v487_v30 = vld [vmem:[%s6029_s25 + $0xc8] sm:$0xff]  ;;  %v488_v32 = vld [vmem:[%s6029_s25 + $0xd0] sm:$0xff] }
  0x42   : > { %v506_v31 = vpack.c.bf16 %v487_v30, %v486_v29  ;;  %v489_v33 = vld [vmem:[%s6029_s25 + $0xd8] sm:$0xff]  ;;  %v490_v36 = vld [vmem:[%s6029_s25 + $0xe0] sm:$0xff]  ;;  %v491_v37 = vld [vmem:[%s6029_s25 + $0xe8] sm:$0xff] }
  0x43   : > { %627 = vmatpush1.bf16.msra.mxu0 %v5115_v48  ;;  %965 = vmatmul.mubr.bf16.vlgmr.msra.gmra.mrb[0].mxu1 %v7927_v34  ;;  %v507_v35 = vpack.c.bf16 %v489_v33, %v488_v32  ;;  %v508_v38 = vpack.c.bf16 %v491_v37, %v490_v36  ;;  %v492_v41 = vld [vmem:[%s6029_s25 + $0xf0] sm:$0xff]  ;;  %v493_v44 = vld [vmem:[%s6029_s25 + $0xf8] sm:$0xff]  ;;  %v528_v48 = vlaneseq }
  0x44   : > { %628 = vmatprep.subr.bf16.mxu0 %v5119_v50  ;;  %1111 = vmatpush1.bf16.msra.mxu1 %v5953_v40  ;;  %v509_v45 = vpack.c.bf16 %v493_v44, %v492_v41 }
  0x45   : > { %1142 = vmatprep.mubr.bf16.mxu1 %v7927_v34  ;;  %1112 = vmatprep.subr.bf16.mxu1 %v5963_v42  ;;  %v6097_v50 = vshrl.u32 %v528_v48, 7 }
  0x47   : > { %629 = vmatpush1.bf16.msra.mxu0 %v5121_v52 }
  0x48   : > { %630 = vmatprep.subr.bf16.mxu0 %v5125_v53  ;;  %1113 = vmatpush1.bf16.msra.mxu1 %v5968_v43 }
  0x49   : > { %1114 = vmatprep.subr.bf16.mxu1 %v5980_v46 }
  0x4b   : > { %631 = vmatpush1.bf16.msra.mxu0 %v5127_v54  ;;  %v530_v54 = vsub.s32 0, %v6097_v50 }
  0x4c   : > { %632 = vmatprep.subr.bf16.mxu0 %v5131_v55  ;;  %1115 = vmatpush1.bf16.msra.mxu1 %v5986_v47 }
  0x4d   : > { %1116 = vmatprep.subr.bf16.mxu1 %v5995_v49 }
  0x4f   : > { %633 = vmatpush1.bf16.msra.mxu0 %v5133_v56  ;;  %v6105_v56 = vld [vmem:[%s7920_s2] sm:$0x3] }
  0x50   : > { %2520 = vmatprep.subr.bf16.mxu0 %v5948_v39  ;;  %1117 = vmatpush1.bf16.msra.mxu1 %v6005_v51  ;;  %v6110_v58 = vrot.slane %v6105_v56, %v530_v54 }
  0x51   : > { %1287 = vmatprep.subr.bf16.mxu1 %v5948_v39 }
  0x52   : > { %651 = vmatmul.mubr.bf16.vlgmr.msra.gmra.mrb[0].mxu0 %v494_v59 }
  0x53   : > { %660 = vmatprep.mubr.bf16.mxu0 %v7927_v34  ;;  %2521 = vmatpush1.bf16.msra.mxu0 %v5953_v40 }
  0x54   : > { %2522 = vmatprep.subr.bf16.mxu0 %v5963_v42 }
  0x57   : > { %2523 = vmatpush1.bf16.msra.mxu0 %v5968_v43 }
  0x58   : > { %2524 = vmatprep.subr.bf16.mxu0 %v5980_v46 }
  0x5a   : > { %661 = vmatmul.mubr.bf16.gmra.mrb[4].mxu0 %v495_v62 }
  0x5b   : > { %670 = vmatprep.mubr.bf16.mxu0 %v7927_v34  ;;  %2525 = vmatpush1.bf16.msra.mxu0 %v5986_v47 }
  0x5c   : > { %2526 = vmatprep.subr.bf16.mxu0 %v5995_v49 }
  0x5f   : > { %2527 = vmatpush1.bf16.msra.mxu0 %v6005_v51 }
  0x60   : > { %2866 = vmatprep.subr.bf16.mxu0 %v5948_v39 }
  0x62   : > { %671 = vmatmul.mubr.bf16.gmra.mrb[8].mxu0 %v496_v1 }
  0x63   : > { %680 = vmatprep.mubr.bf16.mxu0 %v7927_v34 }
  0x6a   : > { %681 = vmatmul.mubr.bf16.gmra.mrb[12].mxu0 %v497_v4 }
  0x6b   : > { %690 = vmatprep.mubr.bf16.mxu0 %v7927_v34 }
  0x72   : > { %691 = vmatmul.mubr.bf16.gmra.mrb[16].mxu0 %v498_v7 }
  0x73   : > { %700 = vmatprep.mubr.bf16.mxu0 %v7927_v34 }
  0x7a   : > { %701 = vmatmul.mubr.bf16.gmra.mrb[20].mxu0 %v499_v10 }
  0x7b   : > { %710 = vmatprep.mubr.bf16.mxu0 %v7927_v34 }
  0x82   : > { %711 = vmatmul.mubr.bf16.gmra.mrb[24].mxu0 %v500_v13 }
  0x83   : > { %720 = vmatprep.mubr.bf16.mxu0 %v7927_v34 }
  0x8a   : > { %721 = vmatmul.mubr.bf16.gmra.mrb[28].mxu0 %v501_v16 }
  0x8b   : > { %730 = vmatprep.mubr.bf16.mxu0 %v7927_v34 }
  0x92   : > { %731 = vmatmul.mubr.bf16.gmra.mrb[32].mxu0 %v502_v19 }
  0x93   : > { %740 = vmatprep.mubr.bf16.mxu0 %v7927_v34 }
  0x9a   : > { %741 = vmatmul.mubr.bf16.gmra.mrb[36].mxu0 %v503_v22 }
  0x9b   : > { %750 = vmatprep.mubr.bf16.mxu0 %v7927_v34 }
  0xa2   : > { %751 = vmatmul.mubr.bf16.gmra.mrb[40].mxu0 %v504_v25 }
  0xa3   : > { %760 = vmatprep.mubr.bf16.mxu0 %v7927_v34 }
  0xaa   : > { %761 = vmatmul.mubr.bf16.gmra.mrb[44].mxu0 %v505_v28 }
  0xab   : > { %770 = vmatprep.mubr.bf16.mxu0 %v7927_v34 }
  0xb2   : > { %771 = vmatmul.mubr.bf16.gmra.mrb[48].mxu0 %v506_v31 }
  0xb3   : > { %780 = vmatprep.mubr.bf16.mxu0 %v7927_v34 }
  0xba   : > { %781 = vmatmul.mubr.bf16.gmra.mrb[52].mxu0 %v507_v35 }
  0xbb   : > { %790 = vmatprep.mubr.bf16.mxu0 %v7927_v34 }
  0xc2   : > { %791 = vmatmul.mubr.bf16.gmra.mrb[56].mxu0 %v508_v38 }
  0xc3   : > { %800 = vmatprep.mubr.bf16.mxu0 %v7927_v34 }
  0xca   : > { %801 = vmatmul.mubr.bf16.gmra.mrb[60].mxu0 %v509_v45 }
  0xcb   : > { %2552 = vmatprep.mubr.bf16.mxu0 %v7927_v34 }
 0x116   : > { %v966_v52 = vpop.f32.mrb[0].mxu1 }
 0x117   : > { %v6099_v53 = vpop.f32.mrb[1].mxu1 }
 0x118   : > { %v970_v55 = vpop.f32.mrb[2].mxu1 }
 0x119   : > { %v6107_v57 = vpop.f32.mrb[3].mxu1 }
 0x125   : > { %v652_v59 = vpop.f32.mrb[0].mxu0 }
 0x126   : > { %v653_v60 = vadd.f32 %v652_v59, %v6110_v58  ;;  %v6113_v61 = vpop.f32.mrb[1].mxu0 }
 0x127   : > { %7930 = vst [vmem:[#allocation6_spill] sm:$0xff] %v6113_v61  ;;  %v656_v62 = vpop.f32.mrb[2].mxu0 }
 0x128   : > { %v657_v63 = vadd.f32 %v656_v62, %v6110_v58  ;;  %v975_v0 = vadd.f32 %v966_v52, %v653_v60  ;;  %v6116_v1 = vpop.f32.mrb[3].mxu0 }
 0x129   : > { %7931 = vst [vmem:[#allocation7_spill] sm:$0xff] %v6116_v1 }
 0x12a   : > { %5141 = vtanh.f32 %v975_v0  ;;  %v976_v2 = vadd.f32 %v970_v55, %v657_v63  ;;  %v4896_v1 = vmul.f32 -1.442695, %v975_v0 }
 0x12c   : > { %5143 = vtanh.f32 %v976_v2 }
 0x12d   : > { %v6118_v3 = vpop.f32.mrb[4].mxu0  ;;  %5145 = vpow2.f32 %v4896_v1  ;;  %v534_v1 = vsub.s32 1, %v6097_v50 }
 0x12e   : > { %v6120_v4 = vpop.f32.mrb[5].mxu0 }
 0x12f   : > { %7932 = vst [vmem:[#allocation8_spill] sm:$0xff] %v6120_v4  ;;  %v6122_v5 = vpop.f32.mrb[6].mxu0 }
 0x130   : > { %v6124_v6 = vpop.f32.mrb[7].mxu0 }
 0x131   : > { %7933 = vst [vmem:[#allocation9_spill] sm:$0xff] %v6124_v6 }
 0x134   : > { %v5142_v7 = vpop.eup %5141 }
 0x135   : > { %v6126_v8 = vpop.f32.mrb[8].mxu0  ;;  %1011 = vrot.lane.b32.xlu0 %v5142_v7, %s5767_s11 }
 0x136   : > { %v6129_v9 = vpop.f32.mrb[9].mxu0  ;;  %v5144_v11 = vpop.eup %5143 }
 0x137   : > { %7934 = vst [vmem:[#allocation10_spill] sm:$0xff] %v6129_v9  ;;  %v6131_v10 = vpop.f32.mrb[10].mxu0 }
 0x138   : > { %v6133_v12 = vpop.f32.mrb[11].mxu0 }
 0x139   : > { %7935 = vst [vmem:[#allocation11_spill] sm:$0xff] %v6133_v12  ;;  %1013 = vrot.lane.b32.xlu0 %v5144_v11, %s5767_s11 }
 0x13d   : > { %v6136_v13 = vpop.f32.mrb[12].mxu0 }
 0x13e   : > { %v6138_v14 = vpop.f32.mrb[13].mxu0 }
 0x13f   : > { %7936 = vst [vmem:[#allocation12_spill] sm:$0xff] %v6138_v14  ;;  %v6140_v15 = vpop.f32.mrb[14].mxu0 }
 0x140   : > { %v6142_v16 = vpop.f32.mrb[15].mxu0 }
 0x141   : > { %7937 = vst [vmem:[#allocation13_spill] sm:$0xff] %v6142_v16  ;;  %v4897_v16 = vmul.f32 -1.442695, %v976_v2 }
 0x143   : > { %5147 = vpow2.f32 %v4897_v16 }
 0x145   : > { %v6144_v17 = vpop.f32.mrb[16].mxu0 }
 0x146   : > { %v6146_v18 = vpop.f32.mrb[17].mxu0 }
 0x147   : > { %7938 = vst [vmem:[#allocation14_spill] sm:$0xff] %v6146_v18  ;;  %v6148_v19 = vpop.f32.mrb[18].mxu0 }
 0x148   : > { %v6150_v20 = vpop.f32.mrb[19].mxu0 }
 0x149   : > { %7939 = vst [vmem:[#allocation15_spill] sm:$0xff] %v6150_v20 }
 0x14d   : > { %v6152_v21 = vpop.f32.mrb[20].mxu0 }
 0x14e   : > { %v6154_v22 = vpop.f32.mrb[21].mxu0 }
 0x14f   : > { %7940 = vst [vmem:[#allocation16_spill] sm:$0xff] %v6154_v22  ;;  %v6156_v23 = vpop.f32.mrb[22].mxu0 }
 0x150   : > { %v6158_v24 = vpop.f32.mrb[23].mxu0 }
 0x151   : > { %7941 = vst [vmem:[#allocation17_spill] sm:$0xff] %v6158_v24 }
 0x155   : > { %v6160_v25 = vpop.f32.mrb[24].mxu0 }
 0x156   : > { %v6162_v26 = vpop.f32.mrb[25].mxu0 }
 0x157   : > { %v6164_v27 = vpop.f32.mrb[26].mxu0 }
 0x158   : > { %v6166_v28 = vpop.f32.mrb[27].mxu0 }
 0x15d   : > { %v6168_v29 = vpop.f32.mrb[28].mxu0 }
 0x15e   : > { %v6170_v30 = vpop.f32.mrb[29].mxu0 }
 0x15f   : > { %v6172_v31 = vpop.f32.mrb[30].mxu0 }
 0x160   : > { %v6174_v32 = vpop.f32.mrb[31].mxu0 }
 0x165   : > { %v6176_v33 = vpop.f32.mrb[32].mxu0 }
 0x166   : > { %v6178_v35 = vpop.f32.mrb[33].mxu0 }
 0x167   : > { %v6180_v36 = vpop.f32.mrb[34].mxu0 }
 0x168   : > { %v6182_v37 = vpop.f32.mrb[35].mxu0 }
 0x16d   : > { %v6184_v38 = vpop.f32.mrb[36].mxu0 }
 0x16e   : > { %v6186_v41 = vpop.f32.mrb[37].mxu0 }
 0x16f   : > { %v6188_v44 = vpop.f32.mrb[38].mxu0 }
 0x170   : > { %v6190_v45 = vpop.f32.mrb[39].mxu0 }
 0x175   : > { %v6192_v48 = vpop.f32.mrb[40].mxu0 }
 0x176   : > { %7942 = vst [vmem:[#allocation18_spill] sm:$0xff] %v6192_v48  ;;  %v6194_v52 = vpop.f32.mrb[41].mxu0 }
 0x177   : > { %v6196_v54 = vpop.f32.mrb[42].mxu0 }
 0x178   : > { %7943 = vst [vmem:[#allocation19_spill] sm:$0xff] %v6196_v54  ;;  %v6198_v55 = vpop.f32.mrb[43].mxu0 }
 0x17d   : > { %v6200_v59 = vpop.f32.mrb[44].mxu0 }
 0x17e   : > { %7944 = vst [vmem:[#allocation20_spill] sm:$0xff] %v6200_v59  ;;  %v6202_v60 = vpop.f32.mrb[45].mxu0 }
 0x17f   : > { %v6204_v62 = vpop.f32.mrb[46].mxu0 }
 0x180   : > { %7945 = vst [vmem:[#allocation21_spill] sm:$0xff] %v6204_v62  ;;  %v6206_v63 = vpop.f32.mrb[47].mxu0 }
 0x185   : > { %v6208_v7 = vpop.f32.mrb[48].mxu0 }
 0x186   : > { %7946 = vst [vmem:[#allocation22_spill] sm:$0xff] %v6208_v7  ;;  %v6210_v11 = vpop.f32.mrb[49].mxu0  ;;  %v5146_v7 = vpop.eup %5145 }
 0x187   : > { %v6212_v34 = vpop.f32.mrb[50].mxu0  ;;  %v5148_v24 = vpop.eup %5147 }
 0x188   : > { %7947 = vst [vmem:[#allocation23_spill] sm:$0xff] %v6212_v34  ;;  %v6214_v61 = vpop.f32.mrb[51].mxu0  ;;  %v6234_v34 = vrot.slane %v6105_v56, %v534_v1 }
 0x18d   : > { %v6216_v6 = vpop.f32.mrb[52].mxu0 }
 0x18e   : > { %7948 = vst [vmem:[#allocation24_spill] sm:$0xff] %v6216_v6  ;;  %v6218_v4 = vpop.f32.mrb[53].mxu0  ;;  %v985_v6 = vadd.f32 1.0, %v5146_v7  ;;  %v986_v7 = vadd.f32 1.0, %v5148_v24 }
 0x18f   : > { %v6220_v12 = vpop.f32.mrb[54].mxu0 }
 0x190   : > { %7949 = vst [vmem:[#allocation25_spill] sm:$0xff] %v6220_v12  ;;  %v6222_v9 = vpop.f32.mrb[55].mxu0  ;;  %5149 = vrcp.f32 %v985_v6 }
 0x195   : > { %v6224_v14 = vpop.f32.mrb[56].mxu0 }
 0x196   : > { %7950 = vst [vmem:[#allocation26_spill] sm:$0xff] %v6224_v14  ;;  %v6226_v20 = vpop.f32.mrb[57].mxu0 }
 0x197   : > { %v6228_v62 = vpop.f32.mrb[58].mxu0 }
 0x198   : > { %7951 = vst [vmem:[#allocation27_spill] sm:$0xff] %v6228_v62  ;;  %v6230_v0 = vpop.f32.mrb[59].mxu0 }
 0x19a   : > { %v5150_v56 = vpop.eup %5149 }
 0x19d   : > { %v6236_v12 = vpop.f32.mrb[60].mxu0 }
 0x19e   : > { %7952 = vst [vmem:[#allocation28_spill] sm:$0xff] %v6236_v12  ;;  %v804_v2 = vpop.f32.mrb[61].mxu0 }
 0x19f   : > { %v805_v14 = vadd.f32 %v804_v2, %v6234_v34  ;;  %v6239_v18 = vpop.f32.mrb[62].mxu0 }
 0x1a0   : > { %7953 = vst [vmem:[#allocation29_spill] sm:$0xff] %v6239_v18  ;;  %v808_v59 = vpop.f32.mrb[63].mxu0 }
 0x1a1   : > { %v977_v62 = vadd.f32 %v6099_v53, %v805_v14  ;;  %v809_v16 = vadd.f32 %v808_v59, %v6234_v34 }
 0x1a3   : > { %5151 = vtanh.f32 %v977_v62  ;;  %v978_v50 = vadd.f32 %v6107_v57, %v809_v16  ;;  %v4898_v57 = vmul.f32 -1.442695, %v977_v62 }
 0x1a5   : > { %5153 = vtanh.f32 %v978_v50  ;;  %v4899_v24 = vmul.f32 -1.442695, %v978_v50 }
 0x1a6   : > { %5155 = vrcp.f32 %v986_v7 }
 0x1a7   : > { %v1012_v6 = vpop.permute.xlu0 %1011  ;;  %5157 = vpow2.f32 %v4898_v57 }
 0x1a8   : > { %v1017_v1 = vmul.f32 %v5150_v56, %v1012_v6  ;;  %5159 = vpow2.f32 %v4899_v24 }
 0x1aa   : > { %1021 = vrot.lane.b32.xlu0 %v1017_v1, %s5767_s11  ;;  %v1007_v1 = vmul.f32 0.0, %v5150_v56 }
 0x1ab   : > { %v1014_v12 = vpop.permute.xlu0 %1013 }
 0x1ad   : > { %v5152_v2 = vpop.eup %5151 }
 0x1ae   : > { %1033 = vrot.lane.b32.xlu1 %v5152_v2, %s5767_s11 }
 0x1af   : > { %v5154_v18 = vpop.eup %5153 }
 0x1b0   : > { %v5156_v53 = vpop.eup %5155 }
 0x1b1   : > { %v1018_v14 = vmul.f32 %v5156_v53, %v1014_v12  ;;  %v5158_v59 = vpop.eup %5157  ;;  %v1008_v57 = vmul.f32 0.0, %v5156_v53 }
 0x1b2   : > { %1035 = vrot.lane.b32.xlu1 %v5154_v18, %s5767_s11  ;;  %v997_v16 = vadd.f32 1.0, %v5158_v59  ;;  %v5160_v7 = vpop.eup %5159 }
 0x1b3   : > { %v998_v6 = vadd.f32 1.0, %v5160_v7 }
 0x1b4   : > { %5161 = vrcp.f32 %v997_v16 }
 0x1b5   : > { %5163 = vrcp.f32 %v998_v6 }
 0x1b6   : > { %1023 = vrot.lane.b32.xlu1 %v1018_v14, %s5767_s11 }
 0x1be   : > { %v5162_v18 = vpop.eup %5161 }
 0x1bf   : > { %v5164_v62 = vpop.eup %5163  ;;  %v1029_v6 = vmul.f32 0.0, %v5162_v18 }
 0x21c   : > { %v1022_v2 = vpop.permute.xlu0 %1021 }
 0x21d   : > { %v6248_v54 = vadd.f32 %v1022_v2, %v1007_v1  ;;  %v1030_v2 = vmul.f32 0.0, %v5164_v62 }
 0x21f   : > { %5165 = vtanh.f32 %v6248_v54 }
 0x220   : > { %v1034_v12 = vpop.permute.xlu1 %1033 }
 0x221   : > { %v1039_v22 = vmul.f32 %v5162_v18, %v1034_v12 }
 0x223   : > { %1043 = vrot.lane.b32.xlu0 %v1039_v22, %s5767_s11 }
 0x224   : > { %v1036_v50 = vpop.permute.xlu1 %1035 }
 0x225   : > { %v1040_v14 = vmul.f32 %v5164_v62, %v1036_v50 }
 0x227   : > { %1045 = vrot.lane.b32.xlu1 %v1040_v14, %s5767_s11 }
 0x228   : > { %v1024_v24 = vpop.permute.xlu1 %1023 }
 0x229   : > { %v5166_v59 = vpop.eup %5165  ;;  %v6253_v16 = vadd.f32 %v1024_v24, %v1008_v57 }
 0x22a   : > { %1055 = vrot.lane.b32.xlu0 %v5166_v59, %s5767_s11 }
 0x22b   : > { %5167 = vtanh.f32 %v6253_v16 }
 0x235   : > { %v5168_v7 = vpop.eup %5167 }
 0x236   : > { %1057 = vrot.lane.b32.xlu1 %v5168_v7, %s5767_s11 }
 0x295   : > { %v1044_v1 = vpop.permute.xlu0 %1043 }
 0x296   : > { %v6258_v22 = vadd.f32 %v1044_v1, %v1029_v6 }
 0x298   : > { %5169 = vtanh.f32 %v6258_v22 }
 0x299   : > { %v1046_v12 = vpop.permute.xlu1 %1045 }
 0x29a   : > { %v6261_v50 = vadd.f32 %v1046_v12, %v1030_v2 }
 0x29c   : > { %5171 = vtanh.f32 %v6261_v50  ;;  %v1056_v57 = vpop.permute.xlu0 %1055 }
 0x29d   : > { %v1061_v24 = vmul.f32 %v5150_v56, %v1056_v57 }
 0x2a2   : > { %v5170_v14 = vpop.eup %5169 }
 0x2a3   : > { %1067 = vrot.lane.b32.xlu0 %v5170_v14, %s5767_s11 }
 0x2a6   : > { %v5172_v59 = vpop.eup %5171 }
 0x2a7   : > { %1069 = vrot.lane.b32.xlu1 %v5172_v59, %s5767_s11  ;;  %1077 = vrot.lane.b32.xlu0 %v1061_v24, %s5768_s14  ;;  %v7954_v59 = vmov 0  }
 0x2a8   : > { %v1058_v7 = vpop.permute.xlu1 %1057 }
 0x2a9   : > { %v1062_v6 = vmul.f32 %v5156_v53, %v1058_v7  ;;  %v795_v7 = vadd.f32 %v6226_v20, %v6234_v34 }
 0x2ab   : > { %1079 = vrot.lane.b32.xlu1 %v1062_v6, %s5768_s14 }
 0x315   : > { %v1068_v1 = vpop.permute.xlu0 %1067 }
 0x316   : > { %v1073_v2 = vmul.f32 %v5162_v18, %v1068_v1  ;;  %v667_v1 = vadd.f32 %v6122_v5, %v6110_v58 }
 0x318   : > { %1088 = vrot.lane.b32.xlu0 %v1073_v2, %s5769_s15 }
 0x319   : > { %v1070_v12 = vpop.permute.xlu1 %1069  ;;  %v1078_v48 = vpop.permute.xlu0 %1077 }
 0x31a   : > { %v1074_v14 = vmul.f32 %v5164_v62, %v1070_v12  ;;  %1084 = vst.msk [vmem:[#allocation3] sm:$0xff] %vm1083_vm0, %v1078_v48 }
 0x31c   : > { %1090 = vrot.lane.b32.xlu1 %v1074_v14, %s5769_s15  ;;  %v799_v14 = vadd.f32 %v6230_v0, %v6234_v34 }
 0x31d   : > { %v1080_v56 = vpop.permute.xlu1 %1079 }
 0x31e   : > { %1085 = vst.msk [vmem:[#allocation3 + $0x8] sm:$0xff] %vm1083_vm0, %v1080_v56 }
 0x38a   : > { %v1089_v53 = vpop.permute.xlu0 %1088 }
 0x38b   : > { %1096 = vst.msk [vmem:[#allocation3 + $0xf0] sm:$0xff] %vm1095_vm1, %v1089_v53  ;;  %v1098_v18 = vsel %vm1083_vm0, %v1078_v48, %v1089_v53  ;;  %v663_v48 = vadd.f32 %v6118_v3, %v6110_v58 }
 0x38e   : > { %v1091_v57 = vpop.permute.xlu1 %1090 }
 0x38f   : > { %1097 = vst.msk [vmem:[#allocation3 + $0xf8] sm:$0xff] %vm1095_vm1, %v1091_v57  ;;  %v1099_v24 = vsel %vm1083_vm0, %v1080_v56, %v1091_v57 }
 0x390   : > { %v1106_v62 = vpack.c.bf16 %v1099_v24, %v1098_v18 }
 0x392   : > { %4900 = vmatmul.mubr.msk.bf16.vlgmr.msra.gmra.mrb[4].mxu1 %vm928_vm2, %v1106_v62 }
 0x393   : > { %1288 = vmatpush1.bf16.msra.mxu1 %v5953_v40  ;;  %1319 = vmatprep.mubr.bf16.mxu1 %v7954_v59 }
 0x394   : > { %1289 = vmatprep.subr.bf16.mxu1 %v5963_v42 }
 0x397   : > { %1290 = vmatpush1.bf16.msra.mxu1 %v5968_v43 }
 0x398   : > { %1291 = vmatprep.subr.bf16.mxu1 %v5980_v46 }
 0x39b   : > { %1292 = vmatpush1.bf16.msra.mxu1 %v5986_v47 }
 0x39c   : > { %1293 = vmatprep.subr.bf16.mxu1 %v5995_v49 }
 0x39f   : > { %1294 = vmatpush1.bf16.msra.mxu1 %v6005_v51 }
 0x3a0   : > { %1464 = vmatprep.subr.bf16.mxu1 %v5948_v39 }
 0x465   : > { %v1144_v6 = vpop.f32.mrb[4].mxu1 }
 0x466   : > { %v1153_v2 = vadd.f32 %v1144_v6, %v663_v48  ;;  %v1146_v12 = vpop.f32.mrb[5].mxu1 }
 0x467   : > { %v1155_v56 = vadd.f32 %v1146_v12, %v795_v7  ;;  %v1148_v53 = vpop.f32.mrb[6].mxu1 }
 0x468   : > { %5173 = vtanh.f32 %v1153_v2  ;;  %v1154_v57 = vadd.f32 %v1148_v53, %v667_v1  ;;  %v1150_v18 = vpop.f32.mrb[7].mxu1  ;;  %v4901_v0 = vmul.f32 -1.442695, %v1153_v2 }
 0x469   : > { %v1156_v24 = vadd.f32 %v1150_v18, %v799_v14  ;;  %5175 = vtanh.f32 %v1155_v56  ;;  %v4903_v48 = vmul.f32 -1.442695, %v1155_v56 }
 0x46a   : > { %5177 = vtanh.f32 %v1154_v57  ;;  %v4902_v7 = vmul.f32 -1.442695, %v1154_v57 }
 0x46b   : > { %5179 = vtanh.f32 %v1156_v24  ;;  %v4904_v6 = vmul.f32 -1.442695, %v1156_v24 }
 0x46c   : > { %5181 = vpow2.f32 %v4901_v0 }
 0x46d   : > { %5183 = vpow2.f32 %v4903_v48 }
 0x46e   : > { %5185 = vpow2.f32 %v4902_v7 }
 0x46f   : > { %5187 = vpow2.f32 %v4904_v6 }
 0x472   : > { %v5174_v3 = vpop.eup %5173 }
 0x473   : > { %1189 = vrot.lane.b32.xlu0 %v5174_v3, %s5767_s11  ;;  %v5176_v20 = vpop.eup %5175 }
 0x474   : > { %v5178_v62 = vpop.eup %5177 }
 0x475   : > { %1191 = vrot.lane.b32.xlu1 %v5178_v62, %s5767_s11  ;;  %v5180_v5 = vpop.eup %5179 }
 0x476   : > { %v5182_v1 = vpop.eup %5181 }
 0x477   : > { %1211 = vrot.lane.b32.xlu0 %v5176_v20, %s5767_s11  ;;  %v1163_v12 = vadd.f32 1.0, %v5182_v1  ;;  %v5184_v14 = vpop.eup %5183 }
 0x478   : > { %v5186_v53 = vpop.eup %5185  ;;  %v1175_v18 = vadd.f32 1.0, %v5184_v14 }
 0x479   : > { %1213 = vrot.lane.b32.xlu1 %v5180_v5, %s5767_s11  ;;  %5189 = vrcp.f32 %v1163_v12  ;;  %v1164_v3 = vadd.f32 1.0, %v5186_v53  ;;  %v5188_v20 = vpop.eup %5187 }
 0x47a   : > { %5191 = vrcp.f32 %v1175_v18  ;;  %v1176_v62 = vadd.f32 1.0, %v5188_v20 }
 0x47b   : > { %5193 = vrcp.f32 %v1164_v3 }
 0x47c   : > { %5195 = vrcp.f32 %v1176_v62 }
 0x483   : > { %v5190_v2 = vpop.eup %5189 }
 0x484   : > { %v5192_v57 = vpop.eup %5191  ;;  %v1185_v53 = vmul.f32 %v5190_v2, %v6248_v54 }
 0x485   : > { %v5194_v0 = vpop.eup %5193  ;;  %v1207_v20 = vmul.f32 %v5192_v57, %v6258_v22 }
 0x486   : > { %v5196_v1 = vpop.eup %5195  ;;  %v1186_v62 = vmul.f32 %v5194_v0, %v6253_v16 }
 0x487   : > { %v1208_v54 = vmul.f32 %v5196_v1, %v6261_v50 }
 0x4e5   : > { %v1190_v5 = vpop.permute.xlu0 %1189 }
 0x4e6   : > { %v1195_v56 = vmul.f32 %v5190_v2, %v1190_v5 }
 0x4e7   : > { %v1192_v48 = vpop.permute.xlu1 %1191 }
 0x4e8   : > { %1199 = vrot.lane.b32.xlu0 %v1195_v56, %s5767_s11  ;;  %v1196_v6 = vmul.f32 %v5194_v0, %v1192_v48 }
 0x4e9   : > { %v1212_v24 = vpop.permute.xlu0 %1211 }
 0x4ea   : > { %v1217_v7 = vmul.f32 %v5192_v57, %v1212_v24  ;;  %1201 = vrot.lane.b32.xlu1 %v1196_v6, %s5767_s11 }
 0x4eb   : > { %v1214_v12 = vpop.permute.xlu1 %1213 }
 0x4ec   : > { %1221 = vrot.lane.b32.xlu0 %v1217_v7, %s5767_s11  ;;  %v1218_v14 = vmul.f32 %v5196_v1, %v1214_v12 }
 0x4ee   : > { %1223 = vrot.lane.b32.xlu1 %v1218_v14, %s5767_s11 }
 0x55a   : > { %v1200_v18 = vpop.permute.xlu0 %1199 }
 0x55b   : > { %v6303_v3 = vadd.f32 %v1200_v18, %v1185_v53 }
 0x55c   : > { %v1202_v56 = vpop.permute.xlu1 %1201 }
 0x55d   : > { %5197 = vtanh.f32 %v6303_v3  ;;  %v6310_v48 = vadd.f32 %v1202_v56, %v1186_v62 }
 0x55e   : > { %v1222_v5 = vpop.permute.xlu0 %1221 }
 0x55f   : > { %v6308_v24 = vadd.f32 %v1222_v5, %v1207_v20 }
 0x560   : > { %v1224_v7 = vpop.permute.xlu1 %1223 }
 0x561   : > { %5199 = vtanh.f32 %v6308_v24  ;;  %v6315_v6 = vadd.f32 %v1224_v7, %v1208_v54 }
 0x562   : > { %5201 = vtanh.f32 %v6310_v48 }
 0x563   : > { %5203 = vtanh.f32 %v6315_v6 }
 0x567   : > { %v5198_v22 = vpop.eup %5197 }
 0x568   : > { %1233 = vrot.lane.b32.xlu0 %v5198_v22, %s5767_s11 }
 0x56b   : > { %v5200_v16 = vpop.eup %5199 }
 0x56c   : > { %v5202_v12 = vpop.eup %5201  ;;  %1245 = vrot.lane.b32.xlu0 %v5200_v16, %s5767_s11 }
 0x56d   : > { %1235 = vrot.lane.b32.xlu1 %v5202_v12, %s5767_s11  ;;  %v5204_v14 = vpop.eup %5203 }
 0x571   : > { %1247 = vrot.lane.b32.xlu1 %v5204_v14, %s5767_s11 }
 0x5da   : > { %v1234_v53 = vpop.permute.xlu0 %1233 }
 0x5db   : > { %v1239_v18 = vmul.f32 %v5190_v2, %v1234_v53 }
 0x5dd   : > { %1255 = vrot.lane.b32.xlu0 %v1239_v18, %s5768_s14 }
 0x5de   : > { %v1246_v50 = vpop.permute.xlu0 %1245 }
 0x5df   : > { %v1236_v20 = vpop.permute.xlu1 %1235  ;;  %v1251_v62 = vmul.f32 %v5192_v57, %v1246_v50 }
 0x5e0   : > { %v1240_v5 = vmul.f32 %v5194_v0, %v1236_v20 }
 0x5e1   : > { %1266 = vrot.lane.b32.xlu0 %v1251_v62, %s5769_s15 }
 0x5e2   : > { %1257 = vrot.lane.b32.xlu1 %v1240_v5, %s5768_s14 }
 0x5e3   : > { %v1248_v56 = vpop.permute.xlu1 %1247 }
 0x5e4   : > { %v1252_v54 = vmul.f32 %v5196_v1, %v1248_v56  ;;  %v673_v1 = vadd.f32 %v6126_v8, %v6110_v58 }
 0x5e6   : > { %1268 = vrot.lane.b32.xlu1 %v1252_v54, %s5769_s15 }
 0x64f   : > { %v1256_v7 = vpop.permute.xlu0 %1255 }
 0x650   : > { %1262 = vst.msk [vmem:[#allocation3 + $0x10] sm:$0xff] %vm1083_vm0, %v1256_v7 }
 0x653   : > { %v1267_v22 = vpop.permute.xlu0 %1266 }
 0x654   : > { %v1258_v16 = vpop.permute.xlu1 %1257  ;;  %1273 = vst.msk [vmem:[#allocation3 + $0xe0] sm:$0xff] %vm1095_vm1, %v1267_v22  ;;  %v1275_v57 = vsel %vm1083_vm0, %v1256_v7, %v1267_v22 }
 0x655   : > { %1263 = vst.msk [vmem:[#allocation3 + $0x18] sm:$0xff] %vm1083_vm0, %v1258_v16 }
 0x658   : > { %v1269_v2 = vpop.permute.xlu1 %1268 }
 0x659   : > { %1274 = vst.msk [vmem:[#allocation3 + $0xe8] sm:$0xff] %vm1095_vm1, %v1269_v2  ;;  %v1276_v0 = vsel %vm1083_vm0, %v1258_v16, %v1269_v2 }
 0x65a   : > { %v1283_v12 = vpack.c.bf16 %v1276_v0, %v1275_v57 }
 0x65c   : > { %4905 = vmatmul.mubr.msk.bf16.vlgmr.msra.gmra.mrb[8].mxu1 %vm928_vm2, %v1283_v12 }
 0x65d   : > { %1465 = vmatpush1.bf16.msra.mxu1 %v5953_v40  ;;  %1496 = vmatprep.mubr.bf16.mxu1 %v7954_v59  ;;  %v785_v40 = vadd.f32 %v6218_v4, %v6234_v34 }
 0x65e   : > { %1466 = vmatprep.subr.bf16.mxu1 %v5963_v42  ;;  %v677_v42 = vadd.f32 %v6131_v10, %v6110_v58 }
 0x661   : > { %1467 = vmatpush1.bf16.msra.mxu1 %v5968_v43 }
 0x662   : > { %1468 = vmatprep.subr.bf16.mxu1 %v5980_v46 }
 0x665   : > { %1469 = vmatpush1.bf16.msra.mxu1 %v5986_v47  ;;  %v789_v47 = vadd.f32 %v6222_v9, %v6234_v34 }
 0x666   : > { %1470 = vmatprep.subr.bf16.mxu1 %v5995_v49 }
 0x669   : > { %1471 = vmatpush1.bf16.msra.mxu1 %v6005_v51 }
 0x66a   : > { %1641 = vmatprep.subr.bf16.mxu1 %v5948_v39 }
 0x72f   : > { %v1321_v14 = vpop.f32.mrb[8].mxu1 }
 0x730   : > { %v1330_v43 = vadd.f32 %v1321_v14, %v673_v1  ;;  %v1323_v46 = vpop.f32.mrb[9].mxu1 }
 0x731   : > { %v1332_v49 = vadd.f32 %v1323_v46, %v785_v40  ;;  %v1325_v53 = vpop.f32.mrb[10].mxu1 }
 0x732   : > { %5205 = vtanh.f32 %v1330_v43  ;;  %v1331_v51 = vadd.f32 %v1325_v53, %v677_v42  ;;  %v1327_v39 = vpop.f32.mrb[11].mxu1  ;;  %v4906_v9 = vmul.f32 -1.442695, %v1330_v43 }
 0x733   : > { %v1333_v18 = vadd.f32 %v1327_v39, %v789_v47  ;;  %5207 = vtanh.f32 %v1332_v49  ;;  %v4908_v20 = vmul.f32 -1.442695, %v1332_v49 }
 0x734   : > { %5209 = vtanh.f32 %v1331_v51  ;;  %v4907_v62 = vmul.f32 -1.442695, %v1331_v51 }
 0x735   : > { %5211 = vtanh.f32 %v1333_v18  ;;  %v4909_v5 = vmul.f32 -1.442695, %v1333_v18 }
 0x736   : > { %5213 = vpow2.f32 %v4906_v9 }
 0x737   : > { %5215 = vpow2.f32 %v4908_v20 }
 0x738   : > { %5217 = vpow2.f32 %v4907_v62 }
 0x739   : > { %5219 = vpow2.f32 %v4909_v5 }
 0x73c   : > { %v5206_v8 = vpop.eup %5205 }
 0x73d   : > { %1366 = vrot.lane.b32.xlu0 %v5206_v8, %s5767_s11  ;;  %v5208_v4 = vpop.eup %5207 }
 0x73e   : > { %v5210_v50 = vpop.eup %5209 }
 0x73f   : > { %1368 = vrot.lane.b32.xlu1 %v5210_v50, %s5767_s11  ;;  %v5212_v10 = vpop.eup %5211 }
 0x740   : > { %v5214_v56 = vpop.eup %5213 }
 0x741   : > { %1388 = vrot.lane.b32.xlu0 %v5208_v4, %s5767_s11  ;;  %v1340_v54 = vadd.f32 1.0, %v5214_v56  ;;  %v5216_v7 = vpop.eup %5215 }
 0x742   : > { %v5218_v22 = vpop.eup %5217  ;;  %v1352_v16 = vadd.f32 1.0, %v5216_v7 }
 0x743   : > { %1390 = vrot.lane.b32.xlu1 %v5212_v10, %s5767_s11  ;;  %5221 = vrcp.f32 %v1340_v54  ;;  %v1341_v2 = vadd.f32 1.0, %v5218_v22  ;;  %v5220_v57 = vpop.eup %5219 }
 0x744   : > { %5223 = vrcp.f32 %v1352_v16  ;;  %v1353_v0 = vadd.f32 1.0, %v5220_v57 }
 0x745   : > { %5225 = vrcp.f32 %v1341_v2 }
 0x746   : > { %5227 = vrcp.f32 %v1353_v0 }
 0x74d   : > { %v5222_v12 = vpop.eup %5221 }
 0x74e   : > { %v5224_v14 = vpop.eup %5223  ;;  %v1362_v18 = vmul.f32 %v5222_v12, %v6303_v3 }
 0x74f   : > { %v5226_v43 = vpop.eup %5225  ;;  %v1384_v50 = vmul.f32 %v5224_v14, %v6308_v24 }
 0x750   : > { %v5228_v53 = vpop.eup %5227  ;;  %v1363_v10 = vmul.f32 %v5226_v43, %v6310_v48 }
 0x751   : > { %v1385_v3 = vmul.f32 %v5228_v53, %v6315_v6 }
 0x7af   : > { %v1367_v1 = vpop.permute.xlu0 %1366 }
 0x7b0   : > { %v1372_v40 = vmul.f32 %v5222_v12, %v1367_v1 }
 0x7b1   : > { %v1369_v46 = vpop.permute.xlu1 %1368 }
 0x7b2   : > { %1376 = vrot.lane.b32.xlu0 %v1372_v40, %s5767_s11  ;;  %v1373_v49 = vmul.f32 %v5226_v43, %v1369_v46 }
 0x7b3   : > { %v1389_v42 = vpop.permute.xlu0 %1388 }
 0x7b4   : > { %v1394_v47 = vmul.f32 %v5224_v14, %v1389_v42  ;;  %1378 = vrot.lane.b32.xlu1 %v1373_v49, %s5767_s11 }
 0x7b5   : > { %v1391_v51 = vpop.permute.xlu1 %1390 }
 0x7b6   : > { %1398 = vrot.lane.b32.xlu0 %v1394_v47, %s5767_s11  ;;  %v1395_v39 = vmul.f32 %v5228_v53, %v1391_v51 }
 0x7b8   : > { %1400 = vrot.lane.b32.xlu1 %v1395_v39, %s5767_s11  ;;  %v6399_v39 = vld [vmem:[%s7921_s3 + $0x14] ss:$8 sps:$4 sm:$0xff]  }
 0x824   : > { %v1377_v8 = vpop.permute.xlu0 %1376 }
 0x825   : > { %v6359_v4 = vadd.f32 %v1377_v8, %v1362_v18  ;;  %v6405_v18 = vld [vmem:[%s7921_s3 + $0x10] ss:$8 sps:$4 sm:$0xff]   ;;  %v6411_v8 = vld [vmem:[%s7921_s3 + $0x24] ss:$8 sps:$4 sm:$0xff]  }
 0x826   : > { %v1379_v20 = vpop.permute.xlu1 %1378 }
 0x827   : > { %5229 = vtanh.f32 %v6359_v4  ;;  %v6366_v5 = vadd.f32 %v1379_v20, %v1363_v10  ;;  %v6423_v10 = vld [vmem:[%s7921_s3 + $0x34] ss:$8 sps:$4 sm:$0xff]   ;;  %v6435_v20 = vld [vmem:[%s7921_s3 + $0x4] ss:$8 sps:$4 sm:$0xff]  }
 0x828   : > { %v1399_v9 = vpop.permute.xlu0 %1398 }
 0x829   : > { %v6364_v62 = vadd.f32 %v1399_v9, %v1384_v50  ;;  %v6417_v50 = vld [vmem:[%s7921_s3 + $0x20] ss:$8 sps:$4 sm:$0xff]   ;;  %v6429_v9 = vld [vmem:[%s7921_s3 + $0x30] ss:$8 sps:$4 sm:$0xff]  }
 0x82a   : > { %v1401_v56 = vpop.permute.xlu1 %1400 }
 0x82b   : > { %5231 = vtanh.f32 %v6364_v62  ;;  %v6371_v54 = vadd.f32 %v1401_v56, %v1385_v3  ;;  %v683_v3 = vadd.f32 %v6136_v13, %v6110_v58  ;;  %v775_v56 = vadd.f32 %v6210_v11, %v6234_v34 }
 0x82c   : > { %5233 = vtanh.f32 %v6366_v5 }
 0x82d   : > { %5235 = vtanh.f32 %v6371_v54 }
 0x831   : > { %v5230_v24 = vpop.eup %5229 }
 0x832   : > { %1410 = vrot.lane.b32.xlu0 %v5230_v24, %s5767_s11 }
 0x835   : > { %v5232_v48 = vpop.eup %5231 }
 0x836   : > { %v5234_v7 = vpop.eup %5233  ;;  %1422 = vrot.lane.b32.xlu0 %v5232_v48, %s5767_s11  ;;  %v687_v48 = vadd.f32 %v6140_v15, %v6110_v58 }
 0x837   : > { %1412 = vrot.lane.b32.xlu1 %v5234_v7, %s5767_s11  ;;  %v5236_v22 = vpop.eup %5235 }
 0x83b   : > { %1424 = vrot.lane.b32.xlu1 %v5236_v22, %s5767_s11 }
 0x8a4   : > { %v1411_v16 = vpop.permute.xlu0 %1410 }
 0x8a5   : > { %v1416_v2 = vmul.f32 %v5222_v12, %v1411_v16  ;;  %v779_v16 = vadd.f32 %v6214_v61, %v6234_v34 }
 0x8a7   : > { %1432 = vrot.lane.b32.xlu0 %v1416_v2, %s5768_s14 }
 0x8a8   : > { %v1423_v6 = vpop.permute.xlu0 %1422 }
 0x8a9   : > { %v1413_v57 = vpop.permute.xlu1 %1412  ;;  %v1428_v0 = vmul.f32 %v5224_v14, %v1423_v6 }
 0x8aa   : > { %v1417_v1 = vmul.f32 %v5226_v43, %v1413_v57 }
 0x8ab   : > { %1443 = vrot.lane.b32.xlu0 %v1428_v0, %s5769_s15 }
 0x8ac   : > { %1434 = vrot.lane.b32.xlu1 %v1417_v1, %s5768_s14 }
 0x8ad   : > { %v1425_v40 = vpop.permute.xlu1 %1424 }
 0x8ae   : > { %v1429_v42 = vmul.f32 %v5228_v53, %v1425_v40  ;;  %v6392_v53 = vld [vmem:[%s7921_s3] ss:$8 sps:$4 sm:$0xff]  }
 0x8b0   : > { %1445 = vrot.lane.b32.xlu1 %v1429_v42, %s5769_s15 }
 0x919   : > { %v1433_v46 = vpop.permute.xlu0 %1432 }
 0x91a   : > { %1439 = vst.msk [vmem:[#allocation3 + $0x20] sm:$0xff] %vm1083_vm0, %v1433_v46 }
 0x91d   : > { %v1444_v47 = vpop.permute.xlu0 %1443 }
 0x91e   : > { %v1435_v49 = vpop.permute.xlu1 %1434  ;;  %1450 = vst.msk [vmem:[#allocation3 + $0xd0] sm:$0xff] %vm1095_vm1, %v1444_v47  ;;  %v1452_v14 = vsel %vm1083_vm0, %v1433_v46, %v1444_v47 }
 0x91f   : > { %1440 = vst.msk [vmem:[#allocation3 + $0x28] sm:$0xff] %vm1083_vm0, %v1435_v49 }
 0x922   : > { %v1446_v12 = vpop.permute.xlu1 %1445 }
 0x923   : > { %1451 = vst.msk [vmem:[#allocation3 + $0xd8] sm:$0xff] %vm1095_vm1, %v1446_v12  ;;  %v1453_v43 = vsel %vm1083_vm0, %v1435_v49, %v1446_v12 }
 0x924   : > { %v1460_v51 = vpack.c.bf16 %v1453_v43, %v1452_v14 }
 0x926   : > { %4910 = vmatmul.mubr.msk.bf16.vlgmr.msra.gmra.mrb[12].mxu1 %vm928_vm2, %v1460_v51 }
 0x927   : > { %1642 = vmatpush1.bf16.msra.mxu1 %v6392_v53  ;;  %1673 = vmatprep.mubr.bf16.mxu1 %v7954_v59 }
 0x928   : > { %1643 = vmatprep.subr.bf16.mxu1 %v6399_v39 }
 0x92b   : > { %1644 = vmatpush1.bf16.msra.mxu1 %v6405_v18 }
 0x92c   : > { %1645 = vmatprep.subr.bf16.mxu1 %v6411_v8 }
 0x92f   : > { %1646 = vmatpush1.bf16.msra.mxu1 %v6417_v50 }
 0x930   : > { %1647 = vmatprep.subr.bf16.mxu1 %v6423_v10 }
 0x933   : > { %1648 = vmatpush1.bf16.msra.mxu1 %v6429_v9 }
 0x934   : > { %1818 = vmatprep.subr.bf16.mxu1 %v6435_v20 }
 0x9f9   : > { %v1498_v24 = vpop.f32.mrb[12].mxu1 }
 0x9fa   : > { %v1507_v7 = vadd.f32 %v1498_v24, %v683_v3  ;;  %v1500_v22 = vpop.f32.mrb[13].mxu1 }
 0x9fb   : > { %v1509_v2 = vadd.f32 %v1500_v22, %v775_v56  ;;  %v1502_v6 = vpop.f32.mrb[14].mxu1 }
 0x9fc   : > { %5237 = vtanh.f32 %v1507_v7  ;;  %v1508_v57 = vadd.f32 %v1502_v6, %v687_v48  ;;  %v1504_v0 = vpop.f32.mrb[15].mxu1  ;;  %v4911_v61 = vmul.f32 -1.442695, %v1507_v7 }
 0x9fd   : > { %v1510_v1 = vadd.f32 %v1504_v0, %v779_v16  ;;  %5239 = vtanh.f32 %v1509_v2  ;;  %v4913_v42 = vmul.f32 -1.442695, %v1509_v2 }
 0x9fe   : > { %5241 = vtanh.f32 %v1508_v57  ;;  %v4912_v46 = vmul.f32 -1.442695, %v1508_v57 }
 0x9ff   : > { %5243 = vtanh.f32 %v1510_v1  ;;  %v4914_v47 = vmul.f32 -1.442695, %v1510_v1 }
 0xa00   : > { %5245 = vpow2.f32 %v4911_v61 }
 0xa01   : > { %5247 = vpow2.f32 %v4913_v42 }
 0xa02   : > { %5249 = vpow2.f32 %v4912_v46 }
 0xa03   : > { %5251 = vpow2.f32 %v4914_v47 }
 0xa06   : > { %v5238_v13 = vpop.eup %5237 }
 0xa07   : > { %1543 = vrot.lane.b32.xlu0 %v5238_v13, %s5767_s11  ;;  %v5240_v11 = vpop.eup %5239 }
 0xa08   : > { %v5242_v40 = vpop.eup %5241 }
 0xa09   : > { %1545 = vrot.lane.b32.xlu1 %v5242_v40, %s5767_s11  ;;  %v5244_v15 = vpop.eup %5243 }
 0xa0a   : > { %v5246_v49 = vpop.eup %5245 }
 0xa0b   : > { %1565 = vrot.lane.b32.xlu0 %v5240_v11, %s5767_s11  ;;  %v1517_v12 = vadd.f32 1.0, %v5246_v49  ;;  %v5248_v14 = vpop.eup %5247 }
 0xa0c   : > { %v5250_v43 = vpop.eup %5249  ;;  %v1529_v51 = vadd.f32 1.0, %v5248_v14 }
 0xa0d   : > { %1567 = vrot.lane.b32.xlu1 %v5244_v15, %s5767_s11  ;;  %5253 = vrcp.f32 %v1517_v12  ;;  %v1518_v3 = vadd.f32 1.0, %v5250_v43  ;;  %v5252_v56 = vpop.eup %5251 }
 0xa0e   : > { %5255 = vrcp.f32 %v1529_v51  ;;  %v1530_v24 = vadd.f32 1.0, %v5252_v56 }
 0xa0f   : > { %5257 = vrcp.f32 %v1518_v3 }
 0xa10   : > { %5259 = vrcp.f32 %v1530_v24 }
 0xa17   : > { %v5254_v48 = vpop.eup %5253 }
 0xa18   : > { %v5256_v16 = vpop.eup %5255  ;;  %v1539_v15 = vmul.f32 %v5254_v48, %v6359_v4 }
 0xa19   : > { %v5258_v6 = vpop.eup %5257  ;;  %v1561_v46 = vmul.f32 %v5256_v16, %v6364_v62 }
 0xa1a   : > { %v5260_v13 = vpop.eup %5259  ;;  %v1540_v47 = vmul.f32 %v5258_v6, %v6366_v5 }
 0xa1b   : > { %v1562_v4 = vmul.f32 %v5260_v13, %v6371_v54 }
 0xa79   : > { %v1544_v7 = vpop.permute.xlu0 %1543 }
 0xa7a   : > { %v1549_v22 = vmul.f32 %v5254_v48, %v1544_v7 }
 0xa7b   : > { %v1546_v57 = vpop.permute.xlu1 %1545 }
 0xa7c   : > { %1553 = vrot.lane.b32.xlu0 %v1549_v22, %s5767_s11  ;;  %v1550_v1 = vmul.f32 %v5258_v6, %v1546_v57 }
 0xa7d   : > { %v1566_v2 = vpop.permute.xlu0 %1565 }
 0xa7e   : > { %v1571_v0 = vmul.f32 %v5256_v16, %v1566_v2  ;;  %1555 = vrot.lane.b32.xlu1 %v1550_v1, %s5767_s11 }
 0xa7f   : > { %v1568_v11 = vpop.permute.xlu1 %1567 }
 0xa80   : > { %1575 = vrot.lane.b32.xlu0 %v1571_v0, %s5767_s11  ;;  %v1572_v40 = vmul.f32 %v5260_v13, %v1568_v11 }
 0xa82   : > { %1577 = vrot.lane.b32.xlu1 %v1572_v40, %s5767_s11 }
 0xaee   : > { %v1554_v61 = vpop.permute.xlu0 %1553 }
 0xaef   : > { %v6455_v42 = vadd.f32 %v1554_v61, %v1539_v15 }
 0xaf0   : > { %v1556_v12 = vpop.permute.xlu1 %1555 }
 0xaf1   : > { %5261 = vtanh.f32 %v6455_v42  ;;  %v6462_v43 = vadd.f32 %v1556_v12, %v1540_v47  ;;  %v765_v47 = vadd.f32 %v6202_v60, %v6234_v34  ;;  %v697_v12 = vadd.f32 %v6148_v19, %v6110_v58 }
 0xaf2   : > { %v1576_v49 = vpop.permute.xlu0 %1575 }
 0xaf3   : > { %v6460_v14 = vadd.f32 %v1576_v49, %v1561_v46 }
 0xaf4   : > { %v1578_v51 = vpop.permute.xlu1 %1577 }
 0xaf5   : > { %5263 = vtanh.f32 %v6460_v14  ;;  %v6467_v3 = vadd.f32 %v1578_v51, %v1562_v4 }
 0xaf6   : > { %5265 = vtanh.f32 %v6462_v43 }
 0xaf7   : > { %5267 = vtanh.f32 %v6467_v3 }
 0xafb   : > { %v5262_v62 = vpop.eup %5261 }
 0xafc   : > { %1587 = vrot.lane.b32.xlu0 %v5262_v62, %s5767_s11  ;;  %v769_v62 = vadd.f32 %v6206_v63, %v6234_v34 }
 0xaff   : > { %v5264_v5 = vpop.eup %5263 }
 0xb00   : > { %v5266_v56 = vpop.eup %5265  ;;  %1599 = vrot.lane.b32.xlu0 %v5264_v5, %s5767_s11 }
 0xb01   : > { %1589 = vrot.lane.b32.xlu1 %v5266_v56, %s5767_s11  ;;  %v5268_v24 = vpop.eup %5267 }
 0xb05   : > { %1601 = vrot.lane.b32.xlu1 %v5268_v24, %s5767_s11 }
 0xb6e   : > { %v1588_v7 = vpop.permute.xlu0 %1587 }
 0xb6f   : > { %v1593_v22 = vmul.f32 %v5254_v48, %v1588_v7 }
 0xb71   : > { %1609 = vrot.lane.b32.xlu0 %v1593_v22, %s5768_s14 }
 0xb72   : > { %v1600_v54 = vpop.permute.xlu0 %1599 }
 0xb73   : > { %v1590_v2 = vpop.permute.xlu1 %1589  ;;  %v1605_v57 = vmul.f32 %v5256_v16, %v1600_v54 }
 0xb74   : > { %v1594_v0 = vmul.f32 %v5258_v6, %v1590_v2 }
 0xb75   : > { %1620 = vrot.lane.b32.xlu0 %v1605_v57, %s5769_s15 }
 0xb76   : > { %1611 = vrot.lane.b32.xlu1 %v1594_v0, %s5768_s14 }
 0xb77   : > { %v1602_v1 = vpop.permute.xlu1 %1601 }
 0xb78   : > { %v1606_v11 = vmul.f32 %v5260_v13, %v1602_v1  ;;  %v693_v13 = vadd.f32 %v6144_v17, %v6110_v58 }
 0xb7a   : > { %1622 = vrot.lane.b32.xlu1 %v1606_v11, %s5769_s15 }
 0xbe3   : > { %v1610_v40 = vpop.permute.xlu0 %1609 }
 0xbe4   : > { %1616 = vst.msk [vmem:[#allocation3 + $0x30] sm:$0xff] %vm1083_vm0, %v1610_v40 }
 0xbe7   : > { %v1621_v15 = vpop.permute.xlu0 %1620 }
 0xbe8   : > { %v1612_v61 = vpop.permute.xlu1 %1611  ;;  %1627 = vst.msk [vmem:[#allocation3 + $0xc0] sm:$0xff] %vm1095_vm1, %v1621_v15  ;;  %v1629_v16 = vsel %vm1083_vm0, %v1610_v40, %v1621_v15 }
 0xbe9   : > { %1617 = vst.msk [vmem:[#allocation3 + $0x38] sm:$0xff] %vm1083_vm0, %v1612_v61 }
 0xbec   : > { %v1623_v48 = vpop.permute.xlu1 %1622 }
 0xbed   : > { %1628 = vst.msk [vmem:[#allocation3 + $0xc8] sm:$0xff] %vm1095_vm1, %v1623_v48  ;;  %v1630_v6 = vsel %vm1083_vm0, %v1612_v61, %v1623_v48 }
 0xbee   : > { %v1637_v46 = vpack.c.bf16 %v1630_v6, %v1629_v16 }
 0xbf0   : > { %4915 = vmatmul.mubr.msk.bf16.vlgmr.msra.gmra.mrb[16].mxu1 %vm928_vm2, %v1637_v46 }
 0xbf1   : > { %1819 = vmatpush1.bf16.msra.mxu1 %v6392_v53  ;;  %1850 = vmatprep.mubr.bf16.mxu1 %v7954_v59 }
 0xbf2   : > { %1820 = vmatprep.subr.bf16.mxu1 %v6399_v39 }
 0xbf5   : > { %1821 = vmatpush1.bf16.msra.mxu1 %v6405_v18 }
 0xbf6   : > { %1822 = vmatprep.subr.bf16.mxu1 %v6411_v8 }
 0xbf9   : > { %1823 = vmatpush1.bf16.msra.mxu1 %v6417_v50 }
 0xbfa   : > { %1824 = vmatprep.subr.bf16.mxu1 %v6423_v10 }
 0xbfd   : > { %1825 = vmatpush1.bf16.msra.mxu1 %v6429_v9 }
 0xbfe   : > { %1995 = vmatprep.subr.bf16.mxu1 %v6435_v20 }
 0xcc3   : > { %v1675_v49 = vpop.f32.mrb[16].mxu1 }
 0xcc4   : > { %v1684_v4 = vadd.f32 %v1675_v49, %v693_v13  ;;  %v1677_v51 = vpop.f32.mrb[17].mxu1 }
 0xcc5   : > { %v1686_v5 = vadd.f32 %v1677_v51, %v765_v47  ;;  %v1679_v56 = vpop.f32.mrb[18].mxu1 }
 0xcc6   : > { %5269 = vtanh.f32 %v1684_v4  ;;  %v1685_v24 = vadd.f32 %v1679_v56, %v697_v12  ;;  %v1681_v7 = vpop.f32.mrb[19].mxu1  ;;  %v4916_v63 = vmul.f32 -1.442695, %v1684_v4 }
 0xcc7   : > { %v1687_v22 = vadd.f32 %v1681_v7, %v769_v62  ;;  %5271 = vtanh.f32 %v1686_v5  ;;  %v4918_v2 = vmul.f32 -1.442695, %v1686_v5 }
 0xcc8   : > { %5273 = vtanh.f32 %v1685_v24  ;;  %v4917_v57 = vmul.f32 -1.442695, %v1685_v24 }
 0xcc9   : > { %5275 = vtanh.f32 %v1687_v22  ;;  %v4919_v0 = vmul.f32 -1.442695, %v1687_v22 }
 0xcca   : > { %5277 = vpow2.f32 %v4916_v63 }
 0xccb   : > { %5279 = vpow2.f32 %v4918_v2 }
 0xccc   : > { %5281 = vpow2.f32 %v4917_v57 }
 0xccd   : > { %5283 = vpow2.f32 %v4919_v0 }
 0xcd0   : > { %v5270_v17 = vpop.eup %5269 }
 0xcd1   : > { %1720 = vrot.lane.b32.xlu0 %v5270_v17, %s5767_s11  ;;  %v5272_v60 = vpop.eup %5271 }
 0xcd2   : > { %v5274_v54 = vpop.eup %5273 }
 0xcd3   : > { %1722 = vrot.lane.b32.xlu1 %v5274_v54, %s5767_s11  ;;  %v5276_v19 = vpop.eup %5275 }
 0xcd4   : > { %v5278_v1 = vpop.eup %5277 }
 0xcd5   : > { %1742 = vrot.lane.b32.xlu0 %v5272_v60, %s5767_s11  ;;  %v1694_v11 = vadd.f32 1.0, %v5278_v1  ;;  %v5280_v40 = vpop.eup %5279 }
 0xcd6   : > { %v5282_v15 = vpop.eup %5281  ;;  %v1706_v61 = vadd.f32 1.0, %v5280_v40 }
 0xcd7   : > { %1744 = vrot.lane.b32.xlu1 %v5276_v19, %s5767_s11  ;;  %5285 = vrcp.f32 %v1694_v11  ;;  %v1695_v48 = vadd.f32 1.0, %v5282_v15  ;;  %v5284_v16 = vpop.eup %5283 }
 0xcd8   : > { %5287 = vrcp.f32 %v1706_v61  ;;  %v1707_v6 = vadd.f32 1.0, %v5284_v16 }
 0xcd9   : > { %5289 = vrcp.f32 %v1695_v48 }
 0xcda   : > { %5291 = vrcp.f32 %v1707_v6 }
 0xce1   : > { %v5286_v46 = vpop.eup %5285 }
 0xce2   : > { %v5288_v49 = vpop.eup %5287  ;;  %v1716_v22 = vmul.f32 %v5286_v46, %v6455_v42 }
 0xce3   : > { %v5290_v4 = vpop.eup %5289  ;;  %v1738_v54 = vmul.f32 %v5288_v49, %v6460_v14 }
 0xce4   : > { %v5292_v56 = vpop.eup %5291  ;;  %v1717_v19 = vmul.f32 %v5290_v4, %v6462_v43 }
 0xce5   : > { %v1739_v42 = vmul.f32 %v5292_v56, %v6467_v3 }
 0xd43   : > { %v1721_v13 = vpop.permute.xlu0 %1720 }
 0xd44   : > { %v1726_v47 = vmul.f32 %v5286_v46, %v1721_v13 }
 0xd45   : > { %v1723_v51 = vpop.permute.xlu1 %1722 }
 0xd46   : > { %1730 = vrot.lane.b32.xlu0 %v1726_v47, %s5767_s11  ;;  %v1727_v5 = vmul.f32 %v5290_v4, %v1723_v51 }
 0xd47   : > { %v1743_v12 = vpop.permute.xlu0 %1742 }
 0xd48   : > { %v1748_v62 = vmul.f32 %v5288_v49, %v1743_v12  ;;  %1732 = vrot.lane.b32.xlu1 %v1727_v5, %s5767_s11 }
 0xd49   : > { %v1745_v24 = vpop.permute.xlu1 %1744 }
 0xd4a   : > { %1752 = vrot.lane.b32.xlu0 %v1748_v62, %s5767_s11  ;;  %v1749_v7 = vmul.f32 %v5292_v56, %v1745_v24 }
 0xd4c   : > { %1754 = vrot.lane.b32.xlu1 %v1749_v7, %s5767_s11  ;;  %v755_v7 = vadd.f32 %v6194_v52, %v6234_v34 }
 0xdb8   : > { %v1731_v17 = vpop.permute.xlu0 %1730 }
 0xdb9   : > { %v6511_v60 = vadd.f32 %v1731_v17, %v1716_v22  ;;  %v707_v17 = vadd.f32 %v6156_v23, %v6110_v58 }
 0xdba   : > { %v1733_v2 = vpop.permute.xlu1 %1732 }
 0xdbb   : > { %5293 = vtanh.f32 %v6511_v60  ;;  %v6518_v0 = vadd.f32 %v1733_v2, %v1717_v19 }
 0xdbc   : > { %v1753_v63 = vpop.permute.xlu0 %1752 }
 0xdbd   : > { %v6516_v57 = vadd.f32 %v1753_v63, %v1738_v54  ;;  %v759_v63 = vadd.f32 %v6198_v55, %v6234_v34 }
 0xdbe   : > { %v1755_v1 = vpop.permute.xlu1 %1754 }
 0xdbf   : > { %5295 = vtanh.f32 %v6516_v57  ;;  %v6523_v11 = vadd.f32 %v1755_v1, %v1739_v42 }
 0xdc0   : > { %5297 = vtanh.f32 %v6518_v0 }
 0xdc1   : > { %5299 = vtanh.f32 %v6523_v11 }
 0xdc5   : > { %v5294_v14 = vpop.eup %5293 }
 0xdc6   : > { %1764 = vrot.lane.b32.xlu0 %v5294_v14, %s5767_s11 }
 0xdc9   : > { %v5296_v43 = vpop.eup %5295 }
 0xdca   : > { %v5298_v40 = vpop.eup %5297  ;;  %1776 = vrot.lane.b32.xlu0 %v5296_v43, %s5767_s11 }
 0xdcb   : > { %1766 = vrot.lane.b32.xlu1 %v5298_v40, %s5767_s11  ;;  %v5300_v15 = vpop.eup %5299 }
 0xdcf   : > { %1778 = vrot.lane.b32.xlu1 %v5300_v15, %s5767_s11 }
 0xe38   : > { %v1765_v61 = vpop.permute.xlu0 %1764 }
 0xe39   : > { %v1770_v48 = vmul.f32 %v5286_v46, %v1765_v61 }
 0xe3b   : > { %1786 = vrot.lane.b32.xlu0 %v1770_v48, %s5768_s14 }
 0xe3c   : > { %v1777_v3 = vpop.permute.xlu0 %1776 }
 0xe3d   : > { %v1767_v16 = vpop.permute.xlu1 %1766  ;;  %v1782_v6 = vmul.f32 %v5288_v49, %v1777_v3 }
 0xe3e   : > { %v1771_v13 = vmul.f32 %v5290_v4, %v1767_v16 }
 0xe3f   : > { %1797 = vrot.lane.b32.xlu0 %v1782_v6, %s5769_s15 }
 0xe40   : > { %1788 = vrot.lane.b32.xlu1 %v1771_v13, %s5768_s14 }
 0xe41   : > { %v1779_v47 = vpop.permute.xlu1 %1778 }
 0xe42   : > { %v1783_v12 = vmul.f32 %v5292_v56, %v1779_v47  ;;  %v703_v56 = vadd.f32 %v6152_v21, %v6110_v58 }
 0xe44   : > { %1799 = vrot.lane.b32.xlu1 %v1783_v12, %s5769_s15 }
 0xead   : > { %v1787_v51 = vpop.permute.xlu0 %1786 }
 0xeae   : > { %1793 = vst.msk [vmem:[#allocation3 + $0x40] sm:$0xff] %vm1083_vm0, %v1787_v51 }
 0xeb1   : > { %v1798_v62 = vpop.permute.xlu0 %1797 }
 0xeb2   : > { %v1789_v5 = vpop.permute.xlu1 %1788  ;;  %1804 = vst.msk [vmem:[#allocation3 + $0xb0] sm:$0xff] %vm1095_vm1, %v1798_v62  ;;  %v1806_v49 = vsel %vm1083_vm0, %v1787_v51, %v1798_v62 }
 0xeb3   : > { %1794 = vst.msk [vmem:[#allocation3 + $0x48] sm:$0xff] %vm1083_vm0, %v1789_v5 }
 0xeb6   : > { %v1800_v46 = vpop.permute.xlu1 %1799 }
 0xeb7   : > { %1805 = vst.msk [vmem:[#allocation3 + $0xb8] sm:$0xff] %vm1095_vm1, %v1800_v46  ;;  %v1807_v4 = vsel %vm1083_vm0, %v1789_v5, %v1800_v46 }
 0xeb8   : > { %v1814_v24 = vpack.c.bf16 %v1807_v4, %v1806_v49 }
 0xeba   : > { %4920 = vmatmul.mubr.msk.bf16.vlgmr.msra.gmra.mrb[20].mxu1 %vm928_vm2, %v1814_v24 }
 0xebb   : > { %1996 = vmatpush1.bf16.msra.mxu1 %v6392_v53  ;;  %2027 = vmatprep.mubr.bf16.mxu1 %v7954_v59 }
 0xebc   : > { %1997 = vmatprep.subr.bf16.mxu1 %v6399_v39 }
 0xebf   : > { %1998 = vmatpush1.bf16.msra.mxu1 %v6405_v18 }
 0xec0   : > { %1999 = vmatprep.subr.bf16.mxu1 %v6411_v8 }
 0xec3   : > { %2000 = vmatpush1.bf16.msra.mxu1 %v6417_v50 }
 0xec4   : > { %2001 = vmatprep.subr.bf16.mxu1 %v6423_v10 }
 0xec7   : > { %2002 = vmatpush1.bf16.msra.mxu1 %v6429_v9 }
 0xec8   : > { %2172 = vmatprep.subr.bf16.mxu1 %v6435_v20 }
 0xf8d   : > { %v1852_v22 = vpop.f32.mrb[20].mxu1 }
 0xf8e   : > { %v1861_v54 = vadd.f32 %v1852_v22, %v703_v56  ;;  %v1854_v19 = vpop.f32.mrb[21].mxu1 }
 0xf8f   : > { %v1863_v2 = vadd.f32 %v1854_v19, %v755_v7  ;;  %v1856_v42 = vpop.f32.mrb[22].mxu1 }
 0xf90   : > { %5301 = vtanh.f32 %v1861_v54  ;;  %v1862_v1 = vadd.f32 %v1856_v42, %v707_v17  ;;  %v1858_v14 = vpop.f32.mrb[23].mxu1  ;;  %v4921_v55 = vmul.f32 -1.442695, %v1861_v54 }
 0xf91   : > { %v1864_v43 = vadd.f32 %v1858_v14, %v759_v63  ;;  %5303 = vtanh.f32 %v1863_v2  ;;  %v4923_v15 = vmul.f32 -1.442695, %v1863_v2 }
 0xf92   : > { %5305 = vtanh.f32 %v1862_v1  ;;  %v4922_v61 = vmul.f32 -1.442695, %v1862_v1 }
 0xf93   : > { %5307 = vtanh.f32 %v1864_v43  ;;  %v4924_v48 = vmul.f32 -1.442695, %v1864_v43 }
 0xf94   : > { %5309 = vpow2.f32 %v4921_v55 }
 0xf95   : > { %5311 = vpow2.f32 %v4923_v15 }
 0xf96   : > { %5313 = vpow2.f32 %v4922_v61 }
 0xf97   : > { %5315 = vpow2.f32 %v4924_v48 }
 0xf9a   : > { %v5302_v21 = vpop.eup %5301 }
 0xf9b   : > { %1897 = vrot.lane.b32.xlu0 %v5302_v21, %s5767_s11  ;;  %v5304_v52 = vpop.eup %5303 }
 0xf9c   : > { %v5306_v40 = vpop.eup %5305 }
 0xf9d   : > { %1899 = vrot.lane.b32.xlu1 %v5306_v40, %s5767_s11  ;;  %v5308_v23 = vpop.eup %5307 }
 0xf9e   : > { %v5310_v3 = vpop.eup %5309 }
 0xf9f   : > { %1919 = vrot.lane.b32.xlu0 %v5304_v52, %s5767_s11  ;;  %v1871_v16 = vadd.f32 1.0, %v5310_v3  ;;  %v5312_v6 = vpop.eup %5311 }
 0xfa0   : > { %v5314_v13 = vpop.eup %5313  ;;  %v1883_v47 = vadd.f32 1.0, %v5312_v6 }
 0xfa1   : > { %1921 = vrot.lane.b32.xlu1 %v5308_v23, %s5767_s11  ;;  %5317 = vrcp.f32 %v1871_v16  ;;  %v1872_v12 = vadd.f32 1.0, %v5314_v13  ;;  %v5316_v51 = vpop.eup %5315 }
 0xfa2   : > { %5319 = vrcp.f32 %v1883_v47  ;;  %v1884_v62 = vadd.f32 1.0, %v5316_v51 }
 0xfa3   : > { %5321 = vrcp.f32 %v1872_v12 }
 0xfa4   : > { %5323 = vrcp.f32 %v1884_v62 }
 0xfab   : > { %v5318_v5 = vpop.eup %5317 }
 0xfac   : > { %v5320_v4 = vpop.eup %5319  ;;  %v1893_v2 = vmul.f32 %v5318_v5, %v6511_v60 }
 0xfad   : > { %v5322_v56 = vpop.eup %5321  ;;  %v1915_v14 = vmul.f32 %v5320_v4, %v6516_v57 }
 0xfae   : > { %v5324_v54 = vpop.eup %5323  ;;  %v1894_v43 = vmul.f32 %v5322_v56, %v6518_v0 }
 0xfaf   : > { %v1916_v60 = vmul.f32 %v5324_v54, %v6523_v11 }
0x100d   : > { %v1898_v46 = vpop.permute.xlu0 %1897 }
0x100e   : > { %v1903_v49 = vmul.f32 %v5318_v5, %v1898_v46 }
0x100f   : > { %v1900_v7 = vpop.permute.xlu1 %1899 }
0x1010   : > { %1907 = vrot.lane.b32.xlu0 %v1903_v49, %s5767_s11  ;;  %v1904_v17 = vmul.f32 %v5322_v56, %v1900_v7  ;;  %v713_v7 = vadd.f32 %v6160_v25, %v6110_v58 }
0x1011   : > { %v1920_v24 = vpop.permute.xlu0 %1919 }
0x1012   : > { %v1925_v22 = vmul.f32 %v5320_v4, %v1920_v24  ;;  %1909 = vrot.lane.b32.xlu1 %v1904_v17, %s5767_s11 }
0x1013   : > { %v1922_v19 = vpop.permute.xlu1 %1921 }
0x1014   : > { %1929 = vrot.lane.b32.xlu0 %v1925_v22, %s5767_s11  ;;  %v1926_v63 = vmul.f32 %v5324_v54, %v1922_v19  ;;  %v745_v22 = vadd.f32 %v6186_v41, %v6234_v34 }
0x1016   : > { %1931 = vrot.lane.b32.xlu1 %v1926_v63, %s5767_s11 }
0x1082   : > { %v1908_v42 = vpop.permute.xlu0 %1907 }
0x1083   : > { %v6567_v1 = vadd.f32 %v1908_v42, %v1893_v2  ;;  %v749_v2 = vadd.f32 %v6190_v45, %v6234_v34 }
0x1084   : > { %v1910_v52 = vpop.permute.xlu1 %1909 }
0x1085   : > { %5325 = vtanh.f32 %v6567_v1  ;;  %v6574_v23 = vadd.f32 %v1910_v52, %v1894_v43 }
0x1086   : > { %v1930_v21 = vpop.permute.xlu0 %1929 }
0x1087   : > { %v6572_v40 = vadd.f32 %v1930_v21, %v1915_v14 }
0x1088   : > { %v1932_v55 = vpop.permute.xlu1 %1931 }
0x1089   : > { %5327 = vtanh.f32 %v6572_v40  ;;  %v6579_v15 = vadd.f32 %v1932_v55, %v1916_v60 }
0x108a   : > { %5329 = vtanh.f32 %v6574_v23 }
0x108b   : > { %5331 = vtanh.f32 %v6579_v15 }
0x108f   : > { %v5326_v57 = vpop.eup %5325 }
0x1090   : > { %1941 = vrot.lane.b32.xlu0 %v5326_v57, %s5767_s11 }
0x1093   : > { %v5328_v0 = vpop.eup %5327 }
0x1094   : > { %v5330_v61 = vpop.eup %5329  ;;  %1953 = vrot.lane.b32.xlu0 %v5328_v0, %s5767_s11 }
0x1095   : > { %1943 = vrot.lane.b32.xlu1 %v5330_v61, %s5767_s11  ;;  %v5332_v48 = vpop.eup %5331 }
0x1099   : > { %1955 = vrot.lane.b32.xlu1 %v5332_v48, %s5767_s11 }
0x1102   : > { %v1942_v3 = vpop.permute.xlu0 %1941 }
0x1103   : > { %v1947_v16 = vmul.f32 %v5318_v5, %v1942_v3 }
0x1105   : > { %1963 = vrot.lane.b32.xlu0 %v1947_v16, %s5768_s14 }
0x1106   : > { %v1954_v11 = vpop.permute.xlu0 %1953 }
0x1107   : > { %v1944_v6 = vpop.permute.xlu1 %1943  ;;  %v1959_v13 = vmul.f32 %v5320_v4, %v1954_v11 }
0x1108   : > { %v1948_v47 = vmul.f32 %v5322_v56, %v1944_v6 }
0x1109   : > { %1974 = vrot.lane.b32.xlu0 %v1959_v13, %s5769_s15 }
0x110a   : > { %1965 = vrot.lane.b32.xlu1 %v1948_v47, %s5768_s14 }
0x110b   : > { %v1956_v12 = vpop.permute.xlu1 %1955 }
0x110c   : > { %v1960_v51 = vmul.f32 %v5324_v54, %v1956_v12  ;;  %v717_v54 = vadd.f32 %v6164_v27, %v6110_v58 }
0x110e   : > { %1976 = vrot.lane.b32.xlu1 %v1960_v51, %s5769_s15 }
0x1177   : > { %v1964_v62 = vpop.permute.xlu0 %1963 }
0x1178   : > { %1970 = vst.msk [vmem:[#allocation3 + $0x50] sm:$0xff] %vm1083_vm0, %v1964_v62 }
0x117b   : > { %v1975_v46 = vpop.permute.xlu0 %1974 }
0x117c   : > { %v1966_v49 = vpop.permute.xlu1 %1965  ;;  %1981 = vst.msk [vmem:[#allocation3 + $0xa0] sm:$0xff] %vm1095_vm1, %v1975_v46  ;;  %v1983_v4 = vsel %vm1083_vm0, %v1964_v62, %v1975_v46 }
0x117d   : > { %1971 = vst.msk [vmem:[#allocation3 + $0x58] sm:$0xff] %vm1083_vm0, %v1966_v49 }
0x1180   : > { %v1977_v5 = vpop.permute.xlu1 %1976 }
0x1181   : > { %1982 = vst.msk [vmem:[#allocation3 + $0xa8] sm:$0xff] %vm1095_vm1, %v1977_v5  ;;  %v1984_v24 = vsel %vm1083_vm0, %v1966_v49, %v1977_v5 }
0x1182   : > { %v1991_v56 = vpack.c.bf16 %v1984_v24, %v1983_v4 }
0x1184   : > { %4925 = vmatmul.mubr.msk.bf16.vlgmr.msra.gmra.mrb[24].mxu1 %vm928_vm2, %v1991_v56 }
0x1185   : > { %2173 = vmatpush1.bf16.msra.mxu1 %v6392_v53  ;;  %2204 = vmatprep.mubr.bf16.mxu1 %v7954_v59 }
0x1186   : > { %2174 = vmatprep.subr.bf16.mxu1 %v6399_v39 }
0x1189   : > { %2175 = vmatpush1.bf16.msra.mxu1 %v6405_v18 }
0x118a   : > { %2176 = vmatprep.subr.bf16.mxu1 %v6411_v8 }
0x118d   : > { %2177 = vmatpush1.bf16.msra.mxu1 %v6417_v50 }
0x118e   : > { %2178 = vmatprep.subr.bf16.mxu1 %v6423_v10 }
0x1191   : > { %2179 = vmatpush1.bf16.msra.mxu1 %v6429_v9 }
0x1192   : > { %2347 = vmatprep.subr.bf16.mxu1 %v6435_v20 }
0x1257   : > { %v2029_v17 = vpop.f32.mrb[24].mxu1 }
0x1258   : > { %v2038_v19 = vadd.f32 %v2029_v17, %v713_v7  ;;  %v2031_v63 = vpop.f32.mrb[25].mxu1 }
0x1259   : > { %v2040_v42 = vadd.f32 %v2031_v63, %v745_v22  ;;  %v2033_v14 = vpop.f32.mrb[26].mxu1 }
0x125a   : > { %5333 = vtanh.f32 %v2038_v19  ;;  %v2039_v43 = vadd.f32 %v2033_v14, %v717_v54  ;;  %v2035_v21 = vpop.f32.mrb[27].mxu1  ;;  %v4926_v45 = vmul.f32 -1.442695, %v2038_v19 }
0x125b   : > { %v2041_v52 = vadd.f32 %v2035_v21, %v749_v2  ;;  %5335 = vtanh.f32 %v2040_v42  ;;  %v4928_v55 = vmul.f32 -1.442695, %v2040_v42 }
0x125c   : > { %5337 = vtanh.f32 %v2039_v43  ;;  %v4927_v57 = vmul.f32 -1.442695, %v2039_v43 }
0x125d   : > { %5339 = vtanh.f32 %v2041_v52  ;;  %v4929_v0 = vmul.f32 -1.442695, %v2041_v52 }
0x125e   : > { %5341 = vpow2.f32 %v4926_v45 }
0x125f   : > { %5343 = vpow2.f32 %v4928_v55 }
0x1260   : > { %5345 = vpow2.f32 %v4927_v57 }
0x1261   : > { %5347 = vpow2.f32 %v4929_v0 }
0x1264   : > { %v5334_v25 = vpop.eup %5333 }
0x1265   : > { %2074 = vrot.lane.b32.xlu0 %v5334_v25, %s5767_s11  ;;  %v5336_v41 = vpop.eup %5335 }
0x1266   : > { %v5338_v60 = vpop.eup %5337 }
0x1267   : > { %2076 = vrot.lane.b32.xlu1 %v5338_v60, %s5767_s11  ;;  %v5340_v27 = vpop.eup %5339 }
0x1268   : > { %v5342_v61 = vpop.eup %5341 }
0x1269   : > { %2096 = vrot.lane.b32.xlu0 %v5336_v41, %s5767_s11  ;;  %v2048_v48 = vadd.f32 1.0, %v5342_v61  ;;  %v5344_v3 = vpop.eup %5343 }
0x126a   : > { %v5346_v16 = vpop.eup %5345  ;;  %v2060_v11 = vadd.f32 1.0, %v5344_v3 }
0x126b   : > { %2098 = vrot.lane.b32.xlu1 %v5340_v27, %s5767_s11  ;;  %5349 = vrcp.f32 %v2048_v48  ;;  %v2049_v6 = vadd.f32 1.0, %v5346_v16  ;;  %v5348_v13 = vpop.eup %5347 }
0x126c   : > { %5351 = vrcp.f32 %v2060_v11  ;;  %v2061_v47 = vadd.f32 1.0, %v5348_v13 }
0x126d   : > { %5353 = vrcp.f32 %v2049_v6 }
0x126e   : > { %5355 = vrcp.f32 %v2061_v47 }
0x1275   : > { %v5350_v12 = vpop.eup %5349 }
0x1276   : > { %v5352_v46 = vpop.eup %5351  ;;  %v2070_v54 = vmul.f32 %v5350_v12, %v6567_v1 }
0x1277   : > { %v5354_v5 = vpop.eup %5353  ;;  %v2092_v2 = vmul.f32 %v5352_v46, %v6572_v40 }
0x1278   : > { %v5356_v7 = vpop.eup %5355  ;;  %v2071_v42 = vmul.f32 %v5354_v5, %v6574_v23 }
0x1279   : > { %v2093_v1 = vmul.f32 %v5356_v7, %v6579_v15 }
0x12d7   : > { %v2075_v51 = vpop.permute.xlu0 %2074 }
0x12d8   : > { %v2080_v62 = vmul.f32 %v5350_v12, %v2075_v51 }
0x12d9   : > { %v2077_v4 = vpop.permute.xlu1 %2076 }
0x12da   : > { %2084 = vrot.lane.b32.xlu0 %v2080_v62, %s5767_s11  ;;  %v2081_v56 = vmul.f32 %v5354_v5, %v2077_v4  ;;  %v723_v62 = vadd.f32 %v6168_v29, %v6110_v58 }
0x12db   : > { %v2097_v49 = vpop.permute.xlu0 %2096 }
0x12dc   : > { %v2102_v24 = vmul.f32 %v5352_v46, %v2097_v49  ;;  %2086 = vrot.lane.b32.xlu1 %v2081_v56, %s5767_s11 }
0x12dd   : > { %v2099_v22 = vpop.permute.xlu1 %2098 }
0x12de   : > { %2106 = vrot.lane.b32.xlu0 %v2102_v24, %s5767_s11  ;;  %v2103_v17 = vmul.f32 %v5356_v7, %v2099_v22 }
0x12e0   : > { %2108 = vrot.lane.b32.xlu1 %v2103_v17, %s5767_s11 }
0x134c   : > { %v2085_v19 = vpop.permute.xlu0 %2084 }
0x134d   : > { %v6623_v63 = vadd.f32 %v2085_v19, %v2070_v54 }
0x134e   : > { %v2087_v43 = vpop.permute.xlu1 %2086 }
0x134f   : > { %5357 = vtanh.f32 %v6623_v63  ;;  %v6630_v52 = vadd.f32 %v2087_v43, %v2071_v42 }
0x1350   : > { %v2107_v14 = vpop.permute.xlu0 %2106 }
0x1351   : > { %v6628_v21 = vadd.f32 %v2107_v14, %v2092_v2 }
0x1352   : > { %v2109_v25 = vpop.permute.xlu1 %2108 }
0x1353   : > { %5359 = vtanh.f32 %v6628_v21  ;;  %v6635_v41 = vadd.f32 %v2109_v25, %v2093_v1 }
0x1354   : > { %5361 = vtanh.f32 %v6630_v52 }
0x1355   : > { %5363 = vtanh.f32 %v6635_v41 }
0x1359   : > { %v5358_v40 = vpop.eup %5357 }
0x135a   : > { %2118 = vrot.lane.b32.xlu0 %v5358_v40, %s5767_s11 }
0x135d   : > { %v5360_v23 = vpop.eup %5359 }
0x135e   : > { %v5362_v60 = vpop.eup %5361  ;;  %2130 = vrot.lane.b32.xlu0 %v5360_v23, %s5767_s11 }
0x135f   : > { %2120 = vrot.lane.b32.xlu1 %v5362_v60, %s5767_s11  ;;  %v5364_v27 = vpop.eup %5363 }
0x1363   : > { %2132 = vrot.lane.b32.xlu1 %v5364_v27, %s5767_s11 }
0x13cc   : > { %v2119_v45 = vpop.permute.xlu0 %2118 }
0x13cd   : > { %v2124_v55 = vmul.f32 %v5350_v12, %v2119_v45 }
0x13cf   : > { %2140 = vrot.lane.b32.xlu0 %v2124_v55, %s5768_s14 }
0x13d0   : > { %v2131_v15 = vpop.permute.xlu0 %2130 }
0x13d1   : > { %v2121_v57 = vpop.permute.xlu1 %2120  ;;  %v2136_v0 = vmul.f32 %v5352_v46, %v2131_v15 }
0x13d2   : > { %v2125_v61 = vmul.f32 %v5354_v5, %v2121_v57 }
0x13d3   : > { %2151 = vrot.lane.b32.xlu0 %v2136_v0, %s5769_s15 }
0x13d4   : > { %2142 = vrot.lane.b32.xlu1 %v2125_v61, %s5768_s14 }
0x13d5   : > { %v2133_v48 = vpop.permute.xlu1 %2132 }
0x13d6   : > { %v2137_v3 = vmul.f32 %v5356_v7, %v2133_v48 }
0x13d8   : > { %2153 = vrot.lane.b32.xlu1 %v2137_v3, %s5769_s15 }
0x1441   : > { %v2141_v16 = vpop.permute.xlu0 %2140 }
0x1442   : > { %2147 = vst.msk [vmem:[#allocation3 + $0x60] sm:$0xff] %vm1083_vm0, %v2141_v16 }
0x1445   : > { %v2152_v11 = vpop.permute.xlu0 %2151 }
0x1446   : > { %v2143_v6 = vpop.permute.xlu1 %2142  ;;  %2158 = vst.msk [vmem:[#allocation3 + $0x90] sm:$0xff] %vm1095_vm1, %v2152_v11  ;;  %v2160_v47 = vsel %vm1083_vm0, %v2141_v16, %v2152_v11 }
0x1447   : > { %2148 = vst.msk [vmem:[#allocation3 + $0x68] sm:$0xff] %vm1083_vm0, %v2143_v6 }
0x144a   : > { %v2154_v13 = vpop.permute.xlu1 %2153 }
0x144b   : > { %2159 = vst.msk [vmem:[#allocation3 + $0x98] sm:$0xff] %vm1095_vm1, %v2154_v13  ;;  %v2161_v12 = vsel %vm1083_vm0, %v2143_v6, %v2154_v13 }
0x144c   : > { %v2168_v51 = vpack.c.bf16 %v2161_v12, %v2160_v47 }
0x144e   : > { %4930 = vmatmul.mubr.msk.bf16.vlgmr.msra.gmra.mrb[28].mxu1 %vm928_vm2, %v2168_v51 }
0x144f   : > { %2348 = vmatpush1.bf16.msra.mxu1 %v6392_v53  ;;  %2379 = vmatprep.mubr.bf16.mxu1 %v7954_v59  ;;  %v735_v53 = vadd.f32 %v6178_v35, %v6234_v34 }
0x1450   : > { %2349 = vmatprep.subr.bf16.mxu1 %v6399_v39  ;;  %v727_v39 = vadd.f32 %v6172_v31, %v6110_v58 }
0x1453   : > { %2350 = vmatpush1.bf16.msra.mxu1 %v6405_v18 }
0x1454   : > { %2351 = vmatprep.subr.bf16.mxu1 %v6411_v8 }
0x1457   : > { %2352 = vmatpush1.bf16.msra.mxu1 %v6417_v50  ;;  %v739_v50 = vadd.f32 %v6182_v37, %v6234_v34 }
0x1458   : > { %2353 = vmatprep.subr.bf16.mxu1 %v6423_v10 }
0x145b   : > { %2354 = vmatpush1.bf16.msra.mxu1 %v6429_v9 }
0x145c   : > { %2693 = vmatprep.subr.bf16.mxu1 %v6435_v20 }
0x1521   : > { %v2206_v46 = vpop.f32.mrb[28].mxu1 }
0x1522   : > { %v2215_v18 = vadd.f32 %v2206_v46, %v723_v62  ;;  %v2208_v8 = vpop.f32.mrb[29].mxu1 }
0x1523   : > { %v2217_v10 = vadd.f32 %v2208_v8, %v735_v53  ;;  %v2210_v49 = vpop.f32.mrb[30].mxu1 }
0x1524   : > { %5365 = vtanh.f32 %v2215_v18  ;;  %v2216_v9 = vadd.f32 %v2210_v49, %v727_v39  ;;  %v2212_v20 = vpop.f32.mrb[31].mxu1  ;;  %v4931_v37 = vmul.f32 -1.442695, %v2215_v18 }
0x1525   : > { %v2218_v5 = vadd.f32 %v2212_v20, %v739_v50  ;;  %5367 = vtanh.f32 %v2217_v10  ;;  %v4933_v24 = vmul.f32 -1.442695, %v2217_v10 }
0x1526   : > { %5369 = vtanh.f32 %v2216_v9  ;;  %v4932_v56 = vmul.f32 -1.442695, %v2216_v9 }
0x1527   : > { %5371 = vtanh.f32 %v2218_v5  ;;  %v4934_v7 = vmul.f32 -1.442695, %v2218_v5 }
0x1528   : > { %5373 = vpow2.f32 %v4931_v37 }
0x1529   : > { %5375 = vpow2.f32 %v4933_v24 }
0x152a   : > { %5377 = vpow2.f32 %v4932_v56  ;;  %v6712_v56 = vld [vmem:[%s7921_s3] ss:$8 sps:$4 sm:$0xff]  }
0x152b   : > { %5379 = vpow2.f32 %v4934_v7  ;;  %v6719_v7 = vld [vmem:[%s7921_s3 + $0x14] ss:$8 sps:$4 sm:$0xff]  }
0x152e   : > { %v5366_v29 = vpop.eup %5365 }
0x152f   : > { %2251 = vrot.lane.b32.xlu0 %v5366_v29, %s5767_s11  ;;  %v5368_v35 = vpop.eup %5367 }
0x1530   : > { %v5370_v4 = vpop.eup %5369 }
0x1531   : > { %2253 = vrot.lane.b32.xlu1 %v5370_v4, %s5767_s11  ;;  %v5372_v31 = vpop.eup %5371 }
0x1532   : > { %v5374_v22 = vpop.eup %5373 }
0x1533   : > { %2273 = vrot.lane.b32.xlu0 %v5368_v35, %s5767_s11  ;;  %v2225_v17 = vadd.f32 1.0, %v5374_v22  ;;  %v5376_v54 = vpop.eup %5375  ;;  %v6725_v22 = vld [vmem:[%s7921_s3 + $0x10] ss:$8 sps:$4 sm:$0xff]  }
0x1534   : > { %v5378_v19 = vpop.eup %5377  ;;  %v2237_v2 = vadd.f32 1.0, %v5376_v54  ;;  %v6737_v54 = vld [vmem:[%s7921_s3 + $0x20] ss:$8 sps:$4 sm:$0xff]  }
0x1535   : > { %2275 = vrot.lane.b32.xlu1 %v5372_v31, %s5767_s11  ;;  %5381 = vrcp.f32 %v2225_v17  ;;  %v2226_v42 = vadd.f32 1.0, %v5378_v19  ;;  %v5380_v14 = vpop.eup %5379  ;;  %v6731_v17 = vld [vmem:[%s7921_s3 + $0x24] ss:$8 sps:$4 sm:$0xff]   ;;  %v6743_v19 = vld [vmem:[%s7921_s3 + $0x34] ss:$8 sps:$4 sm:$0xff]  }
0x1536   : > { %5383 = vrcp.f32 %v2237_v2  ;;  %v2238_v43 = vadd.f32 1.0, %v5380_v14  ;;  %v6749_v2 = vld [vmem:[%s7921_s3 + $0x30] ss:$8 sps:$4 sm:$0xff]   ;;  %v733_v14 = vadd.f32 %v6176_v33, %v6110_v58 }
0x1537   : > { %5385 = vrcp.f32 %v2226_v42  ;;  %v6755_v42 = vld [vmem:[%s7921_s3 + $0x4] ss:$8 sps:$4 sm:$0xff]  }
0x1538   : > { %5387 = vrcp.f32 %v2238_v43  ;;  %v725_v43 = vadd.f32 %v6170_v30, %v6234_v34 }
0x153f   : > { %v5382_v1 = vpop.eup %5381 }
0x1540   : > { %v5384_v23 = vpop.eup %5383  ;;  %v2247_v48 = vmul.f32 %v5382_v1, %v6623_v63 }
0x1541   : > { %v5386_v27 = vpop.eup %5385  ;;  %v2269_v11 = vmul.f32 %v5384_v23, %v6628_v21 }
0x1542   : > { %v5388_v57 = vpop.eup %5387  ;;  %v2248_v6 = vmul.f32 %v5386_v27, %v6630_v52 }
0x1543   : > { %v2270_v63 = vmul.f32 %v5388_v57, %v6635_v41 }
0x15a1   : > { %v2252_v25 = vpop.permute.xlu0 %2251 }
0x15a2   : > { %v2257_v40 = vmul.f32 %v5382_v1, %v2252_v25  ;;  %v737_v25 = vadd.f32 %v6180_v36, %v6110_v58 }
0x15a3   : > { %v2254_v45 = vpop.permute.xlu1 %2253 }
0x15a4   : > { %2261 = vrot.lane.b32.xlu0 %v2257_v40, %s5767_s11  ;;  %v2258_v15 = vmul.f32 %v5386_v27, %v2254_v45 }
0x15a5   : > { %v2274_v60 = vpop.permute.xlu0 %2273 }
0x15a6   : > { %v2279_v55 = vmul.f32 %v5384_v23, %v2274_v60  ;;  %2263 = vrot.lane.b32.xlu1 %v2258_v15, %s5767_s11  ;;  %v729_v60 = vadd.f32 %v6174_v32, %v6234_v34 }
0x15a7   : > { %v2276_v0 = vpop.permute.xlu1 %2275 }
0x15a8   : > { %2283 = vrot.lane.b32.xlu0 %v2279_v55, %s5767_s11  ;;  %v2280_v61 = vmul.f32 %v5388_v57, %v2276_v0 }
0x15aa   : > { %2285 = vrot.lane.b32.xlu1 %v2280_v61, %s5767_s11 }
0x1616   : > { %v2262_v3 = vpop.permute.xlu0 %2261 }
0x1617   : > { %v6679_v16 = vadd.f32 %v2262_v3, %v2247_v48 }
0x1618   : > { %v2264_v47 = vpop.permute.xlu1 %2263 }
0x1619   : > { %5389 = vtanh.f32 %v6679_v16  ;;  %v6686_v51 = vadd.f32 %v2264_v47, %v2248_v6 }
0x161a   : > { %v2284_v13 = vpop.permute.xlu0 %2283 }
0x161b   : > { %v6684_v12 = vadd.f32 %v2284_v13, %v2269_v11 }
0x161c   : > { %v2286_v62 = vpop.permute.xlu1 %2285 }
0x161d   : > { %5391 = vtanh.f32 %v6684_v12  ;;  %v6691_v53 = vadd.f32 %v2286_v62, %v2270_v63 }
0x161e   : > { %5393 = vtanh.f32 %v6686_v51 }
0x161f   : > { %5395 = vtanh.f32 %v6691_v53 }
0x1623   : > { %v5390_v21 = vpop.eup %5389 }
0x1624   : > { %2295 = vrot.lane.b32.xlu0 %v5390_v21, %s5767_s11 }
0x1627   : > { %v5392_v52 = vpop.eup %5391 }
0x1628   : > { %v5394_v46 = vpop.eup %5393  ;;  %2307 = vrot.lane.b32.xlu0 %v5392_v52, %s5767_s11 }
0x1629   : > { %2297 = vrot.lane.b32.xlu1 %v5394_v46, %s5767_s11  ;;  %v5396_v39 = vpop.eup %5395 }
0x162d   : > { %2309 = vrot.lane.b32.xlu1 %v5396_v39, %s5767_s11 }
0x1696   : > { %v2296_v18 = vpop.permute.xlu0 %2295 }
0x1697   : > { %v2301_v8 = vmul.f32 %v5382_v1, %v2296_v18 }
0x1699   : > { %2317 = vrot.lane.b32.xlu0 %v2301_v8, %s5768_s14 }
0x169a   : > { %v2308_v41 = vpop.permute.xlu0 %2307 }
0x169b   : > { %v2298_v50 = vpop.permute.xlu1 %2297  ;;  %v2313_v10 = vmul.f32 %v5384_v23, %v2308_v41 }
0x169c   : > { %v2302_v49 = vmul.f32 %v5386_v27, %v2298_v50 }
0x169d   : > { %2328 = vrot.lane.b32.xlu0 %v2313_v10, %s5769_s15 }
0x169e   : > { %2319 = vrot.lane.b32.xlu1 %v2302_v49, %s5768_s14 }
0x169f   : > { %v2310_v9 = vpop.permute.xlu1 %2309 }
0x16a0   : > { %v2314_v20 = vmul.f32 %v5388_v57, %v2310_v9 }
0x16a2   : > { %2330 = vrot.lane.b32.xlu1 %v2314_v20, %s5769_s15 }
0x170b   : > { %v2318_v5 = vpop.permute.xlu0 %2317 }
0x170c   : > { %2324 = vst.msk [vmem:[#allocation3 + $0x70] sm:$0xff] %vm1083_vm0, %v2318_v5 }
0x170f   : > { %v2329_v29 = vpop.permute.xlu0 %2328 }
0x1710   : > { %v2320_v35 = vpop.permute.xlu1 %2319  ;;  %2335 = vst.msk [vmem:[#allocation3 + $0x80] sm:$0xff] %vm1095_vm1, %v2329_v29  ;;  %v2337_v31 = vsel %vm1083_vm0, %v2318_v5, %v2329_v29 }
0x1711   : > { %2325 = vst.msk [vmem:[#allocation3 + $0x78] sm:$0xff] %vm1083_vm0, %v2320_v35 }
0x1714   : > { %v2331_v4 = vpop.permute.xlu1 %2330 }
0x1715   : > { %2336 = vst.msk [vmem:[#allocation3 + $0x88] sm:$0xff] %vm1095_vm1, %v2331_v4  ;;  %v2338_v37 = vsel %vm1083_vm0, %v2320_v35, %v2331_v4 }
0x1716   : > { %v2343_v24 = vpack.c.bf16 %v2338_v37, %v2337_v31 }
0x1718   : > { %4935 = vmatmul.mubr.msk.bf16.vlgmr.msra.gmra.mrb[32].mxu1 %vm928_vm2, %v2343_v24 }
0x1719   : > { %2694 = vmatpush1.bf16.msra.mxu1 %v6712_v56  ;;  %2725 = vmatprep.mubr.bf16.mxu1 %v7954_v59 }
0x171a   : > { %2695 = vmatprep.subr.bf16.mxu1 %v6719_v7 }
0x171d   : > { %2696 = vmatpush1.bf16.msra.mxu1 %v6725_v22 }
0x171e   : > { %2697 = vmatprep.subr.bf16.mxu1 %v6731_v17 }
0x1721   : > { %2698 = vmatpush1.bf16.msra.mxu1 %v6737_v54 }
0x1722   : > { %2699 = vmatprep.subr.bf16.mxu1 %v6743_v19 }
0x1725   : > { %2700 = vmatpush1.bf16.msra.mxu1 %v6749_v2 }
0x1726   : > { %3039 = vmatprep.subr.bf16.mxu1 %v6755_v42 }
0x17eb   : > { %v2381_v1 = vpop.f32.mrb[32].mxu1 }
0x17ec   : > { %v2390_v40 = vadd.f32 %v2381_v1, %v733_v14  ;;  %v2383_v23 = vpop.f32.mrb[33].mxu1 }
0x17ed   : > { %v2392_v27 = vadd.f32 %v2383_v23, %v725_v43  ;;  %v2385_v45 = vpop.f32.mrb[34].mxu1 }
0x17ee   : > { %5397 = vtanh.f32 %v2390_v40  ;;  %v2391_v55 = vadd.f32 %v2385_v45, %v737_v25  ;;  %v2387_v15 = vpop.f32.mrb[35].mxu1  ;;  %v4936_v32 = vmul.f32 -1.442695, %v2390_v40 }
0x17ef   : > { %v2393_v57 = vadd.f32 %v2387_v15, %v729_v60  ;;  %5399 = vtanh.f32 %v2392_v27  ;;  %v4938_v61 = vmul.f32 -1.442695, %v2392_v27 }
0x17f0   : > { %5401 = vtanh.f32 %v2391_v55  ;;  %v4937_v48 = vmul.f32 -1.442695, %v2391_v55 }
0x17f1   : > { %5403 = vtanh.f32 %v2393_v57  ;;  %v4939_v3 = vmul.f32 -1.442695, %v2393_v57 }
0x17f2   : > { %5405 = vpow2.f32 %v4936_v32 }
0x17f3   : > { %5407 = vpow2.f32 %v4938_v61 }
0x17f4   : > { %5409 = vpow2.f32 %v4937_v48 }
0x17f5   : > { %5411 = vpow2.f32 %v4939_v3 }
0x17f8   : > { %v5398_v33 = vpop.eup %5397 }
0x17f9   : > { %2426 = vrot.lane.b32.xlu0 %v5398_v33, %s5767_s11  ;;  %v5400_v30 = vpop.eup %5399 }
0x17fa   : > { %v5402_v0 = vpop.eup %5401 }
0x17fb   : > { %2428 = vrot.lane.b32.xlu1 %v5402_v0, %s5767_s11  ;;  %v5404_v36 = vpop.eup %5403 }
0x17fc   : > { %v5406_v11 = vpop.eup %5405 }
0x17fd   : > { %2448 = vrot.lane.b32.xlu0 %v5400_v30, %s5767_s11  ;;  %v2400_v6 = vadd.f32 1.0, %v5406_v11  ;;  %v5408_v13 = vpop.eup %5407 }
0x17fe   : > { %v5410_v47 = vpop.eup %5409  ;;  %v2412_v63 = vadd.f32 1.0, %v5408_v13  ;;  %v743_v13 = vadd.f32 %v6184_v38, %v6110_v58 }
0x17ff   : > { %2450 = vrot.lane.b32.xlu1 %v5404_v36, %s5767_s11  ;;  %5413 = vrcp.f32 %v2400_v6  ;;  %v2401_v62 = vadd.f32 1.0, %v5410_v47  ;;  %v5412_v21 = vpop.eup %5411  ;;  %v715_v47 = vadd.f32 %v6162_v26, %v6234_v34 }
0x1800   : > { %5415 = vrcp.f32 %v2412_v63  ;;  %v2413_v52 = vadd.f32 1.0, %v5412_v21 }
0x1801   : > { %5417 = vrcp.f32 %v2401_v62  ;;  %v747_v62 = vadd.f32 %v6188_v44, %v6110_v58 }
0x1802   : > { %5419 = vrcp.f32 %v2413_v52 }
0x1809   : > { %v5414_v46 = vpop.eup %5413 }
0x180a   : > { %v5416_v8 = vpop.eup %5415  ;;  %v2422_v35 = vmul.f32 %v5414_v46, %v6679_v16 }
0x180b   : > { %v5418_v50 = vpop.eup %5417  ;;  %v2444_v37 = vmul.f32 %v5416_v8, %v6684_v12 }
0x180c   : > { %v5420_v20 = vpop.eup %5419  ;;  %v2423_v24 = vmul.f32 %v5418_v50, %v6686_v51 }
0x180d   : > { %v2445_v16 = vmul.f32 %v5420_v20, %v6691_v53 }
0x186b   : > { %v2427_v39 = vpop.permute.xlu0 %2426 }
0x186c   : > { %v2432_v18 = vmul.f32 %v5414_v46, %v2427_v39 }
0x186d   : > { %v2429_v10 = vpop.permute.xlu1 %2428 }
0x186e   : > { %2436 = vrot.lane.b32.xlu0 %v2432_v18, %s5767_s11  ;;  %v2433_v9 = vmul.f32 %v5418_v50, %v2429_v10 }
0x186f   : > { %v2449_v41 = vpop.permute.xlu0 %2448 }
0x1870   : > { %v2454_v49 = vmul.f32 %v5416_v8, %v2449_v41  ;;  %2438 = vrot.lane.b32.xlu1 %v2433_v9, %s5767_s11 }
0x1871   : > { %v2451_v5 = vpop.permute.xlu1 %2450 }
0x1872   : > { %2458 = vrot.lane.b32.xlu0 %v2454_v49, %s5767_s11  ;;  %v2455_v29 = vmul.f32 %v5420_v20, %v2451_v5 }
0x1874   : > { %2460 = vrot.lane.b32.xlu1 %v2455_v29, %s5767_s11 }
0x18e0   : > { %v2437_v4 = vpop.permute.xlu0 %2436 }
0x18e1   : > { %v6775_v31 = vadd.f32 %v2437_v4, %v2422_v35 }
0x18e2   : > { %v2439_v43 = vpop.permute.xlu1 %2438 }
0x18e3   : > { %5421 = vtanh.f32 %v6775_v31  ;;  %v6782_v25 = vadd.f32 %v2439_v43, %v2423_v24 }
0x18e4   : > { %v2459_v14 = vpop.permute.xlu0 %2458 }
0x18e5   : > { %v6780_v1 = vadd.f32 %v2459_v14, %v2444_v37 }
0x18e6   : > { %v2461_v40 = vpop.permute.xlu1 %2460 }
0x18e7   : > { %5423 = vtanh.f32 %v6780_v1  ;;  %v6787_v23 = vadd.f32 %v2461_v40, %v2445_v16 }
0x18e8   : > { %5425 = vtanh.f32 %v6782_v25 }
0x18e9   : > { %5427 = vtanh.f32 %v6787_v23 }
0x18ed   : > { %v5422_v12 = vpop.eup %5421 }
0x18ee   : > { %2470 = vrot.lane.b32.xlu0 %v5422_v12, %s5767_s11 }
0x18f1   : > { %v5424_v51 = vpop.eup %5423 }
0x18f2   : > { %v5426_v60 = vpop.eup %5425  ;;  %2482 = vrot.lane.b32.xlu0 %v5424_v51, %s5767_s11 }
0x18f3   : > { %2472 = vrot.lane.b32.xlu1 %v5426_v60, %s5767_s11  ;;  %v5428_v27 = vpop.eup %5427 }
0x18f7   : > { %2484 = vrot.lane.b32.xlu1 %v5428_v27, %s5767_s11 }
0x1960   : > { %v2471_v45 = vpop.permute.xlu0 %2470 }
0x1961   : > { %v2476_v55 = vmul.f32 %v5414_v46, %v2471_v45  ;;  %v719_v46 = vadd.f32 %v6166_v28, %v6234_v34 }
0x1963   : > { %2492 = vrot.lane.b32.xlu0 %v2476_v55, %s5768_s14 }
0x1964   : > { %v2483_v53 = vpop.permute.xlu0 %2482 }
0x1965   : > { %v2473_v15 = vpop.permute.xlu1 %2472  ;;  %v2488_v57 = vmul.f32 %v5416_v8, %v2483_v53 }
0x1966   : > { %v2477_v33 = vmul.f32 %v5418_v50, %v2473_v15 }
0x1967   : > { %2502 = vrot.lane.b32.xlu0 %v2488_v57, %s5769_s15 }
0x1968   : > { %2494 = vrot.lane.b32.xlu1 %v2477_v33, %s5768_s14 }
0x1969   : > { %v2485_v30 = vpop.permute.xlu1 %2484 }
0x196a   : > { %v2489_v0 = vmul.f32 %v5420_v20, %v2485_v30 }
0x196c   : > { %2504 = vrot.lane.b32.xlu1 %v2489_v0, %s5769_s15 }
0x19d5   : > { %v2493_v36 = vpop.permute.xlu0 %2492 }
0x19d6   : > { %2498 = vst.msk [vmem:[#allocation3 + $0x80] sm:$0xff] %vm1083_vm0, %v2493_v36 }
0x19d9   : > { %v2503_v32 = vpop.permute.xlu0 %2502 }
0x19da   : > { %v2495_v61 = vpop.permute.xlu1 %2494  ;;  %2508 = vst.msk [vmem:[#allocation3 + $0x70] sm:$0xff] %vm1095_vm1, %v2503_v32  ;;  %v2510_v3 = vsel %vm1083_vm0, %v2493_v36, %v2503_v32 }
0x19db   : > { %2499 = vst.msk [vmem:[#allocation3 + $0x88] sm:$0xff] %vm1083_vm0, %v2495_v61 }
0x19de   : > { %v2505_v48 = vpop.permute.xlu1 %2504 }
0x19df   : > { %2509 = vst.msk [vmem:[#allocation3 + $0x78] sm:$0xff] %vm1095_vm1, %v2505_v48  ;;  %v2511_v11 = vsel %vm1083_vm0, %v2495_v61, %v2505_v48 }
0x19e0   : > { %v2516_v6 = vpack.c.bf16 %v2511_v11, %v2510_v3 }
0x19e2   : > { %4940 = vmatmul.mubr.msk.bf16.vlgmr.msra.gmra.mrb[64].mxu0 %vm928_vm2, %v2516_v6 }
0x19e3   : > { %2867 = vmatpush1.bf16.msra.mxu0 %v6712_v56  ;;  %2898 = vmatprep.mubr.bf16.mxu0 %v7954_v59 }
0x19e4   : > { %2868 = vmatprep.subr.bf16.mxu0 %v6719_v7 }
0x19e7   : > { %2869 = vmatpush1.bf16.msra.mxu0 %v6725_v22 }
0x19e8   : > { %2870 = vmatprep.subr.bf16.mxu0 %v6731_v17 }
0x19eb   : > { %2871 = vmatpush1.bf16.msra.mxu0 %v6737_v54 }
0x19ec   : > { %2872 = vmatprep.subr.bf16.mxu0 %v6743_v19 }
0x19ef   : > { %2873 = vmatpush1.bf16.msra.mxu0 %v6749_v2 }
0x19f0   : > { %3212 = vmatprep.subr.bf16.mxu0 %v6755_v42 }
0x1ab5   : > { %v2554_v63 = vpop.f32.mrb[64].mxu0 }
0x1ab6   : > { %v2563_v21 = vadd.f32 %v2554_v63, %v743_v13  ;;  %v2556_v52 = vpop.f32.mrb[65].mxu0 }
0x1ab7   : > { %v2565_v39 = vadd.f32 %v2556_v52, %v715_v47  ;;  %v2558_v18 = vpop.f32.mrb[66].mxu0 }
0x1ab8   : > { %5429 = vtanh.f32 %v2563_v21  ;;  %v2564_v8 = vadd.f32 %v2558_v18, %v747_v62  ;;  %v2560_v41 = vpop.f32.mrb[67].mxu0  ;;  %v4941_v28 = vmul.f32 -1.442695, %v2563_v21 }
0x1ab9   : > { %v2566_v50 = vadd.f32 %v2560_v41, %v719_v46  ;;  %5431 = vtanh.f32 %v2565_v39  ;;  %v4943_v49 = vmul.f32 -1.442695, %v2565_v39 }
0x1aba   : > { %5433 = vtanh.f32 %v2564_v8  ;;  %v4942_v9 = vmul.f32 -1.442695, %v2564_v8 }
0x1abb   : > { %5435 = vtanh.f32 %v2566_v50  ;;  %v4944_v20 = vmul.f32 -1.442695, %v2566_v50 }
0x1abc   : > { %5437 = vpow2.f32 %v4941_v28 }
0x1abd   : > { %5439 = vpow2.f32 %v4943_v49 }
0x1abe   : > { %5441 = vpow2.f32 %v4942_v9  ;;  %v7955_v9 = vld [vmem:[#allocation18_spill] sm:$0xff] }
0x1abf   : > { %5443 = vpow2.f32 %v4944_v20  ;;  %v753_v20 = vadd.f32 %v7955_v9, %v6110_v58 }
0x1ac2   : > { %v5430_v38 = vpop.eup %5429 }
0x1ac3   : > { %2599 = vrot.lane.b32.xlu0 %v5430_v38, %s5767_s11  ;;  %v5432_v26 = vpop.eup %5431 }
0x1ac4   : > { %v5434_v10 = vpop.eup %5433 }
0x1ac5   : > { %2601 = vrot.lane.b32.xlu1 %v5434_v10, %s5767_s11  ;;  %v5436_v44 = vpop.eup %5435 }
0x1ac6   : > { %v5438_v5 = vpop.eup %5437 }
0x1ac7   : > { %2621 = vrot.lane.b32.xlu0 %v5432_v26, %s5767_s11  ;;  %v2573_v29 = vadd.f32 1.0, %v5438_v5  ;;  %v5440_v35 = vpop.eup %5439  ;;  %v7956_v5 = vld [vmem:[#allocation16_spill] sm:$0xff] }
0x1ac8   : > { %v5442_v4 = vpop.eup %5441  ;;  %v2585_v37 = vadd.f32 1.0, %v5440_v35 }
0x1ac9   : > { %2623 = vrot.lane.b32.xlu1 %v5436_v44, %s5767_s11  ;;  %5445 = vrcp.f32 %v2573_v29  ;;  %v2574_v24 = vadd.f32 1.0, %v5442_v4  ;;  %v5444_v14 = vpop.eup %5443  ;;  %v705_v29 = vadd.f32 %v7956_v5, %v6234_v34  ;;  %v7957_v4 = vld [vmem:[#allocation19_spill] sm:$0xff] }
0x1aca   : > { %5447 = vrcp.f32 %v2585_v37  ;;  %v2586_v43 = vadd.f32 1.0, %v5444_v14  ;;  %v757_v37 = vadd.f32 %v7957_v4, %v6110_v58 }
0x1acb   : > { %5449 = vrcp.f32 %v2574_v24 }
0x1acc   : > { %5451 = vrcp.f32 %v2586_v43  ;;  %v7958_v43 = vld [vmem:[#allocation17_spill] sm:$0xff] }
0x1ad3   : > { %v5446_v16 = vpop.eup %5445 }
0x1ad4   : > { %v5448_v51 = vpop.eup %5447  ;;  %v2595_v30 = vmul.f32 %v5446_v16, %v6775_v31 }
0x1ad5   : > { %v5450_v27 = vpop.eup %5449  ;;  %v2617_v32 = vmul.f32 %v5448_v51, %v6780_v1 }
0x1ad6   : > { %v5452_v15 = vpop.eup %5451  ;;  %v2596_v61 = vmul.f32 %v5450_v27, %v6782_v25 }
0x1ad7   : > { %v2618_v31 = vmul.f32 %v5452_v15, %v6787_v23 }
0x1b35   : > { %v2600_v40 = vpop.permute.xlu0 %2599 }
0x1b36   : > { %v2605_v12 = vmul.f32 %v5446_v16, %v2600_v40 }
0x1b37   : > { %v2602_v45 = vpop.permute.xlu1 %2601 }
0x1b38   : > { %2609 = vrot.lane.b32.xlu0 %v2605_v12, %s5767_s11  ;;  %v2606_v53 = vmul.f32 %v5450_v27, %v2602_v45 }
0x1b39   : > { %v2622_v60 = vpop.permute.xlu0 %2621 }
0x1b3a   : > { %v2627_v55 = vmul.f32 %v5448_v51, %v2622_v60  ;;  %2611 = vrot.lane.b32.xlu1 %v2606_v53, %s5767_s11 }
0x1b3b   : > { %v2624_v57 = vpop.permute.xlu1 %2623 }
0x1b3c   : > { %2631 = vrot.lane.b32.xlu0 %v2627_v55, %s5767_s11  ;;  %v2628_v33 = vmul.f32 %v5452_v15, %v2624_v57 }
0x1b3e   : > { %2633 = vrot.lane.b32.xlu1 %v2628_v33, %s5767_s11 }
0x1baa   : > { %v2610_v0 = vpop.permute.xlu0 %2609 }
0x1bab   : > { %v6831_v36 = vadd.f32 %v2610_v0, %v2595_v30 }
0x1bac   : > { %v2612_v3 = vpop.permute.xlu1 %2611 }
0x1bad   : > { %5453 = vtanh.f32 %v6831_v36  ;;  %v6838_v6 = vadd.f32 %v2612_v3, %v2596_v61 }
0x1bae   : > { %v2632_v48 = vpop.permute.xlu0 %2631 }
0x1baf   : > { %v6836_v11 = vadd.f32 %v2632_v48, %v2617_v32 }
0x1bb0   : > { %v2634_v13 = vpop.permute.xlu1 %2633 }
0x1bb1   : > { %5455 = vtanh.f32 %v6836_v11  ;;  %v6843_v47 = vadd.f32 %v2634_v13, %v2618_v31 }
0x1bb2   : > { %5457 = vtanh.f32 %v6838_v6 }
0x1bb3   : > { %5459 = vtanh.f32 %v6843_v47 }
0x1bb7   : > { %v5454_v1 = vpop.eup %5453 }
0x1bb8   : > { %2643 = vrot.lane.b32.xlu0 %v5454_v1, %s5767_s11 }
0x1bbb   : > { %v5456_v25 = vpop.eup %5455 }
0x1bbc   : > { %v5458_v63 = vpop.eup %5457  ;;  %2655 = vrot.lane.b32.xlu0 %v5456_v25, %s5767_s11 }
0x1bbd   : > { %2645 = vrot.lane.b32.xlu1 %v5458_v63, %s5767_s11  ;;  %v5460_v62 = vpop.eup %5459 }
0x1bc1   : > { %2657 = vrot.lane.b32.xlu1 %v5460_v62, %s5767_s11 }
0x1c2a   : > { %v2644_v21 = vpop.permute.xlu0 %2643 }
0x1c2b   : > { %v2649_v52 = vmul.f32 %v5446_v16, %v2644_v21  ;;  %v709_v16 = vadd.f32 %v7958_v43, %v6234_v34 }
0x1c2d   : > { %2665 = vrot.lane.b32.xlu0 %v2649_v52, %s5768_s14 }
0x1c2e   : > { %v2656_v23 = vpop.permute.xlu0 %2655 }
0x1c2f   : > { %v2646_v46 = vpop.permute.xlu1 %2645  ;;  %v2661_v39 = vmul.f32 %v5448_v51, %v2656_v23 }
0x1c30   : > { %v2650_v18 = vmul.f32 %v5450_v27, %v2646_v46 }
0x1c31   : > { %2675 = vrot.lane.b32.xlu0 %v2661_v39, %s5769_s15 }
0x1c32   : > { %2667 = vrot.lane.b32.xlu1 %v2650_v18, %s5768_s14 }
0x1c33   : > { %v2658_v8 = vpop.permute.xlu1 %2657 }
0x1c34   : > { %v2662_v41 = vmul.f32 %v5452_v15, %v2658_v8 }
0x1c36   : > { %2677 = vrot.lane.b32.xlu1 %v2662_v41, %s5769_s15 }
0x1c9f   : > { %v2666_v50 = vpop.permute.xlu0 %2665 }
0x1ca0   : > { %2671 = vst.msk [vmem:[#allocation3 + $0x90] sm:$0xff] %vm1083_vm0, %v2666_v50 }
0x1ca3   : > { %v2676_v38 = vpop.permute.xlu0 %2675 }
0x1ca4   : > { %v2668_v26 = vpop.permute.xlu1 %2667  ;;  %2681 = vst.msk [vmem:[#allocation3 + $0x60] sm:$0xff] %vm1095_vm1, %v2676_v38  ;;  %v2683_v44 = vsel %vm1083_vm0, %v2666_v50, %v2676_v38 }
0x1ca5   : > { %2672 = vst.msk [vmem:[#allocation3 + $0x98] sm:$0xff] %vm1083_vm0, %v2668_v26 }
0x1ca8   : > { %v2678_v10 = vpop.permute.xlu1 %2677 }
0x1ca9   : > { %2682 = vst.msk [vmem:[#allocation3 + $0x68] sm:$0xff] %vm1095_vm1, %v2678_v10  ;;  %v2684_v28 = vsel %vm1083_vm0, %v2668_v26, %v2678_v10 }
0x1caa   : > { %v2689_v49 = vpack.c.bf16 %v2684_v28, %v2683_v44 }
0x1cac   : > { %4945 = vmatmul.mubr.msk.bf16.vlgmr.msra.gmra.mrb[36].mxu1 %vm928_vm2, %v2689_v49 }
0x1cad   : > { %3040 = vmatpush1.bf16.msra.mxu1 %v6712_v56  ;;  %3071 = vmatprep.mubr.bf16.mxu1 %v7954_v59 }
0x1cae   : > { %3041 = vmatprep.subr.bf16.mxu1 %v6719_v7 }
0x1cb1   : > { %3042 = vmatpush1.bf16.msra.mxu1 %v6725_v22 }
0x1cb2   : > { %3043 = vmatprep.subr.bf16.mxu1 %v6731_v17 }
0x1cb5   : > { %3044 = vmatpush1.bf16.msra.mxu1 %v6737_v54 }
0x1cb6   : > { %3045 = vmatprep.subr.bf16.mxu1 %v6743_v19 }
0x1cb9   : > { %3046 = vmatpush1.bf16.msra.mxu1 %v6749_v2 }
0x1cba   : > { %3385 = vmatprep.subr.bf16.mxu1 %v6755_v42 }
0x1d7f   : > { %v2727_v35 = vpop.f32.mrb[36].mxu1 }
0x1d80   : > { %v2736_v24 = vadd.f32 %v2727_v35, %v753_v20  ;;  %v2729_v14 = vpop.f32.mrb[37].mxu1 }
0x1d81   : > { %v2738_v40 = vadd.f32 %v2729_v14, %v705_v29  ;;  %v2731_v12 = vpop.f32.mrb[38].mxu1 }
0x1d82   : > { %5461 = vtanh.f32 %v2736_v24  ;;  %v2737_v51 = vadd.f32 %v2731_v12, %v757_v37  ;;  %v2733_v60 = vpop.f32.mrb[39].mxu1  ;;  %v4946_v57 = vmul.f32 -1.442695, %v2736_v24 }
0x1d83   : > { %v2739_v27 = vadd.f32 %v2733_v60, %v709_v16  ;;  %5463 = vtanh.f32 %v2738_v40  ;;  %v4948_v33 = vmul.f32 -1.442695, %v2738_v40 }
0x1d84   : > { %5465 = vtanh.f32 %v2737_v51  ;;  %v4947_v30 = vmul.f32 -1.442695, %v2737_v51 }
0x1d85   : > { %5467 = vtanh.f32 %v2739_v27  ;;  %v4949_v0 = vmul.f32 -1.442695, %v2739_v27 }
0x1d86   : > { %5469 = vpow2.f32 %v4946_v57 }
0x1d87   : > { %5471 = vpow2.f32 %v4948_v33 }
0x1d88   : > { %5473 = vpow2.f32 %v4947_v30  ;;  %v7959_v30 = vld [vmem:[#allocation20_spill] sm:$0xff] }
0x1d89   : > { %5475 = vpow2.f32 %v4949_v0  ;;  %v763_v0 = vadd.f32 %v7959_v30, %v6110_v58 }
0x1d8c   : > { %v5462_v45 = vpop.eup %5461 }
0x1d8d   : > { %2772 = vrot.lane.b32.xlu0 %v5462_v45, %s5767_s11  ;;  %v5464_v55 = vpop.eup %5463 }
0x1d8e   : > { %v5466_v53 = vpop.eup %5465 }
0x1d8f   : > { %2774 = vrot.lane.b32.xlu1 %v5466_v53, %s5767_s11  ;;  %v5468_v15 = vpop.eup %5467 }
0x1d90   : > { %v5470_v32 = vpop.eup %5469 }
0x1d91   : > { %2794 = vrot.lane.b32.xlu0 %v5464_v55, %s5767_s11  ;;  %v2746_v61 = vadd.f32 1.0, %v5470_v32  ;;  %v5472_v48 = vpop.eup %5471  ;;  %v7960_v32 = vld [vmem:[#allocation14_spill] sm:$0xff] }
0x1d92   : > { %v5474_v3 = vpop.eup %5473  ;;  %v2758_v31 = vadd.f32 1.0, %v5472_v48 }
0x1d93   : > { %2796 = vrot.lane.b32.xlu1 %v5468_v15, %s5767_s11  ;;  %5477 = vrcp.f32 %v2746_v61  ;;  %v2747_v13 = vadd.f32 1.0, %v5474_v3  ;;  %v5476_v1 = vpop.eup %5475  ;;  %v695_v61 = vadd.f32 %v7960_v32, %v6234_v34  ;;  %v7961_v3 = vld [vmem:[#allocation21_spill] sm:$0xff] }
0x1d94   : > { %5479 = vrcp.f32 %v2758_v31  ;;  %v2759_v25 = vadd.f32 1.0, %v5476_v1  ;;  %v767_v31 = vadd.f32 %v7961_v3, %v6110_v58 }
0x1d95   : > { %5481 = vrcp.f32 %v2747_v13 }
0x1d96   : > { %5483 = vrcp.f32 %v2759_v25  ;;  %v7962_v25 = vld [vmem:[#allocation15_spill] sm:$0xff] }
0x1d9d   : > { %v5478_v63 = vpop.eup %5477 }
0x1d9e   : > { %v5480_v52 = vpop.eup %5479  ;;  %v2768_v26 = vmul.f32 %v5478_v63, %v6831_v36 }
0x1d9f   : > { %v5482_v46 = vpop.eup %5481  ;;  %v2790_v28 = vmul.f32 %v5480_v52, %v6836_v11 }
0x1da0   : > { %v5484_v41 = vpop.eup %5483  ;;  %v2769_v49 = vmul.f32 %v5482_v46, %v6838_v6 }
0x1da1   : > { %v2791_v36 = vmul.f32 %v5484_v41, %v6843_v47 }
0x1dff   : > { %v2773_v62 = vpop.permute.xlu0 %2772 }
0x1e00   : > { %v2778_v21 = vmul.f32 %v5478_v63, %v2773_v62 }
0x1e01   : > { %v2775_v39 = vpop.permute.xlu1 %2774 }
0x1e02   : > { %2782 = vrot.lane.b32.xlu0 %v2778_v21, %s5767_s11  ;;  %v2779_v8 = vmul.f32 %v5482_v46, %v2775_v39 }
0x1e03   : > { %v2795_v23 = vpop.permute.xlu0 %2794 }
0x1e04   : > { %v2800_v18 = vmul.f32 %v5480_v52, %v2795_v23  ;;  %2784 = vrot.lane.b32.xlu1 %v2779_v8, %s5767_s11 }
0x1e05   : > { %v2797_v50 = vpop.permute.xlu1 %2796 }
0x1e06   : > { %2804 = vrot.lane.b32.xlu0 %v2800_v18, %s5767_s11  ;;  %v2801_v38 = vmul.f32 %v5484_v41, %v2797_v50 }
0x1e08   : > { %2806 = vrot.lane.b32.xlu1 %v2801_v38, %s5767_s11 }
0x1e74   : > { %v2783_v10 = vpop.permute.xlu0 %2782 }
0x1e75   : > { %v6887_v44 = vadd.f32 %v2783_v10, %v2768_v26 }
0x1e76   : > { %v2785_v20 = vpop.permute.xlu1 %2784 }
0x1e77   : > { %5485 = vtanh.f32 %v6887_v44  ;;  %v6894_v29 = vadd.f32 %v2785_v20, %v2769_v49 }
0x1e78   : > { %v2805_v9 = vpop.permute.xlu0 %2804 }
0x1e79   : > { %v6892_v5 = vadd.f32 %v2805_v9, %v2790_v28 }
0x1e7a   : > { %v2807_v35 = vpop.permute.xlu1 %2806 }
0x1e7b   : > { %5487 = vtanh.f32 %v6892_v5  ;;  %v6899_v4 = vadd.f32 %v2807_v35, %v2791_v36 }
0x1e7c   : > { %5489 = vtanh.f32 %v6894_v29 }
0x1e7d   : > { %5491 = vtanh.f32 %v6899_v4 }
0x1e81   : > { %v5486_v11 = vpop.eup %5485 }
0x1e82   : > { %2816 = vrot.lane.b32.xlu0 %v5486_v11, %s5767_s11 }
0x1e85   : > { %v5488_v6 = vpop.eup %5487 }
0x1e86   : > { %v5490_v37 = vpop.eup %5489  ;;  %2828 = vrot.lane.b32.xlu0 %v5488_v6, %s5767_s11 }
0x1e87   : > { %2818 = vrot.lane.b32.xlu1 %v5490_v37, %s5767_s11  ;;  %v5492_v24 = vpop.eup %5491 }
0x1e8b   : > { %2830 = vrot.lane.b32.xlu1 %v5492_v24, %s5767_s11 }
0x1ef4   : > { %v2817_v14 = vpop.permute.xlu0 %2816 }
0x1ef5   : > { %v2822_v43 = vmul.f32 %v5478_v63, %v2817_v14  ;;  %v699_v63 = vadd.f32 %v7962_v25, %v6234_v34 }
0x1ef7   : > { %2838 = vrot.lane.b32.xlu0 %v2822_v43, %s5768_s14 }
0x1ef8   : > { %v2829_v47 = vpop.permute.xlu0 %2828 }
0x1ef9   : > { %v2819_v16 = vpop.permute.xlu1 %2818  ;;  %v2834_v40 = vmul.f32 %v5480_v52, %v2829_v47 }
0x1efa   : > { %v2823_v12 = vmul.f32 %v5482_v46, %v2819_v16 }
0x1efb   : > { %2848 = vrot.lane.b32.xlu0 %v2834_v40, %s5769_s15 }
0x1efc   : > { %2840 = vrot.lane.b32.xlu1 %v2823_v12, %s5768_s14 }
0x1efd   : > { %v2831_v51 = vpop.permute.xlu1 %2830 }
0x1efe   : > { %v2835_v60 = vmul.f32 %v5484_v41, %v2831_v51 }
0x1f00   : > { %2850 = vrot.lane.b32.xlu1 %v2835_v60, %s5769_s15 }
0x1f69   : > { %v2839_v27 = vpop.permute.xlu0 %2838 }
0x1f6a   : > { %2844 = vst.msk [vmem:[#allocation3 + $0xa0] sm:$0xff] %vm1083_vm0, %v2839_v27 }
0x1f6d   : > { %v2849_v45 = vpop.permute.xlu0 %2848 }
0x1f6e   : > { %v2841_v55 = vpop.permute.xlu1 %2840  ;;  %2854 = vst.msk [vmem:[#allocation3 + $0x50] sm:$0xff] %vm1095_vm1, %v2849_v45  ;;  %v2856_v15 = vsel %vm1083_vm0, %v2839_v27, %v2849_v45 }
0x1f6f   : > { %2845 = vst.msk [vmem:[#allocation3 + $0xa8] sm:$0xff] %vm1083_vm0, %v2841_v55 }
0x1f72   : > { %v2851_v53 = vpop.permute.xlu1 %2850 }
0x1f73   : > { %2855 = vst.msk [vmem:[#allocation3 + $0x58] sm:$0xff] %vm1095_vm1, %v2851_v53  ;;  %v2857_v57 = vsel %vm1083_vm0, %v2841_v55, %v2851_v53 }
0x1f74   : > { %v2862_v33 = vpack.c.bf16 %v2857_v57, %v2856_v15 }
0x1f76   : > { %4950 = vmatmul.mubr.msk.bf16.vlgmr.msra.gmra.mrb[68].mxu0 %vm928_vm2, %v2862_v33 }
0x1f77   : > { %3213 = vmatpush1.bf16.msra.mxu0 %v6712_v56  ;;  %3244 = vmatprep.mubr.bf16.mxu0 %v7954_v59 }
0x1f78   : > { %3214 = vmatprep.subr.bf16.mxu0 %v6719_v7 }
0x1f7b   : > { %3215 = vmatpush1.bf16.msra.mxu0 %v6725_v22 }
0x1f7c   : > { %3216 = vmatprep.subr.bf16.mxu0 %v6731_v17 }
0x1f7f   : > { %3217 = vmatpush1.bf16.msra.mxu0 %v6737_v54 }
0x1f80   : > { %3218 = vmatprep.subr.bf16.mxu0 %v6743_v19 }
0x1f83   : > { %3219 = vmatpush1.bf16.msra.mxu0 %v6749_v2 }
0x1f84   : > { %3558 = vmatprep.subr.bf16.mxu0 %v6755_v42 }
0x2049   : > { %v2900_v48 = vpop.f32.mrb[68].mxu0 }
0x204a   : > { %v2909_v13 = vadd.f32 %v2900_v48, %v763_v0  ;;  %v2902_v1 = vpop.f32.mrb[69].mxu0 }
0x204b   : > { %v2911_v62 = vadd.f32 %v2902_v1, %v695_v61  ;;  %v2904_v21 = vpop.f32.mrb[70].mxu0 }
0x204c   : > { %5493 = vtanh.f32 %v2909_v13  ;;  %v2910_v52 = vadd.f32 %v2904_v21, %v767_v31  ;;  %v2906_v42 = vpop.f32.mrb[71].mxu0  ;;  %v4951_v41 = vmul.f32 -1.442695, %v2909_v13 }
0x204d   : > { %v2912_v23 = vadd.f32 %v2906_v42, %v699_v63  ;;  %5495 = vtanh.f32 %v2911_v62  ;;  %v4953_v50 = vmul.f32 -1.442695, %v2911_v62 }
0x204e   : > { %5497 = vtanh.f32 %v2910_v52  ;;  %v4952_v38 = vmul.f32 -1.442695, %v2910_v52 }
0x204f   : > { %5499 = vtanh.f32 %v2912_v23  ;;  %v4954_v26 = vmul.f32 -1.442695, %v2912_v23 }
0x2050   : > { %5501 = vpow2.f32 %v4951_v41 }
0x2051   : > { %5503 = vpow2.f32 %v4953_v50  ;;  %v7963_v50 = vld [vmem:[#allocation22_spill] sm:$0xff] }
0x2052   : > { %5505 = vpow2.f32 %v4952_v38  ;;  %v773_v38 = vadd.f32 %v7963_v50, %v6110_v58 }
0x2053   : > { %5507 = vpow2.f32 %v4954_v26  ;;  %v7964_v26 = vld [vmem:[#allocation12_spill] sm:$0xff] }
0x2056   : > { %v5494_v46 = vpop.eup %5493 }
0x2057   : > { %2945 = vrot.lane.b32.xlu0 %v5494_v46, %s5767_s11  ;;  %v5496_v39 = vpop.eup %5495 }
0x2058   : > { %v5498_v18 = vpop.eup %5497 }
0x2059   : > { %2947 = vrot.lane.b32.xlu1 %v5498_v18, %s5767_s11  ;;  %v5500_v8 = vpop.eup %5499 }
0x205a   : > { %v5502_v10 = vpop.eup %5501 }
0x205b   : > { %2967 = vrot.lane.b32.xlu0 %v5496_v39, %s5767_s11  ;;  %v2919_v28 = vadd.f32 1.0, %v5502_v10  ;;  %v5504_v49 = vpop.eup %5503 }
0x205c   : > { %v5506_v9 = vpop.eup %5505  ;;  %v2931_v20 = vadd.f32 1.0, %v5504_v49 }
0x205d   : > { %2969 = vrot.lane.b32.xlu1 %v5500_v8, %s5767_s11  ;;  %5509 = vrcp.f32 %v2919_v28  ;;  %v2920_v36 = vadd.f32 1.0, %v5506_v9  ;;  %v5508_v35 = vpop.eup %5507  ;;  %v7965_v28 = vld [vmem:[#allocation23_spill] sm:$0xff] }
0x205e   : > { %5511 = vrcp.f32 %v2931_v20  ;;  %v2932_v11 = vadd.f32 1.0, %v5508_v35 }
0x205f   : > { %5513 = vrcp.f32 %v2920_v36 }
0x2060   : > { %5515 = vrcp.f32 %v2932_v11 }
0x2067   : > { %v5510_v6 = vpop.eup %5509 }
0x2068   : > { %v5512_v14 = vpop.eup %5511  ;;  %v2941_v45 = vmul.f32 %v5510_v6, %v6887_v44 }
0x2069   : > { %v5514_v47 = vpop.eup %5513  ;;  %v2963_v15 = vmul.f32 %v5512_v14, %v6892_v5 }
0x206a   : > { %v5516_v51 = vpop.eup %5515  ;;  %v2942_v57 = vmul.f32 %v5514_v47, %v6894_v29 }
0x206b   : > { %v2964_v44 = vmul.f32 %v5516_v51, %v6899_v4 }
0x20c9   : > { %v2946_v37 = vpop.permute.xlu0 %2945 }
0x20ca   : > { %v2951_v24 = vmul.f32 %v5510_v6, %v2946_v37 }
0x20cb   : > { %v2948_v16 = vpop.permute.xlu1 %2947 }
0x20cc   : > { %2955 = vrot.lane.b32.xlu0 %v2951_v24, %s5767_s11  ;;  %v2952_v12 = vmul.f32 %v5514_v47, %v2948_v16 }
0x20cd   : > { %v2968_v43 = vpop.permute.xlu0 %2967 }
0x20ce   : > { %v2973_v40 = vmul.f32 %v5512_v14, %v2968_v43  ;;  %2957 = vrot.lane.b32.xlu1 %v2952_v12, %s5767_s11 }
0x20cf   : > { %v2970_v60 = vpop.permute.xlu1 %2969 }
0x20d0   : > { %2977 = vrot.lane.b32.xlu0 %v2973_v40, %s5767_s11  ;;  %v2974_v27 = vmul.f32 %v5516_v51, %v2970_v60 }
0x20d2   : > { %2979 = vrot.lane.b32.xlu1 %v2974_v27, %s5767_s11 }
0x213e   : > { %v2956_v55 = vpop.permute.xlu0 %2955 }
0x213f   : > { %v6943_v53 = vadd.f32 %v2956_v55, %v2941_v45 }
0x2140   : > { %v2958_v30 = vpop.permute.xlu1 %2957 }
0x2141   : > { %5517 = vtanh.f32 %v6943_v53  ;;  %v6950_v32 = vadd.f32 %v2958_v30, %v2942_v57 }
0x2142   : > { %v2978_v33 = vpop.permute.xlu0 %2977 }
0x2143   : > { %v6948_v0 = vadd.f32 %v2978_v33, %v2963_v15 }
0x2144   : > { %v2980_v61 = vpop.permute.xlu1 %2979 }
0x2145   : > { %5519 = vtanh.f32 %v6948_v0  ;;  %v6955_v48 = vadd.f32 %v2980_v61, %v2964_v44 }
0x2146   : > { %5521 = vtanh.f32 %v6950_v32 }
0x2147   : > { %5523 = vtanh.f32 %v6955_v48 }
0x214b   : > { %v5518_v5 = vpop.eup %5517 }
0x214c   : > { %2989 = vrot.lane.b32.xlu0 %v5518_v5, %s5767_s11 }
0x214f   : > { %v5520_v29 = vpop.eup %5519 }
0x2150   : > { %v5522_v3 = vpop.eup %5521  ;;  %3001 = vrot.lane.b32.xlu0 %v5520_v29, %s5767_s11 }
0x2151   : > { %2991 = vrot.lane.b32.xlu1 %v5522_v3, %s5767_s11  ;;  %v5524_v31 = vpop.eup %5523 }
0x2155   : > { %3003 = vrot.lane.b32.xlu1 %v5524_v31, %s5767_s11 }
0x21be   : > { %v2990_v13 = vpop.permute.xlu0 %2989 }
0x21bf   : > { %v2995_v1 = vmul.f32 %v5510_v6, %v2990_v13 }
0x21c1   : > { %3011 = vrot.lane.b32.xlu0 %v2995_v1, %s5768_s14 }
0x21c2   : > { %v3002_v4 = vpop.permute.xlu0 %3001 }
0x21c3   : > { %v2992_v25 = vpop.permute.xlu1 %2991  ;;  %v3007_v63 = vmul.f32 %v5512_v14, %v3002_v4 }
0x21c4   : > { %v2996_v62 = vmul.f32 %v5514_v47, %v2992_v25 }
0x21c5   : > { %3021 = vrot.lane.b32.xlu0 %v3007_v63, %s5769_s15 }
0x21c6   : > { %3013 = vrot.lane.b32.xlu1 %v2996_v62, %s5768_s14 }
0x21c7   : > { %v3004_v21 = vpop.permute.xlu1 %3003 }
0x21c8   : > { %v3008_v52 = vmul.f32 %v5516_v51, %v3004_v21 }
0x21ca   : > { %3023 = vrot.lane.b32.xlu1 %v3008_v52, %s5769_s15 }
0x2233   : > { %v3012_v42 = vpop.permute.xlu0 %3011 }
0x2234   : > { %3017 = vst.msk [vmem:[#allocation3 + $0xb0] sm:$0xff] %vm1083_vm0, %v3012_v42 }
0x2237   : > { %v3022_v23 = vpop.permute.xlu0 %3021 }
0x2238   : > { %v3014_v46 = vpop.permute.xlu1 %3013  ;;  %3027 = vst.msk [vmem:[#allocation3 + $0x40] sm:$0xff] %vm1095_vm1, %v3022_v23  ;;  %v3029_v18 = vsel %vm1083_vm0, %v3012_v42, %v3022_v23 }
0x2239   : > { %3018 = vst.msk [vmem:[#allocation3 + $0xb8] sm:$0xff] %vm1083_vm0, %v3014_v46 }
0x223c   : > { %v3024_v39 = vpop.permute.xlu1 %3023 }
0x223d   : > { %3028 = vst.msk [vmem:[#allocation3 + $0x48] sm:$0xff] %vm1095_vm1, %v3024_v39  ;;  %v3030_v8 = vsel %vm1083_vm0, %v3014_v46, %v3024_v39 }
0x223e   : > { %v3035_v41 = vpack.c.bf16 %v3030_v8, %v3029_v18 }
0x2240   : > { %4955 = vmatmul.mubr.msk.bf16.vlgmr.msra.gmra.mrb[40].mxu1 %vm928_vm2, %v3035_v41 }
0x2241   : > { %3386 = vmatpush1.bf16.msra.mxu1 %v6712_v56  ;;  %3417 = vmatprep.mubr.bf16.mxu1 %v7954_v59  ;;  %v685_v56 = vadd.f32 %v7964_v26, %v6234_v34 }
0x2242   : > { %3387 = vmatprep.subr.bf16.mxu1 %v6719_v7  ;;  %v777_v7 = vadd.f32 %v7965_v28, %v6110_v58 }
0x2245   : > { %3388 = vmatpush1.bf16.msra.mxu1 %v6725_v22 }
0x2246   : > { %3389 = vmatprep.subr.bf16.mxu1 %v6731_v17  ;;  %v7966_v17 = vld [vmem:[#allocation13_spill] sm:$0xff] }
0x2247   : > { %v689_v9 = vadd.f32 %v7966_v17, %v6234_v34 }
0x2249   : > { %3390 = vmatpush1.bf16.msra.mxu1 %v6737_v54 }
0x224a   : > { %3391 = vmatprep.subr.bf16.mxu1 %v6743_v19 }
0x224d   : > { %3392 = vmatpush1.bf16.msra.mxu1 %v6749_v2 }
0x2313   : > { %v3073_v10 = vpop.f32.mrb[40].mxu1 }
0x2314   : > { %v3082_v49 = vadd.f32 %v3073_v10, %v773_v38  ;;  %v3075_v22 = vpop.f32.mrb[41].mxu1 }
0x2315   : > { %v3084_v54 = vadd.f32 %v3075_v22, %v685_v56  ;;  %v3077_v20 = vpop.f32.mrb[42].mxu1 }
0x2316   : > { %5525 = vtanh.f32 %v3082_v49  ;;  %v3083_v19 = vadd.f32 %v3077_v20, %v777_v7  ;;  %v3079_v2 = vpop.f32.mrb[43].mxu1  ;;  %v4956_v24 = vmul.f32 -1.442695, %v3082_v49 }
0x2317   : > { %v3085_v36 = vadd.f32 %v3079_v2, %v689_v9  ;;  %5527 = vtanh.f32 %v3084_v54  ;;  %v4958_v14 = vmul.f32 -1.442695, %v3084_v54  ;;  %v5733_v2 = vld [vmem:[%s7921_s3] ss:$8 sps:$4 sm:$0xff]  }
0x2318   : > { %5529 = vtanh.f32 %v3083_v19  ;;  %v4957_v43 = vmul.f32 -1.442695, %v3083_v19 }
0x2319   : > { %5531 = vtanh.f32 %v3085_v36  ;;  %v4959_v47 = vmul.f32 -1.442695, %v3085_v36  ;;  %v5734_v36 = vld [vmem:[%s7921_s3 + $0x14] ss:$8 sps:$4 sm:$0xff]  }
0x231a   : > { %5533 = vpow2.f32 %v4956_v24  ;;  %v7967_v24 = vld [vmem:[#allocation24_spill] sm:$0xff] }
0x231b   : > { %5535 = vpow2.f32 %v4958_v14  ;;  %v783_v14 = vadd.f32 %v7967_v24, %v6110_v58 }
0x231c   : > { %5537 = vpow2.f32 %v4957_v43  ;;  %v7968_v43 = vld [vmem:[#allocation10_spill] sm:$0xff] }
0x231d   : > { %5539 = vpow2.f32 %v4959_v47  ;;  %v675_v47 = vadd.f32 %v7968_v43, %v6234_v34 }
0x2320   : > { %v5526_v35 = vpop.eup %5525 }
0x2321   : > { %3118 = vrot.lane.b32.xlu0 %v5526_v35, %s5767_s11  ;;  %v5528_v11 = vpop.eup %5527  ;;  %v5735_v35 = vld [vmem:[%s7921_s3 + $0x10] ss:$8 sps:$4 sm:$0xff]  }
0x2322   : > { %v5530_v6 = vpop.eup %5529 }
0x2323   : > { %3120 = vrot.lane.b32.xlu1 %v5530_v6, %s5767_s11  ;;  %v5532_v37 = vpop.eup %5531  ;;  %v5737_v6 = vld [vmem:[%s7921_s3 + $0x20] ss:$8 sps:$4 sm:$0xff]  }
0x2324   : > { %v5534_v16 = vpop.eup %5533 }
0x2325   : > { %3140 = vrot.lane.b32.xlu0 %v5528_v11, %s5767_s11  ;;  %v3092_v40 = vadd.f32 1.0, %v5534_v16  ;;  %v5536_v12 = vpop.eup %5535  ;;  %v5736_v11 = vld [vmem:[%s7921_s3 + $0x24] ss:$8 sps:$4 sm:$0xff]  }
0x2326   : > { %v5538_v51 = vpop.eup %5537  ;;  %v3104_v60 = vadd.f32 1.0, %v5536_v12 }
0x2327   : > { %3142 = vrot.lane.b32.xlu1 %v5532_v37, %s5767_s11  ;;  %5541 = vrcp.f32 %v3092_v40  ;;  %v3093_v27 = vadd.f32 1.0, %v5538_v51  ;;  %v5540_v45 = vpop.eup %5539  ;;  %v5739_v37 = vld [vmem:[%s7921_s3 + $0x30] ss:$8 sps:$4 sm:$0xff]  }
0x2328   : > { %5543 = vrcp.f32 %v3104_v60  ;;  %v3105_v55 = vadd.f32 1.0, %v5540_v45  ;;  %v7969_v40 = vld [vmem:[#allocation25_spill] sm:$0xff] }
0x2329   : > { %5545 = vrcp.f32 %v3093_v27  ;;  %v787_v12 = vadd.f32 %v7969_v40, %v6110_v58  ;;  %v7970_v27 = vld [vmem:[#allocation11_spill] sm:$0xff] }
0x232a   : > { %5547 = vrcp.f32 %v3105_v55  ;;  %v679_v45 = vadd.f32 %v7970_v27, %v6234_v34 }
0x2331   : > { %v5542_v15 = vpop.eup %5541 }
0x2332   : > { %v5544_v30 = vpop.eup %5543  ;;  %v3114_v4 = vmul.f32 %v5542_v15, %v6943_v53 }
0x2333   : > { %v5546_v61 = vpop.eup %5545  ;;  %v3136_v62 = vmul.f32 %v5544_v30, %v6948_v0 }
0x2334   : > { %v5548_v31 = vpop.eup %5547  ;;  %v3115_v21 = vmul.f32 %v5546_v61, %v6950_v32 }
0x2335   : > { %v3137_v53 = vmul.f32 %v5548_v31, %v6955_v48 }
0x2393   : > { %v3119_v57 = vpop.permute.xlu0 %3118 }
0x2394   : > { %v3124_v33 = vmul.f32 %v5542_v15, %v3119_v57 }
0x2395   : > { %v3121_v5 = vpop.permute.xlu1 %3120 }
0x2396   : > { %3128 = vrot.lane.b32.xlu0 %v3124_v33, %s5767_s11  ;;  %v3125_v3 = vmul.f32 %v5546_v61, %v3121_v5 }
0x2397   : > { %v3141_v44 = vpop.permute.xlu0 %3140 }
0x2398   : > { %v3146_v29 = vmul.f32 %v5544_v30, %v3141_v44  ;;  %3130 = vrot.lane.b32.xlu1 %v3125_v3, %s5767_s11 }
0x2399   : > { %v3143_v13 = vpop.permute.xlu1 %3142 }
0x239a   : > { %3150 = vrot.lane.b32.xlu0 %v3146_v29, %s5767_s11  ;;  %v3147_v1 = vmul.f32 %v5548_v31, %v3143_v13 }
0x239c   : > { %3152 = vrot.lane.b32.xlu1 %v3147_v1, %s5767_s11 }
0x2408   : > { %v3129_v25 = vpop.permute.xlu0 %3128 }
0x2409   : > { %v6998_v63 = vadd.f32 %v3129_v25, %v3114_v4 }
0x240a   : > { %v3131_v42 = vpop.permute.xlu1 %3130 }
0x240b   : > { %5549 = vtanh.f32 %v6998_v63  ;;  %v7005_v46 = vadd.f32 %v3131_v42, %v3115_v21 }
0x240c   : > { %v3151_v52 = vpop.permute.xlu0 %3150 }
0x240d   : > { %v7003_v23 = vadd.f32 %v3151_v52, %v3136_v62 }
0x240e   : > { %v3153_v39 = vpop.permute.xlu1 %3152 }
0x240f   : > { %5551 = vtanh.f32 %v7003_v23  ;;  %v7010_v18 = vadd.f32 %v3153_v39, %v3137_v53 }
0x2410   : > { %5553 = vtanh.f32 %v7005_v46 }
0x2411   : > { %5555 = vtanh.f32 %v7010_v18 }
0x2415   : > { %v5550_v0 = vpop.eup %5549 }
0x2416   : > { %3162 = vrot.lane.b32.xlu0 %v5550_v0, %s5767_s11 }
0x2419   : > { %v5552_v32 = vpop.eup %5551 }
0x241a   : > { %v5554_v8 = vpop.eup %5553  ;;  %3174 = vrot.lane.b32.xlu0 %v5552_v32, %s5767_s11 }
0x241b   : > { %3164 = vrot.lane.b32.xlu1 %v5554_v8, %s5767_s11  ;;  %v5556_v41 = vpop.eup %5555 }
0x241f   : > { %3176 = vrot.lane.b32.xlu1 %v5556_v41, %s5767_s11 }
0x2488   : > { %v3163_v50 = vpop.permute.xlu0 %3162 }
0x2489   : > { %v3168_v38 = vmul.f32 %v5542_v15, %v3163_v50 }
0x248b   : > { %3184 = vrot.lane.b32.xlu0 %v3168_v38, %s5768_s14 }
0x248c   : > { %v3175_v48 = vpop.permute.xlu0 %3174 }
0x248d   : > { %v3165_v26 = vpop.permute.xlu1 %3164  ;;  %v3180_v56 = vmul.f32 %v5544_v30, %v3175_v48 }
0x248e   : > { %v3169_v10 = vmul.f32 %v5546_v61, %v3165_v26 }
0x248f   : > { %3194 = vrot.lane.b32.xlu0 %v3180_v56, %s5769_s15 }
0x2490   : > { %3186 = vrot.lane.b32.xlu1 %v3169_v10, %s5768_s14 }
0x2491   : > { %v3177_v28 = vpop.permute.xlu1 %3176 }
0x2492   : > { %v3181_v7 = vmul.f32 %v5548_v31, %v3177_v28 }
0x2494   : > { %3196 = vrot.lane.b32.xlu1 %v3181_v7, %s5769_s15 }
0x24fd   : > { %v3185_v49 = vpop.permute.xlu0 %3184 }
0x24fe   : > { %3190 = vst.msk [vmem:[#allocation3 + $0xc0] sm:$0xff] %vm1083_vm0, %v3185_v49 }
0x2501   : > { %v3195_v22 = vpop.permute.xlu0 %3194 }
0x2502   : > { %v3187_v17 = vpop.permute.xlu1 %3186  ;;  %3200 = vst.msk [vmem:[#allocation3 + $0x30] sm:$0xff] %vm1095_vm1, %v3195_v22  ;;  %v3202_v54 = vsel %vm1083_vm0, %v3185_v49, %v3195_v22 }
0x2503   : > { %3191 = vst.msk [vmem:[#allocation3 + $0xc8] sm:$0xff] %vm1083_vm0, %v3187_v17 }
0x2506   : > { %v3197_v9 = vpop.permute.xlu1 %3196 }
0x2507   : > { %3201 = vst.msk [vmem:[#allocation3 + $0x38] sm:$0xff] %vm1095_vm1, %v3197_v9  ;;  %v3203_v20 = vsel %vm1083_vm0, %v3187_v17, %v3197_v9 }
0x2508   : > { %v3208_v19 = vpack.c.bf16 %v3203_v20, %v3202_v54 }
0x250a   : > { %4960 = vmatmul.mubr.msk.bf16.vlgmr.msra.gmra.mrb[72].mxu0 %vm928_vm2, %v3208_v19 }
0x250b   : > { %3559 = vmatpush1.bf16.msra.mxu0 %v5733_v2  ;;  %3590 = vmatprep.mubr.bf16.mxu0 %v7954_v59  ;;  %v5738_v59 = vld [vmem:[%s7921_s3 + $0x34] ss:$8 sps:$4 sm:$0xff]  }
0x250c   : > { %3560 = vmatprep.subr.bf16.mxu0 %v5734_v36 }
0x250f   : > { %3561 = vmatpush1.bf16.msra.mxu0 %v5735_v35 }
0x2510   : > { %3562 = vmatprep.subr.bf16.mxu0 %v5736_v11 }
0x2513   : > { %3563 = vmatpush1.bf16.msra.mxu0 %v5737_v6 }
0x2514   : > { %3564 = vmatprep.subr.bf16.mxu0 %v5738_v59 }
0x2517   : > { %3565 = vmatpush1.bf16.msra.mxu0 %v5739_v37 }
0x25dd   : > { %v3246_v16 = vpop.f32.mrb[72].mxu0 }
0x25de   : > { %v3255_v51 = vadd.f32 %v3246_v16, %v783_v14  ;;  %v3248_v60 = vpop.f32.mrb[73].mxu0 }
0x25df   : > { %v3257_v55 = vadd.f32 %v3248_v60, %v675_v47  ;;  %v3250_v15 = vpop.f32.mrb[74].mxu0 }
0x25e0   : > { %5557 = vtanh.f32 %v3255_v51  ;;  %v3256_v57 = vadd.f32 %v3250_v15, %v787_v12  ;;  %v3252_v33 = vpop.f32.mrb[75].mxu0  ;;  %v4961_v3 = vmul.f32 -1.442695, %v3255_v51 }
0x25e1   : > { %v3258_v30 = vadd.f32 %v3252_v33, %v679_v45  ;;  %5559 = vtanh.f32 %v3257_v55  ;;  %v4963_v31 = vmul.f32 -1.442695, %v3257_v55  ;;  %v3734_v55 = vld [vmem:[#allocation3 + $0x68] sm:$0xff] }
0x25e2   : > { %5561 = vtanh.f32 %v3256_v57  ;;  %v4962_v13 = vmul.f32 -1.442695, %v3256_v57 }
0x25e3   : > { %5563 = vtanh.f32 %v3258_v30  ;;  %v4964_v1 = vmul.f32 -1.442695, %v3258_v30  ;;  %v3733_v30 = vld [vmem:[#allocation3 + $0x60] sm:$0xff] }
0x25e4   : > { %5565 = vpow2.f32 %v4961_v3  ;;  %v3736_v3 = vld [vmem:[#allocation3 + $0x78] sm:$0xff] }
0x25e5   : > { %5567 = vpow2.f32 %v4963_v31  ;;  %v3738_v31 = vld [vmem:[#allocation3 + $0x88] sm:$0xff] }
0x25e6   : > { %5569 = vpow2.f32 %v4962_v13  ;;  %v3735_v13 = vld [vmem:[#allocation3 + $0x70] sm:$0xff] }
0x25e7   : > { %5571 = vpow2.f32 %v4964_v1  ;;  %v3760_v1 = vpack.c.bf16 %v3736_v3, %v3735_v13 }
0x25ea   : > { %v5558_v44 = vpop.eup %5557 }
0x25eb   : > { %3291 = vrot.lane.b32.xlu0 %v5558_v44, %s5767_s11  ;;  %v5560_v61 = vpop.eup %5559  ;;  %v7106_v44 = vld [vmem:[%s7922_s4 + $0x8] sm:$0xff]  }
0x25ec   : > { %v5562_v5 = vpop.eup %5561 }
0x25ed   : > { %3293 = vrot.lane.b32.xlu1 %v5562_v5, %s5767_s11  ;;  %v5564_v29 = vpop.eup %5563  ;;  %v7115_v5 = vld [vmem:[%s7922_s4 + $0x10] sm:$0xff]  }
0x25ee   : > { %v5566_v4 = vpop.eup %5565 }
0x25ef   : > { %3313 = vrot.lane.b32.xlu0 %v5560_v61, %s5767_s11  ;;  %v3265_v25 = vadd.f32 1.0, %v5566_v4  ;;  %v5568_v62 = vpop.eup %5567  ;;  %v3759_v61 = vpack.c.bf16 %v3734_v55, %v3733_v30  ;;  %v3737_v4 = vld [vmem:[#allocation3 + $0x80] sm:$0xff] }
0x25f0   : > { %v5570_v21 = vpop.eup %5569  ;;  %v3277_v52 = vadd.f32 1.0, %v5568_v62  ;;  %v3740_v62 = vld [vmem:[#allocation3 + $0x98] sm:$0xff] }
0x25f1   : > { %3315 = vrot.lane.b32.xlu1 %v5564_v29, %s5767_s11  ;;  %5573 = vrcp.f32 %v3265_v25  ;;  %v3266_v42 = vadd.f32 1.0, %v5570_v21  ;;  %v5572_v53 = vpop.eup %5571  ;;  %v7122_v29 = vld [vmem:[%s7922_s4 + $0x18] sm:$0xff]   ;;  %v3761_v25 = vpack.c.bf16 %v3738_v31, %v3737_v4  ;;  %v3742_v21 = vld [vmem:[#allocation3 + $0xa8] sm:$0xff] }
0x25f2   : > { %5575 = vrcp.f32 %v3277_v52  ;;  %v3278_v39 = vadd.f32 1.0, %v5572_v53  ;;  %v3739_v52 = vld [vmem:[#allocation3 + $0x90] sm:$0xff]  ;;  %v3741_v53 = vld [vmem:[#allocation3 + $0xa0] sm:$0xff] }
0x25f3   : > { %5577 = vrcp.f32 %v3266_v42  ;;  %v3762_v42 = vpack.c.bf16 %v3740_v62, %v3739_v52 }
0x25f4   : > { %5579 = vrcp.f32 %v3278_v39  ;;  %v3763_v39 = vpack.c.bf16 %v3742_v21, %v3741_v53 }
0x25fb   : > { %v5574_v0 = vpop.eup %5573 }
0x25fc   : > { %v5576_v41 = vpop.eup %5575  ;;  %v3287_v49 = vmul.f32 %v5574_v0, %v6998_v63 }
0x25fd   : > { %v5578_v38 = vpop.eup %5577  ;;  %v3309_v9 = vmul.f32 %v5576_v41, %v7003_v23 }
0x25fe   : > { %v5580_v10 = vpop.eup %5579  ;;  %v3288_v54 = vmul.f32 %v5578_v38, %v7005_v46 }
0x25ff   : > { %v3310_v63 = vmul.f32 %v5580_v10, %v7010_v18  ;;  %v7089_v18 = vld [vmem:[%s7922_s4] sm:$0xff]  }
0x2600   : > { %5065 = vmatprep.subr.bf16.mxu1 %v7089_v18  ;;  %5025 = vmatprep.subr.bf16.mxu0 %v7089_v18 }
0x265d   : > { %v3292_v32 = vpop.permute.xlu0 %3291 }
0x265e   : > { %v3297_v8 = vmul.f32 %v5574_v0, %v3292_v32  ;;  %v3746_v32 = vld [vmem:[#allocation3 + $0xc8] sm:$0xff] }
0x265f   : > { %v3294_v48 = vpop.permute.xlu1 %3293 }
0x2660   : > { %3301 = vrot.lane.b32.xlu0 %v3297_v8, %s5767_s11  ;;  %v3298_v56 = vmul.f32 %v5578_v38, %v3294_v48  ;;  %v3743_v8 = vld [vmem:[#allocation3 + $0xb0] sm:$0xff] }
0x2661   : > { %v3314_v50 = vpop.permute.xlu0 %3313 }
0x2662   : > { %v3319_v26 = vmul.f32 %v5576_v41, %v3314_v50  ;;  %3303 = vrot.lane.b32.xlu1 %v3298_v56, %s5767_s11  ;;  %v3745_v50 = vld [vmem:[#allocation3 + $0xc0] sm:$0xff] }
0x2663   : > { %v3316_v28 = vpop.permute.xlu1 %3315 }
0x2664   : > { %3323 = vrot.lane.b32.xlu0 %v3319_v26, %s5767_s11  ;;  %v3320_v7 = vmul.f32 %v5580_v10, %v3316_v28 }
0x2666   : > { %3325 = vrot.lane.b32.xlu1 %v3320_v7, %s5767_s11  ;;  %v7972_v7 = vld [vmem:[#allocation8_spill] sm:$0xff] }
0x26d2   : > { %v3302_v22 = vpop.permute.xlu0 %3301 }
0x26d3   : > { %v7067_v17 = vadd.f32 %v3302_v22, %v3287_v49  ;;  %v665_v49 = vadd.f32 %v7972_v7, %v6234_v34 }
0x26d4   : > { %v3304_v19 = vpop.permute.xlu1 %3303 }
0x26d5   : > { %5581 = vtanh.f32 %v7067_v17  ;;  %v7074_v36 = vadd.f32 %v3304_v19, %v3288_v54 }
0x26d6   : > { %v3324_v20 = vpop.permute.xlu0 %3323 }
0x26d7   : > { %v7072_v2 = vadd.f32 %v3324_v20, %v3309_v9  ;;  %v7973_v9 = vld [vmem:[#allocation27_spill] sm:$0xff] }
0x26d8   : > { %v3326_v35 = vpop.permute.xlu1 %3325  ;;  %v797_v54 = vadd.f32 %v7973_v9, %v6110_v58 }
0x26d9   : > { %5583 = vtanh.f32 %v7072_v2  ;;  %v7079_v11 = vadd.f32 %v3326_v35, %v3310_v63  ;;  %v7974_v63 = vld [vmem:[#allocation9_spill] sm:$0xff] }
0x26da   : > { %5585 = vtanh.f32 %v7074_v36  ;;  %v669_v35 = vadd.f32 %v7974_v63, %v6234_v34 }
0x26db   : > { %5587 = vtanh.f32 %v7079_v11 }
0x26df   : > { %v5582_v23 = vpop.eup %5581 }
0x26e0   : > { %3335 = vrot.lane.b32.xlu0 %v5582_v23, %s5767_s11 }
0x26e3   : > { %v5584_v46 = vpop.eup %5583 }
0x26e4   : > { %v5586_v6 = vpop.eup %5585  ;;  %3347 = vrot.lane.b32.xlu0 %v5584_v46, %s5767_s11 }
0x26e5   : > { %3337 = vrot.lane.b32.xlu1 %v5586_v6, %s5767_s11  ;;  %v5588_v59 = vpop.eup %5587 }
0x26e9   : > { %3349 = vrot.lane.b32.xlu1 %v5588_v59, %s5767_s11 }
0x2752   : > { %v3336_v37 = vpop.permute.xlu0 %3335 }
0x2753   : > { %v3341_v24 = vmul.f32 %v5574_v0, %v3336_v37  ;;  %v3744_v0 = vld [vmem:[#allocation3 + $0xb8] sm:$0xff] }
0x2755   : > { %3357 = vrot.lane.b32.xlu0 %v3341_v24, %s5768_s14 }
0x2756   : > { %v3348_v14 = vpop.permute.xlu0 %3347 }
0x2757   : > { %v3338_v43 = vpop.permute.xlu1 %3337  ;;  %v3353_v47 = vmul.f32 %v5576_v41, %v3348_v14  ;;  %v3764_v41 = vpack.c.bf16 %v3744_v0, %v3743_v8 }
0x2758   : > { %v3342_v16 = vmul.f32 %v5578_v38, %v3338_v43  ;;  %v3765_v38 = vpack.c.bf16 %v3746_v32, %v3745_v50 }
0x2759   : > { %3367 = vrot.lane.b32.xlu0 %v3353_v47, %s5769_s15 }
0x275a   : > { %3359 = vrot.lane.b32.xlu1 %v3342_v16, %s5768_s14 }
0x275b   : > { %v3350_v40 = vpop.permute.xlu1 %3349 }
0x275c   : > { %v3354_v12 = vmul.f32 %v5580_v10, %v3350_v40  ;;  %v7971_v10 = vld [vmem:[#allocation26_spill] sm:$0xff] }
0x275d   : > { %v793_v28 = vadd.f32 %v7971_v10, %v6110_v58 }
0x275e   : > { %3369 = vrot.lane.b32.xlu1 %v3354_v12, %s5769_s15 }
0x27c7   : > { %v3358_v51 = vpop.permute.xlu0 %3357 }
0x27c8   : > { %3363 = vst.msk [vmem:[#allocation3 + $0xd0] sm:$0xff] %vm1083_vm0, %v3358_v51 }
0x27cb   : > { %v3368_v60 = vpop.permute.xlu0 %3367 }
0x27cc   : > { %v3360_v27 = vpop.permute.xlu1 %3359  ;;  %3373 = vst.msk [vmem:[#allocation3 + $0x20] sm:$0xff] %vm1095_vm1, %v3368_v60  ;;  %v3375_v15 = vsel %vm1083_vm0, %v3358_v51, %v3368_v60 }
0x27cd   : > { %3364 = vst.msk [vmem:[#allocation3 + $0xd8] sm:$0xff] %vm1083_vm0, %v3360_v27 }
0x27cf   : > { %v3747_v26 = vld [vmem:[#allocation3 + $0xd0] sm:$0xff] }
0x27d0   : > { %v3370_v45 = vpop.permute.xlu1 %3369 }
0x27d1   : > { %3374 = vst.msk [vmem:[#allocation3 + $0x28] sm:$0xff] %vm1095_vm1, %v3370_v45  ;;  %v3376_v57 = vsel %vm1083_vm0, %v3360_v27, %v3370_v45 }
0x27d2   : > { %v3381_v33 = vpack.c.bf16 %v3376_v57, %v3375_v15 }
0x27d4   : > { %4965 = vmatmul.mubr.msk.bf16.vlgmr.msra.gmra.mrb[44].mxu1 %vm928_vm2, %v3381_v33  ;;  %v3748_v48 = vld [vmem:[#allocation3 + $0xd8] sm:$0xff] }
0x27d5   : > { %5069 = vmatpush3.bf16.msra.mxu1 %v7089_v18  ;;  %5045 = vmatprep.mubr.msk.bf16.mxu1 %vm928_vm2, %v3759_v61  ;;  %v3766_v56 = vpack.c.bf16 %v3748_v48, %v3747_v26 }
0x27d6   : > { %5066 = vmatprep.subr.bf16.mxu1 %v7106_v44 }
0x27d9   : > { %5070 = vmatpush3.bf16.msra.mxu1 %v7106_v44 }
0x27da   : > { %5067 = vmatprep.subr.bf16.mxu1 %v7115_v5 }
0x27dd   : > { %5071 = vmatpush3.bf16.msra.mxu1 %v7115_v5 }
0x27de   : > { %5068 = vmatprep.subr.bf16.mxu1 %v7122_v29 }
0x27e1   : > { %5072 = vmatpush3.bf16.msra.mxu1 %v7122_v29 }
0x27e4   : > { %5046 = vmatmul.mubr.msk.bf16.vlgmr.msra.gmra.mrb[48].mxu1 %vm928_vm2, %v3760_v1 }
0x27e5   : > { %5049 = vmatprep.mubr.msk.bf16.mxu1 %vm928_vm2, %v3761_v25 }
0x27ec   : > { %5050 = vmatmul.mubr.msk.bf16.gmra.mrb[52].mxu1 %vm928_vm2, %v3762_v42 }
0x27ed   : > { %5053 = vmatprep.mubr.msk.bf16.mxu1 %vm928_vm2, %v3763_v39 }
0x27f4   : > { %5054 = vmatmul.mubr.msk.bf16.gmra.mrb[56].mxu1 %vm928_vm2, %v3764_v41 }
0x27f5   : > { %5057 = vmatprep.mubr.msk.bf16.mxu1 %vm928_vm2, %v3765_v38 }
0x27fc   : > { %5058 = vmatmul.mubr.msk.bf16.gmra.mrb[60].mxu1 %vm928_vm2, %v3766_v56 }
0x28a7   : > { %v3419_v22 = vpop.f32.mrb[44].mxu1 }
0x28a8   : > { %v3428_v20 = vadd.f32 %v3419_v22, %v793_v28  ;;  %v3421_v19 = vpop.f32.mrb[45].mxu1 }
0x28a9   : > { %v3430_v23 = vadd.f32 %v3421_v19, %v665_v49  ;;  %v3423_v46 = vpop.f32.mrb[46].mxu1 }
0x28aa   : > { %5589 = vtanh.f32 %v3428_v20  ;;  %v3429_v6 = vadd.f32 %v3423_v46, %v797_v54  ;;  %v3425_v59 = vpop.f32.mrb[47].mxu1  ;;  %v4966_v1 = vmul.f32 -1.442695, %v3428_v20 }
0x28ab   : > { %v3431_v37 = vadd.f32 %v3425_v59, %v669_v35  ;;  %5591 = vtanh.f32 %v3430_v23  ;;  %v4968_v4 = vmul.f32 -1.442695, %v3430_v23 }
0x28ac   : > { %5593 = vtanh.f32 %v3429_v6  ;;  %v4967_v25 = vmul.f32 -1.442695, %v3429_v6 }
0x28ad   : > { %5595 = vtanh.f32 %v3431_v37  ;;  %v4969_v62 = vmul.f32 -1.442695, %v3431_v37 }
0x28ae   : > { %5597 = vpow2.f32 %v4966_v1 }
0x28af   : > { %5599 = vpow2.f32 %v4968_v4 }
0x28b0   : > { %5601 = vpow2.f32 %v4967_v25 }
0x28b1   : > { %5603 = vpow2.f32 %v4969_v62 }
0x28b4   : > { %v5590_v24 = vpop.eup %5589 }
0x28b5   : > { %3464 = vrot.lane.b32.xlu0 %v5590_v24, %s5767_s11  ;;  %v5592_v43 = vpop.eup %5591 }
0x28b6   : > { %v5594_v16 = vpop.eup %5593 }
0x28b7   : > { %v7143_v14 = vpop.f32.mrb[48].mxu1  ;;  %3466 = vrot.lane.b32.xlu1 %v5594_v16, %s5767_s11  ;;  %v5596_v51 = vpop.eup %5595 }
0x28b8   : > { %v7145_v47 = vpop.f32.mrb[49].mxu1  ;;  %v5598_v21 = vpop.eup %5597 }
0x28b9   : > { %v7147_v40 = vpop.f32.mrb[50].mxu1  ;;  %3486 = vrot.lane.b32.xlu0 %v5592_v43, %s5767_s11  ;;  %v3438_v52 = vadd.f32 1.0, %v5598_v21  ;;  %v5600_v42 = vpop.eup %5599 }
0x28ba   : > { %v7151_v12 = vpop.f32.mrb[51].mxu1  ;;  %v5602_v53 = vpop.eup %5601  ;;  %v3450_v39 = vadd.f32 1.0, %v5600_v42 }
0x28bb   : > { %3488 = vrot.lane.b32.xlu1 %v5596_v51, %s5767_s11  ;;  %5605 = vrcp.f32 %v3438_v52  ;;  %v3439_v0 = vadd.f32 1.0, %v5602_v53  ;;  %v5604_v32 = vpop.eup %5603 }
0x28bc   : > { %5607 = vrcp.f32 %v3450_v39  ;;  %v3451_v8 = vadd.f32 1.0, %v5604_v32 }
0x28bd   : > { %5609 = vrcp.f32 %v3439_v0 }
0x28be   : > { %5611 = vrcp.f32 %v3451_v8 }
0x28bf   : > { %v7154_v60 = vpop.f32.mrb[52].mxu1 }
0x28c0   : > { %v7156_v27 = vpop.f32.mrb[53].mxu1 }
0x28c1   : > { %v7158_v45 = vpop.f32.mrb[54].mxu1 }
0x28c2   : > { %v7160_v55 = vpop.f32.mrb[55].mxu1 }
0x28c5   : > { %v5606_v41 = vpop.eup %5605 }
0x28c6   : > { %v5608_v48 = vpop.eup %5607  ;;  %v3460_v54 = vmul.f32 %v5606_v41, %v7067_v17 }
0x28c7   : > { %v7162_v15 = vpop.f32.mrb[56].mxu1  ;;  %v5610_v56 = vpop.eup %5609  ;;  %v3482_v63 = vmul.f32 %v5608_v48, %v7072_v2 }
0x28c8   : > { %v7164_v57 = vpop.f32.mrb[57].mxu1  ;;  %v5612_v49 = vpop.eup %5611  ;;  %v3461_v35 = vmul.f32 %v5610_v56, %v7074_v36 }
0x28c9   : > { %v7166_v33 = vpop.f32.mrb[58].mxu1  ;;  %v3483_v17 = vmul.f32 %v5612_v49, %v7079_v11 }
0x28ca   : > { %v7168_v30 = vpop.f32.mrb[59].mxu1 }
0x28cf   : > { %v7170_v61 = vpop.f32.mrb[60].mxu1 }
0x28d0   : > { %v7172_v3 = vpop.f32.mrb[61].mxu1 }
0x28d1   : > { %v7174_v31 = vpop.f32.mrb[62].mxu1 }
0x28d2   : > { %v7176_v13 = vpop.f32.mrb[63].mxu1 }
0x2927   : > { %v3465_v50 = vpop.permute.xlu0 %3464 }
0x2928   : > { %v3470_v38 = vmul.f32 %v5606_v41, %v3465_v50 }
0x2929   : > { %v3467_v10 = vpop.permute.xlu1 %3466 }
0x292a   : > { %3474 = vrot.lane.b32.xlu0 %v3470_v38, %s5767_s11  ;;  %v3471_v7 = vmul.f32 %v5610_v56, %v3467_v10  ;;  %v7976_v10 = vld [vmem:[#allocation6_spill] sm:$0xff] }
0x292b   : > { %v3487_v26 = vpop.permute.xlu0 %3486 }
0x292c   : > { %v3492_v28 = vmul.f32 %v5608_v48, %v3487_v26  ;;  %3476 = vrot.lane.b32.xlu1 %v3471_v7, %s5767_s11  ;;  %v7975_v26 = vld [vmem:[#allocation28_spill] sm:$0xff]  ;;  %v7977_v7 = vld [vmem:[#allocation29_spill] sm:$0xff] }
0x292d   : > { %v3489_v22 = vpop.permute.xlu1 %3488 }
0x292e   : > { %3496 = vrot.lane.b32.xlu0 %v3492_v28, %s5767_s11  ;;  %v3493_v9 = vmul.f32 %v5612_v49, %v3489_v22 }
0x2930   : > { %3498 = vrot.lane.b32.xlu1 %v3493_v9, %s5767_s11  ;;  %v7978_v9 = vld [vmem:[#allocation7_spill] sm:$0xff] }
0x299c   : > { %v3475_v20 = vpop.permute.xlu0 %3474 }
0x299d   : > { %v7183_v19 = vadd.f32 %v3475_v20, %v3460_v54  ;;  %v659_v54 = vadd.f32 %v7978_v9, %v6234_v34 }
0x299e   : > { %v3477_v46 = vpop.permute.xlu1 %3476 }
0x299f   : > { %5613 = vtanh.f32 %v7183_v19  ;;  %v7190_v59 = vadd.f32 %v3477_v46, %v3461_v35 }
0x29a0   : > { %v3497_v23 = vpop.permute.xlu0 %3496 }
0x29a1   : > { %v7188_v6 = vadd.f32 %v3497_v23, %v3482_v63 }
0x29a2   : > { %v3499_v37 = vpop.permute.xlu1 %3498 }
0x29a3   : > { %5615 = vtanh.f32 %v7188_v6  ;;  %v7195_v24 = vadd.f32 %v3499_v37, %v3483_v17 }
0x29a4   : > { %5617 = vtanh.f32 %v7190_v59 }
0x29a5   : > { %5619 = vtanh.f32 %v7195_v24 }
0x29a9   : > { %v5614_v2 = vpop.eup %5613 }
0x29aa   : > { %3508 = vrot.lane.b32.xlu0 %v5614_v2, %s5767_s11 }
0x29ad   : > { %v5616_v36 = vpop.eup %5615 }
0x29ae   : > { %v5618_v43 = vpop.eup %5617  ;;  %3520 = vrot.lane.b32.xlu0 %v5616_v36, %s5767_s11 }
0x29af   : > { %3510 = vrot.lane.b32.xlu1 %v5618_v43, %s5767_s11  ;;  %v5620_v16 = vpop.eup %5619 }
0x29b3   : > { %3522 = vrot.lane.b32.xlu1 %v5620_v16, %s5767_s11 }
0x2a1c   : > { %v3509_v51 = vpop.permute.xlu0 %3508 }
0x2a1d   : > { %v3514_v1 = vmul.f32 %v5606_v41, %v3509_v51 }
0x2a1f   : > { %3530 = vrot.lane.b32.xlu0 %v3514_v1, %s5768_s14 }
0x2a20   : > { %v3521_v11 = vpop.permute.xlu0 %3520 }
0x2a21   : > { %v3511_v4 = vpop.permute.xlu1 %3510  ;;  %v3526_v25 = vmul.f32 %v5608_v48, %v3521_v11 }
0x2a22   : > { %v3515_v62 = vmul.f32 %v5610_v56, %v3511_v4  ;;  %v803_v56 = vadd.f32 %v7975_v26, %v6110_v58 }
0x2a23   : > { %3540 = vrot.lane.b32.xlu0 %v3526_v25, %s5769_s15 }
0x2a24   : > { %3532 = vrot.lane.b32.xlu1 %v3515_v62, %s5768_s14 }
0x2a25   : > { %v3523_v21 = vpop.permute.xlu1 %3522 }
0x2a26   : > { %v3527_v52 = vmul.f32 %v5612_v49, %v3523_v21  ;;  %v807_v49 = vadd.f32 %v7977_v7, %v6110_v58 }
0x2a28   : > { %3542 = vrot.lane.b32.xlu1 %v3527_v52, %s5769_s15 }
0x2a91   : > { %v3531_v42 = vpop.permute.xlu0 %3530 }
0x2a92   : > { %3536 = vst.msk [vmem:[#allocation3 + $0xe0] sm:$0xff] %vm1083_vm0, %v3531_v42 }
0x2a95   : > { %v3541_v53 = vpop.permute.xlu0 %3540 }
0x2a96   : > { %v3533_v39 = vpop.permute.xlu1 %3532  ;;  %3546 = vst.msk [vmem:[#allocation3 + $0x10] sm:$0xff] %vm1095_vm1, %v3541_v53  ;;  %v3548_v32 = vsel %vm1083_vm0, %v3531_v42, %v3541_v53 }
0x2a97   : > { %3537 = vst.msk [vmem:[#allocation3 + $0xe8] sm:$0xff] %vm1083_vm0, %v3533_v39 }
0x2a99   : > { %v3749_v50 = vld [vmem:[#allocation3 + $0xe0] sm:$0xff] }
0x2a9a   : > { %v3543_v0 = vpop.permute.xlu1 %3542 }
0x2a9b   : > { %3547 = vst.msk [vmem:[#allocation3 + $0x18] sm:$0xff] %vm1095_vm1, %v3543_v0  ;;  %v3549_v8 = vsel %vm1083_vm0, %v3533_v39, %v3543_v0 }
0x2a9c   : > { %v3554_v41 = vpack.c.bf16 %v3549_v8, %v3548_v32 }
0x2a9e   : > { %4970 = vmatmul.mubr.msk.bf16.vlgmr.msra.gmra.mrb[76].mxu0 %vm928_vm2, %v3554_v41  ;;  %v3750_v38 = vld [vmem:[#allocation3 + $0xe8] sm:$0xff] }
0x2a9f   : > { %v3767_v48 = vpack.c.bf16 %v3750_v38, %v3749_v50  ;;  %5026 = vmatpush3.bf16.msra.mxu0 %v7089_v18  ;;  %v655_v18 = vadd.f32 %v7976_v10, %v6234_v34 }
0x2aa0   : > { %5027 = vmatprep.subr.bf16.mxu0 %v7106_v44 }
0x2aa1   : > { %5061 = vmatprep.mubr.msk.bf16.mxu1 %vm928_vm2, %v3767_v48 }
0x2aa3   : > { %5028 = vmatpush3.bf16.msra.mxu0 %v7106_v44 }
0x2aa4   : > { %5029 = vmatprep.subr.bf16.mxu0 %v7115_v5 }
0x2aa7   : > { %5030 = vmatpush3.bf16.msra.mxu0 %v7115_v5 }
0x2aa8   : > { %5031 = vmatprep.subr.bf16.mxu0 %v7122_v29 }
0x2aab   : > { %5032 = vmatpush3.bf16.msra.mxu0 %v7122_v29 }
0x2b71   : > { %v3592_v28 = vpop.f32.mrb[76].mxu0 }
0x2b72   : > { %v3601_v22 = vadd.f32 %v3592_v28, %v803_v56  ;;  %v3594_v44 = vpop.f32.mrb[77].mxu0 }
0x2b73   : > { %v3603_v5 = vadd.f32 %v3594_v44, %v655_v18  ;;  %v3596_v20 = vpop.f32.mrb[78].mxu0 }
0x2b74   : > { %v3602_v63 = vadd.f32 %v3596_v20, %v807_v49  ;;  %v3598_v35 = vpop.f32.mrb[79].mxu0  ;;  %v4971_v37 = vmul.f32 -1.442695, %v3601_v22 }
0x2b75   : > { %5621 = vtanh.f32 %v3603_v5  ;;  %v3604_v29 = vadd.f32 %v3598_v35, %v659_v54  ;;  %v4973_v34 = vmul.f32 -1.442695, %v3603_v5 }
0x2b76   : > { %5623 = vtanh.f32 %v3601_v22  ;;  %v4972_v36 = vmul.f32 -1.442695, %v3602_v63 }
0x2b77   : > { %5625 = vtanh.f32 %v3604_v29  ;;  %v4974_v2 = vmul.f32 -1.442695, %v3604_v29 }
0x2b78   : > { %5627 = vtanh.f32 %v3602_v63 }
0x2b79   : > { %5629 = vpow2.f32 %v4973_v34  ;;  %v7252_v34 = vld [vmem:[%s7923_s5] ss:$0 sm:$0xff] }
0x2b7a   : > { %5631 = vpow2.f32 %v4971_v37  ;;  %v7256_v37 = vadd.f32 %v7252_v34, %v7151_v12  ;;  %v7275_v12 = vadd.f32 %v7158_v45, %v7252_v34  ;;  %v7295_v45 = vadd.f32 %v7166_v33, %v7252_v34 }
0x2b7b   : > { %5633 = vpow2.f32 %v4974_v2  ;;  %v7261_v2 = vadd.f32 %v7147_v40, %v7252_v34  ;;  %v7281_v40 = vadd.f32 %v7143_v14, %v7252_v34  ;;  %v7301_v14 = vadd.f32 %v7154_v60, %v7252_v34 }
0x2b7c   : > { %5635 = vpow2.f32 %v4972_v36  ;;  %v7266_v36 = vadd.f32 %v7252_v34, %v7160_v55  ;;  %v7285_v55 = vadd.f32 %v7252_v34, %v7168_v30  ;;  %v7305_v30 = vadd.f32 %v7252_v34, %v7176_v13 }
0x2b7d   : > { %v7315_v33 = vadd.f32 %v7174_v31, %v7252_v34  ;;  %v7321_v60 = vadd.f32 %v7162_v15, %v7252_v34  ;;  %v4127_v13 = vmul.f32 %v7256_v37, %v7256_v37  ;;  %v4129_v31 = vmul.f32 %v7261_v2, %v7261_v2 }
0x2b7e   : > { %v7335_v15 = vadd.f32 %v7170_v61, %v7252_v34  ;;  %v4135_v61 = vmul.f32 %v7285_v55, %v7285_v55 }
0x2b7f   : > { %v5622_v23 = vpop.eup %5621 }
0x2b80   : > { %3659 = vrot.lane.b32.xlu0 %v5622_v23, %s5767_s11  ;;  %v5624_v46 = vpop.eup %5623 }
0x2b81   : > { %v5626_v58 = vpop.eup %5625 }
0x2b82   : > { %3661 = vrot.lane.b32.xlu1 %v5626_v58, %s5767_s11  ;;  %v5628_v17 = vpop.eup %5627 }
0x2b83   : > { %v5630_v43 = vpop.eup %5629 }
0x2b84   : > { %3637 = vrot.lane.b32.xlu0 %v5624_v46, %s5767_s11  ;;  %v3623_v16 = vadd.f32 1.0, %v5630_v43  ;;  %v5632_v51 = vpop.eup %5631  ;;  %v7271_v43 = vadd.f32 %v7252_v34, %v7145_v47  ;;  %v7291_v47 = vadd.f32 %v7252_v34, %v7156_v27  ;;  %v7311_v27 = vadd.f32 %v7252_v34, %v7164_v57 }
0x2b85   : > { %v5634_v1 = vpop.eup %5633  ;;  %v3611_v11 = vadd.f32 1.0, %v5632_v51  ;;  %v7328_v57 = vadd.f32 %v7252_v34, %v7172_v3  ;;  %v4133_v51 = vmul.f32 %v7275_v12, %v7275_v12 }
0x2b86   : > { %3639 = vrot.lane.b32.xlu1 %v5628_v17, %s5767_s11  ;;  %5637 = vrcp.f32 %v3623_v16  ;;  %v3624_v4 = vadd.f32 1.0, %v5634_v1  ;;  %v5636_v25 = vpop.eup %5635  ;;  %v4131_v16 = vmul.f32 %v7266_v36, %v7266_v36  ;;  %v4126_v3 = vmul.f32 %v7271_v43, %v7271_v43 }
0x2b87   : > { %5639 = vrcp.f32 %v3611_v11  ;;  %v3612_v62 = vadd.f32 1.0, %v5636_v25  ;;  %v4128_v1 = vmul.f32 %v7281_v40, %v7281_v40  ;;  %v4130_v11 = vmul.f32 %v7291_v47, %v7291_v47 }
0x2b88   : > { %5641 = vrcp.f32 %v3624_v4  ;;  %v4137_v4 = vmul.f32 %v7295_v45, %v7295_v45  ;;  %v4132_v25 = vmul.f32 %v7301_v14, %v7301_v14 }
0x2b89   : > { %5643 = vrcp.f32 %v3612_v62  ;;  %v4139_v62 = vmul.f32 %v7305_v30, %v7305_v30 }
0x2b90   : > { %v5638_v21 = vpop.eup %5637 }
0x2b91   : > { %v5640_v53 = vpop.eup %5639  ;;  %v3655_v26 = vmul.f32 %v5638_v21, %v7188_v6 }
0x2b92   : > { %v5642_v32 = vpop.eup %5641  ;;  %v3633_v18 = vmul.f32 %v5640_v53, %v7183_v19 }
0x2b93   : > { %v5644_v50 = vpop.eup %5643  ;;  %v3656_v7 = vmul.f32 %v5642_v32, %v7195_v24 }
0x2b94   : > { %v3634_v9 = vmul.f32 %v5644_v50, %v7190_v59 }
0x2bf2   : > { %v3660_v52 = vpop.permute.xlu0 %3659 }
0x2bf3   : > { %v3665_v42 = vmul.f32 %v5638_v21, %v3660_v52  ;;  %v4141_v52 = vmul.f32 %v7315_v33, %v7315_v33 }
0x2bf4   : > { %v3662_v8 = vpop.permute.xlu1 %3661 }
0x2bf5   : > { %3669 = vrot.lane.b32.xlu0 %v3665_v42, %s5767_s11  ;;  %v3666_v41 = vmul.f32 %v5642_v32, %v3662_v8  ;;  %v4136_v42 = vmul.f32 %v7321_v60, %v7321_v60 }
0x2bf6   : > { %v3638_v39 = vpop.permute.xlu0 %3637 }
0x2bf7   : > { %v3643_v0 = vmul.f32 %v5640_v53, %v3638_v39  ;;  %3671 = vrot.lane.b32.xlu1 %v3666_v41, %s5767_s11  ;;  %v4140_v39 = vmul.f32 %v7335_v15, %v7335_v15 }
0x2bf8   : > { %v3640_v38 = vpop.permute.xlu1 %3639 }
0x2bf9   : > { %3647 = vrot.lane.b32.xlu0 %v3643_v0, %s5767_s11  ;;  %v3644_v48 = vmul.f32 %v5644_v50, %v3640_v38 }
0x2bfb   : > { %3649 = vrot.lane.b32.xlu1 %v3644_v48, %s5767_s11 }
0x2c67   : > { %v3670_v56 = vpop.permute.xlu0 %3669 }
0x2c68   : > { %v3675_v10 = vadd.f32 %v3670_v56, %v3655_v26  ;;  %v3726_v26 = vld [vmem:[#allocation3 + $0x28] sm:$0xff] }
0x2c69   : > { %v3672_v22 = vpop.permute.xlu1 %3671 }
0x2c6a   : > { %5645 = vtanh.f32 %v3675_v10  ;;  %v3676_v44 = vadd.f32 %v3672_v22, %v3656_v7  ;;  %v3723_v10 = vld [vmem:[#allocation3 + $0x10] sm:$0xff] }
0x2c6b   : > { %v3648_v28 = vpop.permute.xlu0 %3647 }
0x2c6c   : > { %v3653_v49 = vadd.f32 %v3648_v28, %v3633_v18  ;;  %v3725_v28 = vld [vmem:[#allocation3 + $0x20] sm:$0xff] }
0x2c6d   : > { %v3650_v54 = vpop.permute.xlu1 %3649  ;;  %v3755_v7 = vpack.c.bf16 %v3726_v26, %v3725_v28 }
0x2c6e   : > { %5647 = vtanh.f32 %v3653_v49  ;;  %v3654_v5 = vadd.f32 %v3650_v54, %v3634_v9  ;;  %v3728_v9 = vld [vmem:[#allocation3 + $0x38] sm:$0xff]  ;;  %v3730_v54 = vld [vmem:[#allocation3 + $0x48] sm:$0xff] }
0x2c6f   : > { %5649 = vtanh.f32 %v3676_v44 }
0x2c70   : > { %5651 = vtanh.f32 %v3654_v5  ;;  %v3727_v5 = vld [vmem:[#allocation3 + $0x30] sm:$0xff] }
0x2c74   : > { %v5646_v20 = vpop.eup %5645 }
0x2c75   : > { %3693 = vrot.lane.b32.xlu0 %v5646_v20, %s5767_s11  ;;  %v3756_v20 = vpack.c.bf16 %v3728_v9, %v3727_v5 }
0x2c78   : > { %v5648_v6 = vpop.eup %5647 }
0x2c79   : > { %3681 = vrot.lane.b32.xlu0 %v5648_v6, %s5767_s11  ;;  %v5650_v19 = vpop.eup %5649  ;;  %v3729_v6 = vld [vmem:[#allocation3 + $0x40] sm:$0xff] }
0x2c7a   : > { %3695 = vrot.lane.b32.xlu1 %v5650_v19, %s5767_s11  ;;  %v5652_v24 = vpop.eup %5651  ;;  %v3757_v19 = vpack.c.bf16 %v3730_v54, %v3729_v6 }
0x2c7e   : > { %3683 = vrot.lane.b32.xlu1 %v5652_v24, %s5767_s11  ;;  %v3732_v24 = vld [vmem:[#allocation3 + $0x58] sm:$0xff] }
0x2ce7   : > { %v3694_v63 = vpop.permute.xlu0 %3693 }
0x2ce8   : > { %v3699_v35 = vmul.f32 %v5638_v21, %v3694_v63  ;;  %v4134_v21 = vmul.f32 %v7311_v27, %v7311_v27  ;;  %v3731_v63 = vld [vmem:[#allocation3 + $0x50] sm:$0xff] }
0x2cea   : > { %3713 = vrot.lane.b32.xlu0 %v3699_v35, %s5769_s15  ;;  %v3758_v35 = vpack.c.bf16 %v3732_v24, %v3731_v63 }
0x2ceb   : > { %v3682_v59 = vpop.permute.xlu0 %3681 }
0x2cec   : > { %v3687_v29 = vmul.f32 %v5640_v53, %v3682_v59  ;;  %v3696_v23 = vpop.permute.xlu1 %3695  ;;  %v4138_v53 = vmul.f32 %v7328_v57, %v7328_v57 }
0x2ced   : > { %v3700_v46 = vmul.f32 %v5642_v32, %v3696_v23 }
0x2cee   : > { %3703 = vrot.lane.b32.xlu0 %v3687_v29, %s5768_s14 }
0x2cef   : > { %3715 = vrot.lane.b32.xlu1 %v3700_v46, %s5769_s15 }
0x2cf0   : > { %v3684_v58 = vpop.permute.xlu1 %3683 }
0x2cf1   : > { %v3688_v17 = vmul.f32 %v5644_v50, %v3684_v58  ;;  %v3724_v50 = vld [vmem:[#allocation3 + $0x18] sm:$0xff] }
0x2cf2   : > { %v3754_v18 = vpack.c.bf16 %v3724_v50, %v3723_v10 }
0x2cf3   : > { %3705 = vrot.lane.b32.xlu1 %v3688_v17, %s5768_s14 }
0x2d0d   : > { %4043 = vadd.xlane.f32.xlu0 %v7256_v37 }
0x2d11   : > { %4047 = vadd.xlane.f32.xlu0 %v7261_v2 }
0x2d15   : > { %4051 = vadd.xlane.f32.xlu0 %v7266_v36 }
0x2d17   : > { %4041 = vadd.xlane.f32.xlu1 %v7271_v43 }
0x2d19   : > { %4055 = vadd.xlane.f32.xlu0 %v7275_v12 }
0x2d1b   : > { %4045 = vadd.xlane.f32.xlu1 %v7281_v40 }
0x2d1d   : > { %4059 = vadd.xlane.f32.xlu0 %v7285_v55 }
0x2d1f   : > { %4049 = vadd.xlane.f32.xlu1 %v7291_v47 }
0x2d21   : > { %4063 = vadd.xlane.f32.xlu0 %v7295_v45 }
0x2d23   : > { %4053 = vadd.xlane.f32.xlu1 %v7301_v14 }
0x2d25   : > { %4067 = vadd.xlane.f32.xlu0 %v7305_v30 }
0x2d27   : > { %4057 = vadd.xlane.f32.xlu1 %v7311_v27 }
0x2d29   : > { %4071 = vadd.xlane.f32.xlu0 %v7315_v33 }
0x2d2b   : > { %4061 = vadd.xlane.f32.xlu1 %v7321_v60 }
0x2d2d   : > { %4172 = vadd.xlane.f32.xlu0 %v4127_v13 }
0x2d2f   : > { %4065 = vadd.xlane.f32.xlu1 %v7328_v57 }
0x2d31   : > { %4176 = vadd.xlane.f32.xlu0 %v4129_v31 }
0x2d33   : > { %4069 = vadd.xlane.f32.xlu1 %v7335_v15 }
0x2d35   : > { %4180 = vadd.xlane.f32.xlu0 %v4131_v16 }
0x2d37   : > { %4170 = vadd.xlane.f32.xlu1 %v4126_v3 }
0x2d39   : > { %4184 = vadd.xlane.f32.xlu0 %v4133_v51 }
0x2d3b   : > { %4174 = vadd.xlane.f32.xlu1 %v4128_v1 }
0x2d3d   : > { %4188 = vadd.xlane.f32.xlu0 %v4135_v61 }
0x2d3f   : > { %4178 = vadd.xlane.f32.xlu1 %v4130_v11 }
0x2d41   : > { %4192 = vadd.xlane.f32.xlu0 %v4137_v4 }
0x2d43   : > { %4182 = vadd.xlane.f32.xlu1 %v4132_v25 }
0x2d45   : > { %4196 = vadd.xlane.f32.xlu0 %v4139_v62 }
0x2d47   : > { %4186 = vadd.xlane.f32.xlu1 %v4134_v21 }
0x2d49   : > { %4200 = vadd.xlane.f32.xlu0 %v4141_v52 }
0x2d4b   : > { %4190 = vadd.xlane.f32.xlu1 %v4136_v42 }
0x2d4f   : > { %4194 = vadd.xlane.f32.xlu1 %v4138_v53 }
0x2d53   : > { %4198 = vadd.xlane.f32.xlu1 %v4140_v39 }
0x2d5c   : > { %v3714_v0 = vpop.permute.xlu0 %3713 }
0x2d5d   : > { %3719 = vst.msk [vmem:[#allocation3] sm:$0xff] %vm1095_vm1, %v3714_v0 }
0x2d60   : > { %v3704_v32 = vpop.permute.xlu0 %3703 }
0x2d61   : > { %3709 = vst.msk [vmem:[#allocation3 + $0xf0] sm:$0xff] %vm1083_vm0, %v3704_v32  ;;  %v3716_v8 = vpop.permute.xlu1 %3715 }
0x2d62   : > { %3720 = vst.msk [vmem:[#allocation3 + $0x8] sm:$0xff] %vm1095_vm1, %v3716_v8 }
0x2d64   : > { %v3721_v38 = vld [vmem:[#allocation3] sm:$0xff] }
0x2d65   : > { %v3706_v41 = vpop.permute.xlu1 %3705 }
0x2d66   : > { %3710 = vst.msk [vmem:[#allocation3 + $0xf8] sm:$0xff] %vm1083_vm0, %v3706_v41 }
0x2d68   : > { %v3751_v49 = vld [vmem:[#allocation3 + $0xf0] sm:$0xff] }
0x2d69   : > { %v3722_v48 = vld [vmem:[#allocation3 + $0x8] sm:$0xff] }
0x2d6a   : > { %v3753_v56 = vpack.c.bf16 %v3722_v48, %v3721_v38 }
0x2d6c   : > { %5033 = vmatprep.mubr.msk.bf16.mxu0 %vm928_vm2, %v3753_v56 }
0x2d6d   : > { %5034 = vmatmul.mubr.msk.bf16.vlgmr.msra.gmra.mrb[80].mxu0 %vm928_vm2, %v3754_v18  ;;  %v3752_v22 = vld [vmem:[#allocation3 + $0xf8] sm:$0xff] }
0x2d6e   : > { %5037 = vmatprep.mubr.msk.bf16.mxu0 %vm928_vm2, %v3755_v7  ;;  %v3768_v44 = vpack.c.bf16 %v3752_v22, %v3751_v49 }
0x2d70   : > { %5062 = vmatmul.mubr.msk.bf16.gmra.mrb[64].mxu1 %vm928_vm2, %v3768_v44 }
0x2d75   : > { %5038 = vmatmul.mubr.msk.bf16.gmra.mrb[84].mxu0 %vm928_vm2, %v3756_v20 }
0x2d76   : > { %5041 = vmatprep.mubr.msk.bf16.mxu0 %vm928_vm2, %v3757_v19 }
0x2d7d   : > { %5042 = vmatmul.mubr.msk.bf16.gmra.mrb[88].mxu0 %vm928_vm2, %v3758_v35 }
0x2d9a   : > { %v4044_v59 = vpop.xlane.xlu0 %4043 }
0x2d9b   : > { %v7381_v11 = vmul.f32 0.0078125, %v4044_v59 }
0x2d9d   : > { %v4255_v62 = vmul.f32 %v7381_v11, %v7381_v11  ;;  %v4351_v22 = vsub.f32 %v7256_v37, %v7381_v11 }
0x2d9e   : > { %v4048_v29 = vpop.xlane.xlu0 %4047 }
0x2d9f   : > { %v7387_v21 = vmul.f32 0.0078125, %v4048_v29 }
0x2da1   : > { %v4257_v32 = vmul.f32 %v7387_v21, %v7387_v21  ;;  %v4353_v44 = vsub.f32 %v7261_v2, %v7387_v21  ;;  %v4559_v21 = vld [vmem:[%s6029_s25 + $0x78] sm:$0xff] }
0x2da2   : > { %v4052_v23 = vpop.xlane.xlu0 %4051 }
0x2da3   : > { %v7391_v39 = vmul.f32 0.0078125, %v4052_v23 }
0x2da4   : > { %v4042_v46 = vpop.xlane.xlu1 %4041 }
0x2da5   : > { %v7395_v50 = vmul.f32 0.0078125, %v4042_v46  ;;  %v4259_v56 = vmul.f32 %v7391_v39, %v7391_v39  ;;  %v4355_v9 = vsub.f32 %v7266_v36, %v7391_v39  ;;  %v4561_v39 = vld [vmem:[%s6029_s25 + $0x88] sm:$0xff] }
0x2da6   : > { %v4056_v58 = vpop.xlane.xlu0 %4055 }
0x2da7   : > { %v7401_v10 = vmul.f32 0.0078125, %v4056_v58  ;;  %v4254_v5 = vmul.f32 %v7395_v50, %v7395_v50  ;;  %v4350_v20 = vsub.f32 %v7271_v43, %v7395_v50 }
0x2da8   : > { %v4046_v17 = vpop.xlane.xlu1 %4045 }
0x2da9   : > { %v7403_v28 = vmul.f32 0.0078125, %v4046_v17  ;;  %v4261_v37 = vmul.f32 %v7401_v10, %v7401_v10  ;;  %v4357_v63 = vsub.f32 %v7275_v12, %v7401_v10 }
0x2daa   : > { %v4060_v13 = vpop.xlane.xlu0 %4059 }
0x2dab   : > { %v7411_v54 = vmul.f32 0.0078125, %v4060_v13  ;;  %v4256_v23 = vmul.f32 %v7403_v28, %v7403_v28  ;;  %v4352_v17 = vsub.f32 %v7281_v40, %v7403_v28 }
0x2dac   : > { %v4050_v31 = vpop.xlane.xlu1 %4049 }
0x2dad   : > { %v7421_v35 = vmul.f32 0.0078125, %v4050_v31  ;;  %v4263_v13 = vmul.f32 %v7411_v54, %v7411_v54  ;;  %v4359_v31 = vsub.f32 %v7285_v55, %v7411_v54 }
0x2dae   : > { %v4064_v16 = vpop.xlane.xlu0 %4063 }
0x2daf   : > { %v7429_v11 = vmul.f32 0.0078125, %v4064_v16 }
0x2db0   : > { %v4054_v3 = vpop.xlane.xlu1 %4053 }
0x2db2   : > { %v4068_v51 = vpop.xlane.xlu0 %4067 }
0x2db3   : > { %v7439_v16 = vmul.f32 0.0078125, %v4068_v51  ;;  %v7454_v51 = vld [vmem:[%s7924_s6] ss:$0 sm:$0xff] }
0x2db4   : > { %v7377_v1 = vpop.xlane.xlu1 %4057 }
0x2db6   : > { %v7379_v61 = vpop.xlane.xlu0 %4071 }
0x2db8   : > { %v7383_v4 = vpop.xlane.xlu1 %4061 }
0x2dba   : > { %v4173_v25 = vpop.xlane.xlu0 %4172 }
0x2dbb   : > { %v4223_v52 = vmul.f32 0.0078125, %v4173_v25 }
0x2dbc   : > { %v7389_v42 = vpop.xlane.xlu1 %4065 }
0x2dbd   : > { %v4287_v53 = vsub.f32 %v4223_v52, %v4255_v62  ;;  %v7433_v62 = vmul.f32 0.0078125, %v4054_v3  ;;  %v4265_v3 = vmul.f32 %v7429_v11, %v7429_v11 }
0x2dbe   : > { %v4177_v0 = vpop.xlane.xlu0 %4176 }
0x2dbf   : > { %v4319_v8 = vmax.f32 %v4287_v53, 0.0  ;;  %v4225_v41 = vmul.f32 0.0078125, %v4177_v0 }
0x2dc0   : > { %v7397_v48 = vpop.xlane.xlu1 %4069 }
0x2dc1   : > { %v4383_v38 = vadd.f32 1e-05, %v4319_v8  ;;  %v4289_v26 = vsub.f32 %v4225_v41, %v4257_v32  ;;  %v4258_v32 = vmul.f32 %v7421_v35, %v7421_v35  ;;  %v4354_v8 = vsub.f32 %v7291_v47, %v7421_v35  ;;  %v4560_v47 = vld [vmem:[%s6029_s25 + $0x80] sm:$0xff] }
0x2dc2   : > { %v4181_v18 = vpop.xlane.xlu0 %4180 }
0x2dc3   : > { %5653 = vrsqrt.f32 %v4383_v38  ;;  %v4321_v7 = vmax.f32 %v4289_v26, 0.0  ;;  %v4227_v49 = vmul.f32 0.0078125, %v4181_v18 }
0x2dc4   : > { %v4171_v19 = vpop.xlane.xlu1 %4170 }
0x2dc5   : > { %v4385_v6 = vadd.f32 1e-05, %v4321_v7  ;;  %v4291_v24 = vsub.f32 %v4227_v49, %v4259_v56  ;;  %v4222_v59 = vmul.f32 0.0078125, %v4171_v19  ;;  %v7444_v7 = vmul.f32 0.0078125, %v7377_v1 }
0x2dc6   : > { %v4185_v29 = vpop.xlane.xlu0 %4184  ;;  %v4260_v19 = vmul.f32 %v7433_v62, %v7433_v62 }
0x2dc7   : > { %5655 = vrsqrt.f32 %v4385_v6  ;;  %v4323_v46 = vmax.f32 %v4291_v24, 0.0  ;;  %v4229_v58 = vmul.f32 0.0078125, %v4185_v29  ;;  %v4286_v25 = vsub.f32 %v4222_v59, %v4254_v5 }
0x2dc8   : > { %v4175_v53 = vpop.xlane.xlu1 %4174  ;;  %v7449_v24 = vmul.f32 0.0078125, %v7379_v61  ;;  %v7461_v61 = vld [vmem:[%s7925_s7] ss:$0 sm:$0xff] }
0x2dc9   : > { %v4387_v52 = vadd.f32 1e-05, %v4323_v46  ;;  %v4293_v0 = vsub.f32 %v4229_v58, %v4261_v37  ;;  %v4318_v41 = vmax.f32 %v4286_v25, 0.0  ;;  %v4224_v38 = vmul.f32 0.0078125, %v4175_v53 }
0x2dca   : > { %v4189_v26 = vpop.xlane.xlu0 %4188  ;;  %v4267_v25 = vmul.f32 %v7439_v16, %v7439_v16 }
0x2dcb   : > { %5657 = vrsqrt.f32 %v4387_v52  ;;  %v4325_v56 = vmax.f32 %v4293_v0, 0.0  ;;  %v4231_v18 = vmul.f32 0.0078125, %v4189_v26  ;;  %v4382_v49 = vadd.f32 1e-05, %v4318_v41 }
0x2dcc   : > { %v4288_v5 = vsub.f32 %v4224_v38, %v4256_v23  ;;  %v4179_v59 = vpop.xlane.xlu1 %4178  ;;  %v7467_v26 = vmul.f32 0.0078125, %v7383_v4 }
0x2dcd   : > { %v5654_v6 = vpop.eup %5653  ;;  %v4389_v37 = vadd.f32 1e-05, %v4325_v56  ;;  %v4295_v29 = vsub.f32 %v4231_v18, %v4263_v13  ;;  %5659 = vrsqrt.f32 %v4382_v49  ;;  %v4226_v23 = vmul.f32 0.0078125, %v4179_v59  ;;  %v4557_v18 = vld [vmem:[%s6029_s25 + $0x68] sm:$0xff] }
0x2dce   : > { %v4447_v46 = vmul.f32 %v5654_v6, %v4351_v22  ;;  %v4320_v1 = vmax.f32 %v4288_v5, 0.0  ;;  %v4193_v58 = vpop.xlane.xlu0 %4192  ;;  %v4262_v13 = vmul.f32 %v7444_v7, %v7444_v7  ;;  %v4269_v56 = vmul.f32 %v7449_v24, %v7449_v24 }
0x2dcf   : > { %5661 = vrsqrt.f32 %v4389_v37  ;;  %v4327_v52 = vmax.f32 %v4295_v29, 0.0  ;;  %v4233_v53 = vmul.f32 0.0078125, %v4193_v58  ;;  %v4290_v41 = vsub.f32 %v4226_v23, %v4258_v32 }
0x2dd0   : > { %v4486_v22 = vmul.f32 %v7454_v51, %v4447_v46  ;;  %v4384_v0 = vadd.f32 1e-05, %v4320_v1  ;;  %v4183_v5 = vpop.xlane.xlu1 %4182  ;;  %v7477_v23 = vmul.f32 0.0078125, %v7389_v42  ;;  %v4264_v2 = vmul.f32 %v7467_v26, %v7467_v26 }
0x2dd1   : > { %v5656_v38 = vpop.eup %5655  ;;  %v4391_v49 = vadd.f32 1e-05, %v4327_v52  ;;  %v4297_v6 = vsub.f32 %v4233_v53, %v4265_v3  ;;  %v4322_v32 = vmax.f32 %v4290_v41, 0.0  ;;  %v4228_v4 = vmul.f32 0.0078125, %v4183_v5 }
0x2dd2   : > { %v4525_v37 = vadd.f32 %v7461_v61, %v4486_v22  ;;  %v4449_v59 = vmul.f32 %v5656_v38, %v4353_v44  ;;  %5663 = vrsqrt.f32 %v4384_v0  ;;  %v4197_v29 = vpop.xlane.xlu0 %4196 }
0x2dd3   : > { %5665 = vrsqrt.f32 %v4391_v49  ;;  %v4329_v46 = vmax.f32 %v4297_v6, 0.0  ;;  %v4235_v1 = vmul.f32 0.0078125, %v4197_v29  ;;  %v4386_v52 = vadd.f32 1e-05, %v4322_v32 }
0x2dd4   : > { %v4589_v58 = vadd.f32 %v4557_v18, %v4525_v37  ;;  %v4488_v3 = vmul.f32 %v7454_v51, %v4449_v59  ;;  %v4292_v44 = vsub.f32 %v4228_v4, %v4260_v19  ;;  %v4187_v0 = vpop.xlane.xlu1 %4186  ;;  %v4266_v37 = vmul.f32 %v7477_v23, %v7477_v23 }
0x2dd5   : > { %v5658_v53 = vpop.eup %5657  ;;  %v4393_v22 = vadd.f32 1e-05, %v4329_v46  ;;  %v4299_v41 = vsub.f32 %v4235_v1, %v4267_v25  ;;  %5667 = vrsqrt.f32 %v4386_v52  ;;  %v4230_v18 = vmul.f32 0.0078125, %v4187_v0 }
0x2dd6   : > { %4621 = vst [vmem:[%s7484_s18 + $0x68] sm:$0xff] %v4589_v58  ;;  %v4527_v42 = vadd.f32 %v7461_v61, %v4488_v3  ;;  %v4451_v38 = vmul.f32 %v5658_v53, %v4355_v9  ;;  %v4201_v49 = vpop.xlane.xlu0 %4200  ;;  %v4324_v5 = vmax.f32 %v4292_v44, 0.0 }
0x2dd7   : > { %5669 = vrsqrt.f32 %v4393_v22  ;;  %v4331_v19 = vmax.f32 %v4299_v41, 0.0  ;;  %v4237_v6 = vmul.f32 0.0078125, %v4201_v49  ;;  %v5660_v25 = vpop.eup %5659  ;;  %v4294_v29 = vsub.f32 %v4230_v18, %v4262_v13 }
0x2dd8   : > { %v4591_v59 = vadd.f32 %v4559_v21, %v4527_v42  ;;  %v4490_v32 = vmul.f32 %v7454_v51, %v4451_v38  ;;  %v4446_v36 = vmul.f32 %v5660_v25, %v4350_v20  ;;  %v4388_v9 = vadd.f32 1e-05, %v4324_v5  ;;  %v4191_v1 = vpop.xlane.xlu1 %4190 }
0x2dd9   : > { %v5662_v4 = vpop.eup %5661  ;;  %v4395_v46 = vadd.f32 1e-05, %v4331_v19  ;;  %v4301_v58 = vsub.f32 %v4237_v6, %v4269_v56  ;;  %v4326_v13 = vmax.f32 %v4294_v29, 0.0  ;;  %v4232_v53 = vmul.f32 0.0078125, %v4191_v1  ;;  %v4556_v56 = vld [vmem:[%s6029_s25 + $0x60] sm:$0xff]  ;;  %v4558_v6 = vld [vmem:[%s6029_s25 + $0x70] sm:$0xff] }
0x2dda   : > { %4623 = vst [vmem:[%s7484_s18 + $0x78] sm:$0xff] %v4591_v59  ;;  %v4529_v3 = vadd.f32 %v7461_v61, %v4490_v32  ;;  %v4453_v52 = vmul.f32 %v5662_v4, %v4357_v63  ;;  %v7504_v21 = vmul.f32 0.0078125, %v7397_v48  ;;  %v4485_v43 = vmul.f32 %v7454_v51, %v4446_v36  ;;  %v4563_v63 = vld [vmem:[%s6029_s25 + $0x98] sm:$0xff]  ;;  %v4565_v4 = vld [vmem:[%s6029_s25 + $0xa8] sm:$0xff] }
0x2ddb   : > { %5671 = vrsqrt.f32 %v4388_v9  ;;  %v4333_v50 = vmax.f32 %v4301_v58, 0.0  ;;  %v4390_v0 = vadd.f32 1e-05, %v4326_v13  ;;  %v4296_v41 = vsub.f32 %v4232_v53, %v4264_v2 }
0x2ddc   : > { %v5664_v20 = vpop.eup %5663  ;;  %v4593_v44 = vadd.f32 %v4561_v39, %v4529_v3  ;;  %v4492_v22 = vmul.f32 %v7454_v51, %v4453_v52  ;;  %5673 = vrsqrt.f32 %v4395_v46  ;;  %v4524_v10 = vadd.f32 %v7461_v61, %v4485_v43  ;;  %v4195_v38 = vpop.xlane.xlu1 %4194 }
0x2ddd   : > { %v5666_v12 = vpop.eup %5665  ;;  %v4448_v48 = vmul.f32 %v5664_v20, %v4352_v17  ;;  %v4397_v42 = vadd.f32 1e-05, %v4333_v50  ;;  %5675 = vrsqrt.f32 %v4390_v0  ;;  %v4234_v5 = vmul.f32 0.0078125, %v4195_v38  ;;  %v4567_v50 = vld [vmem:[%s6029_s25 + $0xb8] sm:$0xff] }
0x2dde   : > { %4625 = vst [vmem:[%s7484_s18 + $0x88] sm:$0xff] %v4593_v44  ;;  %v4531_v18 = vadd.f32 %v7461_v61, %v4492_v22  ;;  %v4455_v49 = vmul.f32 %v5666_v12, %v4359_v31  ;;  %v4588_v19 = vadd.f32 %v4556_v56, %v4524_v10  ;;  %v4328_v28 = vmax.f32 %v4296_v41, 0.0  ;;  %v4562_v41 = vld [vmem:[%s6029_s25 + $0x90] sm:$0xff] }
0x2ddf   : > { %v4487_v40 = vmul.f32 %v7454_v51, %v4448_v48  ;;  %5677 = vrsqrt.f32 %v4397_v42  ;;  %v5668_v17 = vpop.eup %5667  ;;  %v4361_v2 = vsub.f32 %v7295_v45, %v7429_v11  ;;  %v4298_v55 = vsub.f32 %v4234_v5, %v4266_v37 }
0x2de0   : > { %v4595_v25 = vadd.f32 %v4563_v63, %v4531_v18  ;;  %v4494_v59 = vmul.f32 %v7454_v51, %v4455_v49  ;;  %v4268_v31 = vmul.f32 %v7504_v21, %v7504_v21  ;;  %4620 = vst [vmem:[%s7484_s18 + $0x60] sm:$0xff] %v4588_v19  ;;  %v4450_v29 = vmul.f32 %v5668_v17, %v4354_v8  ;;  %v4199_v45 = vpop.xlane.xlu1 %4198  ;;  %v4564_v19 = vld [vmem:[%s6029_s25 + $0xa0] sm:$0xff] }
0x2de1   : > { %v5670_v54 = vpop.eup %5669  ;;  %v4526_v32 = vadd.f32 %v7461_v61, %v4487_v40  ;;  %v4392_v36 = vadd.f32 1e-05, %v4328_v28  ;;  %v4330_v39 = vmax.f32 %v4298_v55, 0.0  ;;  %v4236_v9 = vmul.f32 0.0078125, %v4199_v45 }
0x2de2   : > { %4627 = vst [vmem:[%s7484_s18 + $0x98] sm:$0xff] %v4595_v25  ;;  %v4533_v11 = vadd.f32 %v7461_v61, %v4494_v59  ;;  %v4457_v37 = vmul.f32 %v5670_v54, %v4361_v2  ;;  %v4356_v46 = vsub.f32 %v7301_v14, %v7433_v62  ;;  %v4489_v58 = vmul.f32 %v7454_v51, %v4450_v29 }
0x2de3   : > { %v4590_v1 = vadd.f32 %v4558_v6, %v4526_v32  ;;  %5679 = vrsqrt.f32 %v4392_v36  ;;  %v4394_v3 = vadd.f32 1e-05, %v4330_v39  ;;  %v4300_v52 = vsub.f32 %v4236_v9, %v4268_v31  ;;  %v4571_v6 = vld [vmem:[%s6029_s25 + $0xd8] sm:$0xff]  ;;  %v4566_v32 = vld [vmem:[%s6029_s25 + $0xb0] sm:$0xff] }
0x2de4   : > { %v4597_v35 = vadd.f32 %v4565_v4, %v4533_v11  ;;  %v4496_v8 = vmul.f32 %v7454_v51, %v4457_v37  ;;  %v4363_v53 = vsub.f32 %v7305_v30, %v7439_v16  ;;  %v4528_v43 = vadd.f32 %v7461_v61, %v4489_v58  ;;  %v4568_v11 = vld [vmem:[%s6029_s25 + $0xc0] sm:$0xff] }
0x2de5   : > { %v5672_v13 = vpop.eup %5671  ;;  %4622 = vst [vmem:[%s7484_s18 + $0x70] sm:$0xff] %v4590_v1  ;;  %5681 = vrsqrt.f32 %v4394_v3  ;;  %v4332_v56 = vmax.f32 %v4300_v52, 0.0  ;;  %v4358_v44 = vsub.f32 %v7311_v27, %v7444_v7  ;;  %v4365_v0 = vsub.f32 %v7315_v33, %v7449_v24  ;;  %v4569_v7 = vld [vmem:[%s6029_s25 + $0xc8] sm:$0xff]  ;;  %v4570_v1 = vld [vmem:[%s6029_s25 + $0xd0] sm:$0xff] }
0x2de6   : > { %v5674_v14 = vpop.eup %5673  ;;  %4629 = vst [vmem:[%s7484_s18 + $0xa8] sm:$0xff] %v4597_v35  ;;  %v4452_v62 = vmul.f32 %v5672_v13, %v4356_v46  ;;  %v4535_v20 = vadd.f32 %v7461_v61, %v4496_v8  ;;  %v4592_v22 = vadd.f32 %v4560_v47, %v4528_v43  ;;  %v4360_v49 = vsub.f32 %v7321_v60, %v7467_v26 }
0x2de7   : > { %v4459_v30 = vmul.f32 %v5674_v14, %v4363_v53  ;;  %v5676_v16 = vpop.eup %5675  ;;  %v4396_v48 = vadd.f32 1e-05, %v4332_v56  ;;  %v4362_v60 = vsub.f32 %v7328_v57, %v7477_v23  ;;  %v4364_v36 = vsub.f32 %v7335_v15, %v7504_v21 }
0x2de8   : > { %v4491_v12 = vmul.f32 %v7454_v51, %v4452_v62  ;;  %v4599_v10 = vadd.f32 %v4567_v50, %v4535_v20  ;;  %4624 = vst [vmem:[%s7484_s18 + $0x80] sm:$0xff] %v4592_v22  ;;  %v4454_v42 = vmul.f32 %v5676_v16, %v4358_v44 }
0x2de9   : > { %v5678_v63 = vpop.eup %5677  ;;  %v4498_v38 = vmul.f32 %v7454_v51, %v4459_v30  ;;  %5683 = vrsqrt.f32 %v4396_v48 }
0x2dea   : > { %v4530_v27 = vadd.f32 %v7461_v61, %v4491_v12  ;;  %4631 = vst [vmem:[%s7484_s18 + $0xb8] sm:$0xff] %v4599_v10  ;;  %v4461_v18 = vmul.f32 %v5678_v63, %v4365_v0  ;;  %v4493_v33 = vmul.f32 %v7454_v51, %v4454_v42 }
0x2deb   : > { %v4537_v24 = vadd.f32 %v7461_v61, %v4498_v38 }
0x2dec   : > { %v4594_v5 = vadd.f32 %v4562_v41, %v4530_v27  ;;  %v4500_v40 = vmul.f32 %v7454_v51, %v4461_v18  ;;  %v4532_v17 = vadd.f32 %v7461_v61, %v4493_v33 }
0x2ded   : > { %v5680_v28 = vpop.eup %5679  ;;  %v4601_v2 = vadd.f32 %v4569_v7, %v4537_v24 }
0x2dee   : > { %4626 = vst [vmem:[%s7484_s18 + $0x90] sm:$0xff] %v4594_v5  ;;  %v4456_v25 = vmul.f32 %v5680_v28, %v4360_v49  ;;  %v4539_v59 = vadd.f32 %v7461_v61, %v4500_v40  ;;  %v4596_v26 = vadd.f32 %v4564_v19, %v4532_v17 }
0x2def   : > { %4633 = vst [vmem:[%s7484_s18 + $0xc8] sm:$0xff] %v4601_v2  ;;  %v5682_v55 = vpop.eup %5681 }
0x2df0   : > { %v4495_v54 = vmul.f32 %v7454_v51, %v4456_v25  ;;  %v4603_v31 = vadd.f32 %v4571_v6, %v4539_v59  ;;  %4628 = vst [vmem:[%s7484_s18 + $0xa0] sm:$0xff] %v4596_v26  ;;  %v4458_v29 = vmul.f32 %v5682_v55, %v4362_v60 }
0x2df2   : > { %v4534_v4 = vadd.f32 %v7461_v61, %v4495_v54  ;;  %4635 = vst [vmem:[%s7484_s18 + $0xd8] sm:$0xff] %v4603_v31  ;;  %v4497_v57 = vmul.f32 %v7454_v51, %v4458_v29 }
0x2df3   : > { %v5684_v23 = vpop.eup %5683 }
0x2df4   : > { %v4598_v45 = vadd.f32 %v4566_v32, %v4534_v4  ;;  %v4536_v37 = vadd.f32 %v7461_v61, %v4497_v57  ;;  %v4460_v39 = vmul.f32 %v5684_v23, %v4364_v36 }
0x2df6   : > { %4630 = vst [vmem:[%s7484_s18 + $0xb0] sm:$0xff] %v4598_v45  ;;  %v4600_v9 = vadd.f32 %v4568_v11, %v4536_v37  ;;  %v4499_v46 = vmul.f32 %v7454_v51, %v4460_v39 }
0x2df8   : > { %4632 = vst [vmem:[%s7484_s18 + $0xc0] sm:$0xff] %v4600_v9  ;;  %v4538_v58 = vadd.f32 %v7461_v61, %v4499_v46 }
0x2dfa   : > { %v4602_v47 = vadd.f32 %v4570_v1, %v4538_v58 }
0x2dfc   : > { %4634 = vst [vmem:[%s7484_s18 + $0xd0] sm:$0xff] %v4602_v47 }
0x2e40   : > { %v5035_v35 = vpop.f32.mrb[80].mxu0 }
0x2e41   : > { %v7587_v15 = vadd.f32 %v5035_v35, %v7252_v34  ;;  %v3890_v21 = vpop.f32.mrb[81].mxu0 }
0x2e42   : > { %v5036_v8 = vpop.f32.mrb[82].mxu0  ;;  %v7602_v44 = vadd.f32 %v7252_v34, %v3890_v21 }
0x2e43   : > { %v3893_v3 = vpop.f32.mrb[83].mxu0  ;;  %4021 = vadd.xlane.f32.xlu0 %v7587_v15  ;;  %v5063_v52 = vpop.f32.mrb[64].mxu1  ;;  %v4116_v10 = vmul.f32 %v7587_v15, %v7587_v15  ;;  %v7615_v63 = vadd.f32 %v5036_v8, %v7252_v34 }
0x2e44   : > { %v7591_v13 = vadd.f32 %v5063_v52, %v7252_v34  ;;  %v4002_v53 = vpop.f32.mrb[65].mxu1  ;;  %v7618_v38 = vadd.f32 %v7252_v34, %v3893_v3  ;;  %v4114_v7 = vmul.f32 %v7602_v44, %v7602_v44 }
0x2e45   : > { %v5064_v43 = vpop.f32.mrb[66].mxu1  ;;  %v7598_v62 = vadd.f32 %v7252_v34, %v4002_v53  ;;  %v4117_v18 = vmul.f32 %v7615_v63, %v7615_v63 }
0x2e46   : > { %v7594_v50 = vadd.f32 %v5064_v43, %v7252_v34  ;;  %4077 = vadd.xlane.f32.xlu1 %v7591_v13  ;;  %v4005_v14 = vpop.f32.mrb[67].mxu1  ;;  %v4115_v24 = vmul.f32 %v7618_v38, %v7618_v38  ;;  %v4144_v31 = vmul.f32 %v7591_v13, %v7591_v13 }
0x2e47   : > { %v4142_v16 = vmul.f32 %v7598_v62, %v7598_v62  ;;  %v7609_v0 = vadd.f32 %v7252_v34, %v4005_v14 }
0x2e48   : > { %v5039_v20 = vpop.f32.mrb[84].mxu0  ;;  %4079 = vadd.xlane.f32.xlu0 %v7594_v50 }
0x2e49   : > { %v3906_v56 = vpop.f32.mrb[85].mxu0  ;;  %v4143_v27 = vmul.f32 %v7609_v0, %v7609_v0  ;;  %v7629_v33 = vadd.f32 %v5039_v20, %v7252_v34 }
0x2e4a   : > { %v5040_v22 = vpop.f32.mrb[86].mxu0  ;;  %4073 = vadd.xlane.f32.xlu1 %v7598_v62  ;;  %v7635_v49 = vadd.f32 %v7252_v34, %v3906_v56 }
0x2e4b   : > { %v3909_v30 = vpop.f32.mrb[87].mxu0  ;;  %v7638_v5 = vadd.f32 %v5040_v22, %v7252_v34  ;;  %v4120_v19 = vmul.f32 %v7629_v33, %v7629_v33 }
0x2e4c   : > { %4017 = vadd.xlane.f32.xlu0 %v7602_v44  ;;  %v7645_v40 = vadd.f32 %v7252_v34, %v3909_v30  ;;  %v4118_v28 = vmul.f32 %v7635_v49, %v7635_v49 }
0x2e4d   : > { %v4121_v17 = vmul.f32 %v7638_v5, %v7638_v5 }
0x2e4e   : > { %4202 = vadd.xlane.f32.xlu1 %v4142_v16  ;;  %v4119_v6 = vmul.f32 %v7645_v40, %v7645_v40 }
0x2e50   : > { %v5043_v12 = vpop.f32.mrb[88].mxu0  ;;  %4075 = vadd.xlane.f32.xlu0 %v7609_v0 }
0x2e51   : > { %v3922_v48 = vpop.f32.mrb[89].mxu0  ;;  %v7653_v2 = vadd.f32 %v5043_v12, %v7252_v34 }
0x2e52   : > { %v5044_v41 = vpop.f32.mrb[90].mxu0  ;;  %4150 = vadd.xlane.f32.xlu1 %v4116_v10  ;;  %v7659_v25 = vadd.f32 %v7252_v34, %v3922_v48 }
0x2e53   : > { %v3925_v42 = vpop.f32.mrb[91].mxu0  ;;  %v7662_v59 = vadd.f32 %v5044_v41, %v7252_v34  ;;  %v4124_v60 = vmul.f32 %v7653_v2, %v7653_v2 }
0x2e54   : > { %4023 = vadd.xlane.f32.xlu0 %v7615_v63  ;;  %v7669_v26 = vadd.f32 %v7252_v34, %v3925_v42  ;;  %v4122_v55 = vmul.f32 %v7659_v25, %v7659_v25  ;;  %v4145_v34 = vmul.f32 %v7594_v50, %v7594_v50 }
0x2e55   : > { %v4125_v54 = vmul.f32 %v7662_v59, %v7662_v59 }
0x2e56   : > { %4019 = vadd.xlane.f32.xlu1 %v7618_v38  ;;  %v4123_v32 = vmul.f32 %v7669_v26, %v7669_v26 }
0x2e58   : > { %4204 = vadd.xlane.f32.xlu0 %v4143_v27 }
0x2e5a   : > { %4146 = vadd.xlane.f32.xlu1 %v4114_v7 }
0x2e5c   : > { %4152 = vadd.xlane.f32.xlu0 %v4117_v18 }
0x2e5e   : > { %4029 = vadd.xlane.f32.xlu1 %v7629_v33 }
0x2e60   : > { %4148 = vadd.xlane.f32.xlu0 %v4115_v24 }
0x2e62   : > { %4025 = vadd.xlane.f32.xlu1 %v7635_v49 }
0x2e64   : > { %4031 = vadd.xlane.f32.xlu0 %v7638_v5 }
0x2e66   : > { %4158 = vadd.xlane.f32.xlu1 %v4120_v19 }
0x2e68   : > { %4027 = vadd.xlane.f32.xlu0 %v7645_v40 }
0x2e6a   : > { %4154 = vadd.xlane.f32.xlu1 %v4118_v28 }
0x2e6c   : > { %4160 = vadd.xlane.f32.xlu0 %v4121_v17 }
0x2e6e   : > { %4037 = vadd.xlane.f32.xlu1 %v7653_v2 }
0x2e70   : > { %4156 = vadd.xlane.f32.xlu0 %v4119_v6 }
0x2e72   : > { %4033 = vadd.xlane.f32.xlu1 %v7659_v25 }
0x2e74   : > { %4039 = vadd.xlane.f32.xlu0 %v7662_v59 }
0x2e76   : > { %4166 = vadd.xlane.f32.xlu1 %v4124_v60 }
0x2e78   : > { %4035 = vadd.xlane.f32.xlu0 %v7669_v26 }
0x2e7a   : > { %4162 = vadd.xlane.f32.xlu1 %v4122_v55 }
0x2e7c   : > { %4168 = vadd.xlane.f32.xlu0 %v4125_v54 }
0x2e7e   : > { %4206 = vadd.xlane.f32.xlu1 %v4144_v31 }
0x2e80   : > { %4164 = vadd.xlane.f32.xlu0 %v4123_v32 }
0x2e84   : > { %4208 = vadd.xlane.f32.xlu0 %v4145_v34 }
0x2ed0   : > { %v4022_v29 = vpop.xlane.xlu0 %4021 }
0x2ed1   : > { %v4084_v37 = vmul.f32 0.0078125, %v4022_v29 }
0x2ed3   : > { %v7682_v4 = vpop.xlane.xlu1 %4077  ;;  %v4244_v47 = vmul.f32 %v4084_v37, %v4084_v37 }
0x2ed5   : > { %v7684_v36 = vpop.xlane.xlu0 %4079 }
0x2ed7   : > { %v4074_v57 = vpop.xlane.xlu1 %4073 }
0x2ed8   : > { %v4110_v23 = vmul.f32 0.0078125, %v4074_v57 }
0x2ed9   : > { %v4018_v45 = vpop.xlane.xlu0 %4017 }
0x2eda   : > { %v4270_v39 = vmul.f32 %v4110_v23, %v4110_v23  ;;  %v7688_v14 = vmul.f32 0.0078125, %v4018_v45  ;;  %v4366_v54 = vsub.f32 %v7598_v62, %v4110_v23 }
0x2edb   : > { %v4203_v11 = vpop.xlane.xlu1 %4202 }
0x2edc   : > { %v4238_v9 = vmul.f32 0.0078125, %v4203_v11  ;;  %v4242_v48 = vmul.f32 %v7688_v14, %v7688_v14 }
0x2edd   : > { %v4076_v46 = vpop.xlane.xlu0 %4075 }
0x2ede   : > { %v4302_v1 = vsub.f32 %v4238_v9, %v4270_v39  ;;  %v7686_v52 = vmul.f32 0.0078125, %v4076_v46 }
0x2edf   : > { %v4151_v58 = vpop.xlane.xlu1 %4150 }
0x2ee0   : > { %v4334_v35 = vmax.f32 %v4302_v1, 0.0  ;;  %v4212_v21 = vmul.f32 0.0078125, %v4151_v58  ;;  %v4271_v22 = vmul.f32 %v7686_v52, %v7686_v52  ;;  %v4340_v1 = vsub.f32 %v7587_v15, %v4084_v37 }
0x2ee1   : > { %v4024_v8 = vpop.xlane.xlu0 %4023 }
0x2ee2   : > { %v4398_v3 = vadd.f32 1e-05, %v4334_v35  ;;  %v4276_v53 = vsub.f32 %v4212_v21, %v4244_v47  ;;  %v7692_v16 = vmul.f32 0.0078125, %v4024_v8  ;;  %v4572_v35 = vld [vmem:[%s6029_s25 + $0xe0] sm:$0xff] }
0x2ee3   : > { %v4020_v43 = vpop.xlane.xlu1 %4019 }
0x2ee4   : > { %5685 = vrsqrt.f32 %v4398_v3  ;;  %v4308_v20 = vmax.f32 %v4276_v53, 0.0  ;;  %v4245_v7 = vmul.f32 %v7692_v16, %v7692_v16  ;;  %v7698_v28 = vmul.f32 0.0078125, %v4020_v43 }
0x2ee5   : > { %v4205_v56 = vpop.xlane.xlu0 %4204 }
0x2ee6   : > { %v4372_v30 = vadd.f32 1e-05, %v4308_v20  ;;  %v4239_v12 = vmul.f32 0.0078125, %v4205_v56  ;;  %v4243_v45 = vmul.f32 %v7698_v28, %v7698_v28 }
0x2ee7   : > { %v4147_v10 = vpop.xlane.xlu1 %4146 }
0x2ee8   : > { %5687 = vrsqrt.f32 %v4372_v30  ;;  %v4303_v41 = vsub.f32 %v4239_v12, %v4271_v22  ;;  %v4210_v42 = vmul.f32 0.0078125, %v4147_v10  ;;  %v4546_v10 = vld [vmem:[%s6029_s25 + $0x10] sm:$0xff] }
0x2ee9   : > { %v4153_v27 = vpop.xlane.xlu0 %4152 }
0x2eea   : > { %v4335_v18 = vmax.f32 %v4303_v41, 0.0  ;;  %v4274_v24 = vsub.f32 %v4210_v42, %v4242_v48  ;;  %v4213_v19 = vmul.f32 0.0078125, %v4153_v27  ;;  %v4367_v41 = vsub.f32 %v7609_v0, %v7686_v52 }
0x2eeb   : > { %v4030_v17 = vpop.xlane.xlu1 %4029 }
0x2eec   : > { %v4399_v6 = vadd.f32 1e-05, %v4335_v18  ;;  %v4306_v60 = vmax.f32 %v4274_v24, 0.0  ;;  %v4277_v55 = vsub.f32 %v4213_v19, %v4245_v7  ;;  %v7703_v46 = vmul.f32 0.0078125, %v4030_v17 }
0x2eed   : > { %v4149_v31 = vpop.xlane.xlu0 %4148  ;;  %v4338_v17 = vsub.f32 %v7602_v44, %v7688_v14 }
0x2eee   : > { %v5686_v32 = vpop.eup %5685  ;;  %5689 = vrsqrt.f32 %v4399_v6  ;;  %v4370_v34 = vadd.f32 1e-05, %v4306_v60  ;;  %v4309_v29 = vmax.f32 %v4277_v55, 0.0  ;;  %v4211_v11 = vmul.f32 0.0078125, %v4149_v31 }
0x2eef   : > { %v4462_v57 = vmul.f32 %v5686_v32, %v4366_v54  ;;  %v4026_v39 = vpop.xlane.xlu1 %4025  ;;  %v4248_v43 = vmul.f32 %v7703_v46, %v7703_v46 }
0x2ef0   : > { %5691 = vrsqrt.f32 %v4370_v34  ;;  %v4373_v9 = vadd.f32 1e-05, %v4309_v29  ;;  %v4275_v23 = vsub.f32 %v4211_v11, %v4243_v45  ;;  %v7711_v20 = vmul.f32 0.0078125, %v4026_v39  ;;  %v4573_v11 = vld [vmem:[%s6029_s25 + $0xe8] sm:$0xff] }
0x2ef1   : > { %v4501_v62 = vmul.f32 %v7454_v51, %v4462_v57  ;;  %v4032_v58 = vpop.xlane.xlu0 %4031  ;;  %v4341_v29 = vsub.f32 %v7615_v63, %v7692_v16 }
0x2ef2   : > { %v5688_v47 = vpop.eup %5687  ;;  %5693 = vrsqrt.f32 %v4373_v9  ;;  %v4307_v3 = vmax.f32 %v4275_v23, 0.0  ;;  %v7714_v30 = vmul.f32 0.0078125, %v4032_v58  ;;  %v4246_v18 = vmul.f32 %v7711_v20, %v7711_v20 }
0x2ef3   : > { %v4540_v21 = vadd.f32 %v7461_v61, %v4501_v62  ;;  %v4436_v8 = vmul.f32 %v5688_v47, %v4340_v1  ;;  %v4159_v53 = vpop.xlane.xlu1 %4158  ;;  %v4544_v47 = vld [vmem:[%s6029_s25] sm:$0xff] }
0x2ef4   : > { %v4216_v15 = vmul.f32 0.0078125, %v4159_v53  ;;  %v4371_v22 = vadd.f32 1e-05, %v4307_v3  ;;  %v4249_v0 = vmul.f32 %v7714_v30, %v7714_v30 }
0x2ef5   : > { %v4604_v37 = vadd.f32 %v4572_v35, %v4540_v21  ;;  %v4475_v56 = vmul.f32 %v7454_v51, %v4436_v8  ;;  %v4028_v12 = vpop.xlane.xlu0 %4027 }
0x2ef6   : > { %v4280_v48 = vsub.f32 %v4216_v15, %v4248_v43  ;;  %5695 = vrsqrt.f32 %v4371_v22  ;;  %v7727_v31 = vmul.f32 0.0078125, %v4028_v12  ;;  %v4339_v15 = vsub.f32 %v7618_v38, %v7698_v28 }
0x2ef7   : > { %4636 = vst [vmem:[%s7484_s18 + $0xe0] sm:$0xff] %v4604_v37  ;;  %v4514_v42 = vadd.f32 %v7461_v61, %v4475_v56  ;;  %v4155_v27 = vpop.xlane.xlu1 %4154  ;;  %v4547_v37 = vld [vmem:[%s6029_s25 + $0x18] sm:$0xff] }
0x2ef8   : > { %v5690_v7 = vpop.eup %5689  ;;  %v4312_v24 = vmax.f32 %v4280_v48, 0.0  ;;  %v4214_v19 = vmul.f32 0.0078125, %v4155_v27  ;;  %v4247_v63 = vmul.f32 %v7727_v31, %v7727_v31 }
0x2ef9   : > { %v4578_v6 = vadd.f32 %v4546_v10, %v4514_v42  ;;  %v4463_v60 = vmul.f32 %v5690_v7, %v4367_v41  ;;  %v4161_v52 = vpop.xlane.xlu0 %4160 }
0x2efa   : > { %v5692_v55 = vpop.eup %5691  ;;  %v4376_v54 = vadd.f32 1e-05, %v4312_v24  ;;  %v4278_v32 = vsub.f32 %v4214_v19, %v4246_v18  ;;  %v4217_v34 = vmul.f32 0.0078125, %v4161_v52 }
0x2efb   : > { %4610 = vst [vmem:[%s7484_s18 + $0x10] sm:$0xff] %v4578_v6  ;;  %v4502_v44 = vmul.f32 %v7454_v51, %v4463_v60  ;;  %v4434_v14 = vmul.f32 %v5692_v55, %v4338_v17  ;;  %v4038_v57 = vpop.xlane.xlu1 %4037  ;;  %v4344_v17 = vsub.f32 %v7629_v33, %v7703_v46  ;;  %v4545_v6 = vld [vmem:[%s6029_s25 + $0x8] sm:$0xff] }
0x2efc   : > { %v5694_v45 = vpop.eup %5693  ;;  %5697 = vrsqrt.f32 %v4376_v54  ;;  %v4310_v39 = vmax.f32 %v4278_v32, 0.0  ;;  %v4281_v9 = vsub.f32 %v4217_v34, %v4249_v0  ;;  %v7744_v22 = vmul.f32 0.0078125, %v4038_v57 }
0x2efd   : > { %v4541_v1 = vadd.f32 %v7461_v61, %v4502_v44  ;;  %v4473_v62 = vmul.f32 %v7454_v51, %v4434_v14  ;;  %v4437_v23 = vmul.f32 %v5694_v45, %v4341_v29  ;;  %v4157_v58 = vpop.xlane.xlu0 %4156  ;;  %v7762_v14 = vmul.f32 0.0078125, %v7682_v4 }
0x2efe   : > { %v4374_v16 = vadd.f32 1e-05, %v4310_v39  ;;  %v4313_v35 = vmax.f32 %v4281_v9, 0.0  ;;  %v4215_v53 = vmul.f32 0.0078125, %v4157_v58  ;;  %v4252_v24 = vmul.f32 %v7744_v22, %v7744_v22 }
0x2eff   : > { %v4605_v21 = vadd.f32 %v4573_v11, %v4541_v1  ;;  %v4512_v8 = vadd.f32 %v7461_v61, %v4473_v62  ;;  %v4476_v3 = vmul.f32 %v7454_v51, %v4437_v23  ;;  %v4034_v43 = vpop.xlane.xlu1 %4033  ;;  %v4342_v57 = vsub.f32 %v7635_v49, %v7711_v20  ;;  %v4550_v62 = vld [vmem:[%s6029_s25 + $0x30] sm:$0xff] }
0x2f00   : > { %5699 = vrsqrt.f32 %v4374_v16  ;;  %v4377_v56 = vadd.f32 1e-05, %v4313_v35  ;;  %v5696_v12 = vpop.eup %5695  ;;  %v4279_v41 = vsub.f32 %v4215_v53, %v4247_v63  ;;  %v7756_v0 = vmul.f32 0.0078125, %v4034_v43 }
0x2f01   : > { %4637 = vst [vmem:[%s7484_s18 + $0xe8] sm:$0xff] %v4605_v21  ;;  %v4576_v10 = vadd.f32 %v4544_v47, %v4512_v8  ;;  %v4515_v48 = vadd.f32 %v7461_v61, %v4476_v3  ;;  %v4040_v42 = vpop.xlane.xlu0 %4039  ;;  %v4435_v27 = vmul.f32 %v5696_v12, %v4339_v15  ;;  %v4345_v49 = vsub.f32 %v7638_v5, %v7714_v30  ;;  %v4548_v30 = vld [vmem:[%s6029_s25 + $0x20] sm:$0xff] }
0x2f02   : > { %5701 = vrsqrt.f32 %v4377_v56  ;;  %v4311_v18 = vmax.f32 %v4279_v41, 0.0  ;;  %v7759_v32 = vmul.f32 0.0078125, %v4040_v42  ;;  %v4250_v11 = vmul.f32 %v7756_v0, %v7756_v0 }
0x2f03   : > { %4608 = vst [vmem:[%s7484_s18] sm:$0xff] %v4576_v10  ;;  %v4579_v7 = vadd.f32 %v4547_v37, %v4515_v48  ;;  %v4167_v38 = vpop.xlane.xlu1 %4166  ;;  %v4474_v28 = vmul.f32 %v7454_v51, %v4435_v27  ;;  %v4272_v8 = vmul.f32 %v7762_v14, %v7762_v14  ;;  %v7785_v42 = vmul.f32 0.0078125, %v7684_v36 }
0x2f04   : > { %v4220_v19 = vmul.f32 0.0078125, %v4167_v38  ;;  %v4375_v60 = vadd.f32 1e-05, %v4311_v18  ;;  %v4253_v23 = vmul.f32 %v7759_v32, %v7759_v32  ;;  %v4343_v38 = vsub.f32 %v7645_v40, %v7727_v31 }
0x2f05   : > { %4611 = vst [vmem:[%s7484_s18 + $0x18] sm:$0xff] %v4579_v7  ;;  %v4036_v52 = vpop.xlane.xlu0 %4035  ;;  %v4513_v54 = vadd.f32 %v7461_v61, %v4474_v28  ;;  %v4551_v28 = vld [vmem:[%s6029_s25 + $0x38] sm:$0xff] }
0x2f06   : > { %v5698_v55 = vpop.eup %5697  ;;  %v4284_v34 = vsub.f32 %v4220_v19, %v4252_v24  ;;  %5703 = vrsqrt.f32 %v4375_v60  ;;  %v7773_v58 = vmul.f32 0.0078125, %v4036_v52 }
0x2f07   : > { %v4440_v29 = vmul.f32 %v5698_v55, %v4344_v17  ;;  %v4163_v44 = vpop.xlane.xlu1 %4162  ;;  %v4577_v33 = vadd.f32 %v4545_v6, %v4513_v54 }
0x2f08   : > { %v4316_v46 = vmax.f32 %v4284_v34, 0.0  ;;  %v4218_v39 = vmul.f32 0.0078125, %v4163_v44  ;;  %v4251_v12 = vmul.f32 %v7773_v58, %v7773_v58 }
0x2f09   : > { %v4479_v45 = vmul.f32 %v7454_v51, %v4440_v29  ;;  %v4169_v9 = vpop.xlane.xlu0 %4168  ;;  %4609 = vst [vmem:[%s7484_s18 + $0x8] sm:$0xff] %v4577_v33  ;;  %v4273_v29 = vmul.f32 %v7785_v42, %v7785_v42 }
0x2f0a   : > { %v5700_v1 = vpop.eup %5699  ;;  %v4380_v4 = vadd.f32 1e-05, %v4316_v46  ;;  %v4221_v47 = vmul.f32 0.0078125, %v4169_v9  ;;  %v4282_v16 = vsub.f32 %v4218_v39, %v4250_v11  ;;  %v4348_v46 = vsub.f32 %v7653_v2, %v7744_v22 }
0x2f0b   : > { %v4518_v20 = vadd.f32 %v7461_v61, %v4479_v45  ;;  %v4438_v63 = vmul.f32 %v5700_v1, %v4342_v57  ;;  %v4207_v35 = vpop.xlane.xlu1 %4206  ;;  %v4549_v57 = vld [vmem:[%s6029_s25 + $0x28] sm:$0xff]  ;;  %v4349_v22 = vsub.f32 %v7662_v59, %v7759_v32  ;;  %v4347_v59 = vsub.f32 %v7669_v26, %v7773_v58  ;;  %v4552_v32 = vld [vmem:[%s6029_s25 + $0x40] sm:$0xff]  ;;  %v4574_v26 = vld [vmem:[%s6029_s25 + $0xf0] sm:$0xff] }
0x2f0c   : > { %v5702_v21 = vpop.eup %5701  ;;  %5705 = vrsqrt.f32 %v4380_v4  ;;  %v4285_v3 = vsub.f32 %v4221_v47, %v4253_v23  ;;  %v4240_v53 = vmul.f32 0.0078125, %v4207_v35  ;;  %v4314_v56 = vmax.f32 %v4282_v16, 0.0 }
0x2f0d   : > { %v4582_v43 = vadd.f32 %v4550_v62, %v4518_v20  ;;  %v4477_v15 = vmul.f32 %v7454_v51, %v4438_v63  ;;  %v4441_v37 = vmul.f32 %v5702_v21, %v4345_v49  ;;  %v4165_v5 = vpop.xlane.xlu0 %4164  ;;  %v4346_v47 = vsub.f32 %v7659_v25, %v7756_v0  ;;  %v4554_v49 = vld [vmem:[%s6029_s25 + $0x50] sm:$0xff]  ;;  %v5740_v25 = vld [vmem:[%s7924_s6] ss:$0 sm:$0xff] }
0x2f0e   : > { %v4317_v10 = vmax.f32 %v4285_v3, 0.0  ;;  %v4304_v48 = vsub.f32 %v4240_v53, %v4272_v8  ;;  %v4219_v41 = vmul.f32 0.0078125, %v4165_v5  ;;  %v4378_v18 = vadd.f32 1e-05, %v4314_v56 }
0x2f0f   : > { %4614 = vst [vmem:[%s7484_s18 + $0x30] sm:$0xff] %v4582_v43  ;;  %v4516_v27 = vadd.f32 %v7461_v61, %v4477_v15  ;;  %v4480_v7 = vmul.f32 %v7454_v51, %v4441_v37  ;;  %v5741_v15 = vld [vmem:[%s7925_s7] ss:$0 sm:$0xff] }
0x2f10   : > { %v4381_v24 = vadd.f32 1e-05, %v4317_v10  ;;  %v4336_v19 = vmax.f32 %v4304_v48, 0.0  ;;  %v4283_v17 = vsub.f32 %v4219_v41, %v4251_v12  ;;  %v5704_v6 = vpop.eup %5703  ;;  %5707 = vrsqrt.f32 %v4378_v18  ;;  %v4553_v48 = vld [vmem:[%s6029_s25 + $0x48] sm:$0xff] }
0x2f11   : > { %v4580_v60 = vadd.f32 %v4548_v30, %v4516_v27  ;;  %v4519_v36 = vadd.f32 %v7461_v61, %v4480_v7  ;;  %v4209_v52 = vpop.xlane.xlu0 %4208  ;;  %v4439_v55 = vmul.f32 %v5704_v6, %v4343_v38  ;;  %v4743_v6 = vld [vmem:[%s7484_s18 + $0x10] sm:$0xff] (%p5845_p5) }
0x2f12   : > { %5709 = vrsqrt.f32 %v4381_v24  ;;  %v4400_v54 = vadd.f32 1e-05, %v4336_v19  ;;  %v4315_v34 = vmax.f32 %v4283_v17, 0.0  ;;  %v4241_v31 = vmul.f32 0.0078125, %v4209_v52  ;;  %v4575_v24 = vld [vmem:[%s6029_s25 + $0xf8] sm:$0xff]  ;;  %4744 = vst [vmem:[%s7845_s13 + $0x20] sm:$0xff] (%p5845_p5), %v4743_v6 }
0x2f13   : > { %4612 = vst [vmem:[%s7484_s18 + $0x20] sm:$0xff] %v4580_v60  ;;  %v4583_v40 = vadd.f32 %v4551_v28, %v4519_v36  ;;  %v4478_v44 = vmul.f32 %v7454_v51, %v4439_v55  ;;  %v4745_v60 = vld [vmem:[%s7484_s18 + $0x18] sm:$0xff] (%p5845_p5) }
0x2f14   : > { %5711 = vrsqrt.f32 %v4400_v54  ;;  %v4379_v33 = vadd.f32 1e-05, %v4315_v34  ;;  %v4305_v45 = vsub.f32 %v4241_v31, %v4273_v29  ;;  %4746 = vst [vmem:[%s7845_s13 + $0x28] sm:$0xff] (%p5845_p5), %v4745_v60 }
0x2f15   : > { %4615 = vst [vmem:[%s7484_s18 + $0x38] sm:$0xff] %v4583_v40  ;;  %v4517_v39 = vadd.f32 %v7461_v61, %v4478_v44  ;;  %v4763_v44 = vld [vmem:[%s7484_s18 + $0x60] sm:$0xff] (%p5845_p5) }
0x2f16   : > { %v5706_v11 = vpop.eup %5705  ;;  %5713 = vrsqrt.f32 %v4379_v33  ;;  %v4337_v1 = vmax.f32 %v4305_v45, 0.0  ;;  %v4751_v55 = vld [vmem:[%s7484_s18 + $0x30] sm:$0xff] (%p5845_p5)  ;;  %v4765_v33 = vld [vmem:[%s7484_s18 + $0x68] sm:$0xff] (%p5845_p5)  ;;  %4764 = vst [vmem:[%s7845_s13 + $0xc0] sm:$0xff] (%p5845_p5), %v4763_v44  ;;  %v4771_v45 = vld [vmem:[%s7484_s18 + $0x80] sm:$0xff] (%p5845_p5) }
0x2f17   : > { %v4444_v9 = vmul.f32 %v5706_v11, %v4348_v46  ;;  %v4581_v62 = vadd.f32 %v4549_v57, %v4517_v39  ;;  %4752 = vst [vmem:[%s7845_s13 + $0x60] sm:$0xff] (%p5845_p5), %v4751_v55  ;;  %v4767_v46 = vld [vmem:[%s7484_s18 + $0x70] sm:$0xff] (%p5845_p5)  ;;  %4766 = vst [vmem:[%s7845_s13 + $0xc8] sm:$0xff] (%p5845_p5), %v4765_v33  ;;  %v4769_v57 = vld [vmem:[%s7484_s18 + $0x78] sm:$0xff] (%p5845_p5) }
0x2f18   : > { %v4401_v4 = vadd.f32 1e-05, %v4337_v1  ;;  %4768 = vst [vmem:[%s7845_s13 + $0xe0] sm:$0xff] (%p5845_p5), %v4767_v46  ;;  %v4773_v11 = vld [vmem:[%s7484_s18 + $0x88] sm:$0xff] (%p5845_p5)  ;;  %4770 = vst [vmem:[%s7845_s13 + $0xe8] sm:$0xff] (%p5845_p5), %v4769_v57  ;;  %v4775_v39 = vld [vmem:[%s7484_s18 + $0x90] sm:$0xff] (%p5845_p5) }
0x2f19   : > { %v4483_v23 = vmul.f32 %v7454_v51, %v4444_v9  ;;  %4613 = vst [vmem:[%s7484_s18 + $0x28] sm:$0xff] %v4581_v62  ;;  %v4368_v51 = vsub.f32 %v7591_v13, %v7762_v14  ;;  %v4555_v14 = vld [vmem:[%s6029_s25 + $0x58] sm:$0xff]  ;;  %4772 = vst [vmem:[%s7845_s13 + $0x100] sm:$0xff] (%p5845_p5), %v4771_v45  ;;  %v4779_v1 = vld [vmem:[%s7484_s18 + $0xa0] sm:$0xff] (%p5845_p5) }
0x2f1a   : > { %v5708_v2 = vpop.eup %5707  ;;  %5715 = vrsqrt.f32 %v4401_v4  ;;  %v4747_v36 = vld [vmem:[%s7484_s18 + $0x20] sm:$0xff] (%p5845_p5)  ;;  %4774 = vst [vmem:[%s7845_s13 + $0x108] sm:$0xff] (%p5845_p5), %v4773_v11  ;;  %v4777_v9 = vld [vmem:[%s7484_s18 + $0x98] sm:$0xff] (%p5845_p5)  ;;  %4776 = vst [vmem:[%s7845_s13 + $0x120] sm:$0xff] (%p5845_p5), %v4775_v39 }
0x2f1b   : > { %v4522_v20 = vadd.f32 %v7461_v61, %v4483_v23  ;;  %v4442_v16 = vmul.f32 %v5708_v2, %v4346_v47  ;;  %4748 = vst [vmem:[%s7845_s13 + $0x40] sm:$0xff] (%p5845_p5), %v4747_v36  ;;  %4778 = vst [vmem:[%s7845_s13 + $0x128] sm:$0xff] (%p5845_p5), %v4777_v9  ;;  %v4781_v62 = vld [vmem:[%s7484_s18 + $0xa8] sm:$0xff] (%p5845_p5)  ;;  %v4783_v23 = vld [vmem:[%s7484_s18 + $0xb0] sm:$0xff] (%p5845_p5) }
0x2f1c   : > { %v5710_v63 = vpop.eup %5709  ;;  %v4753_v54 = vld [vmem:[%s7484_s18 + $0x38] sm:$0xff] (%p5845_p5)  ;;  %4780 = vst [vmem:[%s7845_s13 + $0x140] sm:$0xff] (%p5845_p5), %v4779_v1  ;;  %4782 = vst [vmem:[%s7845_s13 + $0x148] sm:$0xff] (%p5845_p5), %v4781_v62  ;;  %v4787_v47 = vld [vmem:[%s7484_s18 + $0xc0] sm:$0xff] (%p5845_p5) }
0x2f1d   : > { %v4586_v35 = vadd.f32 %v4554_v49, %v4522_v20  ;;  %v4445_v21 = vmul.f32 %v5710_v63, %v4349_v22  ;;  %v4481_v0 = vmul.f32 %v5740_v25, %v4442_v16  ;;  %4754 = vst [vmem:[%s7845_s13 + $0x68] sm:$0xff] (%p5845_p5), %v4753_v54  ;;  %v4785_v4 = vld [vmem:[%s7484_s18 + $0xb8] sm:$0xff] (%p5845_p5)  ;;  %4784 = vst [vmem:[%s7845_s13 + $0x160] sm:$0xff] (%p5845_p5), %v4783_v23  ;;  %v4789_v49 = vld [vmem:[%s7484_s18 + $0xc8] sm:$0xff] (%p5845_p5) }
0x2f1e   : > { %v5712_v8 = vpop.eup %5711  ;;  %4786 = vst [vmem:[%s7845_s13 + $0x168] sm:$0xff] (%p5845_p5), %v4785_v4  ;;  %v4791_v2 = vld [vmem:[%s7484_s18 + $0xd0] sm:$0xff] (%p5845_p5)  ;;  %4788 = vst [vmem:[%s7845_s13 + $0x180] sm:$0xff] (%p5845_p5), %v4787_v47  ;;  %v4793_v22 = vld [vmem:[%s7484_s18 + $0xd8] sm:$0xff] (%p5845_p5) }
0x2f1f   : > { %4618 = vst [vmem:[%s7484_s18 + $0x50] sm:$0xff] %v4586_v35  ;;  %v4484_v3 = vmul.f32 %v5740_v25, %v4445_v21  ;;  %v4464_v53 = vmul.f32 %v5712_v8, %v4368_v51  ;;  %v4520_v13 = vadd.f32 %v7461_v61, %v4481_v0  ;;  %v4369_v61 = vsub.f32 %v7594_v50, %v7785_v42  ;;  %v4739_v50 = vld [vmem:[%s7484_s18] sm:$0xff] (%p5845_p5)  ;;  %v4741_v42 = vld [vmem:[%s7484_s18 + $0x8] sm:$0xff] (%p5845_p5) }
0x2f20   : > { %v5714_v43 = vpop.eup %5713  ;;  %v4749_v52 = vld [vmem:[%s7484_s18 + $0x28] sm:$0xff] (%p5845_p5)  ;;  %4740 = vst [vmem:[%s7845_s13] sm:$0xff] (%p5845_p5), %v4739_v50  ;;  %4742 = vst [vmem:[%s7845_s13 + $0x8] sm:$0xff] (%p5845_p5), %v4741_v42  ;;  %v4795_v20 = vld [vmem:[%s7484_s18 + $0xe0] sm:$0xff] (%p5845_p5) }
0x2f21   : > { %v4523_v37 = vadd.f32 %v5741_v15, %v4484_v3  ;;  %v4503_v56 = vmul.f32 %v5740_v25, %v4464_v53  ;;  %v4443_v5 = vmul.f32 %v5714_v43, %v4347_v59  ;;  %v4584_v30 = vadd.f32 %v4552_v32, %v4520_v13  ;;  %4750 = vst [vmem:[%s7845_s13 + $0x48] sm:$0xff] (%p5845_p5), %v4749_v52  ;;  %v4797_v63 = vld [vmem:[%s7484_s18 + $0xe8] sm:$0xff] (%p5845_p5) }
0x2f22   : > { %4790 = vst [vmem:[%s7845_s13 + $0x188] sm:$0xff] (%p5845_p5), %v4789_v49  ;;  %4792 = vst [vmem:[%s7845_s13 + $0x1a0] sm:$0xff] (%p5845_p5), %v4791_v2 }
0x2f23   : > { %v4587_v58 = vadd.f32 %v4555_v14, %v4523_v37  ;;  %v4542_v12 = vadd.f32 %v5741_v15, %v4503_v56  ;;  %v4482_v10 = vmul.f32 %v5740_v25, %v4443_v5  ;;  %4616 = vst [vmem:[%s7484_s18 + $0x40] sm:$0xff] %v4584_v30  ;;  %4794 = vst [vmem:[%s7845_s13 + $0x1a8] sm:$0xff] (%p5845_p5), %v4793_v22 }
0x2f24   : > { %v5716_v41 = vpop.eup %5715  ;;  %4796 = vst [vmem:[%s7845_s13 + $0x1c0] sm:$0xff] (%p5845_p5), %v4795_v20  ;;  %4798 = vst [vmem:[%s7845_s13 + $0x1c8] sm:$0xff] (%p5845_p5), %v4797_v63 }
0x2f25   : > { %4619 = vst [vmem:[%s7484_s18 + $0x58] sm:$0xff] %v4587_v58  ;;  %v4606_v27 = vadd.f32 %v4574_v26, %v4542_v12  ;;  %v4521_v7 = vadd.f32 %v5741_v15, %v4482_v10  ;;  %v4465_v18 = vmul.f32 %v5716_v41, %v4369_v61 }
0x2f26   : > { %v4759_v40 = vld [vmem:[%s7484_s18 + $0x50] sm:$0xff] (%p5845_p5) }
0x2f27   : > { %4638 = vst [vmem:[%s7484_s18 + $0xf0] sm:$0xff] %v4606_v27  ;;  %v4585_v38 = vadd.f32 %v4553_v48, %v4521_v7  ;;  %v4504_v28 = vmul.f32 %v5740_v25, %v4465_v18  ;;  %4646 = sbr.rel (!%p5845_p5) target bundleno = 12086 (0x2f36), region = 94  ;;  %4760 = vst [vmem:[%s7845_s13 + $0xa0] sm:$0xff] (%p5845_p5), %v4759_v40 }
0x2f29   : > { %4617 = vst [vmem:[%s7484_s18 + $0x48] sm:$0xff] %v4585_v38  ;;  %v4543_v19 = vadd.f32 %v5741_v15, %v4504_v28 }
0x2f2a   : > { %v4755_v34 = vld [vmem:[%s7484_s18 + $0x40] sm:$0xff] (%p5845_p5) }
0x2f2b   : > { %v4607_v17 = vadd.f32 %v4575_v24, %v4543_v19  ;;  %4756 = vst [vmem:[%s7845_s13 + $0x80] sm:$0xff] (%p5845_p5), %v4755_v34 }
0x2f2c   : > { %v4761_v31 = vld [vmem:[%s7484_s18 + $0x58] sm:$0xff] (%p5845_p5) }
0x2f2d   : > { %4639 = vst [vmem:[%s7484_s18 + $0xf8] sm:$0xff] %v4607_v17  ;;  %4762 = vst [vmem:[%s7845_s13 + $0xa8] sm:$0xff] (%p5845_p5), %v4761_v31 }
0x2f2e   : > { %v4799_v16 = vld [vmem:[%s7484_s18 + $0xf0] sm:$0xff] }
0x2f2f   : > { %4800 = vst [vmem:[%s7845_s13 + $0x1e0] sm:$0xff] %v4799_v16 }
0x2f30   : > { %v4757_v29 = vld [vmem:[%s7484_s18 + $0x48] sm:$0xff] }
0x2f31   : > { %4758 = vst [vmem:[%s7845_s13 + $0x88] sm:$0xff] %v4757_v29 }
0x2f34   : > { %v4801_v51 = vld [vmem:[%s7484_s18 + $0xf8] sm:$0xff] }
0x2f35   : > { %4802 = vst [vmem:[%s7845_s13 + $0x1e8] sm:$0xff] %v4801_v51 }
0x2f36 PF: > { %p15_p10 = scmp.ge.s32.totalorder %s5832_s9, 4   ;;  %s7979_s27 = smov %s5760_s28 }
0x2f37   : > { %s7980_s28 = smov %s5843_s12  ;;  %s7981_s29 = smov %s5832_s9 }
0x2f38   :  { %17 = sbr.rel (!%p15_p10) target bundleno = 2 (0x2), region = 193 }

</bundles_post_ra>
